<compile_context>
chip_gen: v7x
topology: tpu7x:2x2x1
jax: 0.10.0
libtpu: 0.0.40
codegen_flags: <defaults>
</compile_context>

<pallas_src>
import jax
import jax.numpy as jnp
from jax import lax
from jax.experimental import pallas as pl
from jax.experimental.pallas import tpu as pltpu

# ---------------- model hyper-parameters (small but valid config) -------------
CHANS = 8        # EEG channels   (module arg `chans`)
SAMPLES = 128    # time samples   (module arg `samples`)
NUM_CLASSES = 4
KERN_LEN = 32    # temporal kernel length (module arg `kernLength`)
F1 = 8
D = 2
F2 = 16
G = D * F1       # channels after the spatial depthwise conv = 16
K2 = 16          # separable depthwise temporal kernel length
EPS = 1e-5       # BatchNorm2d default eps

# derived time dimensions (PyTorch 'VALID' convs + floor-mode AvgPool)
T1 = SAMPLES - KERN_LEN + 1      # after Conv2d(1, F1, (1, KERN_LEN))        = 97
T2 = T1 // 4                     # after AvgPool2d((1, 4))                   = 24
T3 = T2 - K2 + 1                 # after depthwise Conv2d(.., (1, 16))       = 9
T4 = T3 // 8                     # after AvgPool2d((1, 8))                   = 1
FEAT = F2 * 1 * T4               # Flatten features into the Linear          = 16

TP = 128                         # T1 padded to one lane tile per filter
T2P = 32                         # padded T2
NCP = 128                        # lane-dense (padded) class dimension

# batching / tiling
B_TOTAL = 64                     # total batch processed per call
BT = 16                          # batch tile per grid step
NSTEPS = B_TOTAL // BT           # grid steps (parallel => both v7x TCs used)
BTC = BT * CHANS                 # 128 rows of x per step
BTG = BT * G                     # 256 grouped-channel rows per step
BTD = BT * D                     # 32 rows per temporal-filter group
BTF2 = BT * F2                   # 256 pointwise-output rows per step

assert B_TOTAL % BT == 0
assert BTF2 == BTG               # lets bias3 share the per-row aux pack
assert 4 * T2 <= T1              # pool-4 never reads the padded Toeplitz lanes


# ------------------------- host-side operand building -------------------------
def _bn_fold(bn):
    g, b, m, v = bn[0], bn[1], bn[2], bn[3]
    s = g * lax.rsqrt(v + EPS)
    return s, b - m * s


def build_operands(params):
    """Fold BN running stats into conv weights and build the matmul operands.

    Called ONCE per parameter set (outside the jitted forward); the results are
    plain device arrays reused by every inference call.
    Row ordering conventions (within one batch tile):
      * grouped-channel rows r = g * BT + b   (g = spatial-conv output channel)
        -> rows of one temporal-filter group f = g // D are contiguous.
      * pointwise rows     p = b * F2 + q     (q = pointwise output channel)
    """
    w1, bn1, w2, bn2, w3, w4, bn3, wfc, bfc = params
    s1, o1 = _bn_fold(bn1)                         # (F1,)
    s2, o2 = _bn_fold(bn2)                         # (G,)
    s3, o3 = _bn_fold(bn3)                         # (F2,)

    r = jnp.arange(BTG)
    g_r = r // BT
    b_r = r % BT
    f_r = g_r // D
    p = jnp.arange(BTF2)
    b_p = p // F2
    q_p = p % F2

    # (1) spatial depthwise conv Conv2d(F1,G,(CHANS,1),groups=F1), commuted in
    # front of the temporal conv; BN1/BN2 scales folded in; batch-block-diagonal
    # so one left matmul handles the whole tile; rows ordered (g, b).
    col = jnp.arange(BTC)
    cb = col // CHANS
    cc = col % CHANS
    w2blk = jnp.where(b_r[:, None] == cb[None, :],
                      (s2[g_r] * s1[f_r])[:, None] * w2[g_r][:, cc],
                      0.0).astype(jnp.bfloat16)                  # (BTG, BTC)

    # (2) temporal Toeplitz for Conv2d(1,F1,(1,KERN_LEN)); one (S, TP) block per
    # filter, concatenated along lanes (lane-aligned slices in-kernel).  Raw w1
    # here — the BN scales already live in w2blk rows.
    s_i = jnp.arange(SAMPLES)[:, None]
    t_i = jnp.arange(TP)[None, :]
    k_i = s_i - t_i
    valid = (k_i >= 0) & (k_i < KERN_LEN) & (t_i < T1)
    taps = jnp.where(valid[None, :, :],
                     w1[:, jnp.clip(k_i, 0, KERN_LEN - 1)], 0.0)  # (F1, S, TP)
    toep = jnp.transpose(taps, (1, 0, 2)).reshape(
        SAMPLES, F1 * TP).astype(jnp.bfloat16)

    # (3) AvgPool2d((1,4)) as a 0 / 0.25 matrix (floor mode: sources t < 96).
    p4 = (((jnp.arange(TP)[:, None] // 4) == jnp.arange(T2P)[None, :])
          & (jnp.arange(T2P)[None, :] < T2)).astype(jnp.float32) * 0.25
    p4 = p4.astype(jnp.bfloat16)                                  # (TP, T2P)

    # (4) pointwise Conv2d(G,F2,(1,1)) + BN3 scale, batch-block-diagonal,
    # output rows (b, q), input columns (g, b).
    w4blk = jnp.where(b_p[:, None] == b_r[None, :],
                      s3[q_p][:, None] * w4[q_p][:, g_r],
                      0.0).astype(jnp.bfloat16)                   # (BTF2, BTG)

    # (5) f32 aux pack (kept exact for the VPU stages):
    #   cols [0:K2]  depthwise taps w3[g]  (rows indexed by (g, b))
    #   col  16      bias2 (BN1 offset pushed through conv2/BN2) (rows by (g,b))
    #   col  17      bias3 = BN3 offset                          (rows by (b,q))
    bias2 = s2[g_r] * o1[f_r] * jnp.sum(w2, axis=1)[g_r] + o2[g_r]
    bias3 = o3[q_p]
    aux = jnp.zeros((BTG, 32), jnp.float32)
    aux = aux.at[:, 0:K2].set(w3[g_r])
    aux = aux.at[:, 16].set(bias2)
    aux = aux.at[:, 17].set(bias3)

    # (6) classifier operands (kept f32 — the final stage stays exact).
    # AvgPool(1,8)+Flatten+Linear folded into lane-reduce + one tiny matmul,
    # padded to a lane-dense 128-class slab (padding logits forced to -1e30
    # so softmax gives exactly 0 there).
    wmpad = jnp.zeros((BTF2, NCP), jnp.float32).at[:, :NUM_CLASSES].set(
        wfc.T[q_p])
    lb = jnp.kron(jnp.eye(BT, dtype=jnp.float32),
                  jnp.ones((1, F2), jnp.float32))                 # (BT, BTF2)
    bfcpad = jnp.full((1, NCP), -1e30,
                      jnp.float32).at[0, :NUM_CLASSES].set(bfc)

    return (w2blk, toep, p4, w4blk, aux, wmpad, lb, bfcpad)


# ------------------------------- Pallas kernel --------------------------------
def _kernel(x_ref, w2_ref, toep_ref, p4_ref, w4_ref, aux_ref, wm_ref, lb_ref,
            bfc_ref, o_ref, h2p_scr):
    f32 = jnp.float32
    bf16 = jnp.bfloat16

    def elu(h):
        return jnp.where(h > 0, h, jnp.exp(jnp.minimum(h, 0.0)) - 1.0)

    # --- Stage 1: spatial depthwise conv + BN1/BN2 scales (one MXU matmul). ---
    # Rows of z are ordered (g, b): each temporal-filter group is a contiguous
    # sublane block.
    z = jnp.dot(w2_ref[...], x_ref[...], preferred_element_type=f32)  # (BTG, S)
    z16 = z.astype(bf16)

    toep = toep_ref[...]                       # (S, F1*TP) bf16
    p4 = p4_ref[...]                           # (TP, T2P)  bf16
    b2 = aux_ref[:, 16:17]                     # (BTG, 1)   f32

    # --- Stage 2+3 per filter group: temporal Toeplitz matmul -> +bias -> ELU
    # -> AvgPool2d((1,4)) as a matmul, written into a small VMEM scratch. -----
    # Toeplitz lanes t >= T1 are zero, so those lanes of the ELU output hold
    # ELU(bias) garbage; p4 only sources t < 4*T2 = 96 <= T1 = 97, so the
    # garbage lanes are provably never read.
    for f in range(F1):
        rows = slice(f * BTD, (f + 1) * BTD)
        blk = jnp.dot(z16[rows, :], toep[:, f * TP:(f + 1) * TP],
                      preferred_element_type=f32)                  # (BTD, TP)
        blk = elu(blk + b2[rows, :])
        h2p_scr[rows, :] = jnp.dot(blk.astype(bf16), p4,
                                   preferred_element_type=f32)     # (BTD, T2P)

    h2p = h2p_scr[...]                                             # (BTG, T2P)

    # --- Stage 4: separable depthwise Conv2d(G,G,(1,16)): 16 taps, two
    # interleaved accumulators (halves the dependence chain, keeps the live
    # vreg set small). ---------------------------------------------------------
    w3t = aux_ref[:, 0:K2]                                         # (BTG, K2)
    acc0 = w3t[:, 0:1] * h2p[:, 0:T3]
    acc1 = w3t[:, 1:2] * h2p[:, 1:1 + T3]
    for k in range(2, K2, 2):
        acc0 = acc0 + w3t[:, k:k + 1] * h2p[:, k:k + T3]
        acc1 = acc1 + w3t[:, k + 1:k + 2] * h2p[:, k + 1:k + 1 + T3]
    h3 = acc0 + acc1                                               # (BTG, T3)

    # --- Stage 5: pointwise Conv2d(G,F2,(1,1)) + BN3 + ELU (MXU matmul). ------
    h4 = jnp.dot(w4_ref[...], h3.astype(bf16),
                 preferred_element_type=f32)                       # (BTF2, T3)
    h4 = elu(h4 + aux_ref[:, 17:18])

    # --- Stage 6: AvgPool2d((1,8)) + Flatten + Linear + Softmax ---------------
    feat = jnp.sum(h4[:, 0:8], axis=1, keepdims=True) * 0.125      # (BTF2, 1)
    logits = jnp.dot(lb_ref[...], feat * wm_ref[...],
                     preferred_element_type=f32) + bfc_ref[...]    # (BT, NCP)
    m = jnp.max(logits, axis=-1, keepdims=True)
    e = jnp.exp(logits - m)
    # exact reciprocal: keeps row sums at 1 to f32 precision (approx buys nothing
    # here — the divide is off the throughput-critical path).
    o_ref[...] = e / jnp.sum(e, axis=-1, keepdims=True)            # lane-dense store


# ------------------------------- wrapper ---------------------------------------
def eegnet_forward(x, ops):
    """x: (B_TOTAL, 1, CHANS, SAMPLES) f32; ops: prebuilt operands."""
    w2blk, toep, p4, w4blk, aux, wmpad, lb, bfcpad = ops
    x2d = x.reshape(B_TOTAL * CHANS, SAMPLES).astype(jnp.bfloat16)

    out = pl.pallas_call(
        _kernel,
        out_shape=jax.ShapeDtypeStruct((B_TOTAL, NCP), jnp.float32),
        grid=(NSTEPS,),
        in_specs=[
            # x tile streams per step (DMA overlaps previous step's compute)
            pl.BlockSpec((BTC, SAMPLES), lambda i: (i, 0)),
            # weights: constant block index -> fetched once, VMEM-resident
            pl.BlockSpec((BTG, BTC), lambda i: (0, 0)),
            pl.BlockSpec((SAMPLES, F1 * TP), lambda i: (0, 0)),
            pl.BlockSpec((TP, T2P), lambda i: (0, 0)),
            pl.BlockSpec((BTF2, BTG), lambda i: (0, 0)),
            pl.BlockSpec((BTG, 32), lambda i: (0, 0)),
            pl.BlockSpec((BTF2, NCP), lambda i: (0, 0)),
            pl.BlockSpec((BT, BTF2), lambda i: (0, 0)),
            pl.BlockSpec((1, NCP), lambda i: (0, 0)),
        ],
        out_specs=pl.BlockSpec((BT, NCP), lambda i: (i, 0)),
        scratch_shapes=[pltpu.VMEM((BTG, T2P), jnp.float32)],
        compiler_params=pltpu.CompilerParams(
            dimension_semantics=("parallel",)),     # v7x: shard steps over 2 TCs
    )(x2d, w2blk, toep, p4, w4blk, aux, wmpad, lb, bfcpad)

    return out[:, :NUM_CLASSES]


# ------------------------- pure-JAX reference (for checking) -------------------
def eegnet_reference(x, params):
    w1, bn1, w2, bn2, w3, w4, bn3, wfc, bfc = params
    dn = ("NCHW", "OIHW", "NCHW")
    hp = lax.Precision.HIGHEST

    def bn(h, pp):
        g, b, m, v = pp[0], pp[1], pp[2], pp[3]
        s = g / jnp.sqrt(v + EPS)
        return h * s[None, :, None, None] + (b - m * s)[None, :, None, None]

    def avgpool_w(h, k):
        b_, c_, hh, w_ = h.shape
        return h[..., :(w_ // k) * k].reshape(b_, c_, hh, w_ // k, k).mean(-1)

    h = lax.conv_general_dilated(x, w1.reshape(F1, 1, 1, KERN_LEN), (1, 1),
                                 "VALID", dimension_numbers=dn, precision=hp)
    h = bn(h, bn1)
    h = lax.conv_general_dilated(h, w2.reshape(G, 1, CHANS, 1), (1, 1),
                                 "VALID", dimension_numbers=dn,
                                 feature_group_count=F1, precision=hp)
    h = jax.nn.elu(bn(h, bn2))
    h = avgpool_w(h, 4)
    h = lax.conv_general_dilated(h, w3.reshape(G, 1, 1, K2), (1, 1),
                                 "VALID", dimension_numbers=dn,
                                 feature_group_count=G, precision=hp)
    h = lax.conv_general_dilated(h, w4.reshape(F2, G, 1, 1), (1, 1),
                                 "VALID", dimension_numbers=dn, precision=hp)
    h = jax.nn.elu(bn(h, bn3))
    h = avgpool_w(h, 8)
    flat = h.reshape(h.shape[0], -1)
    logits = jnp.matmul(flat, wfc.T, precision=hp) + bfc
    return jax.nn.softmax(logits, axis=1)


# ------------------------------- main -------------------------------------------
if __name__ == "__main__":
    key = jax.random.PRNGKey(0)
    ks = jax.random.split(key, 12)

    def bn_init(k, c):
        k1, k2, k3, k4 = jax.random.split(k, 4)
        gamma = 1.0 + 0.1 * jax.random.normal(k1, (c,))
        beta = 0.1 * jax.random.normal(k2, (c,))
        mean = 0.1 * jax.random.normal(k3, (c,))
        var = jax.random.uniform(k4, (c,), minval=0.5, maxval=1.5)
        return jnp.stack([gamma, beta, mean, var]).astype(jnp.float32)

    w1 = 0.1 * jax.random.normal(ks[0], (F1, KERN_LEN), jnp.float32)
    w2 = 0.1 * jax.random.normal(ks[1], (G, CHANS), jnp.float32)
    w3 = 0.1 * jax.random.normal(ks[2], (G, K2), jnp.float32)
    w4 = 0.1 * jax.random.normal(ks[3], (F2, G), jnp.float32)
    wfc = 0.1 * jax.random.normal(ks[4], (NUM_CLASSES, FEAT), jnp.float32)
    bfc = 0.1 * jax.random.normal(ks[5], (NUM_CLASSES,), jnp.float32)
    bn1 = bn_init(ks[6], F1)
    bn2 = bn_init(ks[7], G)
    bn3 = bn_init(ks[8], F2)

    params = (w1, bn1, w2, bn2, w3, w4, bn3, wfc, bfc)
    x = jax.random.normal(ks[9], (B_TOTAL, 1, CHANS, SAMPLES), jnp.float32)

    # Operands are built ONCE per parameter set (not per inference call).
    ops = jax.tree_util.tree_map(jax.block_until_ready, build_operands(params))

    fwd = jax.jit(eegnet_forward)
    out = jax.block_until_ready(fwd(x, ops))

    ref = jax.block_until_ready(eegnet_reference(x, params))
    assert out.shape == (B_TOTAL, NUM_CLASSES)
    # bf16 MXU operands (f32 accumulate) give ~1e-3-level deviations on the
    # softmax probabilities vs. the full-f32 reference.
    err = jnp.max(jnp.abs(out - ref))
    assert jnp.allclose(out, ref, atol=3e-3, rtol=3e-3), (err, out[:2], ref[:2])
    # exact softmax reciprocal => rows sum to 1 to f32 precision
    assert jnp.allclose(jnp.sum(out, axis=1), 1.0, atol=1e-5)

    print("KERNEL_OK")
</pallas_src>

<mosaic_0001>
module attributes {stable_mosaic.version = 11 : i64} {
  func.func @_kernel(%arg0: i32, %arg1: memref<128x128xbf16, #tpu.memory_space<vmem>>, %arg2: memref<256x128xbf16, #tpu.memory_space<vmem>>, %arg3: memref<128x1024xbf16, #tpu.memory_space<vmem>>, %arg4: memref<128x32xbf16, #tpu.memory_space<vmem>>, %arg5: memref<256x256xbf16, #tpu.memory_space<vmem>>, %arg6: memref<256x32xf32, #tpu.memory_space<vmem>>, %arg7: memref<256x128xf32, #tpu.memory_space<vmem>>, %arg8: memref<16x256xf32, #tpu.memory_space<vmem>>, %arg9: memref<1x128xf32, #tpu.memory_space<vmem>>, %arg10: memref<16x128xf32, #tpu.memory_space<vmem>>, %arg11: memref<256x32xf32, #tpu.memory_space<vmem>>) attributes {dimension_semantics = [#tpu.dimension_semantics<parallel>], iteration_bounds = array<i64: 4>, scalar_prefetch = 0 : i64, scratch_operands = 1 : i64, tpu.core_type = #tpu.core_type<tc>, window_params = [{transform_indices = @transform_0, window_bounds = array<i64: 128, 128>}, {pipeline_mode = #tpu.pipeline_mode<synchronous>, transform_indices = @transform_1, window_bounds = array<i64: 256, 128>}, {pipeline_mode = #tpu.pipeline_mode<synchronous>, transform_indices = @transform_2, window_bounds = array<i64: 128, 1024>}, {pipeline_mode = #tpu.pipeline_mode<synchronous>, transform_indices = @transform_3, window_bounds = array<i64: 128, 32>}, {pipeline_mode = #tpu.pipeline_mode<synchronous>, transform_indices = @transform_4, window_bounds = array<i64: 256, 256>}, {pipeline_mode = #tpu.pipeline_mode<synchronous>, transform_indices = @transform_5, window_bounds = array<i64: 256, 32>}, {pipeline_mode = #tpu.pipeline_mode<synchronous>, transform_indices = @transform_6, window_bounds = array<i64: 256, 128>}, {pipeline_mode = #tpu.pipeline_mode<synchronous>, transform_indices = @transform_7, window_bounds = array<i64: 16, 256>}, {pipeline_mode = #tpu.pipeline_mode<synchronous>, transform_indices = @transform_8, window_bounds = array<i64: 1, 128>}, {transform_indices = @transform_9, window_bounds = array<i64: 16, 128>}]} {
    %c0 = arith.constant 0 : index
    %c0_0 = arith.constant 0 : index
    %0 = vector.load %arg2[%c0, %c0_0] : memref<256x128xbf16, #tpu.memory_space<vmem>>, vector<256x128xbf16>
    %c0_1 = arith.constant 0 : index
    %c0_2 = arith.constant 0 : index
    %1 = vector.load %arg1[%c0_1, %c0_2] : memref<128x128xbf16, #tpu.memory_space<vmem>>, vector<128x128xbf16>
    %cst = arith.constant dense<0.000000e+00> : vector<256x128xf32>
    %2 = tpu.matmul %0, %1, %cst {dimension_numbers = #tpu.dot_dimension_numbers<[1], [0], [0], [1], [0, 0, 1, 1], [], []>} : vector<256x128xbf16>, vector<128x128xbf16>, vector<256x128xf32> -> vector<256x128xf32>
    %3 = arith.truncf %2 : vector<256x128xf32> to vector<256x128xbf16>
    %c0_3 = arith.constant 0 : index
    %c0_4 = arith.constant 0 : index
    %4 = vector.load %arg3[%c0_3, %c0_4] : memref<128x1024xbf16, #tpu.memory_space<vmem>>, vector<128x1024xbf16>
    %c0_5 = arith.constant 0 : index
    %c0_6 = arith.constant 0 : index
    %5 = vector.load %arg4[%c0_5, %c0_6] : memref<128x32xbf16, #tpu.memory_space<vmem>>, vector<128x32xbf16>
    %c0_7 = arith.constant 0 : index
    %c16 = arith.constant 16 : index
    %6 = vector.load %arg6[%c0_7, %c16] : memref<256x32xf32, #tpu.memory_space<vmem>>, vector<256x1xf32>
    %7 = vector.extract_strided_slice %3 {offsets = [0, 0], sizes = [32, 128], strides = [1, 1]} : vector<256x128xbf16> to vector<32x128xbf16>
    %8 = vector.extract_strided_slice %4 {offsets = [0, 0], sizes = [128, 128], strides = [1, 1]} : vector<128x1024xbf16> to vector<128x128xbf16>
    %cst_8 = arith.constant dense<0.000000e+00> : vector<32x128xf32>
    %9 = tpu.matmul %7, %8, %cst_8 {dimension_numbers = #tpu.dot_dimension_numbers<[1], [0], [0], [1], [0, 0, 1, 1], [], []>} : vector<32x128xbf16>, vector<128x128xbf16>, vector<32x128xf32> -> vector<32x128xf32>
    %10 = vector.extract_strided_slice %6 {offsets = [0, 0], sizes = [32, 1], strides = [1, 1]} : vector<256x1xf32> to vector<32x1xf32>
    %11 = vector.broadcast %10 : vector<32x1xf32> to vector<32x128xf32>
    %12 = arith.addf %9, %11 : vector<32x128xf32>
    %cst_9 = arith.constant 0.000000e+00 : f32
    %13 = vector.broadcast %cst_9 : f32 to vector<32x128xf32>
    %14 = arith.cmpf ogt, %12, %13 : vector<32x128xf32>
    %cst_10 = arith.constant 0.000000e+00 : f32
    %15 = vector.broadcast %cst_10 : f32 to vector<32x128xf32>
    %16 = arith.minimumf %12, %15 : vector<32x128xf32>
    %17 = math.exp %16 : vector<32x128xf32>
    %cst_11 = arith.constant 1.000000e+00 : f32
    %18 = vector.broadcast %cst_11 : f32 to vector<32x128xf32>
    %19 = arith.subf %17, %18 : vector<32x128xf32>
    %20 = arith.select %14, %12, %19 : vector<32x128xi1>, vector<32x128xf32>
    %21 = arith.truncf %20 : vector<32x128xf32> to vector<32x128xbf16>
    %cst_12 = arith.constant dense<0.000000e+00> : vector<32x32xf32>
    %22 = tpu.matmul %21, %5, %cst_12 {dimension_numbers = #tpu.dot_dimension_numbers<[1], [0], [0], [1], [0, 0, 1, 1], [], []>} : vector<32x128xbf16>, vector<128x32xbf16>, vector<32x32xf32> -> vector<32x32xf32>
    %c0_13 = arith.constant 0 : index
    %c0_14 = arith.constant 0 : index
    %23 = vector.load %arg11[%c0_13, %c0_14] : memref<256x32xf32, #tpu.memory_space<vmem>>, vector<32x32xf32>
    tpu.vector_store %arg11[%c0_13, %c0_14], %22 {strides = array<i32>} : memref<256x32xf32, #tpu.memory_space<vmem>>, vector<32x32xf32>,
    %24 = vector.extract_strided_slice %3 {offsets = [32, 0], sizes = [32, 128], strides = [1, 1]} : vector<256x128xbf16> to vector<32x128xbf16>
    %25 = vector.extract_strided_slice %4 {offsets = [0, 128], sizes = [128, 128], strides = [1, 1]} : vector<128x1024xbf16> to vector<128x128xbf16>
    %cst_15 = arith.constant dense<0.000000e+00> : vector<32x128xf32>
    %26 = tpu.matmul %24, %25, %cst_15 {dimension_numbers = #tpu.dot_dimension_numbers<[1], [0], [0], [1], [0, 0, 1, 1], [], []>} : vector<32x128xbf16>, vector<128x128xbf16>, vector<32x128xf32> -> vector<32x128xf32>
    %27 = vector.extract_strided_slice %6 {offsets = [32, 0], sizes = [32, 1], strides = [1, 1]} : vector<256x1xf32> to vector<32x1xf32>
    %28 = vector.broadcast %27 : vector<32x1xf32> to vector<32x128xf32>
    %29 = arith.addf %26, %28 : vector<32x128xf32>
    %cst_16 = arith.constant 0.000000e+00 : f32
    %30 = vector.broadcast %cst_16 : f32 to vector<32x128xf32>
    %31 = arith.cmpf ogt, %29, %30 : vector<32x128xf32>
    %cst_17 = arith.constant 0.000000e+00 : f32
    %32 = vector.broadcast %cst_17 : f32 to vector<32x128xf32>
    %33 = arith.minimumf %29, %32 : vector<32x128xf32>
    %34 = math.exp %33 : vector<32x128xf32>
    %cst_18 = arith.constant 1.000000e+00 : f32
    %35 = vector.broadcast %cst_18 : f32 to vector<32x128xf32>
    %36 = arith.subf %34, %35 : vector<32x128xf32>
    %37 = arith.select %31, %29, %36 : vector<32x128xi1>, vector<32x128xf32>
    %38 = arith.truncf %37 : vector<32x128xf32> to vector<32x128xbf16>
    %cst_19 = arith.constant dense<0.000000e+00> : vector<32x32xf32>
    %39 = tpu.matmul %38, %5, %cst_19 {dimension_numbers = #tpu.dot_dimension_numbers<[1], [0], [0], [1], [0, 0, 1, 1], [], []>} : vector<32x128xbf16>, vector<128x32xbf16>, vector<32x32xf32> -> vector<32x32xf32>
    %c32 = arith.constant 32 : index
    %c0_20 = arith.constant 0 : index
    %40 = vector.load %arg11[%c32, %c0_20] : memref<256x32xf32, #tpu.memory_space<vmem>>, vector<32x32xf32>
    tpu.vector_store %arg11[%c32, %c0_20], %39 {strides = array<i32>} : memref<256x32xf32, #tpu.memory_space<vmem>>, vector<32x32xf32>,
    %41 = vector.extract_strided_slice %3 {offsets = [64, 0], sizes = [32, 128], strides = [1, 1]} : vector<256x128xbf16> to vector<32x128xbf16>
    %42 = vector.extract_strided_slice %4 {offsets = [0, 256], sizes = [128, 128], strides = [1, 1]} : vector<128x1024xbf16> to vector<128x128xbf16>
    %cst_21 = arith.constant dense<0.000000e+00> : vector<32x128xf32>
    %43 = tpu.matmul %41, %42, %cst_21 {dimension_numbers = #tpu.dot_dimension_numbers<[1], [0], [0], [1], [0, 0, 1, 1], [], []>} : vector<32x128xbf16>, vector<128x128xbf16>, vector<32x128xf32> -> vector<32x128xf32>
    %44 = vector.extract_strided_slice %6 {offsets = [64, 0], sizes = [32, 1], strides = [1, 1]} : vector<256x1xf32> to vector<32x1xf32>
    %45 = vector.broadcast %44 : vector<32x1xf32> to vector<32x128xf32>
    %46 = arith.addf %43, %45 : vector<32x128xf32>
    %cst_22 = arith.constant 0.000000e+00 : f32
    %47 = vector.broadcast %cst_22 : f32 to vector<32x128xf32>
    %48 = arith.cmpf ogt, %46, %47 : vector<32x128xf32>
    %cst_23 = arith.constant 0.000000e+00 : f32
    %49 = vector.broadcast %cst_23 : f32 to vector<32x128xf32>
    %50 = arith.minimumf %46, %49 : vector<32x128xf32>
    %51 = math.exp %50 : vector<32x128xf32>
    %cst_24 = arith.constant 1.000000e+00 : f32
    %52 = vector.broadcast %cst_24 : f32 to vector<32x128xf32>
    %53 = arith.subf %51, %52 : vector<32x128xf32>
    %54 = arith.select %48, %46, %53 : vector<32x128xi1>, vector<32x128xf32>
    %55 = arith.truncf %54 : vector<32x128xf32> to vector<32x128xbf16>
    %cst_25 = arith.constant dense<0.000000e+00> : vector<32x32xf32>
    %56 = tpu.matmul %55, %5, %cst_25 {dimension_numbers = #tpu.dot_dimension_numbers<[1], [0], [0], [1], [0, 0, 1, 1], [], []>} : vector<32x128xbf16>, vector<128x32xbf16>, vector<32x32xf32> -> vector<32x32xf32>
    %c64 = arith.constant 64 : index
    %c0_26 = arith.constant 0 : index
    %57 = vector.load %arg11[%c64, %c0_26] : memref<256x32xf32, #tpu.memory_space<vmem>>, vector<32x32xf32>
    tpu.vector_store %arg11[%c64, %c0_26], %56 {strides = array<i32>} : memref<256x32xf32, #tpu.memory_space<vmem>>, vector<32x32xf32>,
    %58 = vector.extract_strided_slice %3 {offsets = [96, 0], sizes = [32, 128], strides = [1, 1]} : vector<256x128xbf16> to vector<32x128xbf16>
    %59 = vector.extract_strided_slice %4 {offsets = [0, 384], sizes = [128, 128], strides = [1, 1]} : vector<128x1024xbf16> to vector<128x128xbf16>
    %cst_27 = arith.constant dense<0.000000e+00> : vector<32x128xf32>
    %60 = tpu.matmul %58, %59, %cst_27 {dimension_numbers = #tpu.dot_dimension_numbers<[1], [0], [0], [1], [0, 0, 1, 1], [], []>} : vector<32x128xbf16>, vector<128x128xbf16>, vector<32x128xf32> -> vector<32x128xf32>
    %61 = vector.extract_strided_slice %6 {offsets = [96, 0], sizes = [32, 1], strides = [1, 1]} : vector<256x1xf32> to vector<32x1xf32>
    %62 = vector.broadcast %61 : vector<32x1xf32> to vector<32x128xf32>
    %63 = arith.addf %60, %62 : vector<32x128xf32>
    %cst_28 = arith.constant 0.000000e+00 : f32
    %64 = vector.broadcast %cst_28 : f32 to vector<32x128xf32>
    %65 = arith.cmpf ogt, %63, %64 : vector<32x128xf32>
    %cst_29 = arith.constant 0.000000e+00 : f32
    %66 = vector.broadcast %cst_29 : f32 to vector<32x128xf32>
    %67 = arith.minimumf %63, %66 : vector<32x128xf32>
    %68 = math.exp %67 : vector<32x128xf32>
    %cst_30 = arith.constant 1.000000e+00 : f32
    %69 = vector.broadcast %cst_30 : f32 to vector<32x128xf32>
    %70 = arith.subf %68, %69 : vector<32x128xf32>
    %71 = arith.select %65, %63, %70 : vector<32x128xi1>, vector<32x128xf32>
    %72 = arith.truncf %71 : vector<32x128xf32> to vector<32x128xbf16>
    %cst_31 = arith.constant dense<0.000000e+00> : vector<32x32xf32>
    %73 = tpu.matmul %72, %5, %cst_31 {dimension_numbers = #tpu.dot_dimension_numbers<[1], [0], [0], [1], [0, 0, 1, 1], [], []>} : vector<32x128xbf16>, vector<128x32xbf16>, vector<32x32xf32> -> vector<32x32xf32>
    %c96 = arith.constant 96 : index
    %c0_32 = arith.constant 0 : index
    %74 = vector.load %arg11[%c96, %c0_32] : memref<256x32xf32, #tpu.memory_space<vmem>>, vector<32x32xf32>
    tpu.vector_store %arg11[%c96, %c0_32], %73 {strides = array<i32>} : memref<256x32xf32, #tpu.memory_space<vmem>>, vector<32x32xf32>,
    %75 = vector.extract_strided_slice %3 {offsets = [128, 0], sizes = [32, 128], strides = [1, 1]} : vector<256x128xbf16> to vector<32x128xbf16>
    %76 = vector.extract_strided_slice %4 {offsets = [0, 512], sizes = [128, 128], strides = [1, 1]} : vector<128x1024xbf16> to vector<128x128xbf16>
    %cst_33 = arith.constant dense<0.000000e+00> : vector<32x128xf32>
    %77 = tpu.matmul %75, %76, %cst_33 {dimension_numbers = #tpu.dot_dimension_numbers<[1], [0], [0], [1], [0, 0, 1, 1], [], []>} : vector<32x128xbf16>, vector<128x128xbf16>, vector<32x128xf32> -> vector<32x128xf32>
    %78 = vector.extract_strided_slice %6 {offsets = [128, 0], sizes = [32, 1], strides = [1, 1]} : vector<256x1xf32> to vector<32x1xf32>
    %79 = vector.broadcast %78 : vector<32x1xf32> to vector<32x128xf32>
    %80 = arith.addf %77, %79 : vector<32x128xf32>
    %cst_34 = arith.constant 0.000000e+00 : f32
    %81 = vector.broadcast %cst_34 : f32 to vector<32x128xf32>
    %82 = arith.cmpf ogt, %80, %81 : vector<32x128xf32>
    %cst_35 = arith.constant 0.000000e+00 : f32
    %83 = vector.broadcast %cst_35 : f32 to vector<32x128xf32>
    %84 = arith.minimumf %80, %83 : vector<32x128xf32>
    %85 = math.exp %84 : vector<32x128xf32>
    %cst_36 = arith.constant 1.000000e+00 : f32
    %86 = vector.broadcast %cst_36 : f32 to vector<32x128xf32>
    %87 = arith.subf %85, %86 : vector<32x128xf32>
    %88 = arith.select %82, %80, %87 : vector<32x128xi1>, vector<32x128xf32>
    %89 = arith.truncf %88 : vector<32x128xf32> to vector<32x128xbf16>
    %cst_37 = arith.constant dense<0.000000e+00> : vector<32x32xf32>
    %90 = tpu.matmul %89, %5, %cst_37 {dimension_numbers = #tpu.dot_dimension_numbers<[1], [0], [0], [1], [0, 0, 1, 1], [], []>} : vector<32x128xbf16>, vector<128x32xbf16>, vector<32x32xf32> -> vector<32x32xf32>
    %c128 = arith.constant 128 : index
    %c0_38 = arith.constant 0 : index
    %91 = vector.load %arg11[%c128, %c0_38] : memref<256x32xf32, #tpu.memory_space<vmem>>, vector<32x32xf32>
    tpu.vector_store %arg11[%c128, %c0_38], %90 {strides = array<i32>} : memref<256x32xf32, #tpu.memory_space<vmem>>, vector<32x32xf32>,
    %92 = vector.extract_strided_slice %3 {offsets = [160, 0], sizes = [32, 128], strides = [1, 1]} : vector<256x128xbf16> to vector<32x128xbf16>
    %93 = vector.extract_strided_slice %4 {offsets = [0, 640], sizes = [128, 128], strides = [1, 1]} : vector<128x1024xbf16> to vector<128x128xbf16>
    %cst_39 = arith.constant dense<0.000000e+00> : vector<32x128xf32>
    %94 = tpu.matmul %92, %93, %cst_39 {dimension_numbers = #tpu.dot_dimension_numbers<[1], [0], [0], [1], [0, 0, 1, 1], [], []>} : vector<32x128xbf16>, vector<128x128xbf16>, vector<32x128xf32> -> vector<32x128xf32>
    %95 = vector.extract_strided_slice %6 {offsets = [160, 0], sizes = [32, 1], strides = [1, 1]} : vector<256x1xf32> to vector<32x1xf32>
    %96 = vector.broadcast %95 : vector<32x1xf32> to vector<32x128xf32>
    %97 = arith.addf %94, %96 : vector<32x128xf32>
    %cst_40 = arith.constant 0.000000e+00 : f32
    %98 = vector.broadcast %cst_40 : f32 to vector<32x128xf32>
    %99 = arith.cmpf ogt, %97, %98 : vector<32x128xf32>
    %cst_41 = arith.constant 0.000000e+00 : f32
    %100 = vector.broadcast %cst_41 : f32 to vector<32x128xf32>
    %101 = arith.minimumf %97, %100 : vector<32x128xf32>
    %102 = math.exp %101 : vector<32x128xf32>
    %cst_42 = arith.constant 1.000000e+00 : f32
    %103 = vector.broadcast %cst_42 : f32 to vector<32x128xf32>
    %104 = arith.subf %102, %103 : vector<32x128xf32>
    %105 = arith.select %99, %97, %104 : vector<32x128xi1>, vector<32x128xf32>
    %106 = arith.truncf %105 : vector<32x128xf32> to vector<32x128xbf16>
    %cst_43 = arith.constant dense<0.000000e+00> : vector<32x32xf32>
    %107 = tpu.matmul %106, %5, %cst_43 {dimension_numbers = #tpu.dot_dimension_numbers<[1], [0], [0], [1], [0, 0, 1, 1], [], []>} : vector<32x128xbf16>, vector<128x32xbf16>, vector<32x32xf32> -> vector<32x32xf32>
    %c160 = arith.constant 160 : index
    %c0_44 = arith.constant 0 : index
    %108 = vector.load %arg11[%c160, %c0_44] : memref<256x32xf32, #tpu.memory_space<vmem>>, vector<32x32xf32>
    tpu.vector_store %arg11[%c160, %c0_44], %107 {strides = array<i32>} : memref<256x32xf32, #tpu.memory_space<vmem>>, vector<32x32xf32>,
    %109 = vector.extract_strided_slice %3 {offsets = [192, 0], sizes = [32, 128], strides = [1, 1]} : vector<256x128xbf16> to vector<32x128xbf16>
    %110 = vector.extract_strided_slice %4 {offsets = [0, 768], sizes = [128, 128], strides = [1, 1]} : vector<128x1024xbf16> to vector<128x128xbf16>
    %cst_45 = arith.constant dense<0.000000e+00> : vector<32x128xf32>
    %111 = tpu.matmul %109, %110, %cst_45 {dimension_numbers = #tpu.dot_dimension_numbers<[1], [0], [0], [1], [0, 0, 1, 1], [], []>} : vector<32x128xbf16>, vector<128x128xbf16>, vector<32x128xf32> -> vector<32x128xf32>
    %112 = vector.extract_strided_slice %6 {offsets = [192, 0], sizes = [32, 1], strides = [1, 1]} : vector<256x1xf32> to vector<32x1xf32>
    %113 = vector.broadcast %112 : vector<32x1xf32> to vector<32x128xf32>
    %114 = arith.addf %111, %113 : vector<32x128xf32>
    %cst_46 = arith.constant 0.000000e+00 : f32
    %115 = vector.broadcast %cst_46 : f32 to vector<32x128xf32>
    %116 = arith.cmpf ogt, %114, %115 : vector<32x128xf32>
    %cst_47 = arith.constant 0.000000e+00 : f32
    %117 = vector.broadcast %cst_47 : f32 to vector<32x128xf32>
    %118 = arith.minimumf %114, %117 : vector<32x128xf32>
    %119 = math.exp %118 : vector<32x128xf32>
    %cst_48 = arith.constant 1.000000e+00 : f32
    %120 = vector.broadcast %cst_48 : f32 to vector<32x128xf32>
    %121 = arith.subf %119, %120 : vector<32x128xf32>
    %122 = arith.select %116, %114, %121 : vector<32x128xi1>, vector<32x128xf32>
    %123 = arith.truncf %122 : vector<32x128xf32> to vector<32x128xbf16>
    %cst_49 = arith.constant dense<0.000000e+00> : vector<32x32xf32>
    %124 = tpu.matmul %123, %5, %cst_49 {dimension_numbers = #tpu.dot_dimension_numbers<[1], [0], [0], [1], [0, 0, 1, 1], [], []>} : vector<32x128xbf16>, vector<128x32xbf16>, vector<32x32xf32> -> vector<32x32xf32>
    %c192 = arith.constant 192 : index
    %c0_50 = arith.constant 0 : index
    %125 = vector.load %arg11[%c192, %c0_50] : memref<256x32xf32, #tpu.memory_space<vmem>>, vector<32x32xf32>
    tpu.vector_store %arg11[%c192, %c0_50], %124 {strides = array<i32>} : memref<256x32xf32, #tpu.memory_space<vmem>>, vector<32x32xf32>,
    %126 = vector.extract_strided_slice %3 {offsets = [224, 0], sizes = [32, 128], strides = [1, 1]} : vector<256x128xbf16> to vector<32x128xbf16>
    %127 = vector.extract_strided_slice %4 {offsets = [0, 896], sizes = [128, 128], strides = [1, 1]} : vector<128x1024xbf16> to vector<128x128xbf16>
    %cst_51 = arith.constant dense<0.000000e+00> : vector<32x128xf32>
    %128 = tpu.matmul %126, %127, %cst_51 {dimension_numbers = #tpu.dot_dimension_numbers<[1], [0], [0], [1], [0, 0, 1, 1], [], []>} : vector<32x128xbf16>, vector<128x128xbf16>, vector<32x128xf32> -> vector<32x128xf32>
    %129 = vector.extract_strided_slice %6 {offsets = [224, 0], sizes = [32, 1], strides = [1, 1]} : vector<256x1xf32> to vector<32x1xf32>
    %130 = vector.broadcast %129 : vector<32x1xf32> to vector<32x128xf32>
    %131 = arith.addf %128, %130 : vector<32x128xf32>
    %cst_52 = arith.constant 0.000000e+00 : f32
    %132 = vector.broadcast %cst_52 : f32 to vector<32x128xf32>
    %133 = arith.cmpf ogt, %131, %132 : vector<32x128xf32>
    %cst_53 = arith.constant 0.000000e+00 : f32
    %134 = vector.broadcast %cst_53 : f32 to vector<32x128xf32>
    %135 = arith.minimumf %131, %134 : vector<32x128xf32>
    %136 = math.exp %135 : vector<32x128xf32>
    %cst_54 = arith.constant 1.000000e+00 : f32
    %137 = vector.broadcast %cst_54 : f32 to vector<32x128xf32>
    %138 = arith.subf %136, %137 : vector<32x128xf32>
    %139 = arith.select %133, %131, %138 : vector<32x128xi1>, vector<32x128xf32>
    %140 = arith.truncf %139 : vector<32x128xf32> to vector<32x128xbf16>
    %cst_55 = arith.constant dense<0.000000e+00> : vector<32x32xf32>
    %141 = tpu.matmul %140, %5, %cst_55 {dimension_numbers = #tpu.dot_dimension_numbers<[1], [0], [0], [1], [0, 0, 1, 1], [], []>} : vector<32x128xbf16>, vector<128x32xbf16>, vector<32x32xf32> -> vector<32x32xf32>
    %c224 = arith.constant 224 : index
    %c0_56 = arith.constant 0 : index
    %142 = vector.load %arg11[%c224, %c0_56] : memref<256x32xf32, #tpu.memory_space<vmem>>, vector<32x32xf32>
    tpu.vector_store %arg11[%c224, %c0_56], %141 {strides = array<i32>} : memref<256x32xf32, #tpu.memory_space<vmem>>, vector<32x32xf32>,
    %c0_57 = arith.constant 0 : index
    %c0_58 = arith.constant 0 : index
    %143 = vector.load %arg11[%c0_57, %c0_58] : memref<256x32xf32, #tpu.memory_space<vmem>>, vector<256x32xf32>
    %c0_59 = arith.constant 0 : index
    %c0_60 = arith.constant 0 : index
    %144 = vector.load %arg6[%c0_59, %c0_60] : memref<256x32xf32, #tpu.memory_space<vmem>>, vector<256x16xf32>
    %145 = vector.extract_strided_slice %144 {offsets = [0, 0], sizes = [256, 1], strides = [1, 1]} : vector<256x16xf32> to vector<256x1xf32>
    %146 = vector.extract_strided_slice %143 {offsets = [0, 0], sizes = [256, 9], strides = [1, 1]} : vector<256x32xf32> to vector<256x9xf32>
    %147 = vector.broadcast %145 : vector<256x1xf32> to vector<256x9xf32>
    %148 = arith.mulf %147, %146 : vector<256x9xf32>
    %149 = vector.extract_strided_slice %144 {offsets = [0, 1], sizes = [256, 1], strides = [1, 1]} : vector<256x16xf32> to vector<256x1xf32>
    %150 = vector.extract_strided_slice %143 {offsets = [0, 1], sizes = [256, 9], strides = [1, 1]} : vector<256x32xf32> to vector<256x9xf32>
    %151 = vector.broadcast %149 : vector<256x1xf32> to vector<256x9xf32>
    %152 = arith.mulf %151, %150 : vector<256x9xf32>
    %153 = vector.extract_strided_slice %144 {offsets = [0, 2], sizes = [256, 1], strides = [1, 1]} : vector<256x16xf32> to vector<256x1xf32>
    %154 = vector.extract_strided_slice %143 {offsets = [0, 2], sizes = [256, 9], strides = [1, 1]} : vector<256x32xf32> to vector<256x9xf32>
    %155 = vector.broadcast %153 : vector<256x1xf32> to vector<256x9xf32>
    %156 = arith.mulf %155, %154 : vector<256x9xf32>
    %157 = arith.addf %148, %156 : vector<256x9xf32>
    %158 = vector.extract_strided_slice %144 {offsets = [0, 3], sizes = [256, 1], strides = [1, 1]} : vector<256x16xf32> to vector<256x1xf32>
    %159 = vector.extract_strided_slice %143 {offsets = [0, 3], sizes = [256, 9], strides = [1, 1]} : vector<256x32xf32> to vector<256x9xf32>
    %160 = vector.broadcast %158 : vector<256x1xf32> to vector<256x9xf32>
    %161 = arith.mulf %160, %159 : vector<256x9xf32>
    %162 = arith.addf %152, %161 : vector<256x9xf32>
    %163 = vector.extract_strided_slice %144 {offsets = [0, 4], sizes = [256, 1], strides = [1, 1]} : vector<256x16xf32> to vector<256x1xf32>
    %164 = vector.extract_strided_slice %143 {offsets = [0, 4], sizes = [256, 9], strides = [1, 1]} : vector<256x32xf32> to vector<256x9xf32>
    %165 = vector.broadcast %163 : vector<256x1xf32> to vector<256x9xf32>
    %166 = arith.mulf %165, %164 : vector<256x9xf32>
    %167 = arith.addf %157, %166 : vector<256x9xf32>
    %168 = vector.extract_strided_slice %144 {offsets = [0, 5], sizes = [256, 1], strides = [1, 1]} : vector<256x16xf32> to vector<256x1xf32>
    %169 = vector.extract_strided_slice %143 {offsets = [0, 5], sizes = [256, 9], strides = [1, 1]} : vector<256x32xf32> to vector<256x9xf32>
    %170 = vector.broadcast %168 : vector<256x1xf32> to vector<256x9xf32>
    %171 = arith.mulf %170, %169 : vector<256x9xf32>
    %172 = arith.addf %162, %171 : vector<256x9xf32>
    %173 = vector.extract_strided_slice %144 {offsets = [0, 6], sizes = [256, 1], strides = [1, 1]} : vector<256x16xf32> to vector<256x1xf32>
    %174 = vector.extract_strided_slice %143 {offsets = [0, 6], sizes = [256, 9], strides = [1, 1]} : vector<256x32xf32> to vector<256x9xf32>
    %175 = vector.broadcast %173 : vector<256x1xf32> to vector<256x9xf32>
    %176 = arith.mulf %175, %174 : vector<256x9xf32>
    %177 = arith.addf %167, %176 : vector<256x9xf32>
    %178 = vector.extract_strided_slice %144 {offsets = [0, 7], sizes = [256, 1], strides = [1, 1]} : vector<256x16xf32> to vector<256x1xf32>
    %179 = vector.extract_strided_slice %143 {offsets = [0, 7], sizes = [256, 9], strides = [1, 1]} : vector<256x32xf32> to vector<256x9xf32>
    %180 = vector.broadcast %178 : vector<256x1xf32> to vector<256x9xf32>
    %181 = arith.mulf %180, %179 : vector<256x9xf32>
    %182 = arith.addf %172, %181 : vector<256x9xf32>
    %183 = vector.extract_strided_slice %144 {offsets = [0, 8], sizes = [256, 1], strides = [1, 1]} : vector<256x16xf32> to vector<256x1xf32>
    %184 = vector.extract_strided_slice %143 {offsets = [0, 8], sizes = [256, 9], strides = [1, 1]} : vector<256x32xf32> to vector<256x9xf32>
    %185 = vector.broadcast %183 : vector<256x1xf32> to vector<256x9xf32>
    %186 = arith.mulf %185, %184 : vector<256x9xf32>
    %187 = arith.addf %177, %186 : vector<256x9xf32>
    %188 = vector.extract_strided_slice %144 {offsets = [0, 9], sizes = [256, 1], strides = [1, 1]} : vector<256x16xf32> to vector<256x1xf32>
    %189 = vector.extract_strided_slice %143 {offsets = [0, 9], sizes = [256, 9], strides = [1, 1]} : vector<256x32xf32> to vector<256x9xf32>
    %190 = vector.broadcast %188 : vector<256x1xf32> to vector<256x9xf32>
    %191 = arith.mulf %190, %189 : vector<256x9xf32>
    %192 = arith.addf %182, %191 : vector<256x9xf32>
    %193 = vector.extract_strided_slice %144 {offsets = [0, 10], sizes = [256, 1], strides = [1, 1]} : vector<256x16xf32> to vector<256x1xf32>
    %194 = vector.extract_strided_slice %143 {offsets = [0, 10], sizes = [256, 9], strides = [1, 1]} : vector<256x32xf32> to vector<256x9xf32>
    %195 = vector.broadcast %193 : vector<256x1xf32> to vector<256x9xf32>
    %196 = arith.mulf %195, %194 : vector<256x9xf32>
    %197 = arith.addf %187, %196 : vector<256x9xf32>
    %198 = vector.extract_strided_slice %144 {offsets = [0, 11], sizes = [256, 1], strides = [1, 1]} : vector<256x16xf32> to vector<256x1xf32>
    %199 = vector.extract_strided_slice %143 {offsets = [0, 11], sizes = [256, 9], strides = [1, 1]} : vector<256x32xf32> to vector<256x9xf32>
    %200 = vector.broadcast %198 : vector<256x1xf32> to vector<256x9xf32>
    %201 = arith.mulf %200, %199 : vector<256x9xf32>
    %202 = arith.addf %192, %201 : vector<256x9xf32>
    %203 = vector.extract_strided_slice %144 {offsets = [0, 12], sizes = [256, 1], strides = [1, 1]} : vector<256x16xf32> to vector<256x1xf32>
    %204 = vector.extract_strided_slice %143 {offsets = [0, 12], sizes = [256, 9], strides = [1, 1]} : vector<256x32xf32> to vector<256x9xf32>
    %205 = vector.broadcast %203 : vector<256x1xf32> to vector<256x9xf32>
    %206 = arith.mulf %205, %204 : vector<256x9xf32>
    %207 = arith.addf %197, %206 : vector<256x9xf32>
    %208 = vector.extract_strided_slice %144 {offsets = [0, 13], sizes = [256, 1], strides = [1, 1]} : vector<256x16xf32> to vector<256x1xf32>
    %209 = vector.extract_strided_slice %143 {offsets = [0, 13], sizes = [256, 9], strides = [1, 1]} : vector<256x32xf32> to vector<256x9xf32>
    %210 = vector.broadcast %208 : vector<256x1xf32> to vector<256x9xf32>
    %211 = arith.mulf %210, %209 : vector<256x9xf32>
    %212 = arith.addf %202, %211 : vector<256x9xf32>
    %213 = vector.extract_strided_slice %144 {offsets = [0, 14], sizes = [256, 1], strides = [1, 1]} : vector<256x16xf32> to vector<256x1xf32>
    %214 = vector.extract_strided_slice %143 {offsets = [0, 14], sizes = [256, 9], strides = [1, 1]} : vector<256x32xf32> to vector<256x9xf32>
    %215 = vector.broadcast %213 : vector<256x1xf32> to vector<256x9xf32>
    %216 = arith.mulf %215, %214 : vector<256x9xf32>
    %217 = arith.addf %207, %216 : vector<256x9xf32>
    %218 = vector.extract_strided_slice %144 {offsets = [0, 15], sizes = [256, 1], strides = [1, 1]} : vector<256x16xf32> to vector<256x1xf32>
    %219 = vector.extract_strided_slice %143 {offsets = [0, 15], sizes = [256, 9], strides = [1, 1]} : vector<256x32xf32> to vector<256x9xf32>
    %220 = vector.broadcast %218 : vector<256x1xf32> to vector<256x9xf32>
    %221 = arith.mulf %220, %219 : vector<256x9xf32>
    %222 = arith.addf %212, %221 : vector<256x9xf32>
    %223 = arith.addf %217, %222 : vector<256x9xf32>
    %c0_61 = arith.constant 0 : index
    %c0_62 = arith.constant 0 : index
    %224 = vector.load %arg5[%c0_61, %c0_62] : memref<256x256xbf16, #tpu.memory_space<vmem>>, vector<256x256xbf16>
    %225 = arith.truncf %223 : vector<256x9xf32> to vector<256x9xbf16>
    %cst_63 = arith.constant dense<0.000000e+00> : vector<256x9xf32>
    %226 = tpu.matmul %224, %225, %cst_63 {dimension_numbers = #tpu.dot_dimension_numbers<[1], [0], [0], [1], [0, 0, 1, 1], [], []>} : vector<256x256xbf16>, vector<256x9xbf16>, vector<256x9xf32> -> vector<256x9xf32>
    %c0_64 = arith.constant 0 : index
    %c17 = arith.constant 17 : index
    %227 = vector.load %arg6[%c0_64, %c17] : memref<256x32xf32, #tpu.memory_space<vmem>>, vector<256x1xf32>
    %228 = vector.broadcast %227 : vector<256x1xf32> to vector<256x9xf32>
    %229 = arith.addf %226, %228 : vector<256x9xf32>
    %cst_65 = arith.constant 0.000000e+00 : f32
    %230 = vector.broadcast %cst_65 : f32 to vector<256x9xf32>
    %231 = arith.cmpf ogt, %229, %230 : vector<256x9xf32>
    %cst_66 = arith.constant 0.000000e+00 : f32
    %232 = vector.broadcast %cst_66 : f32 to vector<256x9xf32>
    %233 = arith.minimumf %229, %232 : vector<256x9xf32>
    %234 = math.exp %233 : vector<256x9xf32>
    %cst_67 = arith.constant 1.000000e+00 : f32
    %235 = vector.broadcast %cst_67 : f32 to vector<256x9xf32>
    %236 = arith.subf %234, %235 : vector<256x9xf32>
    %237 = arith.select %231, %229, %236 : vector<256x9xi1>, vector<256x9xf32>
    %238 = vector.extract_strided_slice %237 {offsets = [0, 0], sizes = [256, 8], strides = [1, 1]} : vector<256x9xf32> to vector<256x8xf32>
    %cst_68 = arith.constant dense<0.000000e+00> : vector<256xf32>
    %239 = vector.multi_reduction <add>, %238, %cst_68 [1] : vector<256x8xf32> to vector<256xf32>
    %240 = vector.shape_cast %239 : vector<256xf32> to vector<256x1xf32>
    %cst_69 = arith.constant 1.250000e-01 : f32
    %241 = vector.broadcast %cst_69 : f32 to vector<256x1xf32>
    %242 = arith.mulf %240, %241 : vector<256x1xf32>
    %c0_70 = arith.constant 0 : index
    %c0_71 = arith.constant 0 : index
    %243 = vector.load %arg8[%c0_70, %c0_71] : memref<16x256xf32, #tpu.memory_space<vmem>>, vector<16x256xf32>
    %c0_72 = arith.constant 0 : index
    %c0_73 = arith.constant 0 : index
    %244 = vector.load %arg7[%c0_72, %c0_73] : memref<256x128xf32, #tpu.memory_space<vmem>>, vector<256x128xf32>
    %245 = vector.broadcast %242 : vector<256x1xf32> to vector<256x128xf32>
    %246 = arith.mulf %245, %244 : vector<256x128xf32>
    %cst_74 = arith.constant dense<0.000000e+00> : vector<16x128xf32>
    %247 = tpu.matmul %243, %246, %cst_74 {dimension_numbers = #tpu.dot_dimension_numbers<[1], [0], [0], [1], [0, 0, 1, 1], [], []>} : vector<16x256xf32>, vector<256x128xf32>, vector<16x128xf32> -> vector<16x128xf32>
    %c0_75 = arith.constant 0 : index
    %c0_76 = arith.constant 0 : index
    %248 = vector.load %arg9[%c0_75, %c0_76] : memref<1x128xf32, #tpu.memory_space<vmem>>, vector<1x128xf32>
    %249 = vector.broadcast %248 : vector<1x128xf32> to vector<16x128xf32>
    %250 = arith.addf %247, %249 : vector<16x128xf32>
    %cst_77 = arith.constant dense<0xFF800000> : vector<16xf32>
    %251 = vector.multi_reduction <maximumf>, %250, %cst_77 [1] : vector<16x128xf32> to vector<16xf32>
    %252 = vector.shape_cast %251 : vector<16xf32> to vector<16x1xf32>
    %253 = vector.broadcast %252 : vector<16x1xf32> to vector<16x128xf32>
    %254 = arith.subf %250, %253 : vector<16x128xf32>
    %255 = math.exp %254 : vector<16x128xf32>
    %cst_78 = arith.constant dense<0.000000e+00> : vector<16xf32>
    %256 = vector.multi_reduction <add>, %255, %cst_78 [1] : vector<16x128xf32> to vector<16xf32>
    %257 = vector.shape_cast %256 : vector<16xf32> to vector<16x1xf32>
    %258 = vector.broadcast %257 : vector<16x1xf32> to vector<16x128xf32>
    %259 = arith.divf %255, %258 : vector<16x128xf32>
    %c0_79 = arith.constant 0 : index
    %c0_80 = arith.constant 0 : index
    %260 = vector.load %arg10[%c0_79, %c0_80] : memref<16x128xf32, #tpu.memory_space<vmem>>, vector<16x128xf32>
    tpu.vector_store %arg10[%c0_79, %c0_80], %259 {strides = array<i32>} : memref<16x128xf32, #tpu.memory_space<vmem>>, vector<16x128xf32>,
    return
  }
  func.func @transform_0(%arg0: i32) -> (i32, i32) {
    %c0_i32 = arith.constant 0 : i32
    %c0_i32_0 = arith.constant 0 : i32
    return %arg0, %c0_i32 : i32, i32
  }
  func.func @transform_1(%arg0: i32) -> (i32, i32) {
    %c0_i32 = arith.constant 0 : i32
    %c0_i32_0 = arith.constant 0 : i32
    %c0_i32_1 = arith.constant 0 : i32
    return %c0_i32, %c0_i32_0 : i32, i32
  }
  func.func @transform_2(%arg0: i32) -> (i32, i32) {
    %c0_i32 = arith.constant 0 : i32
    %c0_i32_0 = arith.constant 0 : i32
    %c0_i32_1 = arith.constant 0 : i32
    return %c0_i32, %c0_i32_0 : i32, i32
  }
  func.func @transform_3(%arg0: i32) -> (i32, i32) {
    %c0_i32 = arith.constant 0 : i32
    %c0_i32_0 = arith.constant 0 : i32
    %c0_i32_1 = arith.constant 0 : i32
    return %c0_i32, %c0_i32_0 : i32, i32
  }
  func.func @transform_4(%arg0: i32) -> (i32, i32) {
    %c0_i32 = arith.constant 0 : i32
    %c0_i32_0 = arith.constant 0 : i32
    %c0_i32_1 = arith.constant 0 : i32
    return %c0_i32, %c0_i32_0 : i32, i32
  }
  func.func @transform_5(%arg0: i32) -> (i32, i32) {
    %c0_i32 = arith.constant 0 : i32
    %c0_i32_0 = arith.constant 0 : i32
    %c0_i32_1 = arith.constant 0 : i32
    return %c0_i32, %c0_i32_0 : i32, i32
  }
  func.func @transform_6(%arg0: i32) -> (i32, i32) {
    %c0_i32 = arith.constant 0 : i32
    %c0_i32_0 = arith.constant 0 : i32
    %c0_i32_1 = arith.constant 0 : i32
    return %c0_i32, %c0_i32_0 : i32, i32
  }
  func.func @transform_7(%arg0: i32) -> (i32, i32) {
    %c0_i32 = arith.constant 0 : i32
    %c0_i32_0 = arith.constant 0 : i32
    %c0_i32_1 = arith.constant 0 : i32
    return %c0_i32, %c0_i32_0 : i32, i32
  }
  func.func @transform_8(%arg0: i32) -> (i32, i32) {
    %c0_i32 = arith.constant 0 : i32
    %c0_i32_0 = arith.constant 0 : i32
    %c0_i32_1 = arith.constant 0 : i32
    return %c0_i32, %c0_i32_0 : i32, i32
  }
  func.func @transform_9(%arg0: i32) -> (i32, i32) {
    %c0_i32 = arith.constant 0 : i32
    %c0_i32_0 = arith.constant 0 : i32
    return %arg0, %c0_i32 : i32, i32
  }
}

</mosaic_0001>

<bundles_post_ra>
// kernel: eegnet_forward.1
= control target key start
LH: loop header
LB: loop body
LE: loop exit
PB: predicated region body
PF: predicated region fallthrough
CT: control target
= control target key end

     0   :  { %14 = vsyncpa [#allocation4], 0  ;;  %s10132_s30 = smov 0   ;;  %s16358_s0 = inlined_call_operand.vmem [shape: bf16[512,128], index: 0, kind: input, shape index: {}]   ;;  %s16359_s1 = inlined_call_operand.vmem [shape: bf16[256,128], index: 1, kind: input, shape index: {}]   ;;  %s16360_s2 = inlined_call_operand.vmem [shape: bf16[128,1024], index: 2, kind: input, shape index: {}]   ;;  %s16361_s3 = inlined_call_operand.vmem [shape: bf16[128,32], index: 3, kind: input, shape index: {}]   ;;  %s16362_s4 = inlined_call_operand.vmem [shape: bf16[256,256], index: 4, kind: input, shape index: {}]   ;;  %s16363_s5 = inlined_call_operand.vmem [shape: f32[256,32], index: 5, kind: input, shape index: {}]   ;;  %s16364_s6 = inlined_call_operand.vmem [shape: f32[256,128], index: 6, kind: input, shape index: {}]   ;;  %s16365_s7 = inlined_call_operand.hbm [shape: f32[16,256], index: 7, kind: input, shape index: {}]   ;;  %s16366_s8 = inlined_call_operand.vmem [shape: f32[1,128], index: 8, kind: input, shape index: {}]   ;;  %s16367_s9 = inlined_call_operand.vmem [shape: f32[64,128], index: 9, kind: output, shape index: {}]  }
   0x1 LB: > { %s10138_s10 = sadd.s32 4294967295, %s10051_s30   ;;  %p8500_p0 = scmp.ge.s32.totalorder %s10051_s30, 1  ;;  %s10051_s30 = sphi %s10132_s30, %s20_s30  }
   0x2   : > { %p245_p1 = scmp.lt.s32.totalorder %s10051_s30, 5  ;;  %s10053_s11 = smov [#allocation3]  }
   0x3   : > { %s275_s12 = sshll.u32 %s10053_s11, 4  ;;  %p16368_p3 = scmp.eq.s32.totalorder %s10138_s10, 0  ;;  %s276_s12 = int_to_ptr.vmem [resolvable:$true] %s275_s12 }
   0x4   : > { %p10142_p2 = pnand %p8500_p0, %p245_p1  ;;  %s10013_s17 = scalar_lea.hbm %s16365_s7, 512 }
   0x5   : > { %p10014_p6 = scmp.ne.s32.totalorder %s16365_s7, %s10013_s17  ;;  %p10020_p10 = scmp.lt.u32.totalorder %s10013_s17, %s16365_s7 }
   0x6   : > { %s16488_s13 = scalar_select %p10142_p2, 1, 0 }
   0x7   : > { %p9458_p4 = pneg %p10142_p2 }
   0x9   : > { %p10151_p5 = pnand %p16368_p3, %p9458_p4 }
   0xb   : > { %p10015_p7 = pneg %p10151_p5 }
   0xd   : > { %p10016_p8 = pnand %p10015_p7, %p10014_p6 }
   0xf   : > { %p10017_p9 = pneg %p10016_p8 }
  0x11   : > { %p10022_p11 = pnand %p10020_p10, %p10017_p9 }
  0x13   : > { %10025 = shalt.err (!%p10022_p11)
}
  0x14   : > { %s10026_s22 = scalar_lea.vmem %s276_s12, 512  ;;  %p10034_p1 = scmp.lt.s32.totalorder %s276_s12, %s276_s12 }
  0x15   : > { %p10027_p12 = scmp.ne.s32.totalorder %s276_s12, %s10026_s22  ;;  %p10035_p4 = scmp.lt.s32.totalorder %s10026_s22, %s10026_s22 }
  0x17   : > { %p10029_p13 = pnand %p10027_p12, %p10015_p7  ;;  %p10036_p3 = por %p10035_p4, %p10034_p1 }
  0x19   : > { %p10030_p0 = pneg %p10029_p13 }
  0x1b   : > { %p10037_p2 = pnand %p10036_p3, %p10030_p0 }
  0x1d   : > { %10040 = shalt.err (!%p10037_p2)
}
  0x1e   : > { %s10054_s23 = smov 256   ;;  %s10055_s24 = smov 16  }
  0x1f   : > { %9461 = dma.hbm_to_vmem [thread:$0]  (!%p10151_p5), %s16365_s7, 512, %s276_s12, [#allocation4], %s10054_s23, %s10054_s23, %s10055_s24  }
  0x20   : > { %p16490_p6 = scmp.ne.s32.totalorder %s16488_s13, 0 }
  0x22   : > { %303 = sbr.rel (%p16490_p6) target bundleno = 3764 (0xeb4), region = 56 }
  0x29   : > { %p16491_p8 = scmp.eq.s32.totalorder %s10138_s10, 0 }
  0x2b   : > { %10046 = dma.done.wait (%p16491_p8), [#allocation4], 512   ;;  %p16492_p7 = pmov %p16491_p8 }
  0x2c   : > { %s8505_s27 = sshll.u32 %s10138_s10, 4  ;;  %v10056_v0 = vmov 16   ;;  %v10186_v1 = vld [vmem:[%s16363_s5 + $0x10] sm:$0xff]  ;;  %v10193_v3 = vld [vmem:[%s16363_s5 + $0x18] sm:$0xff]  ;;  %v10201_v6 = vld [vmem:[%s16363_s5 + $0x28] sm:$0xff]  ;;  %v10057_v49 = vmov 0  }
  0x2d   : > { %10048 = vsyncadd (%p16492_p7), [#allocation4], 4294966784  ;;  %9502 = vset.pattern.permute.xlu1 %v10056_v0  ;;  %p340_p2 = scmp.lt.s32.totalorder %s8505_s27, 63  ;;  %9501 = vset.pattern.permute.xlu0 %v10056_v0  ;;  %v10208_v8 = vld [vmem:[%s16363_s5 + $0x38] sm:$0xff]  ;;  %v9573_v9 = vld [vmem:[%s16359_s1] sm:$0xff]   ;;  %s10065_s29 = smov 126  }
  0x2e   : > { %845 = vperm.xlu1 %9502, %v10186_v1   ;;  %v10218_v11 = vld [vmem:[%s16363_s5 + $0x48] sm:$0xff]  ;;  %9054 = vmatprep.mubr.bf16.mxu1 %v9573_v9  ;;  %v10225_v13 = vld [vmem:[%s16363_s5] sm:$0xff]  ;;  %v10230_v14 = vld [vmem:[%s16363_s5 + $0x58] sm:$0xff]  ;;  %s10066_s11 = smov 124   ;;  %s10067_s13 = smov 122  }
  0x2f   : > { %s17743_s27 = smov (!%p340_p2, %s8505_s27), 63  ;;  %835 = vperm.xlu0 %9501, %v10225_v13   ;;  %v10236_v15 = vld [vmem:[%s16363_s5 + $0x8] sm:$0xff]  ;;  %v10249_v18 = vld [vmem:[%s16363_s5 + $0x20] sm:$0xff]  ;;  %v10256_v20 = vld [vmem:[%s16363_s5 + $0x78] sm:$0xff]  ;;  %s10070_s21 = smov 120  }
  0x30   : > { %s8506_s28 = sshll.u32 %s17743_s27, 2  ;;  %v10243_v17 = vld [vmem:[%s16363_s5 + $0x68] sm:$0xff]  ;;  %v10262_v21 = vld [vmem:[%s16363_s5 + $0x30] sm:$0xff]  ;;  %v10276_v24 = vld [vmem:[%s16363_s5 + $0x40] sm:$0xff]  ;;  %s10073_s22 = smov 118  }
  0x31   : > { %s10181_s12 = scalar_lea.vmem %s16358_s0, %s8506_s28  ;;  %v10267_v22 = vld [vmem:[%s16363_s5 + $0x88] sm:$0xff]  ;;  %v9575_v25 = vld [vmem:[%s16359_s1 + $0x10] sm:$0xff]   ;;  %v10285_v26 = vld [vmem:[%s16363_s5 + $0x98] sm:$0xff]  ;;  %s10077_s28 = smov 116  }
  0x32   : > { %v9565_v2 = vld [vmem:[%s10181_s12] sm:$0xff]   ;;  %v9566_v4 = vld [vmem:[%s10181_s12 + $0x8] sm:$0xff]   ;;  %850 = vperm.xlu1 %9502, %v10193_v3   ;;  %v9567_v5 = vld [vmem:[%s10181_s12 + $0x10] sm:$0xff]   ;;  %s10080_s16 = smov 127   ;;  %s8507_s20 = sshll.u32 %s10138_s10, 1 }
  0x33   : > { %9038 = vmatprep.subr.bf16.mxu1 %v9565_v2  ;;  %v9568_v7 = vld [vmem:[%s10181_s12 + $0x18] sm:$0xff]   ;;  %v9569_v10 = vld [vmem:[%s10181_s12 + $0x20] sm:$0xff]   ;;  %v9570_v12 = vld [vmem:[%s10181_s12 + $0x28] sm:$0xff]   ;;  %840 = vperm.xlu0 %9501, %v10236_v15   ;;  %p346_p3 = scmp.lt.s32.totalorder %s8507_s20, 7 }
  0x34   : > { %9039 = vmatpush3.bf16.msra.mxu1 %v9565_v2  ;;  %v9571_v16 = vld [vmem:[%s10181_s12 + $0x30] sm:$0xff]   ;;  %v9572_v19 = vld [vmem:[%s10181_s12 + $0x38] sm:$0xff]   ;;  %v9574_v23 = vld [vmem:[%s16359_s1 + $0x8] sm:$0xff]  }
  0x35   : > { %9040 = vmatprep.subr.bf16.mxu1 %v9566_v4  ;;  %v10291_v27 = vld [vmem:[%s16363_s5 + $0x50] sm:$0xff]  ;;  %v10297_v28 = vld [vmem:[%s16363_s5 + $0xa8] sm:$0xff]  ;;  %v9576_v29 = vld [vmem:[%s16359_s1 + $0x18] sm:$0xff]   ;;  %s17745_s20 = smov (!%p346_p3, %s8507_s20), 7 }
  0x36   : > { %1085 = vperm.xlu1 %9502, %v10201_v6   ;;  %v10307_v30 = vld [vmem:[%s16363_s5 + $0x60] sm:$0xff]  ;;  %v10312_v31 = vld [vmem:[%s16363_s5 + $0xb8] sm:$0xff]  ;;  %v10321_v33 = vld [vmem:[%s16363_s5 + $0x70] sm:$0xff] }
  0x37   : > { %1080 = vperm.xlu0 %9501, %v10249_v18   ;;  %v9577_v32 = vld [vmem:[%s16359_s1 + $0x20] sm:$0xff]   ;;  %v10327_v34 = vld [vmem:[%s16363_s5 + $0xc8] sm:$0xff]  ;;  %v9579_v37 = vld [vmem:[%s16359_s1 + $0x30] sm:$0xff]  }
  0x38   : > { %9041 = vmatpush3.bf16.msra.mxu1 %v9566_v4  ;;  %v9578_v35 = vld [vmem:[%s16359_s1 + $0x28] sm:$0xff]   ;;  %v10336_v36 = vld [vmem:[%s16363_s5 + $0x80] sm:$0xff]  ;;  %v10346_v38 = vld [vmem:[%s16363_s5 + $0xd8] sm:$0xff] }
  0x39   : > { %9042 = vmatprep.subr.bf16.mxu1 %v9567_v5  ;;  %v10352_v39 = vld [vmem:[%s16363_s5 + $0x90] sm:$0xff]  ;;  %v10358_v40 = vld [vmem:[%s16363_s5 + $0xe8] sm:$0xff]  ;;  %v10364_v41 = vld [vmem:[%s16363_s5 + $0xa0] sm:$0xff] }
  0x3a   : > { %1095 = vperm.xlu1 %9502, %v10208_v8   ;;  %v9580_v42 = vld [vmem:[%s16359_s1 + $0x38] sm:$0xff]   ;;  %v9581_v43 = vld [vmem:[%s16359_s1 + $0x40] sm:$0xff]   ;;  %v10382_v45 = vld [vmem:[%s16363_s5 + $0xb0] sm:$0xff] }
  0x3b   : > { %1090 = vperm.xlu0 %9501, %v10262_v21   ;;  %v10376_v44 = vld [vmem:[%s16363_s5 + $0xf8] sm:$0xff]  ;;  %v10389_v46 = vld [vmem:[%s16363_s5 + $0xc0] sm:$0xff]  ;;  %v9582_v47 = vld [vmem:[%s16359_s1 + $0x48] sm:$0xff]  }
  0x3c   : > { %9043 = vmatpush3.bf16.msra.mxu1 %v9567_v5  ;;  %v9583_v48 = vld [vmem:[%s16359_s1 + $0x50] sm:$0xff]   ;;  %v10409_v51 = vld [vmem:[%s16363_s5 + $0xe0] sm:$0xff]  ;;  %v9584_v52 = vld [vmem:[%s16359_s1 + $0x58] sm:$0xff]  }
  0x3d   : > { %9044 = vmatprep.subr.bf16.mxu1 %v9568_v7  ;;  %v10402_v50 = vld [vmem:[%s16363_s5 + $0xd0] sm:$0xff]  ;;  %v9585_v53 = vld [vmem:[%s16359_s1 + $0x60] sm:$0xff]   ;;  %v9586_v55 = vld [vmem:[%s16359_s1 + $0x68] sm:$0xff]  }
  0x3e   : > { %1265 = vperm.xlu1 %9502, %v10218_v11   ;;  %v10422_v54 = vld [vmem:[%s16363_s5 + $0xf0] sm:$0xff]  ;;  %v721_v56 = vld [vmem:[%s16360_s2] sm:$0xff] }
  0x3f   : > { %1260 = vperm.xlu0 %9501, %v10276_v24   ;;  %v725_v57 = vld [vmem:[%s16360_s2 + $0x20] sm:$0xff]  ;;  %v9587_v9 = vld [vmem:[%s16359_s1 + $0x70] sm:$0xff]  }
  0x40   : > { %9045 = vmatpush3.bf16.msra.mxu1 %v9568_v7  ;;  %v8533_v58 = vcombine.low %v721_v56, %v725_v57  ;;  %v729_v59 = vld [vmem:[%s16360_s2 + $0x40] sm:$0xff]  ;;  %v8553_v62 = vcombine.high %v721_v56, %v725_v57 }
  0x41   : > { %9046 = vmatprep.subr.bf16.mxu1 %v9569_v10  ;;  %v733_v60 = vld [vmem:[%s16360_s2 + $0x60] sm:$0xff] }
  0x42   : > { %1275 = vperm.xlu1 %9502, %v10230_v14   ;;  %v8534_v61 = vcombine.low %v729_v59, %v733_v60  ;;  %v737_v63 = vld [vmem:[%s16360_s2 + $0x80] sm:$0xff]  ;;  %9126 = vmatprep.subr.bf16.mxu0 %v8553_v62  ;;  %v8554_v4 = vcombine.high %v729_v59, %v733_v60  ;;  %v722_v59 = vld [vmem:[%s16360_s2 + $0x8] sm:$0xff] }
  0x43   : > { %1270 = vperm.xlu0 %9501, %v10291_v27   ;;  %v741_v0 = vld [vmem:[%s16360_s2 + $0xa0] sm:$0xff]  ;;  %9127 = vmatpush3.bf16.msra.mxu0 %v8553_v62  ;;  %v726_v60 = vld [vmem:[%s16360_s2 + $0x28] sm:$0xff] }
  0x44   : > { %9047 = vmatpush3.bf16.msra.mxu1 %v9569_v10  ;;  %v8535_v2 = vcombine.low %v737_v63, %v741_v0  ;;  %v745_v5 = vld [vmem:[%s16360_s2 + $0xc0] sm:$0xff]  ;;  %9128 = vmatprep.subr.bf16.mxu0 %v8554_v4  ;;  %v10515_v62 = vcombine.low %v722_v59, %v726_v60 }
  0x45   : > { %9048 = vmatprep.subr.bf16.mxu1 %v9570_v12  ;;  %v749_v7 = vld [vmem:[%s16360_s2 + $0xe0] sm:$0xff] }
  0x46   : > { %1461 = vperm.xlu1 %9502, %v10243_v17   ;;  %v8536_v10 = vcombine.low %v745_v5, %v749_v7 }
  0x47   : > { %1456 = vperm.xlu0 %9501, %v10307_v30   ;;  %9129 = vmatpush3.bf16.msra.mxu0 %v8554_v4 }
  0x48   : > { %9049 = vmatpush3.bf16.msra.mxu1 %v9570_v12  ;;  %v9588_v12 = vld [vmem:[%s16359_s1 + $0x78] sm:$0xff]  }
  0x49   : > { %9050 = vmatprep.subr.bf16.mxu1 %v9571_v16 }
  0x4a   : > { %1471 = vperm.xlu1 %9502, %v10256_v20  }
  0x4b   : > { %1466 = vperm.xlu0 %9501, %v10321_v33  }
  0x4c   : > { %9051 = vmatpush3.bf16.msra.mxu1 %v9571_v16  ;;  %v8555_v16 = vcombine.high %v737_v63, %v741_v0 }
  0x4d   : > { %9052 = vmatprep.subr.bf16.mxu1 %v9572_v19 }
  0x4e   : > { %1641 = vperm.xlu1 %9502, %v10267_v22   ;;  %9130 = vmatprep.subr.bf16.mxu0 %v8555_v16 }
  0x4f   : > { %1636 = vperm.xlu0 %9501, %v10336_v36   ;;  %9131 = vmatpush3.bf16.msra.mxu0 %v8555_v16 }
  0x50   : > { %9053 = vmatpush3.bf16.msra.mxu1 %v9572_v19  ;;  %v753_v19 = vld [vmem:[%s16360_s2 + $0x100] sm:$0xff] }
  0x51   : > { %9086 = vmatprep.subr.bf16.mxu1 %v8533_v58 }
  0x52   : > { %1651 = vperm.xlu1 %9502, %v10285_v26  }
  0x53   : > { %9055 = vmatmul.mubr.bf16.vlgmr.msra.gmra.mrb[0].mxu1 %v9574_v23  ;;  %1646 = vperm.xlu0 %9501, %v10352_v39   ;;  %v757_v23 = vld [vmem:[%s16360_s2 + $0x120] sm:$0xff] }
  0x54   : > { %9058 = vmatprep.mubr.bf16.mxu1 %v9575_v25  ;;  %9087 = vmatpush3.bf16.msra.mxu1 %v8533_v58  ;;  %v8537_v25 = vcombine.low %v753_v19, %v757_v23 }
  0x55   : > { %9088 = vmatprep.subr.bf16.mxu1 %v8534_v61 }
  0x56   : > { %1837 = vperm.xlu1 %9502, %v10297_v28  }
  0x57   : > { %1832 = vperm.xlu0 %9501, %v10364_v41  }
  0x58   : > { %9089 = vmatpush3.bf16.msra.mxu1 %v8534_v61  ;;  %v10058_v61 = vmov 1  }
  0x59   : > { %9090 = vmatprep.subr.bf16.mxu1 %v8535_v2 }
  0x5a   : > { %1847 = vperm.xlu1 %9502, %v10312_v31  }
  0x5b   : > { %9059 = vmatmul.mubr.bf16.gmra.mrb[4].mxu1 %v9576_v29  ;;  %1842 = vperm.xlu0 %9501, %v10382_v45   ;;  %v8556_v29 = vcombine.high %v745_v5, %v749_v7 }
  0x5c   : > { %9062 = vmatprep.mubr.bf16.mxu1 %v9577_v32  ;;  %9091 = vmatpush3.bf16.msra.mxu1 %v8535_v2  ;;  %v761_v32 = vld [vmem:[%s16360_s2 + $0x140] sm:$0xff] }
  0x5d   : > { %9092 = vmatprep.subr.bf16.mxu1 %v8536_v10  ;;  %9132 = vmatprep.subr.bf16.mxu0 %v8556_v29 }
  0x5e   : > { %2017 = vperm.xlu1 %9502, %v10327_v34   ;;  %9133 = vmatpush3.bf16.msra.mxu0 %v8556_v29  ;;  %v10561_v29 = vcombine.high %v722_v59, %v726_v60 }
  0x5f   : > { %2012 = vperm.xlu0 %9501, %v10389_v46  }
  0x60   : > { %9093 = vmatpush3.bf16.msra.mxu1 %v8536_v10 }
  0x61   : > { %9094 = vmatprep.subr.bf16.mxu1 %v8537_v25 }
  0x62   : > { %2027 = vperm.xlu1 %9502, %v10346_v38  }
  0x63   : > { %9063 = vmatmul.mubr.bf16.gmra.mrb[8].mxu1 %v9578_v35  ;;  %2022 = vperm.xlu0 %9501, %v10402_v50   ;;  %v765_v35 = vld [vmem:[%s16360_s2 + $0x160] sm:$0xff] }
  0x64   : > { %9066 = vmatprep.mubr.bf16.mxu1 %v9579_v37  ;;  %v8538_v37 = vcombine.low %v761_v32, %v765_v35  ;;  %9095 = vmatpush3.bf16.msra.mxu1 %v8537_v25 }
  0x66   : > { %2213 = vperm.xlu1 %9502, %v10358_v40   ;;  %9096 = vmatprep.subr.bf16.mxu1 %v8538_v37 }
  0x67   : > { %2208 = vperm.xlu0 %9501, %v10409_v51  }
  0x68   : > { %9097 = vmatpush3.bf16.msra.mxu1 %v8538_v37 }
  0x6a   : > { %2223 = vperm.xlu1 %9502, %v10376_v44  }
  0x6b   : > { %9067 = vmatmul.mubr.bf16.gmra.mrb[12].mxu1 %v9580_v42  ;;  %2218 = vperm.xlu0 %9501, %v10422_v54   ;;  %v8557_v42 = vcombine.high %v753_v19, %v757_v23 }
  0x6c   : > { %9070 = vmatprep.mubr.bf16.mxu1 %v9581_v43  ;;  %v769_v43 = vld [vmem:[%s16360_s2 + $0x180] sm:$0xff] }
  0x6d   : > { %9134 = vmatprep.subr.bf16.mxu0 %v8557_v42 }
  0x6e   : > { %9504 = vset.pattern.permute.xlu1 %v10057_v49  ;;  %9135 = vmatpush3.bf16.msra.mxu0 %v8557_v42 }
  0x6f   : > { %2457 = vperm.xlu1 %9504, %v10236_v15   ;;  %9503 = vset.pattern.permute.xlu0 %v10057_v49  ;;  %v8558_v49 = vcombine.high %v761_v32, %v765_v35 }
  0x70   : > { %2452 = vperm.xlu0 %9503, %v10225_v13  }
  0x71   : > { %9136 = vmatprep.subr.bf16.mxu0 %v8558_v49 }
  0x72   : > { %9137 = vmatpush3.bf16.msra.mxu0 %v8558_v49 }
  0x73   : > { %9071 = vmatmul.mubr.bf16.gmra.mrb[16].mxu1 %v9582_v47  ;;  %2462 = vperm.xlu1 %9504, %v10186_v1   ;;  %v773_v47 = vld [vmem:[%s16360_s2 + $0x1a0] sm:$0xff] }
  0x74   : > { %9074 = vmatprep.mubr.bf16.mxu1 %v9583_v48  ;;  %2467 = vperm.xlu0 %9503, %v10193_v3   ;;  %v8539_v48 = vcombine.low %v769_v43, %v773_v47  ;;  %v8559_v56 = vcombine.high %v769_v43, %v773_v47 }
  0x76   : > { %9098 = vmatprep.subr.bf16.mxu1 %v8539_v48  ;;  %9138 = vmatprep.subr.bf16.mxu0 %v8559_v56 }
  0x77   : > { %2472 = vperm.xlu1 %9504, %v10249_v18   ;;  %9099 = vmatpush3.bf16.msra.mxu1 %v8539_v48 }
  0x78   : > { %2477 = vperm.xlu0 %9503, %v10201_v6   ;;  %9139 = vmatpush3.bf16.msra.mxu0 %v8559_v56 }
  0x7b   : > { %9075 = vmatmul.mubr.bf16.gmra.mrb[20].mxu1 %v9584_v52  ;;  %2482 = vperm.xlu1 %9504, %v10262_v21   ;;  %v777_v52 = vld [vmem:[%s16360_s2 + $0x1c0] sm:$0xff] }
  0x7c   : > { %9078 = vmatprep.mubr.bf16.mxu1 %v9585_v53  ;;  %2487 = vperm.xlu0 %9503, %v10208_v8   ;;  %v781_v53 = vld [vmem:[%s16360_s2 + $0x1e0] sm:$0xff] }
  0x7d   : > { %v8560_v57 = vcombine.high %v777_v52, %v781_v53 }
  0x7f   : > { %2492 = vperm.xlu1 %9504, %v10276_v24   ;;  %9140 = vmatprep.subr.bf16.mxu0 %v8560_v57 }
  0x80   : > { %2497 = vperm.xlu0 %9503, %v10218_v11   ;;  %9141 = vmatpush3.bf16.msra.mxu0 %v8560_v57 }
  0x81   : > { %9166 = vmatprep.subr.bf16.mxu0 %v10515_v62 }
  0x83   : > { %9079 = vmatmul.mubr.bf16.gmra.mrb[24].mxu1 %v9586_v55  ;;  %2502 = vperm.xlu1 %9504, %v10291_v27   ;;  %v8540_v55 = vcombine.low %v777_v52, %v781_v53 }
  0x84   : > { %2507 = vperm.xlu0 %9503, %v10230_v14   ;;  %9082 = vmatprep.mubr.bf16.mxu1 %v9587_v9 }
  0x85   : > { %9100 = vmatprep.subr.bf16.mxu1 %v8540_v55 }
  0x86   : > { %9101 = vmatpush3.bf16.msra.mxu1 %v8540_v55 }
  0x87   : > { %2512 = vperm.xlu1 %9504, %v10307_v30  }
  0x88   : > { %2517 = vperm.xlu0 %9503, %v10243_v17  }
  0x8b   : > { %2522 = vperm.xlu1 %9504, %v10321_v33   ;;  %9083 = vmatmul.mubr.bf16.gmra.mrb[28].mxu1 %v9588_v12 }
  0x8c   : > { %2527 = vperm.xlu0 %9503, %v10256_v20  }
  0x8f   : > { %2532 = vperm.xlu1 %9504, %v10336_v36  }
  0x90   : > { %2537 = vperm.xlu0 %9503, %v10267_v22  }
  0x93   : > { %2542 = vperm.xlu1 %9504, %v10352_v39  }
  0x94   : > { %2547 = vperm.xlu0 %9503, %v10285_v26  }
  0x97   : > { %2552 = vperm.xlu1 %9504, %v10364_v41  }
  0x98   : > { %2557 = vperm.xlu0 %9503, %v10297_v28  }
  0x9b   : > { %2562 = vperm.xlu1 %9504, %v10382_v45  }
  0x9c   : > { %2567 = vperm.xlu0 %9503, %v10312_v31  }
  0x9f   : > { %2572 = vperm.xlu1 %9504, %v10389_v46  }
  0xa0   : > { %2577 = vperm.xlu0 %9503, %v10327_v34  }
  0xa3   : > { %2582 = vperm.xlu1 %9504, %v10402_v50  }
  0xa4   : > { %2587 = vperm.xlu0 %9503, %v10346_v38  }
  0xa7   : > { %2592 = vperm.xlu1 %9504, %v10409_v51  }
  0xa8   : > { %2597 = vperm.xlu0 %9503, %v10358_v40  }
  0xab   : > { %2602 = vperm.xlu1 %9504, %v10422_v54  }
  0xac   : > { %2607 = vperm.xlu0 %9503, %v10376_v44  }
  0xad   : > { %v10507_v58 = vpop.permute.xlu1 %845 }
  0xae   : > { %v10534_v5 = vpop.permute.xlu0 %835 }
  0xaf   : > { %9505 = vset.pattern.permute.xlu1 %v10058_v61 }
  0xb0   : > { %2643 = vperm.xlu1 %9505, %v10225_v13   ;;  %9506 = vset.pattern.permute.xlu0 %v10058_v61 }
  0xb1   : > { %v10519_v63 = vpop.permute.xlu1 %850  ;;  %2647 = vperm.xlu0 %9506, %v10236_v15  }
  0xb2   : > { %v10540_v9 = vpop.permute.xlu0 %840 }
  0xb4   : > { %2651 = vperm.xlu1 %9505, %v10186_v1  }
  0xb5   : > { %v10524_v0 = vpop.permute.xlu1 %1085  ;;  %2659 = vperm.xlu0 %9506, %v10249_v18  }
  0xb6   : > { %16493 = vst [vmem:[#allocation6_spill] sm:$0xff] %v10524_v0  ;;  %v10546_v12 = vpop.permute.xlu0 %1080 }
  0xb7   : > { %16498 = vst [vmem:[#allocation11_spill] sm:$0xff] %v10546_v12 }
  0xb8   : > { %2655 = vperm.xlu1 %9505, %v10193_v3  }
  0xb9   : > { %v10528_v2 = vpop.permute.xlu1 %1095  ;;  %2667 = vperm.xlu0 %9506, %v10262_v21  }
  0xba   : > { %16494 = vst [vmem:[#allocation7_spill] sm:$0xff] %v10528_v2  ;;  %v10552_v19 = vpop.permute.xlu0 %1090  ;;  %v11523_v2 = vld [vmem:[%s16360_s2 + $0x1d8] sm:$0xff] }
  0xbc   : > { %2663 = vperm.xlu1 %9505, %v10201_v6  }
  0xbd   : > { %v10532_v4 = vpop.permute.xlu1 %1265  ;;  %2675 = vperm.xlu0 %9506, %v10276_v24  }
  0xbe   : > { %16495 = vst [vmem:[#allocation8_spill] sm:$0xff] %v10532_v4  ;;  %v10558_v25 = vpop.permute.xlu0 %1260 }
  0xbf   : > { %16501 = vst [vmem:[#allocation14_spill] sm:$0xff] %v10558_v25 }
  0xc0   : > { %2671 = vperm.xlu1 %9505, %v10208_v8  }
  0xc1   : > { %v10537_v7 = vpop.permute.xlu1 %1275  ;;  %2683 = vperm.xlu0 %9506, %v10291_v27  }
  0xc2   : > { %16496 = vst [vmem:[#allocation9_spill] sm:$0xff] %v10537_v7  ;;  %v10566_v35 = vpop.permute.xlu0 %1270 }
  0xc3   : > { %16503 = vst [vmem:[#allocation16_spill] sm:$0xff] %v10566_v35 }
  0xc4   : > { %2679 = vperm.xlu1 %9505, %v10218_v11  }
  0xc5   : > { %v10543_v10 = vpop.permute.xlu1 %1461  ;;  %2691 = vperm.xlu0 %9506, %v10307_v30  }
  0xc6   : > { %16497 = vst [vmem:[#allocation10_spill] sm:$0xff] %v10543_v10  ;;  %v10572_v42 = vpop.permute.xlu0 %1456 }
  0xc7   : > { %16505 = vst [vmem:[#allocation18_spill] sm:$0xff] %v10572_v42 }
  0xc8   : > { %2687 = vperm.xlu1 %9505, %v10230_v14  }
  0xc9   : > { %v10549_v16 = vpop.permute.xlu1 %1471  ;;  %2699 = vperm.xlu0 %9506, %v10321_v33  }
  0xca   : > { %16499 = vst [vmem:[#allocation12_spill] sm:$0xff] %v10549_v16  ;;  %v10578_v47 = vpop.permute.xlu0 %1466 }
  0xcb   : > { %16507 = vst [vmem:[#allocation20_spill] sm:$0xff] %v10578_v47 }
  0xcc   : > { %2695 = vperm.xlu1 %9505, %v10243_v17  }
  0xcd   : > { %v10555_v23 = vpop.permute.xlu1 %1641  ;;  %2707 = vperm.xlu0 %9506, %v10336_v36  }
  0xce   : > { %16500 = vst [vmem:[#allocation13_spill] sm:$0xff] %v10555_v23  ;;  %v10584_v49 = vpop.permute.xlu0 %1636 }
  0xcf   : > { %16509 = vst [vmem:[#allocation22_spill] sm:$0xff] %v10584_v49  ;;  %v10769_v49 = vld [vmem:[%s16360_s2 + $0x128] sm:$0xff] }
  0xd0   : > { %2703 = vperm.xlu1 %9505, %v10256_v20  }
  0xd1   : > { %v10563_v32 = vpop.permute.xlu1 %1651  ;;  %2715 = vperm.xlu0 %9506, %v10352_v39  }
  0xd2   : > { %16502 = vst [vmem:[#allocation15_spill] sm:$0xff] %v10563_v32  ;;  %v10590_v53 = vpop.permute.xlu0 %1646  ;;  %v10722_v32 = vld [vmem:[%s16360_s2 + $0x88] sm:$0xff] }
  0xd3   : > { %16511 = vst [vmem:[#allocation24_spill] sm:$0xff] %v10590_v53 }
  0xd4   : > { %2711 = vperm.xlu1 %9505, %v10267_v22  }
  0xd5   : > { %v10569_v37 = vpop.permute.xlu1 %1837  ;;  %2723 = vperm.xlu0 %9506, %v10364_v41  }
  0xd6   : > { %16504 = vst [vmem:[#allocation17_spill] sm:$0xff] %v10569_v37  ;;  %v10596_v56 = vpop.permute.xlu0 %1832 }
  0xd7   : > { %16513 = vst [vmem:[#allocation26_spill] sm:$0xff] %v10596_v56 }
  0xd8   : > { %2719 = vperm.xlu1 %9505, %v10285_v26  }
  0xd9   : > { %v10575_v43 = vpop.permute.xlu1 %1847  ;;  %2731 = vperm.xlu0 %9506, %v10382_v45  }
  0xda   : > { %16506 = vst [vmem:[#allocation19_spill] sm:$0xff] %v10575_v43  ;;  %v10602_v59 = vpop.permute.xlu0 %1842 }
  0xdb   : > { %16515 = vst [vmem:[#allocation28_spill] sm:$0xff] %v10602_v59 }
  0xdc   : > { %2727 = vperm.xlu1 %9505, %v10297_v28  }
  0xdd   : > { %v10581_v48 = vpop.permute.xlu1 %2017  ;;  %2739 = vperm.xlu0 %9506, %v10389_v46  }
  0xde   : > { %16508 = vst [vmem:[#allocation21_spill] sm:$0xff] %v10581_v48  ;;  %v10608_v61 = vpop.permute.xlu0 %2012 }
  0xdf   : > { %16517 = vst [vmem:[#allocation30_spill] sm:$0xff] %v10608_v61 }
  0xe0   : > { %2735 = vperm.xlu1 %9505, %v10312_v31  }
  0xe1   : > { %v10587_v52 = vpop.permute.xlu1 %2027  ;;  %2747 = vperm.xlu0 %9506, %v10402_v50  }
  0xe2   : > { %16510 = vst [vmem:[#allocation23_spill] sm:$0xff] %v10587_v52  ;;  %v10614_v48 = vpop.permute.xlu0 %2022 }
  0xe3   : > { %16519 = vst [vmem:[#allocation32_spill] sm:$0xff] %v10614_v48 }
  0xe4   : > { %2743 = vperm.xlu1 %9505, %v10327_v34  }
  0xe5   : > { %v10593_v55 = vpop.permute.xlu1 %2213  ;;  %2755 = vperm.xlu0 %9506, %v10409_v51  }
  0xe6   : > { %16512 = vst [vmem:[#allocation25_spill] sm:$0xff] %v10593_v55  ;;  %v10620_v37 = vpop.permute.xlu0 %2208 }
  0xe7   : > { %16521 = vst [vmem:[#allocation34_spill] sm:$0xff] %v10620_v37 }
  0xe8   : > { %2751 = vperm.xlu1 %9505, %v10346_v38  }
  0xe9   : > { %v10599_v57 = vpop.permute.xlu1 %2223  ;;  %2763 = vperm.xlu0 %9506, %v10422_v54  }
  0xea   : > { %16514 = vst [vmem:[#allocation27_spill] sm:$0xff] %v10599_v57  ;;  %v10059_v57 = vmov 2   ;;  %v10626_v61 = vpop.permute.xlu0 %2218 }
  0xeb   : > { %16523 = vst [vmem:[#allocation36_spill] sm:$0xff] %v10626_v61 }
  0xec   : > { %2759 = vperm.xlu1 %9505, %v10358_v40  }
  0xed   : > { %9507 = vset.pattern.permute.xlu0 %v10059_v57 }
  0xee   : > { %v10606_v60 = vpop.permute.xlu1 %2457  ;;  %2803 = vperm.xlu0 %9507, %v10225_v13  }
  0xef   : > { %16516 = vst [vmem:[#allocation29_spill] sm:$0xff] %v10606_v60  ;;  %v10632_v48 = vpop.permute.xlu0 %2452 }
  0xf0   : > { %2767 = vperm.xlu1 %9505, %v10376_v44   ;;  %16525 = vst [vmem:[#allocation38_spill] sm:$0xff] %v10632_v48 }
  0xf2   : > { %v10612_v55 = vpop.permute.xlu1 %2462  ;;  %2815 = vperm.xlu0 %9507, %v10193_v3  }
  0xf3   : > { %16518 = vst [vmem:[#allocation31_spill] sm:$0xff] %v10612_v55  ;;  %v10638_v37 = vpop.permute.xlu0 %2467 }
  0xf4   : > { %9508 = vset.pattern.permute.xlu1 %v10059_v57  ;;  %16527 = vst [vmem:[#allocation40_spill] sm:$0xff] %v10638_v37 }
  0xf5   : > { %2807 = vperm.xlu1 %9508, %v10236_v15  }
  0xf6   : > { %v10618_v52 = vpop.permute.xlu1 %2472  ;;  %2823 = vperm.xlu0 %9507, %v10201_v6  }
  0xf7   : > { %16520 = vst [vmem:[#allocation33_spill] sm:$0xff] %v10618_v52  ;;  %v10644_v57 = vpop.permute.xlu0 %2477 }
  0xf8   : > { %16529 = vst [vmem:[#allocation42_spill] sm:$0xff] %v10644_v57 }
  0xf9   : > { %2811 = vperm.xlu1 %9508, %v10186_v1  }
  0xfa   : > { %v10624_v60 = vpop.permute.xlu1 %2482  ;;  %2831 = vperm.xlu0 %9507, %v10208_v8  }
  0xfb   : > { %16522 = vst [vmem:[#allocation35_spill] sm:$0xff] %v10624_v60  ;;  %v10650_v48 = vpop.permute.xlu0 %2487 }
  0xfc   : > { %16531 = vst [vmem:[#allocation44_spill] sm:$0xff] %v10650_v48 }
  0xfd   : > { %2819 = vperm.xlu1 %9508, %v10249_v18  }
  0xfe   : > { %v10629_v55 = vpop.permute.xlu1 %2492  ;;  %2839 = vperm.xlu0 %9507, %v10218_v11  }
  0xff   : > { %16524 = vst [vmem:[#allocation37_spill] sm:$0xff] %v10629_v55  ;;  %v10656_v37 = vpop.permute.xlu0 %2497 }
 0x100   : > { %16533 = vst [vmem:[#allocation46_spill] sm:$0xff] %v10656_v37 }
 0x101   : > { %2827 = vperm.xlu1 %9508, %v10262_v21  }
 0x102   : > { %v10635_v52 = vpop.permute.xlu1 %2502  ;;  %2847 = vperm.xlu0 %9507, %v10230_v14  }
 0x103   : > { %16526 = vst [vmem:[#allocation39_spill] sm:$0xff] %v10635_v52  ;;  %v10662_v57 = vpop.permute.xlu0 %2507 }
 0x104   : > { %16535 = vst [vmem:[#allocation48_spill] sm:$0xff] %v10662_v57 }
 0x105   : > { %2835 = vperm.xlu1 %9508, %v10276_v24  }
 0x106   : > { %v10641_v60 = vpop.permute.xlu1 %2512  ;;  %2855 = vperm.xlu0 %9507, %v10243_v17  }
 0x107   : > { %16528 = vst [vmem:[#allocation41_spill] sm:$0xff] %v10641_v60  ;;  %v10668_v48 = vpop.permute.xlu0 %2517 }
 0x108   : > { %16537 = vst [vmem:[#allocation50_spill] sm:$0xff] %v10668_v48 }
 0x109   : > { %2843 = vperm.xlu1 %9508, %v10291_v27  }
 0x10a   : > { %v10647_v55 = vpop.permute.xlu1 %2522  ;;  %2863 = vperm.xlu0 %9507, %v10256_v20  }
 0x10b   : > { %16530 = vst [vmem:[#allocation43_spill] sm:$0xff] %v10647_v55  ;;  %v10674_v37 = vpop.permute.xlu0 %2527 }
 0x10c   : > { %16539 = vst [vmem:[#allocation52_spill] sm:$0xff] %v10674_v37 }
 0x10d   : > { %2851 = vperm.xlu1 %9508, %v10307_v30  }
 0x10e   : > { %v10653_v52 = vpop.permute.xlu1 %2532  ;;  %2871 = vperm.xlu0 %9507, %v10267_v22  }
 0x10f   : > { %16532 = vst [vmem:[#allocation45_spill] sm:$0xff] %v10653_v52  ;;  %v10680_v57 = vpop.permute.xlu0 %2537 }
 0x110   : > { %16541 = vst [vmem:[#allocation54_spill] sm:$0xff] %v10680_v57 }
 0x111   : > { %2859 = vperm.xlu1 %9508, %v10321_v33  }
 0x112   : > { %v10659_v60 = vpop.permute.xlu1 %2542  ;;  %2879 = vperm.xlu0 %9507, %v10285_v26  }
 0x113   : > { %16534 = vst [vmem:[#allocation47_spill] sm:$0xff] %v10659_v60 }
 0x115   : > { %2867 = vperm.xlu1 %9508, %v10336_v36  }
 0x116   : > { %v10665_v55 = vpop.permute.xlu1 %2552  ;;  %2887 = vperm.xlu0 %9507, %v10297_v28  }
 0x117   : > { %16536 = vst [vmem:[#allocation49_spill] sm:$0xff] %v10665_v55 }
 0x119   : > { %2875 = vperm.xlu1 %9508, %v10352_v39  }
 0x11a   : > { %v10671_v52 = vpop.permute.xlu1 %2562  ;;  %2895 = vperm.xlu0 %9507, %v10312_v31  }
 0x11b   : > { %16538 = vst [vmem:[#allocation51_spill] sm:$0xff] %v10671_v52  ;;  %v10686_v52 = vpop.permute.xlu0 %2547 }
 0x11c   : > { %16543 = vst [vmem:[#allocation56_spill] sm:$0xff] %v10686_v52 }
 0x11d   : > { %2883 = vperm.xlu1 %9508, %v10364_v41  }
 0x11e   : > { %v10677_v60 = vpop.permute.xlu1 %2572  ;;  %2903 = vperm.xlu0 %9507, %v10327_v34  }
 0x11f   : > { %16540 = vst [vmem:[#allocation53_spill] sm:$0xff] %v10677_v60  ;;  %v10692_v59 = vpop.permute.xlu0 %2557 }
 0x120   : > { %16545 = vst [vmem:[#allocation58_spill] sm:$0xff] %v10692_v59 }
 0x121   : > { %2891 = vperm.xlu1 %9508, %v10382_v45  }
 0x122   : > { %v10683_v55 = vpop.permute.xlu1 %2582  ;;  %2911 = vperm.xlu0 %9507, %v10346_v38  }
 0x123   : > { %16542 = vst [vmem:[#allocation55_spill] sm:$0xff] %v10683_v55  ;;  %v10698_v23 = vpop.permute.xlu0 %2567 }
 0x124   : > { %16547 = vst [vmem:[#allocation60_spill] sm:$0xff] %v10698_v23 }
 0x125   : > { %2899 = vperm.xlu1 %9508, %v10389_v46  }
 0x126   : > { %v9056_v48 = vpop.f32.mrb[0].mxu1  ;;  %v10689_v56 = vpop.permute.xlu1 %2592  ;;  %2919 = vperm.xlu0 %9507, %v10358_v40  }
 0x127   : > { %v578_v61 = vpop.f32.mrb[1].mxu1  ;;  %16544 = vst [vmem:[#allocation57_spill] sm:$0xff] %v10689_v56  ;;  %v10714_v23 = vpop.permute.xlu0 %2577 }
 0x128   : > { %v9057_v37 = vpop.f32.mrb[2].mxu1  ;;  %16549 = vst [vmem:[#allocation62_spill] sm:$0xff] %v10714_v23 }
 0x129   : > { %v706_v43 = vpack.c.bf16 %v9057_v37, %v9056_v48  ;;  %v581_v60 = vpop.f32.mrb[3].mxu1  ;;  %2907 = vperm.xlu1 %9508, %v10402_v50  }
 0x12a   : > { %v705_v57 = vpack.c.bf16 %v581_v60, %v578_v61  ;;  %v10695_v55 = vpop.permute.xlu1 %2602  ;;  %v10704_v60 = vld [vmem:[%s16360_s2 + $0x48] sm:$0xff]  ;;  %2927 = vperm.xlu0 %9507, %v10376_v44  }
 0x12b   : > { %16546 = vst [vmem:[#allocation59_spill] sm:$0xff] %v10695_v55  ;;  %v10709_v61 = vld [vmem:[%s16360_s2 + $0x68] sm:$0xff]  ;;  %v10737_v23 = vpop.permute.xlu0 %2587 }
 0x12c   : > { %9102 = vmatprep.mubr.bf16.mxu1 %v705_v57  ;;  %v8566_v59 = vcombine.low %v10704_v60, %v10709_v61  ;;  %16551 = vst [vmem:[#allocation64_spill] sm:$0xff] %v10737_v23 }
 0x12d   : > { %9103 = vmatmul.mubr.bf16.vlgmr.msra.gmra.mrb[32].mxu1 %v706_v43  ;;  %2915 = vperm.xlu1 %9508, %v10409_v51  }
 0x12e   : > { %v9060_v52 = vpop.f32.mrb[4].mxu1 }
 0x12f   : > { %v594_v37 = vpop.f32.mrb[5].mxu1  ;;  %v10712_v55 = vpop.permute.xlu1 %2643 }
 0x130   : > { %v9061_v48 = vpop.f32.mrb[6].mxu1  ;;  %16548 = vst [vmem:[#allocation61_spill] sm:$0xff] %v10712_v55  ;;  %v10060_v55 = vmov 3   ;;  %v10759_v42 = vpop.permute.xlu0 %2597 }
 0x131   : > { %v708_v43 = vpack.c.bf16 %v9061_v48, %v9060_v52  ;;  %v597_v57 = vpop.f32.mrb[7].mxu1  ;;  %2923 = vperm.xlu1 %9508, %v10422_v54   ;;  %v10727_v52 = vld [vmem:[%s16360_s2 + $0xa8] sm:$0xff]  ;;  %16553 = vst [vmem:[#allocation66_spill] sm:$0xff] %v10759_v42  ;;  %9510 = vset.pattern.permute.xlu0 %v10060_v55 }
 0x132   : > { %v707_v56 = vpack.c.bf16 %v597_v57, %v594_v37  ;;  %3127 = vperm.xlu0 %9510, %v10236_v15  }
 0x133   : > { %v10731_v37 = vpop.permute.xlu1 %2651 }
 0x134   : > { %9142 = vmatprep.mubr.bf16.mxu0 %v707_v56  ;;  %16550 = vst [vmem:[#allocation63_spill] sm:$0xff] %v10731_v37  ;;  %v8567_v56 = vcombine.low %v10722_v32, %v10727_v52  ;;  %v10779_v42 = vpop.permute.xlu0 %2607 }
 0x135   : > { %9143 = vmatmul.mubr.bf16.vlgmr.msra.gmra.mrb[0].mxu0 %v708_v43  ;;  %9509 = vset.pattern.permute.xlu1 %v10060_v55  ;;  %v10742_v43 = vld [vmem:[%s16360_s2 + $0xc8] sm:$0xff]  ;;  %16555 = vst [vmem:[#allocation68_spill] sm:$0xff] %v10779_v42 }
 0x136   : > { %9167 = vmatpush3.bf16.msra.mxu0 %v10515_v62  ;;  %v10733_v48 = vpop.f32.mrb[8].mxu1  ;;  %v10747_v62 = vld [vmem:[%s16360_s2 + $0xe8] sm:$0xff]  ;;  %3123 = vperm.xlu1 %9509, %v10225_v13  }
 0x137   : > { %9168 = vmatprep.subr.bf16.mxu0 %v8566_v59  ;;  %v610_v57 = vpop.f32.mrb[9].mxu1  ;;  %v10755_v53 = vpop.permute.xlu1 %2655  ;;  %v8568_v16 = vcombine.low %v10742_v43, %v10747_v62  ;;  %v10764_v13 = vld [vmem:[%s16360_s2 + $0x108] sm:$0xff]  ;;  %3139 = vperm.xlu0 %9510, %v10249_v18  }
 0x138   : > { %v10749_v37 = vpop.f32.mrb[10].mxu1  ;;  %16552 = vst [vmem:[#allocation65_spill] sm:$0xff] %v10755_v53  ;;  %v10801_v25 = vpop.permute.xlu0 %2647 }
 0x139   : > { %v613_v23 = vpop.f32.mrb[11].mxu1  ;;  %16557 = vst [vmem:[#allocation70_spill] sm:$0xff] %v10801_v25 }
 0x13a   : > { %9169 = vmatpush3.bf16.msra.mxu0 %v8566_v59  ;;  %v709_v10 = vpack.c.bf16 %v613_v23, %v610_v57  ;;  %3131 = vperm.xlu1 %9509, %v10186_v1   ;;  %v8569_v57 = vcombine.low %v10764_v13, %v10769_v49  ;;  %v10789_v1 = vld [vmem:[%s16360_s2 + $0x168] sm:$0xff] }
 0x13b   : > { %9170 = vmatprep.subr.bf16.mxu0 %v8567_v56  ;;  %v10773_v23 = vpop.permute.xlu1 %2663  ;;  %3147 = vperm.xlu0 %9510, %v10262_v21  }
 0x13c   : > { %9182 = vmatprep.mubr.bf16.mxu0 %v709_v10  ;;  %16554 = vst [vmem:[#allocation67_spill] sm:$0xff] %v10773_v23  ;;  %v10784_v10 = vld [vmem:[%s16360_s2 + $0x148] sm:$0xff]  ;;  %v10821_v55 = vpop.permute.xlu0 %2659 }
 0x13d   : > { %v8570_v7 = vcombine.low %v10784_v10, %v10789_v1  ;;  %16559 = vst [vmem:[#allocation72_spill] sm:$0xff] %v10821_v55 }
 0x13e   : > { %9171 = vmatpush3.bf16.msra.mxu0 %v8567_v56  ;;  %v10775_v59 = vpop.f32.mrb[12].mxu1  ;;  %3135 = vperm.xlu1 %9509, %v10193_v3   ;;  %v10806_v3 = vld [vmem:[%s16360_s2 + $0x188] sm:$0xff] }
 0x13f   : > { %9172 = vmatprep.subr.bf16.mxu0 %v8568_v16  ;;  %v626_v53 = vpop.f32.mrb[13].mxu1  ;;  %v10796_v47 = vpop.permute.xlu1 %2671  ;;  %3155 = vperm.xlu0 %9510, %v10276_v24   ;;  %v11077_v24 = vld [vmem:[%s16363_s5] sm:$0xff] }
 0x140   : > { %v10791_v56 = vpop.f32.mrb[14].mxu1  ;;  %16556 = vst [vmem:[#allocation69_spill] sm:$0xff] %v10796_v47  ;;  %v10828_v47 = vld [vmem:[%s16360_s2 + $0x1c8] sm:$0xff]  ;;  %v10849_v0 = vpop.permute.xlu0 %2667 }
 0x141   : > { %v629_v42 = vpop.f32.mrb[15].mxu1  ;;  %16561 = vst [vmem:[#allocation74_spill] sm:$0xff] %v10849_v0 }
 0x142   : > { %9173 = vmatpush3.bf16.msra.mxu0 %v8568_v16  ;;  %v711_v4 = vpack.c.bf16 %v629_v42, %v626_v53  ;;  %v10811_v16 = vld [vmem:[%s16360_s2 + $0x1a8] sm:$0xff]  ;;  %3143 = vperm.xlu1 %9509, %v10201_v6  }
 0x143   : > { %9174 = vmatprep.subr.bf16.mxu0 %v8569_v57  ;;  %v10814_v15 = vpop.permute.xlu1 %2679  ;;  %v8571_v53 = vcombine.low %v10806_v3, %v10811_v16  ;;  %v10833_v6 = vld [vmem:[%s16360_s2 + $0x1e8] sm:$0xff]  ;;  %3163 = vperm.xlu0 %9510, %v10291_v27  }
 0x144   : > { %16558 = vst [vmem:[#allocation71_spill] sm:$0xff] %v10814_v15  ;;  %v8572_v35 = vcombine.low %v10828_v47, %v10833_v6  ;;  %v10857_v21 = vpop.permute.xlu0 %2675 }
 0x145   : > { %16563 = vst [vmem:[#allocation76_spill] sm:$0xff] %v10857_v21 }
 0x146   : > { %9175 = vmatpush3.bf16.msra.mxu0 %v8569_v57  ;;  %v10817_v42 = vpop.f32.mrb[16].mxu1  ;;  %3151 = vperm.xlu1 %9509, %v10208_v8  }
 0x147   : > { %9176 = vmatprep.subr.bf16.mxu0 %v8570_v7  ;;  %v10823_v23 = vpop.f32.mrb[17].mxu1  ;;  %v10842_v25 = vpop.permute.xlu1 %2687  ;;  %3171 = vperm.xlu0 %9510, %v10307_v30   ;;  %v8580_v30 = vcombine.high %v10742_v43, %v10747_v62  ;;  %v10945_v62 = vld [vmem:[%s16360_s2 + $0x10] sm:$0xff] }
 0x148   : > { %v10835_v18 = vpop.f32.mrb[18].mxu1  ;;  %16560 = vst [vmem:[#allocation73_spill] sm:$0xff] %v10842_v25  ;;  %v10876_v21 = vpop.permute.xlu0 %2683  ;;  %v8579_v25 = vcombine.high %v10722_v32, %v10727_v52  ;;  %v11067_v32 = vld [vmem:[%s16360_s2 + $0x150] sm:$0xff] }
 0x149   : > { %v10840_v15 = vpop.f32.mrb[19].mxu1  ;;  %16565 = vst [vmem:[#allocation78_spill] sm:$0xff] %v10876_v21 }
 0x14a   : > { %9177 = vmatpush3.bf16.msra.mxu0 %v8570_v7  ;;  %3159 = vperm.xlu1 %9509, %v10218_v11  }
 0x14b   : > { %9178 = vmatprep.subr.bf16.mxu0 %v8571_v53  ;;  %v10852_v8 = vpop.permute.xlu1 %2695  ;;  %3179 = vperm.xlu0 %9510, %v10321_v33  }
 0x14c   : > { %16562 = vst [vmem:[#allocation75_spill] sm:$0xff] %v10852_v8  ;;  %v8578_v8 = vcombine.high %v10704_v60, %v10709_v61  ;;  %v10890_v60 = vpop.permute.xlu0 %2691 }
 0x14d   : > { %16568 = vst [vmem:[#allocation80_spill] sm:$0xff] %v10890_v60  ;;  %v11122_v60 = vld [vmem:[%s16361_s3 + $0x18] sm:$0xff]  }
 0x14e   : > { %9179 = vmatpush3.bf16.msra.mxu0 %v8571_v53  ;;  %v10855_v7 = vpop.f32.mrb[20].mxu1  ;;  %3167 = vperm.xlu1 %9509, %v10230_v14   ;;  %v16566_v14 = vpack.c.bf16 %v10749_v37, %v10733_v48  ;;  %v8581_v48 = vcombine.high %v10764_v13, %v10769_v49  ;;  %16596 = vst [vmem:[#allocation106_spill] sm:$0xff] %v11122_v60 }
 0x14f   : > { %9180 = vmatprep.subr.bf16.mxu0 %v8572_v35  ;;  %v10859_v57 = vpop.f32.mrb[21].mxu1  ;;  %v10868_v53 = vpop.permute.xlu1 %2703  ;;  %3187 = vperm.xlu0 %9510, %v10336_v36  }
 0x150   : > { %v10861_v55 = vpop.f32.mrb[22].mxu1  ;;  %16564 = vst [vmem:[#allocation77_spill] sm:$0xff] %v10868_v53  ;;  %v10908_v52 = vpop.permute.xlu0 %2699 }
 0x151   : > { %v10866_v11 = vpop.f32.mrb[23].mxu1  ;;  %16570 = vst [vmem:[#allocation82_spill] sm:$0xff] %v10908_v52  ;;  %v11103_v52 = vld [vmem:[%s16360_s2 + $0x190] sm:$0xff] }
 0x152   : > { %9181 = vmatpush3.bf16.msra.mxu0 %v8572_v35  ;;  %3175 = vperm.xlu1 %9509, %v10243_v17  }
 0x153   : > { %9206 = vmatprep.subr.bf16.mxu0 %v10561_v29  ;;  %v10883_v35 = vpop.permute.xlu1 %2711  ;;  %3195 = vperm.xlu0 %9510, %v10352_v39  }
 0x154   : > { %16567 = vst [vmem:[#allocation79_spill] sm:$0xff] %v10883_v35  ;;  %v11162_v35 = vld [vmem:[%s16363_s5 + $0x30] sm:$0xff] }
 0x155   : > { %9183 = vmatmul.mubr.bf16.vlgmr.msra.gmra.mrb[4].mxu0 %v16566_v14  ;;  %16601 = vst [vmem:[#allocation111_spill] sm:$0xff] %v11162_v35 }
 0x156   : > { %9207 = vmatpush3.bf16.msra.mxu0 %v10561_v29  ;;  %9222 = vmatprep.mubr.bf16.mxu0 %v711_v4  ;;  %v10885_v27 = vpop.f32.mrb[24].mxu1 }
 0x157   : > { %9208 = vmatprep.subr.bf16.mxu0 %v8578_v8  ;;  %v10892_v61 = vpop.f32.mrb[25].mxu1  ;;  %3183 = vperm.xlu1 %9509, %v10256_v20   ;;  %v10901_v29 = vpop.permute.xlu1 %2719 }
 0x158   : > { %v10894_v37 = vpop.f32.mrb[26].mxu1  ;;  %16569 = vst [vmem:[#allocation81_spill] sm:$0xff] %v10901_v29  ;;  %3203 = vperm.xlu0 %9510, %v10364_v41   ;;  %v11157_v29 = vld [vmem:[%s16361_s3 + $0x20] sm:$0xff]  }
 0x159   : > { %v10899_v4 = vpop.f32.mrb[27].mxu1  ;;  %16600 = vst [vmem:[#allocation110_spill] sm:$0xff] %v11157_v29 }
 0x15a   : > { %9209 = vmatpush3.bf16.msra.mxu0 %v8578_v8  ;;  %v10916_v8 = vpop.permute.xlu0 %2707 }
 0x15b   : > { %9210 = vmatprep.subr.bf16.mxu0 %v8579_v25  ;;  %3191 = vperm.xlu1 %9509, %v10267_v22   ;;  %v10911_v20 = vpop.permute.xlu1 %2727  ;;  %16572 = vst [vmem:[#allocation84_spill] sm:$0xff] %v10916_v8  ;;  %v8582_v22 = vcombine.high %v10784_v10, %v10789_v1  ;;  %v10967_v1 = vld [vmem:[%s16360_s2 + $0x50] sm:$0xff]  ;;  %v11187_v8 = vld [vmem:[%s16363_s5 + $0x40] sm:$0xff] }
 0x15c   : > { %16571 = vst [vmem:[#allocation83_spill] sm:$0xff] %v10911_v20  ;;  %3211 = vperm.xlu0 %9510, %v10382_v45   ;;  %v11148_v20 = vld [vmem:[%s16363_s5 + $0x28] sm:$0xff] }
 0x15e   : > { %9211 = vmatpush3.bf16.msra.mxu0 %v8579_v25  ;;  %v10924_v33 = vpop.permute.xlu0 %2715 }
 0x15f   : > { %9212 = vmatprep.subr.bf16.mxu0 %v8580_v30  ;;  %3199 = vperm.xlu1 %9509, %v10285_v26   ;;  %v10919_v43 = vpop.permute.xlu1 %2735  ;;  %16574 = vst [vmem:[#allocation86_spill] sm:$0xff] %v10924_v33  ;;  %v8583_v26 = vcombine.high %v10806_v3, %v10811_v16  ;;  %v11182_v33 = vld [vmem:[%s16361_s3 + $0x28] sm:$0xff]  }
 0x160   : > { %16573 = vst [vmem:[#allocation85_spill] sm:$0xff] %v10919_v43  ;;  %3219 = vperm.xlu0 %9510, %v10389_v46   ;;  %16604 = vst [vmem:[#allocation114_spill] sm:$0xff] %v11182_v33 }
 0x162   : > { %9213 = vmatpush3.bf16.msra.mxu0 %v8580_v30  ;;  %v10932_v36 = vpop.permute.xlu0 %2723 }
 0x163   : > { %9214 = vmatprep.subr.bf16.mxu0 %v8581_v48  ;;  %3207 = vperm.xlu1 %9509, %v10297_v28   ;;  %v10927_v25 = vpop.permute.xlu1 %2743  ;;  %16576 = vst [vmem:[#allocation88_spill] sm:$0xff] %v10932_v36  ;;  %v8584_v28 = vcombine.high %v10828_v47, %v10833_v6  ;;  %v10955_v47 = vpop.f32.mrb[28].mxu1  ;;  %v11173_v36 = vld [vmem:[%s16363_s5 + $0x38] sm:$0xff] }
 0x164   : > { %16575 = vst [vmem:[#allocation87_spill] sm:$0xff] %v10927_v25  ;;  %v10962_v10 = vpop.f32.mrb[29].mxu1  ;;  %3227 = vperm.xlu0 %9510, %v10402_v50   ;;  %v16584_v50 = vpack.c.bf16 %v10840_v15, %v10823_v23  ;;  %v11027_v23 = vld [vmem:[%s16361_s3] sm:$0xff]  }
 0x165   : > { %v10974_v3 = vpop.f32.mrb[30].mxu1  ;;  %16587 = vst [vmem:[#allocation97_spill] sm:$0xff] %v11027_v23  ;;  %9106 = vmatprep.subr.bf16.mxu1 %v11027_v23 }
 0x166   : > { %9215 = vmatpush3.bf16.msra.mxu0 %v8581_v48  ;;  %v10940_v39 = vpop.permute.xlu0 %2731  ;;  %v10979_v16 = vpop.f32.mrb[31].mxu1  ;;  %9107 = vmatpush3.bf16.msra.mxu1 %v11027_v23 }
 0x167   : > { %9216 = vmatprep.subr.bf16.mxu0 %v8582_v22  ;;  %3215 = vperm.xlu1 %9509, %v10312_v31   ;;  %v10935_v49 = vpop.permute.xlu1 %2751  ;;  %16578 = vst [vmem:[#allocation90_spill] sm:$0xff] %v10940_v39  ;;  %v10950_v31 = vld [vmem:[%s16360_s2 + $0x30] sm:$0xff] }
 0x168   : > { %16577 = vst [vmem:[#allocation89_spill] sm:$0xff] %v10935_v49  ;;  %v8589_v45 = vcombine.low %v10945_v62, %v10950_v31  ;;  %3235 = vperm.xlu0 %9510, %v10409_v51  }
 0x16a   : > { %9217 = vmatpush3.bf16.msra.mxu0 %v8582_v22  ;;  %v10960_v13 = vpop.permute.xlu0 %2739  ;;  %v10998_v22 = vld [vmem:[%s16360_s2 + $0xb0] sm:$0xff] }
 0x16b   : > { %9218 = vmatprep.subr.bf16.mxu0 %v8583_v26  ;;  %3223 = vperm.xlu1 %9509, %v10327_v34   ;;  %v10953_v41 = vpop.permute.xlu1 %2759  ;;  %16580 = vst [vmem:[#allocation92_spill] sm:$0xff] %v10960_v13  ;;  %v10972_v34 = vld [vmem:[%s16360_s2 + $0x70] sm:$0xff] }
 0x16c   : > { %16579 = vst [vmem:[#allocation91_spill] sm:$0xff] %v10953_v41  ;;  %v8590_v30 = vcombine.low %v10967_v1, %v10972_v34  ;;  %3243 = vperm.xlu0 %9510, %v10422_v54   ;;  %v11052_v54 = vld [vmem:[%s16361_s3 + $0x8] sm:$0xff]  }
 0x16d   : > { %16590 = vst [vmem:[#allocation100_spill] sm:$0xff] %v11052_v54  ;;  %9108 = vmatprep.subr.bf16.mxu1 %v11052_v54 }
 0x16e   : > { %9219 = vmatpush3.bf16.msra.mxu0 %v8583_v26  ;;  %v10988_v48 = vpop.permute.xlu0 %2747  ;;  %v16583_v26 = vpack.c.bf16 %v10791_v56, %v10775_v59  ;;  %v11017_v59 = vld [vmem:[%s16360_s2 + $0xd0] sm:$0xff]  ;;  %9109 = vmatpush3.bf16.msra.mxu1 %v11052_v54 }
 0x16f   : > { %9220 = vmatprep.subr.bf16.mxu0 %v8584_v28  ;;  %3231 = vperm.xlu1 %9509, %v10346_v38   ;;  %v10981_v6 = vpop.permute.xlu1 %2767  ;;  %16582 = vst [vmem:[#allocation94_spill] sm:$0xff] %v10988_v48  ;;  %v10993_v38 = vld [vmem:[%s16360_s2 + $0x90] sm:$0xff] }
 0x170   : > { %16581 = vst [vmem:[#allocation93_spill] sm:$0xff] %v10981_v6  ;;  %v8591_v46 = vcombine.low %v10993_v38, %v10998_v22  ;;  %v11092_v6 = vld [vmem:[%s16363_s5 + $0x10] sm:$0xff] }
 0x171   : > { %v11138_v48 = vld [vmem:[%s16360_s2 + $0x1d0] sm:$0xff] }
 0x172   : > { %9221 = vmatpush3.bf16.msra.mxu0 %v8584_v28  ;;  %v11012_v14 = vpop.permute.xlu0 %2755 }
 0x173   : > { %9246 = vmatprep.subr.bf16.mxu0 %v8589_v45  ;;  %3239 = vperm.xlu1 %9509, %v10358_v40   ;;  %16586 = vst [vmem:[#allocation96_spill] sm:$0xff] %v11012_v14  ;;  %v11022_v40 = vld [vmem:[%s16360_s2 + $0xf0] sm:$0xff]  ;;  %v11127_v14 = vld [vmem:[%s16363_s5 + $0x20] sm:$0xff] }
 0x174   : > { %v11007_v28 = vpop.permute.xlu1 %2807  ;;  %v8592_v56 = vcombine.low %v11017_v59, %v11022_v40  ;;  %16597 = vst [vmem:[#allocation107_spill] sm:$0xff] %v11127_v14 }
 0x175   : > { %9223 = vmatmul.mubr.bf16.vlgmr.msra.gmra.mrb[8].mxu0 %v16583_v26  ;;  %16585 = vst [vmem:[#allocation95_spill] sm:$0xff] %v11007_v28  ;;  %v11057_v26 = vld [vmem:[%s16363_s5 + $0x8] sm:$0xff] }
 0x176   : > { %9247 = vmatpush3.bf16.msra.mxu0 %v8589_v45  ;;  %9262 = vmatprep.mubr.bf16.mxu0 %v16584_v50  ;;  %v11036_v15 = vpop.permute.xlu0 %2763  ;;  %v11041_v45 = vld [vmem:[%s16360_s2 + $0x110] sm:$0xff] }
 0x177   : > { %9248 = vmatprep.subr.bf16.mxu0 %v8590_v30  ;;  %3247 = vperm.xlu1 %9509, %v10376_v44   ;;  %16589 = vst [vmem:[#allocation99_spill] sm:$0xff] %v11036_v15  ;;  %v11046_v44 = vld [vmem:[%s16360_s2 + $0x130] sm:$0xff]  ;;  %v11113_v15 = vld [vmem:[%s16363_s5 + $0x18] sm:$0xff] }
 0x178   : > { %v11031_v51 = vpop.permute.xlu1 %2811  ;;  %v8593_v17 = vcombine.low %v11041_v45, %v11046_v44 }
 0x179   : > { %16588 = vst [vmem:[#allocation98_spill] sm:$0xff] %v11031_v51  ;;  %v11423_v51 = vld [vmem:[%s16363_s5 + $0xe0] sm:$0xff] }
 0x17a   : > { %9249 = vmatpush3.bf16.msra.mxu0 %v8590_v30  ;;  %v10061_v30 = vmov 4   ;;  %v11080_v53 = vpop.permute.xlu0 %2803 }
 0x17b   : > { %9250 = vmatprep.subr.bf16.mxu0 %v8591_v46  ;;  %9512 = vset.pattern.permute.xlu1 %v10061_v30  ;;  %16592 = vst [vmem:[#allocation102_spill] sm:$0xff] %v11080_v53  ;;  %v16629_v53 = vpack.c.bf16 %v10861_v55, %v10855_v7  ;;  %v11436_v55 = vld [vmem:[%s16360_s2 + $0xd8] sm:$0xff] }
 0x17c   : > { %3447 = vperm.xlu1 %9512, %v11057_v26   ;;  %v11060_v50 = vpop.permute.xlu1 %2819  ;;  %9511 = vset.pattern.permute.xlu0 %v10061_v30  ;;  %v11087_v30 = vld [vmem:[%s16361_s3 + $0x10] sm:$0xff]   ;;  %v11441_v7 = vld [vmem:[%s16360_s2 + $0xf8] sm:$0xff] }
 0x17d   : > { %16591 = vst [vmem:[#allocation101_spill] sm:$0xff] %v11060_v50  ;;  %3443 = vperm.xlu0 %9511, %v11077_v24   ;;  %16593 = vst [vmem:[#allocation103_spill] sm:$0xff] %v11087_v30  ;;  %9110 = vmatprep.subr.bf16.mxu1 %v11087_v30  ;;  %v16610_v50 = vpack.c.bf16 %v10835_v18, %v10817_v42  ;;  %v8603_v42 = vcombine.high %v10993_v38, %v10998_v22  ;;  %v11263_v38 = vld [vmem:[%s16363_s5 + $0x70] sm:$0xff]  ;;  %v11274_v22 = vld [vmem:[%s16363_s5 + $0x78] sm:$0xff] }
 0x17e   : > { %9251 = vmatpush3.bf16.msra.mxu0 %v8591_v46  ;;  %v11072_v46 = vld [vmem:[%s16360_s2 + $0x170] sm:$0xff]  ;;  %v11116_v25 = vpop.permute.xlu0 %2815  ;;  %9111 = vmatpush3.bf16.msra.mxu1 %v11087_v30  ;;  %v16613_v18 = vpack.c.bf16 %v10866_v11, %v10859_v57  ;;  %v8604_v11 = vcombine.high %v11017_v59, %v11022_v40  ;;  %v8605_v40 = vcombine.high %v11041_v45, %v11046_v44  ;;  %v11310_v44 = vld [vmem:[%s16363_s5 + $0x98] sm:$0xff] }
 0x17f   : > { %9252 = vmatprep.subr.bf16.mxu0 %v8592_v56  ;;  %v8594_v49 = vcombine.low %v11067_v32, %v11072_v46  ;;  %16595 = vst [vmem:[#allocation105_spill] sm:$0xff] %v11116_v25  ;;  %9112 = vmatprep.subr.bf16.mxu1 %v11122_v60  ;;  %v8606_v45 = vcombine.high %v11067_v32, %v11072_v46  ;;  %v11328_v46 = vld [vmem:[%s16363_s5 + $0xa8] sm:$0xff]  ;;  %v11402_v25 = vld [vmem:[%s16360_s2 + $0x98] sm:$0xff] }
 0x180   : > { %3451 = vperm.xlu1 %9512, %v11092_v6   ;;  %v11095_v41 = vpop.permute.xlu1 %2827  ;;  %v11487_v30 = vld [vmem:[%s16360_s2 + $0x158] sm:$0xff] }
 0x181   : > { %16594 = vst [vmem:[#allocation104_spill] sm:$0xff] %v11095_v41  ;;  %3455 = vperm.xlu0 %9511, %v11113_v15  }
 0x182   : > { %9253 = vmatpush3.bf16.msra.mxu0 %v8592_v56  ;;  %v11108_v56 = vld [vmem:[%s16360_s2 + $0x1b0] sm:$0xff]  ;;  %v11151_v13 = vpop.permute.xlu0 %2823  ;;  %9113 = vmatpush3.bf16.msra.mxu1 %v11122_v60 }
 0x183   : > { %9254 = vmatprep.subr.bf16.mxu0 %v8593_v17  ;;  %v8595_v21 = vcombine.low %v11103_v52, %v11108_v56  ;;  %16599 = vst [vmem:[#allocation109_spill] sm:$0xff] %v11151_v13  ;;  %9114 = vmatprep.subr.bf16.mxu1 %v11157_v29  ;;  %v11198_v13 = vld [vmem:[%s16363_s5 + $0x48] sm:$0xff]  ;;  %v8607_v32 = vcombine.high %v11103_v52, %v11108_v56  ;;  %v11346_v56 = vld [vmem:[%s16360_s2 + $0x18] sm:$0xff] }
 0x184   : > { %3459 = vperm.xlu1 %9512, %v11127_v14   ;;  %v11130_v43 = vpop.permute.xlu1 %2835 }
 0x185   : > { %16598 = vst [vmem:[#allocation108_spill] sm:$0xff] %v11130_v43  ;;  %3463 = vperm.xlu0 %9511, %v11148_v20  }
 0x186   : > { %9255 = vmatpush3.bf16.msra.mxu0 %v8593_v17  ;;  %v11143_v17 = vld [vmem:[%s16360_s2 + $0x1f0] sm:$0xff]  ;;  %9115 = vmatpush3.bf16.msra.mxu1 %v11157_v29 }
 0x187   : > { %9256 = vmatprep.subr.bf16.mxu0 %v8594_v49  ;;  %v8596_v39 = vcombine.low %v11138_v48, %v11143_v17  ;;  %9116 = vmatprep.subr.bf16.mxu1 %v11182_v33  ;;  %v8608_v52 = vcombine.high %v11138_v48, %v11143_v17  ;;  %v11364_v48 = vld [vmem:[%s16363_s5 + $0xc0] sm:$0xff] }
 0x188   : > { %3467 = vperm.xlu1 %9512, %v11162_v35   ;;  %v11165_v0 = vpop.permute.xlu1 %2843 }
 0x189   : > { %16602 = vst [vmem:[#allocation112_spill] sm:$0xff] %v11165_v0  ;;  %3471 = vperm.xlu0 %9511, %v11173_v36   ;;  %v8601_v0 = vcombine.high %v10945_v62, %v10950_v31  ;;  %v11212_v62 = vld [vmem:[%s16363_s5 + $0x50] sm:$0xff] }
 0x18a   : > { %9257 = vmatpush3.bf16.msra.mxu0 %v8594_v49  ;;  %v11176_v49 = vpop.permute.xlu0 %2831  ;;  %9117 = vmatpush3.bf16.msra.mxu1 %v11182_v33 }
 0x18b   : > { %9258 = vmatprep.subr.bf16.mxu0 %v8595_v21  ;;  %16603 = vst [vmem:[#allocation113_spill] sm:$0xff] %v11176_v49  ;;  %v11223_v49 = vld [vmem:[%s16363_s5 + $0x58] sm:$0xff] }
 0x18c   : > { %3475 = vperm.xlu1 %9512, %v11187_v8   ;;  %v11190_v43 = vpop.permute.xlu1 %2851 }
 0x18d   : > { %16605 = vst [vmem:[#allocation115_spill] sm:$0xff] %v11190_v43  ;;  %3479 = vperm.xlu0 %9511, %v11198_v13   ;;  %v11207_v43 = vld [vmem:[%s16361_s3 + $0x30] sm:$0xff]  }
 0x18e   : > { %9259 = vmatpush3.bf16.msra.mxu0 %v8595_v21  ;;  %v11201_v21 = vpop.permute.xlu0 %2839  ;;  %16607 = vst [vmem:[#allocation117_spill] sm:$0xff] %v11207_v43  ;;  %9118 = vmatprep.subr.bf16.mxu1 %v11207_v43 }
 0x18f   : > { %9260 = vmatprep.subr.bf16.mxu0 %v8596_v39  ;;  %16606 = vst [vmem:[#allocation116_spill] sm:$0xff] %v11201_v21  ;;  %v8602_v21 = vcombine.high %v10967_v1, %v10972_v34  ;;  %9119 = vmatpush3.bf16.msra.mxu1 %v11207_v43  ;;  %v11235_v1 = vld [vmem:[%s16361_s3 + $0x38] sm:$0xff]   ;;  %v11240_v34 = vld [vmem:[%s16363_s5 + $0x60] sm:$0xff]  ;;  %v16630_v43 = vpack.c.bf16 %v10899_v4, %v10892_v61  ;;  %v11454_v4 = vld [vmem:[%s16363_s5 + $0xf0] sm:$0xff] }
 0x190   : > { %3483 = vperm.xlu1 %9512, %v11212_v62   ;;  %v11215_v31 = vpop.permute.xlu1 %2859  ;;  %16611 = vst [vmem:[#allocation120_spill] sm:$0xff] %v11235_v1  ;;  %9120 = vmatprep.subr.bf16.mxu1 %v11235_v1 }
 0x191   : > { %16608 = vst [vmem:[#allocation118_spill] sm:$0xff] %v11215_v31  ;;  %3487 = vperm.xlu0 %9511, %v11223_v49  }
 0x192   : > { %9261 = vmatpush3.bf16.msra.mxu0 %v8596_v39  ;;  %v11226_v39 = vpop.permute.xlu0 %2847 }
 0x193   : > { %9286 = vmatprep.subr.bf16.mxu0 %v8601_v0  ;;  %16609 = vst [vmem:[#allocation119_spill] sm:$0xff] %v11226_v39  ;;  %9121 = vmatpush3.bf16.msra.mxu1 %v11235_v1  ;;  %v11392_v39 = vld [vmem:[%s16363_s5 + $0xd0] sm:$0xff] }
 0x194   : > { %3491 = vperm.xlu1 %9512, %v11240_v34   ;;  %v11243_v31 = vpop.permute.xlu1 %2867  ;;  %9146 = vmatprep.subr.bf16.mxu1 %v11027_v23  ;;  %v11505_v23 = vld [vmem:[%s16360_s2 + $0x198] sm:$0xff] }
 0x195   : > { %9263 = vmatmul.mubr.bf16.vlgmr.msra.gmra.mrb[12].mxu0 %v16610_v50  ;;  %16612 = vst [vmem:[#allocation121_spill] sm:$0xff] %v11243_v31  ;;  %v11292_v31 = vld [vmem:[%s16363_s5 + $0x88] sm:$0xff] }
 0x196   : > { %9287 = vmatpush3.bf16.msra.mxu0 %v8601_v0  ;;  %9302 = vmatprep.mubr.bf16.mxu0 %v16613_v18  ;;  %v11253_v0 = vld [vmem:[%s16363_s5 + $0x68] sm:$0xff]  ;;  %v11256_v50 = vpop.permute.xlu0 %2855  ;;  %v11282_v18 = vld [vmem:[%s16363_s5 + $0x80] sm:$0xff] }
 0x197   : > { %9288 = vmatprep.subr.bf16.mxu0 %v8602_v21  ;;  %3495 = vperm.xlu0 %9511, %v11253_v0   ;;  %16614 = vst [vmem:[#allocation122_spill] sm:$0xff] %v11256_v50 }
 0x198   : > { %3499 = vperm.xlu1 %9512, %v11263_v38   ;;  %v11266_v57 = vpop.permute.xlu1 %2875 }
 0x199   : > { %16615 = vst [vmem:[#allocation123_spill] sm:$0xff] %v11266_v57  ;;  %v11300_v57 = vld [vmem:[%s16363_s5 + $0x90] sm:$0xff] }
 0x19a   : > { %9289 = vmatpush3.bf16.msra.mxu0 %v8602_v21  ;;  %v11277_v21 = vpop.permute.xlu0 %2863 }
 0x19b   : > { %9290 = vmatprep.subr.bf16.mxu0 %v8603_v42  ;;  %3503 = vperm.xlu0 %9511, %v11274_v22   ;;  %16616 = vst [vmem:[#allocation124_spill] sm:$0xff] %v11277_v21  ;;  %v11374_v21 = vld [vmem:[%s16360_s2 + $0x58] sm:$0xff] }
 0x19c   : > { %3507 = vperm.xlu1 %9512, %v11282_v18   ;;  %v11285_v59 = vpop.permute.xlu1 %2883 }
 0x19d   : > { %16617 = vst [vmem:[#allocation125_spill] sm:$0xff] %v11285_v59 }
 0x19e   : > { %9291 = vmatpush3.bf16.msra.mxu0 %v8603_v42  ;;  %v11295_v42 = vpop.permute.xlu0 %2871 }
 0x19f   : > { %9292 = vmatprep.subr.bf16.mxu0 %v8604_v11  ;;  %3511 = vperm.xlu0 %9511, %v11292_v31   ;;  %16618 = vst [vmem:[#allocation126_spill] sm:$0xff] %v11295_v42  ;;  %v11318_v42 = vld [vmem:[%s16363_s5 + $0xa0] sm:$0xff] }
 0x1a0   : > { %3515 = vperm.xlu1 %9512, %v11300_v57   ;;  %v11303_v59 = vpop.permute.xlu1 %2891 }
 0x1a1   : > { %16619 = vst [vmem:[#allocation127_spill] sm:$0xff] %v11303_v59 }
 0x1a2   : > { %9293 = vmatpush3.bf16.msra.mxu0 %v8604_v11  ;;  %v11313_v11 = vpop.permute.xlu0 %2879 }
 0x1a3   : > { %9294 = vmatprep.subr.bf16.mxu0 %v8605_v40  ;;  %3519 = vperm.xlu0 %9511, %v11310_v44   ;;  %16620 = vst [vmem:[#allocation128_spill] sm:$0xff] %v11313_v11  ;;  %v11336_v11 = vld [vmem:[%s16363_s5 + $0xb0] sm:$0xff] }
 0x1a4   : > { %3523 = vperm.xlu1 %9512, %v11318_v42   ;;  %v11321_v59 = vpop.permute.xlu1 %2899 }
 0x1a5   : > { %16621 = vst [vmem:[#allocation129_spill] sm:$0xff] %v11321_v59 }
 0x1a6   : > { %9295 = vmatpush3.bf16.msra.mxu0 %v8605_v40  ;;  %v11331_v40 = vpop.permute.xlu0 %2887 }
 0x1a7   : > { %9296 = vmatprep.subr.bf16.mxu0 %v8606_v45  ;;  %3527 = vperm.xlu0 %9511, %v11328_v46   ;;  %16622 = vst [vmem:[#allocation130_spill] sm:$0xff] %v11331_v40  ;;  %v11356_v40 = vld [vmem:[%s16363_s5 + $0xb8] sm:$0xff] }
 0x1a8   : > { %3531 = vperm.xlu1 %9512, %v11336_v11   ;;  %v11339_v59 = vpop.permute.xlu1 %2907 }
 0x1a9   : > { %16623 = vst [vmem:[#allocation131_spill] sm:$0xff] %v11339_v59 }
 0x1aa   : > { %9297 = vmatpush3.bf16.msra.mxu0 %v8606_v45  ;;  %v11351_v45 = vld [vmem:[%s16360_s2 + $0x38] sm:$0xff]  ;;  %v11359_v59 = vpop.permute.xlu0 %2895 }
 0x1ab   : > { %9298 = vmatprep.subr.bf16.mxu0 %v8607_v32  ;;  %3535 = vperm.xlu0 %9511, %v11356_v40   ;;  %16624 = vst [vmem:[#allocation132_spill] sm:$0xff] %v11359_v59  ;;  %v8613_v50 = vcombine.low %v11346_v56, %v11351_v45  ;;  %v11384_v59 = vld [vmem:[%s16363_s5 + $0xc8] sm:$0xff] }
 0x1ac   : > { %3539 = vperm.xlu1 %9512, %v11364_v48   ;;  %v11367_v17 = vpop.permute.xlu1 %2915 }
 0x1ad   : > { %16625 = vst [vmem:[#allocation133_spill] sm:$0xff] %v11367_v17 }
 0x1ae   : > { %9299 = vmatpush3.bf16.msra.mxu0 %v8607_v32  ;;  %v11379_v32 = vld [vmem:[%s16360_s2 + $0x78] sm:$0xff]  ;;  %v11387_v17 = vpop.permute.xlu0 %2903 }
 0x1af   : > { %9300 = vmatprep.subr.bf16.mxu0 %v8608_v52  ;;  %3543 = vperm.xlu0 %9511, %v11384_v59   ;;  %16626 = vst [vmem:[#allocation134_spill] sm:$0xff] %v11387_v17  ;;  %v8614_v28 = vcombine.low %v11374_v21, %v11379_v32  ;;  %v11412_v17 = vld [vmem:[%s16363_s5 + $0xd8] sm:$0xff] }
 0x1b0   : > { %3547 = vperm.xlu1 %9512, %v11392_v39   ;;  %v11395_v41 = vpop.permute.xlu1 %2923 }
 0x1b1   : > { %16627 = vst [vmem:[#allocation135_spill] sm:$0xff] %v11395_v41 }
 0x1b2   : > { %9301 = vmatpush3.bf16.msra.mxu0 %v8608_v52  ;;  %v11407_v52 = vld [vmem:[%s16360_s2 + $0xb8] sm:$0xff]  ;;  %v11415_v41 = vpop.permute.xlu0 %2911 }
 0x1b3   : > { %9326 = vmatprep.subr.bf16.mxu0 %v8613_v50  ;;  %3551 = vperm.xlu0 %9511, %v11412_v17   ;;  %16628 = vst [vmem:[#allocation136_spill] sm:$0xff] %v11415_v41  ;;  %v8615_v1 = vcombine.low %v11402_v25, %v11407_v52 }
 0x1b4   : > { %3555 = vperm.xlu1 %9512, %v11423_v51  }
 0x1b5   : > { %9303 = vmatmul.mubr.bf16.vlgmr.msra.gmra.mrb[16].mxu0 %v16629_v53  ;;  %v11431_v41 = vpop.permute.xlu1 %3123  ;;  %v11446_v53 = vld [vmem:[%s16363_s5 + $0xe8] sm:$0xff] }
 0x1b6   : > { %9327 = vmatpush3.bf16.msra.mxu0 %v8613_v50  ;;  %9342 = vmatprep.mubr.bf16.mxu0 %v16630_v43  ;;  %16631 = vst [vmem:[#allocation137_spill] sm:$0xff] %v11431_v41  ;;  %v11449_v61 = vpop.permute.xlu0 %2919  ;;  %v8616_v43 = vcombine.low %v11436_v55, %v11441_v7  ;;  %v11464_v41 = vld [vmem:[%s16360_s2 + $0x118] sm:$0xff] }
 0x1b7   : > { %9328 = vmatprep.subr.bf16.mxu0 %v8614_v28  ;;  %3559 = vperm.xlu0 %9511, %v11446_v53   ;;  %16632 = vst [vmem:[#allocation138_spill] sm:$0xff] %v11449_v61  ;;  %v11474_v61 = vld [vmem:[%s16363_s5 + $0xf8] sm:$0xff] }
 0x1b8   : > { %3563 = vperm.xlu1 %9512, %v11454_v4  }
 0x1b9   : > { %v11459_v50 = vpop.permute.xlu1 %3131 }
 0x1ba   : > { %9329 = vmatpush3.bf16.msra.mxu0 %v8614_v28  ;;  %16633 = vst [vmem:[#allocation139_spill] sm:$0xff] %v11459_v50  ;;  %v11469_v28 = vld [vmem:[%s16360_s2 + $0x138] sm:$0xff]  ;;  %v11477_v33 = vpop.permute.xlu0 %2927  ;;  %v10062_v50 = vmov 5  }
 0x1bb   : > { %9330 = vmatprep.subr.bf16.mxu0 %v8615_v1  ;;  %3567 = vperm.xlu0 %9511, %v11474_v61   ;;  %16634 = vst [vmem:[#allocation140_spill] sm:$0xff] %v11477_v33  ;;  %v8617_v29 = vcombine.low %v11464_v41, %v11469_v28  ;;  %v11492_v33 = vld [vmem:[%s16360_s2 + $0x178] sm:$0xff] }
 0x1bc   : > { %9513 = vset.pattern.permute.xlu1 %v10062_v50 }
 0x1bd   : > { %3763 = vperm.xlu1 %9513, %v11077_v24   ;;  %v11482_v60 = vpop.permute.xlu1 %3135 }
 0x1be   : > { %9331 = vmatpush3.bf16.msra.mxu0 %v8615_v1  ;;  %16635 = vst [vmem:[#allocation141_spill] sm:$0xff] %v11482_v60  ;;  %v11495_v1 = vpop.permute.xlu0 %3127  ;;  %v8618_v60 = vcombine.low %v11487_v30, %v11492_v33 }
 0x1bf   : > { %9332 = vmatprep.subr.bf16.mxu0 %v8616_v43  ;;  %9514 = vset.pattern.permute.xlu0 %v10062_v50  ;;  %16636 = vst [vmem:[#allocation142_spill] sm:$0xff] %v11495_v1  ;;  %v11510_v50 = vld [vmem:[%s16360_s2 + $0x1b8] sm:$0xff] }
 0x1c0   : > { %3767 = vperm.xlu0 %9514, %v11057_v26  }
 0x1c1   : > { %3771 = vperm.xlu1 %9513, %v11092_v6   ;;  %v11500_v54 = vpop.permute.xlu1 %3143 }
 0x1c2   : > { %9333 = vmatpush3.bf16.msra.mxu0 %v8616_v43  ;;  %16637 = vst [vmem:[#allocation143_spill] sm:$0xff] %v11500_v54  ;;  %v11513_v43 = vpop.permute.xlu0 %3139  ;;  %v8619_v54 = vcombine.low %v11505_v23, %v11510_v50 }
 0x1c3   : > { %9334 = vmatprep.subr.bf16.mxu0 %v8617_v29  ;;  %16638 = vst [vmem:[#allocation144_spill] sm:$0xff] %v11513_v43 }
 0x1c4   : > { %3779 = vperm.xlu0 %9514, %v11127_v14   ;;  %v11528_v14 = vld [vmem:[%s16360_s2 + $0x1f8] sm:$0xff] }
 0x1c5   : > { %3775 = vperm.xlu1 %9513, %v11113_v15   ;;  %v11518_v1 = vpop.permute.xlu1 %3151 }
 0x1c6   : > { %9335 = vmatpush3.bf16.msra.mxu0 %v8617_v29  ;;  %16639 = vst [vmem:[#allocation145_spill] sm:$0xff] %v11518_v1  ;;  %v11531_v29 = vpop.permute.xlu0 %3147  ;;  %v8620_v1 = vcombine.low %v11523_v2, %v11528_v14 }
 0x1c7   : > { %9336 = vmatprep.subr.bf16.mxu0 %v8618_v60  ;;  %16640 = vst [vmem:[#allocation146_spill] sm:$0xff] %v11531_v29  ;;  %v8625_v29 = vcombine.high %v11346_v56, %v11351_v45  ;;  %v16647_v56 = vpack.c.bf16 %v10979_v16, %v10962_v10 }
 0x1c8   : > { %3787 = vperm.xlu0 %9514, %v11162_v35  }
 0x1c9   : > { %3783 = vperm.xlu1 %9513, %v11148_v20   ;;  %v11536_v43 = vpop.permute.xlu1 %3159 }
 0x1ca   : > { %9337 = vmatpush3.bf16.msra.mxu0 %v8618_v60  ;;  %16641 = vst [vmem:[#allocation147_spill] sm:$0xff] %v11536_v43  ;;  %v11539_v12 = vpop.permute.xlu0 %3155  ;;  %v8626_v43 = vcombine.high %v11374_v21, %v11379_v32  ;;  %v8627_v21 = vcombine.high %v11402_v25, %v11407_v52  ;;  %v8629_v25 = vcombine.high %v11464_v41, %v11469_v28 }
 0x1cb   : > { %9338 = vmatprep.subr.bf16.mxu0 %v8619_v54  ;;  %16642 = vst [vmem:[#allocation148_spill] sm:$0xff] %v11539_v12  ;;  %v16646_v12 = vpack.c.bf16 %v10894_v37, %v10885_v27  ;;  %v8628_v27 = vcombine.high %v11436_v55, %v11441_v7  ;;  %v8630_v55 = vcombine.high %v11487_v30, %v11492_v33 }
 0x1cc   : > { %3795 = vperm.xlu0 %9514, %v11187_v8   ;;  %v8631_v41 = vcombine.high %v11505_v23, %v11510_v50  ;;  %v8632_v33 = vcombine.high %v11523_v2, %v11528_v14  ;;  %v16664_v14 = vpack.c.bf16 %v10974_v3, %v10955_v47 }
 0x1cd   : > { %3791 = vperm.xlu1 %9513, %v11173_v36   ;;  %v11544_v60 = vpop.permute.xlu1 %3167 }
 0x1ce   : > { %9339 = vmatpush3.bf16.msra.mxu0 %v8619_v54  ;;  %16643 = vst [vmem:[#allocation149_spill] sm:$0xff] %v11544_v60  ;;  %v11547_v35 = vpop.permute.xlu0 %3163 }
 0x1cf   : > { %9340 = vmatprep.subr.bf16.mxu0 %v8620_v1  ;;  %16644 = vst [vmem:[#allocation150_spill] sm:$0xff] %v11547_v35 }
 0x1d0   : > { %3803 = vperm.xlu0 %9514, %v11212_v62  }
 0x1d1   : > { %3799 = vperm.xlu1 %9513, %v11198_v13   ;;  %v11552_v54 = vpop.permute.xlu1 %3175 }
 0x1d2   : > { %9341 = vmatpush3.bf16.msra.mxu0 %v8620_v1  ;;  %16645 = vst [vmem:[#allocation151_spill] sm:$0xff] %v11552_v54  ;;  %v11561_v45 = vpop.permute.xlu0 %3171 }
 0x1d3   : > { %9366 = vmatprep.subr.bf16.mxu0 %v8625_v29  ;;  %16648 = vst [vmem:[#allocation152_spill] sm:$0xff] %v11561_v45 }
 0x1d4   : > { %3811 = vperm.xlu0 %9514, %v11240_v34  }
 0x1d5   : > { %9343 = vmatmul.mubr.bf16.vlgmr.msra.gmra.mrb[20].mxu0 %v16646_v12  ;;  %3807 = vperm.xlu1 %9513, %v11223_v49  }
 0x1d6   : > { %9367 = vmatpush3.bf16.msra.mxu0 %v8625_v29  ;;  %9382 = vmatprep.mubr.bf16.mxu0 %v16647_v56  ;;  %v11566_v32 = vpop.permute.xlu1 %3183  ;;  %v11569_v12 = vpop.permute.xlu0 %3179 }
 0x1d7   : > { %9368 = vmatprep.subr.bf16.mxu0 %v8626_v43  ;;  %16649 = vst [vmem:[#allocation153_spill] sm:$0xff] %v11566_v32  ;;  %16650 = vst [vmem:[#allocation154_spill] sm:$0xff] %v11569_v12 }
 0x1d8   : > { %3819 = vperm.xlu0 %9514, %v11263_v38  }
 0x1d9   : > { %3815 = vperm.xlu1 %9513, %v11253_v0  }
 0x1da   : > { %9369 = vmatpush3.bf16.msra.mxu0 %v8626_v43  ;;  %v11574_v37 = vpop.permute.xlu1 %3191  ;;  %v11577_v10 = vpop.permute.xlu0 %3187 }
 0x1db   : > { %9370 = vmatprep.subr.bf16.mxu0 %v8627_v21  ;;  %16651 = vst [vmem:[#allocation155_spill] sm:$0xff] %v11574_v37  ;;  %16652 = vst [vmem:[#allocation156_spill] sm:$0xff] %v11577_v10  ;;  %v16671_v37 = vld [vmem:[#allocation107_spill] sm:$0xff] }
 0x1dc   : > { %3827 = vperm.xlu0 %9514, %v11282_v18  }
 0x1dd   : > { %3823 = vperm.xlu1 %9513, %v11274_v22  }
 0x1de   : > { %9371 = vmatpush3.bf16.msra.mxu0 %v8627_v21  ;;  %v11582_v16 = vpop.permute.xlu1 %3199  ;;  %v11585_v52 = vpop.permute.xlu0 %3195 }
 0x1df   : > { %9372 = vmatprep.subr.bf16.mxu0 %v8628_v27  ;;  %16653 = vst [vmem:[#allocation157_spill] sm:$0xff] %v11582_v16  ;;  %16654 = vst [vmem:[#allocation158_spill] sm:$0xff] %v11585_v52 }
 0x1e0   : > { %3835 = vperm.xlu0 %9514, %v11300_v57  }
 0x1e1   : > { %3831 = vperm.xlu1 %9513, %v11292_v31  }
 0x1e2   : > { %9373 = vmatpush3.bf16.msra.mxu0 %v8628_v27  ;;  %v11590_v7 = vpop.permute.xlu1 %3207  ;;  %v11593_v1 = vpop.permute.xlu0 %3203 }
 0x1e3   : > { %9374 = vmatprep.subr.bf16.mxu0 %v8629_v25  ;;  %16655 = vst [vmem:[#allocation159_spill] sm:$0xff] %v11590_v7  ;;  %16656 = vst [vmem:[#allocation160_spill] sm:$0xff] %v11593_v1 }
 0x1e4   : > { %3843 = vperm.xlu0 %9514, %v11318_v42  }
 0x1e5   : > { %3839 = vperm.xlu1 %9513, %v11310_v44  }
 0x1e6   : > { %9375 = vmatpush3.bf16.msra.mxu0 %v8629_v25  ;;  %v11598_v28 = vpop.permute.xlu1 %3215  ;;  %v11601_v43 = vpop.permute.xlu0 %3211 }
 0x1e7   : > { %9376 = vmatprep.subr.bf16.mxu0 %v8630_v55  ;;  %16657 = vst [vmem:[#allocation161_spill] sm:$0xff] %v11598_v28  ;;  %16658 = vst [vmem:[#allocation162_spill] sm:$0xff] %v11601_v43  ;;  %v16668_v28 = vld [vmem:[#allocation11_spill] sm:$0xff] }
 0x1e8   : > { %3851 = vperm.xlu0 %9514, %v11336_v11  }
 0x1e9   : > { %3847 = vperm.xlu1 %9513, %v11328_v46  }
 0x1ea   : > { %9377 = vmatpush3.bf16.msra.mxu0 %v8630_v55  ;;  %v11606_v30 = vpop.permute.xlu1 %3223  ;;  %v11609_v29 = vpop.permute.xlu0 %3219  ;;  %v10063_v55 = vmov 6  }
 0x1eb   : > { %9378 = vmatprep.subr.bf16.mxu0 %v8631_v41  ;;  %16659 = vst [vmem:[#allocation163_spill] sm:$0xff] %v11606_v30  ;;  %16660 = vst [vmem:[#allocation164_spill] sm:$0xff] %v11609_v29 }
 0x1ec   : > { %3859 = vperm.xlu0 %9514, %v11364_v48  }
 0x1ed   : > { %3855 = vperm.xlu1 %9513, %v11356_v40  }
 0x1ee   : > { %9379 = vmatpush3.bf16.msra.mxu0 %v8631_v41  ;;  %v11612_v23 = vpop.permute.xlu1 %3231  ;;  %v11615_v50 = vpop.permute.xlu0 %3227 }
 0x1ef   : > { %9380 = vmatprep.subr.bf16.mxu0 %v8632_v33  ;;  %16661 = vst [vmem:[#allocation165_spill] sm:$0xff] %v11612_v23  ;;  %16662 = vst [vmem:[#allocation166_spill] sm:$0xff] %v11615_v50 }
 0x1f0   : > { %3867 = vperm.xlu0 %9514, %v11392_v39  }
 0x1f1   : > { %3863 = vperm.xlu1 %9513, %v11384_v59  }
 0x1f2   : > { %9381 = vmatpush3.bf16.msra.mxu0 %v8632_v33  ;;  %v11618_v2 = vpop.permute.xlu1 %3239  ;;  %v11624_v56 = vpop.permute.xlu0 %3235 }
 0x1f3   : > { %16663 = vst [vmem:[#allocation167_spill] sm:$0xff] %v11618_v2  ;;  %16665 = vst [vmem:[#allocation168_spill] sm:$0xff] %v11624_v56 }
 0x1f4   : > { %3875 = vperm.xlu0 %9514, %v11423_v51  }
 0x1f5   : > { %9383 = vmatmul.mubr.bf16.vlgmr.msra.gmra.mrb[24].mxu0 %v16664_v14  ;;  %3871 = vperm.xlu1 %9513, %v11412_v17  }
 0x1f6   : > { %v11627_v21 = vpop.permute.xlu1 %3247  ;;  %v11630_v27 = vpop.permute.xlu0 %3243 }
 0x1f7   : > { %16666 = vst [vmem:[#allocation169_spill] sm:$0xff] %v11627_v21  ;;  %16667 = vst [vmem:[#allocation170_spill] sm:$0xff] %v11630_v27 }
 0x1f8   : > { %3883 = vperm.xlu0 %9514, %v11454_v4  }
 0x1f9   : > { %3879 = vperm.xlu1 %9513, %v11446_v53  }
 0x1fb   : > { %v11633_v25 = vpop.permute.xlu1 %3447 }
 0x1fc   : > { %9515 = vset.pattern.permute.xlu0 %v10063_v55  ;;  %v11637_v47 = vpop.permute.xlu0 %3443 }
 0x1fd   : > { %4083 = vperm.xlu0 %9515, %v11077_v24   ;;  %3887 = vperm.xlu1 %9513, %v11474_v61  }
 0x1ff   : > { %v11642_v33 = vpop.permute.xlu1 %3451 }
 0x200   : > { %v9104_v3 = vpop.f32.mrb[32].mxu1  ;;  %v11652_v23 = vpop.permute.xlu0 %3455 }
 0x201   : > { %v11640_v41 = vadd.f32 %v9104_v3, %v10507_v58  ;;  %v935_v14 = vpop.f32.mrb[33].mxu1  ;;  %4095 = vperm.xlu0 %9515, %v11113_v15   ;;  %9516 = vset.pattern.permute.xlu1 %v10063_v55 }
 0x202   : > { %v11645_v2 = vadd.f32 %v935_v14, %v10534_v5  ;;  %v9105_v21 = vpop.f32.mrb[34].mxu1  ;;  %4087 = vperm.xlu1 %9516, %v11057_v26  }
 0x203   : > { %v956_v56 = vmin.f32 %v11640_v41, 0.0  ;;  %v11650_v27 = vadd.f32 %v9105_v21, %v10519_v63  ;;  %v938_v30 = vpop.f32.mrb[35].mxu1  ;;  %v11660_v29 = vpop.permute.xlu1 %3459  ;;  %vm952_vm0 = vcmp.gt.f32.partialorder %v11640_v41, 0.0 }
 0x204   : > { %v954_v58 = vmin.f32 %v11645_v2, 0.0  ;;  %v11656_v3 = vadd.f32 %v938_v30, %v10540_v9  ;;  %v11664_v55 = vpop.permute.xlu0 %3463  ;;  %vm950_vm2 = vcmp.gt.f32.partialorder %v11645_v2, 0.0 }
 0x205   : > { %v962_v5 = vmul.f32 1.442695, %v956_v56  ;;  %v957_v14 = vmin.f32 %v11650_v27, 0.0  ;;  %4103 = vperm.xlu0 %9515, %v11148_v20   ;;  %vm953_vm1 = vcmp.gt.f32.partialorder %v11650_v27, 0.0 }
 0x206   : > { %v958_v50 = vmul.f32 1.442695, %v954_v58  ;;  %v955_v63 = vmin.f32 %v11656_v3, 0.0  ;;  %4091 = vperm.xlu1 %9516, %v11092_v6   ;;  %vm951_vm3 = vcmp.gt.f32.partialorder %v11656_v3, 0.0 }
 0x207   : > { %9645 = vpow2.f32 %v962_v5  ;;  %v964_v21 = vmul.f32 1.442695, %v957_v14  ;;  %v11670_v56 = vpop.permute.xlu1 %3467  ;;  %v16669_v14 = vld [vmem:[#allocation7_spill] sm:$0xff] }
 0x208   : > { %9647 = vpow2.f32 %v958_v50  ;;  %v960_v7 = vmul.f32 1.442695, %v955_v63  ;;  %v9144_v9 = vpop.f32.mrb[0].mxu0  ;;  %v11688_v16 = vpop.permute.xlu0 %3471 }
 0x209   : > { %9649 = vpow2.f32 %v964_v21  ;;  %v11668_v30 = vadd.f32 %v9144_v9, %v10552_v19  ;;  %v1164_v58 = vpop.f32.mrb[1].mxu0  ;;  %4111 = vperm.xlu0 %9515, %v11173_v36   ;;  %v16670_v19 = vld [vmem:[#allocation6_spill] sm:$0xff] }
 0x20a   : > { %9651 = vpow2.f32 %v960_v7  ;;  %v11673_v1 = vadd.f32 %v1164_v58, %v16668_v28  ;;  %v9145_v5 = vpop.f32.mrb[2].mxu0  ;;  %4099 = vperm.xlu1 %9516, %v16671_v37  }
 0x20b   : > { %v1185_v50 = vmin.f32 %v11668_v30, 0.0  ;;  %v11678_v63 = vadd.f32 %v9145_v5, %v16669_v14  ;;  %v1167_v43 = vpop.f32.mrb[3].mxu0  ;;  %v11686_v58 = vpop.permute.xlu1 %3475  ;;  %vm1181_vm4 = vcmp.gt.f32.partialorder %v11668_v30, 0.0 }
 0x20c   : > { %v1183_v21 = vmin.f32 %v11673_v1, 0.0  ;;  %v11682_v9 = vadd.f32 %v1167_v43, %v16670_v19  ;;  %16672 = vst [vmem:[#allocation11_spill] sm:$0xff] %v11686_v58  ;;  %v16673_v43 = vld [vmem:[#allocation111_spill] sm:$0xff]  ;;  %v11696_v12 = vpop.permute.xlu0 %3479  ;;  %vm1179_vm6 = vcmp.gt.f32.partialorder %v11673_v1, 0.0  ;;  %v16696_v58 = vld [vmem:[#allocation114_spill] sm:$0xff] }
 0x20d   : > { %v1191_v7 = vmul.f32 1.442695, %v1185_v50  ;;  %v1186_v28 = vmin.f32 %v11678_v63, 0.0  ;;  %4119 = vperm.xlu0 %9515, %v11198_v13   ;;  %16675 = vst [vmem:[#allocation6_spill] sm:$0xff] %v11696_v12  ;;  %vm1182_vm5 = vcmp.gt.f32.partialorder %v11678_v63, 0.0 }
 0x20e   : > { %v1187_v10 = vmul.f32 1.442695, %v1183_v21  ;;  %v1184_v52 = vmin.f32 %v11682_v9, 0.0  ;;  %4107 = vperm.xlu1 %9516, %v16673_v43   ;;  %vm1180_vm7 = vcmp.gt.f32.partialorder %v11682_v9, 0.0 }
 0x20f   : > { %9653 = vpow2.f32 %v1191_v7  ;;  %v1193_v5 = vmul.f32 1.442695, %v1186_v28  ;;  %v11693_v50 = vpop.permute.xlu1 %3483 }
 0x210   : > { %9655 = vpow2.f32 %v1187_v10  ;;  %v1189_v14 = vmul.f32 1.442695, %v1184_v52  ;;  %16674 = vst [vmem:[#allocation7_spill] sm:$0xff] %v11693_v50 }
 0x211   : > { %v9646_v19 = vpop.eup %9645  ;;  %9657 = vpow2.f32 %v1193_v5  ;;  %4127 = vperm.xlu0 %9515, %v11223_v49  }
 0x212   : > { %v9648_v54 = vpop.eup %9647  ;;  %v8543_v32 = vadd.f32 -1.0, %v9646_v19  ;;  %9659 = vpow2.f32 %v1189_v14  ;;  %4115 = vperm.xlu1 %9516, %v11187_v8  }
 0x213   : > { %v9650_v21 = vpop.eup %9649  ;;  %v8541_v45 = vadd.f32 -1.0, %v9648_v54  ;;  %v11701_v52 = vpop.permute.xlu1 %3491 }
 0x214   : > { %v9652_v60 = vpop.eup %9651  ;;  %v8544_v7 = vadd.f32 -1.0, %v9650_v21  ;;  %16676 = vst [vmem:[#allocation107_spill] sm:$0xff] %v11701_v52  ;;  %v972_v28 = vsel %vm952_vm0, %v11640_v41, %v8543_v32  ;;  %v11713_v32 = vpop.permute.xlu0 %3487 }
 0x215   : > { %v8542_v10 = vadd.f32 -1.0, %v9652_v60  ;;  %4135 = vperm.xlu0 %9515, %v11253_v0   ;;  %v970_v14 = vsel %vm950_vm2, %v11645_v2, %v8541_v45  ;;  %16678 = vst [vmem:[#allocation171_spill] sm:$0xff] %v11713_v32  ;;  %v16679_v2 = vld [vmem:[#allocation97_spill] sm:$0xff] }
 0x216   : > { %v973_v5 = vsel %vm953_vm1, %v11650_v27, %v8544_v7  ;;  %4123 = vperm.xlu1 %9516, %v11212_v62  }
 0x217   : > { %v975_v54 = vpack.c.bf16 %v973_v5, %v972_v28  ;;  %v971_v19 = vsel %vm951_vm3, %v11656_v3, %v8542_v10  ;;  %v11711_v52 = vpop.permute.xlu1 %3499  ;;  %v16681_v5 = vld [vmem:[#allocation100_spill] sm:$0xff] }
 0x218   : > { %v974_v60 = vpack.c.bf16 %v971_v19, %v970_v14  ;;  %16677 = vst [vmem:[#allocation111_spill] sm:$0xff] %v11711_v52 }
 0x219   : > { %v9654_v21 = vpop.eup %9653  ;;  %4143 = vperm.xlu0 %9515, %v11274_v22  }
 0x21a   : > { %v9656_v41 = vpop.eup %9655  ;;  %v8563_v12 = vadd.f32 -1.0, %v9654_v21  ;;  %9122 = vmatprep.mubr.bf16.mxu1 %v974_v60  ;;  %4131 = vperm.xlu1 %9516, %v11240_v34  }
 0x21b   : > { %v9658_v27 = vpop.eup %9657  ;;  %v8561_v7 = vadd.f32 -1.0, %v9656_v41  ;;  %9123 = vmatmul.mubr.bf16.vlgmr.msra.gmra.mrb[36].mxu1 %v975_v54  ;;  %v11720_v10 = vpop.permute.xlu1 %3507 }
 0x21c   : > { %v9660_v28 = vpop.eup %9659  ;;  %v8564_v45 = vadd.f32 -1.0, %v9658_v27  ;;  %9147 = vmatpush3.bf16.msra.mxu1 %v16679_v2  ;;  %16680 = vst [vmem:[#allocation97_spill] sm:$0xff] %v11720_v10  ;;  %v11724_v14 = vsel %vm1181_vm4, %v11668_v30, %v8563_v12  ;;  %v11736_v41 = vpop.permute.xlu0 %3495 }
 0x21d   : > { %v8562_v3 = vadd.f32 -1.0, %v9660_v28  ;;  %9148 = vmatprep.subr.bf16.mxu1 %v16681_v5  ;;  %4151 = vperm.xlu0 %9515, %v11292_v31   ;;  %v1199_v60 = vsel %vm1179_vm6, %v11673_v1, %v8561_v7  ;;  %16682 = vst [vmem:[#allocation100_spill] sm:$0xff] %v11736_v41  ;;  %v16688_v28 = vld [vmem:[#allocation16_spill] sm:$0xff] }
 0x21e   : > { %v11728_v54 = vsel %vm1182_vm5, %v11678_v63, %v8564_v45  ;;  %4139 = vperm.xlu1 %9516, %v11263_v38   ;;  %v16684_v63 = vld [vmem:[#allocation103_spill] sm:$0xff] }
 0x21f   : > { %v1200_v21 = vsel %vm1180_vm7, %v11682_v9, %v8562_v3  ;;  %v11740_v30 = vpop.permute.xlu1 %3515  ;;  %v16686_v9 = vld [vmem:[#allocation106_spill] sm:$0xff] }
 0x220   : > { %9149 = vmatpush3.bf16.msra.mxu1 %v16681_v5  ;;  %v1203_v12 = vpack.c.bf16 %v1200_v21, %v1199_v60  ;;  %16683 = vst [vmem:[#allocation172_spill] sm:$0xff] %v11740_v30  ;;  %v11749_v27 = vpop.permute.xlu0 %3503  ;;  %v16690_v21 = vld [vmem:[#allocation110_spill] sm:$0xff]  ;;  %v16692_v30 = vld [vmem:[#allocation9_spill] sm:$0xff] }
 0x221   : > { %9150 = vmatprep.subr.bf16.mxu1 %v16684_v63  ;;  %4159 = vperm.xlu0 %9515, %v11310_v44   ;;  %16687 = vst [vmem:[#allocation106_spill] sm:$0xff] %v11749_v27 }
 0x222   : > { %9162 = vmatprep.mubr.bf16.mxu1 %v1203_v12  ;;  %4147 = vperm.xlu1 %9516, %v11282_v18   ;;  %v16691_v12 = vld [vmem:[#allocation14_spill] sm:$0xff] }
 0x223   : > { %v11746_v1 = vpop.permute.xlu1 %3523 }
 0x224   : > { %9151 = vmatpush3.bf16.msra.mxu1 %v16684_v63  ;;  %16685 = vst [vmem:[#allocation103_spill] sm:$0xff] %v11746_v1  ;;  %v11763_v52 = vpop.permute.xlu0 %3511 }
 0x225   : > { %9152 = vmatprep.subr.bf16.mxu1 %v16686_v9  ;;  %4167 = vperm.xlu0 %9515, %v11328_v46   ;;  %16693 = vst [vmem:[#allocation110_spill] sm:$0xff] %v11763_v52 }
 0x226   : > { %4155 = vperm.xlu1 %9516, %v11300_v57  }
 0x227   : > { %v11755_v60 = vpop.permute.xlu1 %3531 }
 0x228   : > { %9153 = vmatpush3.bf16.msra.mxu1 %v16686_v9  ;;  %v9184_v7 = vpop.f32.mrb[4].mxu0  ;;  %16689 = vst [vmem:[#allocation16_spill] sm:$0xff] %v11755_v60 }
 0x229   : > { %v1369_v45 = vadd.f32 %v9184_v7, %v16688_v28  ;;  %v1360_v3 = vpop.f32.mrb[5].mxu0  ;;  %9154 = vmatprep.subr.bf16.mxu1 %v16690_v21  ;;  %4175 = vperm.xlu0 %9515, %v11356_v40   ;;  %v16694_v7 = vld [vmem:[#allocation8_spill] sm:$0xff] }
 0x22a   : > { %v11759_v19 = vadd.f32 %v1360_v3, %v16691_v12  ;;  %v9185_v1 = vpop.f32.mrb[6].mxu0  ;;  %4163 = vperm.xlu1 %9516, %v11318_v42  }
 0x22b   : > { %v1381_v10 = vmin.f32 %v1369_v45, 0.0  ;;  %v1372_v41 = vadd.f32 %v9185_v1, %v16692_v30  ;;  %v1363_v27 = vpop.f32.mrb[7].mxu0  ;;  %v11769_v12 = vpop.permute.xlu1 %3539  ;;  %vm1377_vm8 = vcmp.gt.f32.partialorder %v1369_v45, 0.0 }
 0x22c   : > { %v1379_v32 = vmin.f32 %v11759_v19, 0.0  ;;  %v1364_v28 = vadd.f32 %v1363_v27, %v16694_v7  ;;  %9155 = vmatpush3.bf16.msra.mxu1 %v16690_v21  ;;  %16695 = vst [vmem:[#allocation14_spill] sm:$0xff] %v11769_v12  ;;  %v11778_v7 = vpop.permute.xlu0 %3519  ;;  %vm1375_vm10 = vcmp.gt.f32.partialorder %v11759_v19, 0.0 }
 0x22d   : > { %v1387_v60 = vmul.f32 1.442695, %v1381_v10  ;;  %v1382_v3 = vmin.f32 %v1372_v41, 0.0  ;;  %9156 = vmatprep.subr.bf16.mxu1 %v16696_v58  ;;  %4183 = vperm.xlu0 %9515, %v11384_v59   ;;  %v16698_v10 = vld [vmem:[#allocation117_spill] sm:$0xff]  ;;  %16699 = vst [vmem:[#allocation8_spill] sm:$0xff] %v11778_v7  ;;  %vm1378_vm9 = vcmp.gt.f32.partialorder %v1372_v41, 0.0 }
 0x22e   : > { %v1383_v50 = vmul.f32 1.442695, %v1379_v32  ;;  %v1380_v35 = vmin.f32 %v1364_v28, 0.0  ;;  %4171 = vperm.xlu1 %9516, %v11336_v11   ;;  %vm1376_vm11 = vcmp.gt.f32.partialorder %v1364_v28, 0.0 }
 0x22f   : > { %9661 = vpow2.f32 %v1387_v60  ;;  %v1389_v30 = vmul.f32 1.442695, %v1382_v3  ;;  %v11775_v27 = vpop.permute.xlu1 %3547 }
 0x230   : > { %9663 = vpow2.f32 %v1383_v50  ;;  %v1385_v1 = vmul.f32 1.442695, %v1380_v35  ;;  %9157 = vmatpush3.bf16.msra.mxu1 %v16696_v58  ;;  %16697 = vst [vmem:[#allocation9_spill] sm:$0xff] %v11775_v27  ;;  %v16701_v35 = vld [vmem:[#allocation120_spill] sm:$0xff]  ;;  %v11787_v32 = vpop.permute.xlu0 %3527  ;;  %v16704_v27 = vpack.c.bf16 %v11728_v54, %v11724_v14  ;;  %v10064_v54 = vmov 7  }
 0x231   : > { %9665 = vpow2.f32 %v1389_v30  ;;  %9158 = vmatprep.subr.bf16.mxu1 %v16698_v10  ;;  %4191 = vperm.xlu0 %9515, %v11412_v17   ;;  %16702 = vst [vmem:[#allocation117_spill] sm:$0xff] %v11787_v32 }
 0x232   : > { %9667 = vpow2.f32 %v1385_v1  ;;  %4179 = vperm.xlu1 %9516, %v11364_v48  }
 0x233   : > { %v11783_v50 = vpop.permute.xlu1 %3555 }
 0x234   : > { %9159 = vmatpush3.bf16.msra.mxu1 %v16698_v10  ;;  %16700 = vst [vmem:[#allocation114_spill] sm:$0xff] %v11783_v50 }
 0x235   : > { %9160 = vmatprep.subr.bf16.mxu1 %v16701_v35  ;;  %4199 = vperm.xlu0 %9515, %v11446_v53  }
 0x236   : > { %4187 = vperm.xlu1 %9516, %v11392_v39  }
 0x237   : > { %v11791_v3 = vpop.permute.xlu1 %3563 }
 0x238   : > { %9161 = vmatpush3.bf16.msra.mxu1 %v16701_v35  ;;  %16703 = vst [vmem:[#allocation120_spill] sm:$0xff] %v11791_v3 }
 0x239   : > { %v9662_v60 = vpop.eup %9661  ;;  %9186 = vmatprep.subr.bf16.mxu1 %v16679_v2  ;;  %4207 = vperm.xlu0 %9515, %v11474_v61  }
 0x23a   : > { %v9664_v30 = vpop.eup %9663  ;;  %v8575_v1 = vadd.f32 -1.0, %v9662_v60  ;;  %4195 = vperm.xlu1 %9516, %v11423_v51   ;;  %v11801_v60 = vpop.permute.xlu0 %3535 }
 0x23b   : > { %v9666_v50 = vpop.eup %9665  ;;  %v8573_v12 = vadd.f32 -1.0, %v9664_v30  ;;  %9163 = vmatmul.mubr.bf16.vlgmr.msra.gmra.mrb[40].mxu1 %v16704_v27  ;;  %16705 = vst [vmem:[#allocation173_spill] sm:$0xff] %v11801_v60 }
 0x23c   : > { %v9668_v32 = vpop.eup %9667  ;;  %v8576_v52 = vadd.f32 -1.0, %v9666_v50  ;;  %9187 = vmatpush3.bf16.msra.mxu1 %v16679_v2  ;;  %v11803_v7 = vsel %vm1377_vm8, %v1369_v45, %v8575_v1  ;;  %v11808_v14 = vpop.permute.xlu1 %3763 }
 0x23d   : > { %v8574_v3 = vadd.f32 -1.0, %v9668_v32  ;;  %9188 = vmatprep.subr.bf16.mxu1 %v16681_v5  ;;  %9518 = vset.pattern.permute.xlu0 %v10064_v54  ;;  %v1395_v27 = vsel %vm1375_vm10, %v11759_v19, %v8573_v12  ;;  %v16707_v19 = vld [vmem:[#allocation20_spill] sm:$0xff] }
 0x23e   : > { %v11806_v30 = vsel %vm1378_vm9, %v1372_v41, %v8576_v52  ;;  %4407 = vperm.xlu0 %9518, %v11057_v26   ;;  %4203 = vperm.xlu1 %9516, %v11454_v4   ;;  %v11819_v41 = vpop.permute.xlu0 %3543 }
 0x23f   : > { %v1400_v2 = vpack.c.bf16 %v11806_v30, %v11803_v7  ;;  %v1396_v50 = vsel %vm1376_vm11, %v1364_v28, %v8574_v3  ;;  %16706 = vst [vmem:[#allocation174_spill] sm:$0xff] %v11819_v41  ;;  %v16740_v41 = vld [vmem:[#allocation21_spill] sm:$0xff] }
 0x240   : > { %9189 = vmatpush3.bf16.msra.mxu1 %v16681_v5  ;;  %v1399_v45 = vpack.c.bf16 %v1396_v50, %v1395_v27  ;;  %v11817_v52 = vpop.permute.xlu1 %3771 }
 0x241   : > { %9190 = vmatprep.subr.bf16.mxu1 %v16684_v63 }
 0x242   : > { %9202 = vmatprep.mubr.bf16.mxu1 %v1399_v45  ;;  %4419 = vperm.xlu0 %9518, %v16671_v37   ;;  %v11834_v37 = vpop.permute.xlu0 %3551 }
 0x243   : > { %9517 = vset.pattern.permute.xlu1 %v10064_v54  ;;  %16708 = vst [vmem:[#allocation20_spill] sm:$0xff] %v11834_v37 }
 0x244   : > { %9191 = vmatpush3.bf16.msra.mxu1 %v16684_v63  ;;  %4403 = vperm.xlu1 %9517, %v11077_v24   ;;  %v11825_v26 = vpop.permute.xlu1 %3775  ;;  %v16709_v24 = vld [vmem:[#allocation18_spill] sm:$0xff] }
 0x245   : > { %9192 = vmatprep.subr.bf16.mxu1 %v16686_v9 }
 0x246   : > { %4427 = vperm.xlu0 %9518, %v16673_v43  }
 0x248   : > { %9193 = vmatpush3.bf16.msra.mxu1 %v16686_v9  ;;  %v9224_v5 = vpop.f32.mrb[8].mxu0  ;;  %4411 = vperm.xlu1 %9517, %v11092_v6   ;;  %v11839_v3 = vpop.permute.xlu1 %3783  ;;  %v16710_v9 = vld [vmem:[#allocation12_spill] sm:$0xff]  ;;  %v16711_v6 = vld [vmem:[#allocation10_spill] sm:$0xff] }
 0x249   : > { %v11830_v28 = vadd.f32 %v9224_v5, %v16707_v19  ;;  %v1540_v12 = vpop.f32.mrb[9].mxu0  ;;  %9194 = vmatprep.subr.bf16.mxu1 %v16690_v21 }
 0x24a   : > { %v11837_v63 = vadd.f32 %v1540_v12, %v16709_v24  ;;  %v9225_v32 = vpop.f32.mrb[10].mxu0  ;;  %4435 = vperm.xlu0 %9518, %v11187_v8  }
 0x24b   : > { %v1561_v43 = vmin.f32 %v11830_v28, 0.0  ;;  %v1552_v1 = vadd.f32 %v9225_v32, %v16710_v9  ;;  %v1543_v54 = vpop.f32.mrb[11].mxu0  ;;  %v11853_v9 = vpop.permute.xlu0 %3559  ;;  %vm1557_vm12 = vcmp.gt.f32.partialorder %v11830_v28, 0.0 }
 0x24c   : > { %v1559_v27 = vmin.f32 %v11837_v63, 0.0  ;;  %v1544_v50 = vadd.f32 %v1543_v54, %v16711_v6  ;;  %9195 = vmatpush3.bf16.msra.mxu1 %v16690_v21  ;;  %4415 = vperm.xlu1 %9517, %v11113_v15   ;;  %v11849_v24 = vpop.permute.xlu1 %3791  ;;  %16712 = vst [vmem:[#allocation18_spill] sm:$0xff] %v11853_v9  ;;  %v11890_v6 = vld [vmem:[%s16361_s3 + $0x8] sm:$0xff]   ;;  %vm1555_vm14 = vcmp.gt.f32.partialorder %v11837_v63, 0.0 }
 0x24d   : > { %v1567_v45 = vmul.f32 1.442695, %v1561_v43  ;;  %v1562_v5 = vmin.f32 %v1552_v1, 0.0  ;;  %9196 = vmatprep.subr.bf16.mxu1 %v16696_v58  ;;  %vm1558_vm13 = vcmp.gt.f32.partialorder %v1552_v1, 0.0 }
 0x24e   : > { %v1563_v19 = vmul.f32 1.442695, %v1559_v27  ;;  %v1560_v12 = vmin.f32 %v1544_v50, 0.0  ;;  %4443 = vperm.xlu0 %9518, %v11212_v62   ;;  %vm1556_vm15 = vcmp.gt.f32.partialorder %v1544_v50, 0.0 }
 0x24f   : > { %9669 = vpow2.f32 %v1567_v45  ;;  %v1569_v32 = vmul.f32 1.442695, %v1562_v5 }
 0x250   : > { %9671 = vpow2.f32 %v1563_v19  ;;  %v1565_v8 = vmul.f32 1.442695, %v1560_v12  ;;  %9197 = vmatpush3.bf16.msra.mxu1 %v16696_v58  ;;  %4423 = vperm.xlu1 %9517, %v11148_v20   ;;  %v11857_v15 = vpop.permute.xlu1 %3799  ;;  %v11865_v58 = vpop.permute.xlu0 %3567 }
 0x251   : > { %9673 = vpow2.f32 %v1569_v32  ;;  %9198 = vmatprep.subr.bf16.mxu1 %v16698_v10  ;;  %16713 = vst [vmem:[#allocation12_spill] sm:$0xff] %v11865_v58  ;;  %v16716_v32 = vld [vmem:[#allocation22_spill] sm:$0xff] }
 0x252   : > { %9675 = vpow2.f32 %v1565_v8  ;;  %4451 = vperm.xlu0 %9518, %v11240_v34   ;;  %v11873_v34 = vld [vmem:[%s16361_s3] sm:$0xff]  }
 0x254   : > { %9199 = vmatpush3.bf16.msra.mxu1 %v16698_v10  ;;  %4431 = vperm.xlu1 %9517, %v11173_v36   ;;  %v11863_v62 = vpop.permute.xlu1 %3807  ;;  %v11876_v10 = vpop.permute.xlu0 %3767 }
 0x255   : > { %9200 = vmatprep.subr.bf16.mxu1 %v16701_v35 }
 0x256   : > { %4459 = vperm.xlu0 %9518, %v11263_v38  }
 0x258   : > { %9201 = vmatpush3.bf16.msra.mxu1 %v16701_v35  ;;  %4439 = vperm.xlu1 %9517, %v11198_v13   ;;  %v11882_v35 = vpop.permute.xlu1 %3815  ;;  %v11904_v5 = vpop.permute.xlu0 %3779 }
 0x259   : > { %v9670_v20 = vpop.eup %9669  ;;  %9226 = vmatprep.subr.bf16.mxu1 %v11873_v34 }
 0x25a   : > { %v9672_v36 = vpop.eup %9671  ;;  %v8587_v21 = vadd.f32 -1.0, %v9670_v20  ;;  %4467 = vperm.xlu0 %9518, %v11282_v18  }
 0x25b   : > { %v9674_v43 = vpop.eup %9673  ;;  %v8585_v54 = vadd.f32 -1.0, %v9672_v36  ;;  %9203 = vmatmul.mubr.bf16.vlgmr.msra.gmra.mrb[44].mxu1 %v1400_v2  ;;  %v16717_v36 = vld [vmem:[#allocation15_spill] sm:$0xff] }
 0x25c   : > { %v9676_v13 = vpop.eup %9675  ;;  %v8588_v38 = vadd.f32 -1.0, %v9674_v43  ;;  %9227 = vmatpush3.bf16.msra.mxu1 %v11873_v34  ;;  %4447 = vperm.xlu1 %9517, %v11223_v49   ;;  %v11894_v18 = vsel %vm1557_vm12, %v11830_v28, %v8587_v21  ;;  %v11910_v28 = vld [vmem:[%s16361_s3 + $0x10] sm:$0xff]  }
 0x25d   : > { %v8586_v27 = vadd.f32 -1.0, %v9676_v13  ;;  %9228 = vmatprep.subr.bf16.mxu1 %v11890_v6  ;;  %v1575_v49 = vsel %vm1555_vm14, %v11837_v63, %v8585_v54 }
 0x25e   : > { %v11897_v7 = vsel %vm1558_vm13, %v1552_v1, %v8588_v38  ;;  %4475 = vperm.xlu0 %9518, %v11300_v57   ;;  %v11913_v1 = vpop.permute.xlu1 %3823  ;;  %v11924_v57 = vpop.permute.xlu0 %3787 }
 0x25f   : > { %v1580_v30 = vpack.c.bf16 %v11897_v7, %v11894_v18  ;;  %v1576_v2 = vsel %vm1556_vm15, %v1544_v50, %v8586_v27  ;;  %v16715_v50 = vld [vmem:[#allocation24_spill] sm:$0xff] }
 0x260   : > { %9229 = vmatpush3.bf16.msra.mxu1 %v11890_v6  ;;  %v1579_v45 = vpack.c.bf16 %v1576_v2, %v1575_v49  ;;  %4455 = vperm.xlu1 %9517, %v11253_v0   ;;  %v11921_v0 = vld [vmem:[%s16361_s3 + $0x18] sm:$0xff]   ;;  %v11952_v2 = vld [vmem:[%s16361_s3 + $0x28] sm:$0xff]  }
 0x261   : > { %9230 = vmatprep.subr.bf16.mxu1 %v11910_v28 }
 0x262   : > { %9242 = vmatprep.mubr.bf16.mxu1 %v1579_v45  ;;  %4483 = vperm.xlu0 %9518, %v11318_v42   ;;  %v11927_v63 = vpop.permute.xlu1 %3831  ;;  %v11946_v38 = vpop.permute.xlu0 %3795 }
 0x263   : > { %16714 = vst [vmem:[#allocation10_spill] sm:$0xff] %v11927_v63 }
 0x264   : > { %9231 = vmatpush3.bf16.msra.mxu1 %v11910_v28  ;;  %4463 = vperm.xlu1 %9517, %v11274_v22   ;;  %v11935_v22 = vld [vmem:[%s16361_s3 + $0x20] sm:$0xff]  }
 0x265   : > { %9232 = vmatprep.subr.bf16.mxu1 %v11921_v0 }
 0x266   : > { %4491 = vperm.xlu0 %9518, %v11336_v11  }
 0x268   : > { %9233 = vmatpush3.bf16.msra.mxu1 %v11921_v0  ;;  %v9264_v42 = vpop.f32.mrb[12].mxu0  ;;  %4471 = vperm.xlu1 %9517, %v11292_v31   ;;  %v16718_v31 = vld [vmem:[#allocation13_spill] sm:$0xff] }
 0x269   : > { %v1745_v19 = vadd.f32 %v9264_v42, %v16715_v50  ;;  %v1736_v12 = vpop.f32.mrb[13].mxu0  ;;  %9234 = vmatprep.subr.bf16.mxu1 %v11935_v22 }
 0x26a   : > { %v11939_v8 = vadd.f32 %v1736_v12, %v16716_v32  ;;  %v9265_v11 = vpop.f32.mrb[14].mxu0  ;;  %4499 = vperm.xlu0 %9518, %v11364_v48   ;;  %v11955_v48 = vpop.permute.xlu1 %3839 }
 0x26b   : > { %v1757_v20 = vmin.f32 %v1745_v19, 0.0  ;;  %v1748_v21 = vadd.f32 %v9265_v11, %v16717_v36  ;;  %v1739_v43 = vpop.f32.mrb[15].mxu0  ;;  %16719 = vst [vmem:[#allocation24_spill] sm:$0xff] %v11955_v48  ;;  %v11966_v32 = vpop.permute.xlu0 %3803  ;;  %vm1753_vm0 = vcmp.gt.f32.partialorder %v1745_v19, 0.0 }
 0x26c   : > { %v1755_v54 = vmin.f32 %v11939_v8, 0.0  ;;  %v1740_v13 = vadd.f32 %v1739_v43, %v16718_v31  ;;  %9235 = vmatpush3.bf16.msra.mxu1 %v11935_v22  ;;  %4479 = vperm.xlu1 %9517, %v11310_v44   ;;  %v11963_v44 = vld [vmem:[%s16361_s3 + $0x30] sm:$0xff]   ;;  %vm1751_vm2 = vcmp.gt.f32.partialorder %v11939_v8, 0.0 }
 0x26d   : > { %v1763_v27 = vmul.f32 1.442695, %v1757_v20  ;;  %v1758_v49 = vmin.f32 %v1748_v21, 0.0  ;;  %9236 = vmatprep.subr.bf16.mxu1 %v11952_v2  ;;  %vm1754_vm1 = vcmp.gt.f32.partialorder %v1748_v21, 0.0 }
 0x26e   : > { %v1759_v45 = vmul.f32 1.442695, %v1755_v54  ;;  %v1756_v42 = vmin.f32 %v1740_v13, 0.0  ;;  %4507 = vperm.xlu0 %9518, %v11392_v39   ;;  %v11969_v39 = vpop.permute.xlu1 %3847  ;;  %vm1752_vm3 = vcmp.gt.f32.partialorder %v1740_v13, 0.0 }
 0x26f   : > { %9677 = vpow2.f32 %v1763_v27  ;;  %v1765_v50 = vmul.f32 1.442695, %v1758_v49  ;;  %16720 = vst [vmem:[#allocation22_spill] sm:$0xff] %v11969_v39  ;;  %v11981_v11 = vpop.permute.xlu0 %3811 }
 0x270   : > { %9679 = vpow2.f32 %v1759_v45  ;;  %v1761_v12 = vmul.f32 1.442695, %v1756_v42  ;;  %9237 = vmatpush3.bf16.msra.mxu1 %v11952_v2  ;;  %4487 = vperm.xlu1 %9517, %v11328_v46   ;;  %v11976_v46 = vld [vmem:[%s16361_s3 + $0x38] sm:$0xff]  }
 0x271   : > { %9681 = vpow2.f32 %v1765_v50  ;;  %9238 = vmatprep.subr.bf16.mxu1 %v11963_v44 }
 0x272   : > { %9683 = vpow2.f32 %v1761_v12  ;;  %4515 = vperm.xlu0 %9518, %v11423_v51   ;;  %v11985_v36 = vpop.permute.xlu1 %3855 }
 0x273   : > { %16721 = vst [vmem:[#allocation15_spill] sm:$0xff] %v11985_v36  ;;  %v11994_v45 = vpop.permute.xlu0 %3819 }
 0x274   : > { %9239 = vmatpush3.bf16.msra.mxu1 %v11963_v44  ;;  %4495 = vperm.xlu1 %9517, %v11356_v40  }
 0x275   : > { %9240 = vmatprep.subr.bf16.mxu1 %v11976_v46 }
 0x276   : > { %4523 = vperm.xlu0 %9518, %v11454_v4   ;;  %v11997_v42 = vpop.permute.xlu1 %3863 }
 0x277   : > { %16722 = vst [vmem:[#allocation13_spill] sm:$0xff] %v11997_v42 }
 0x278   : > { %9241 = vmatpush3.bf16.msra.mxu1 %v11976_v46  ;;  %4503 = vperm.xlu1 %9517, %v11384_v59  }
 0x279   : > { %v9678_v51 = vpop.eup %9677  ;;  %9266 = vmatprep.subr.bf16.mxu1 %v11873_v34 }
 0x27a   : > { %v9680_v20 = vpop.eup %9679  ;;  %v8599_v40 = vadd.f32 -1.0, %v9678_v51 }
 0x27b   : > { %v9682_v43 = vpop.eup %9681  ;;  %v8597_v54 = vadd.f32 -1.0, %v9680_v20  ;;  %9243 = vmatmul.mubr.bf16.vlgmr.msra.gmra.mrb[48].mxu1 %v1580_v30 }
 0x27c   : > { %v9684_v4 = vpop.eup %9683  ;;  %v8600_v31 = vadd.f32 -1.0, %v9682_v43  ;;  %9267 = vmatpush3.bf16.msra.mxu1 %v11873_v34  ;;  %4511 = vperm.xlu1 %9517, %v11412_v17   ;;  %v1773_v59 = vsel %vm1753_vm0, %v1745_v19, %v8599_v40  ;;  %v12003_v17 = vpop.permute.xlu0 %3827  ;;  %vm1073_vm0 = vcmask 261120  }
 0x27d   : > { %v8598_v27 = vadd.f32 -1.0, %v9684_v4  ;;  %9268 = vmatprep.subr.bf16.mxu1 %v11890_v6  ;;  %v1771_v7 = vsel %vm1751_vm2, %v11939_v8, %v8597_v54  ;;  %16723 = vst [vmem:[#allocation175_spill] sm:$0xff] %v12003_v17  ;;  %v12007_v19 = vpop.permute.xlu1 %3871  ;;  %v16728_v54 = vld [vmem:[#allocation19_spill] sm:$0xff] }
 0x27e   : > { %v1774_v49 = vsel %vm1754_vm1, %v1748_v21, %v8600_v31  ;;  %16724 = vst [vmem:[#allocation176_spill] sm:$0xff] %v12007_v19  ;;  %v16725_v21 = vld [vmem:[#allocation28_spill] sm:$0xff]  ;;  %vm8131_vm1 = vcmask 64512  }
 0x27f   : > { %v1776_v18 = vpack.c.bf16 %v1774_v49, %v1773_v59  ;;  %v1772_v30 = vsel %vm1752_vm3, %v1740_v13, %v8598_v27  ;;  %v16730_v59 = vld [vmem:[#allocation17_spill] sm:$0xff] }
 0x280   : > { %9269 = vmatpush3.bf16.msra.mxu1 %v11890_v6  ;;  %v1775_v50 = vpack.c.bf16 %v1772_v30, %v1771_v7  ;;  %4519 = vperm.xlu1 %9517, %v11446_v53   ;;  %v16726_v53 = vld [vmem:[#allocation26_spill] sm:$0xff]  ;;  %v12013_v20 = vpop.permute.xlu0 %3835 }
 0x281   : > { %9270 = vmatprep.subr.bf16.mxu1 %v11910_v28  ;;  %16727 = vst [vmem:[#allocation28_spill] sm:$0xff] %v12013_v20  ;;  %v12016_v31 = vpop.permute.xlu1 %3879 }
 0x282   : > { %9282 = vmatprep.mubr.bf16.mxu1 %v1775_v50  ;;  %16729 = vst [vmem:[#allocation26_spill] sm:$0xff] %v12016_v31 }
 0x284   : > { %9271 = vmatpush3.bf16.msra.mxu1 %v11910_v28  ;;  %4527 = vperm.xlu1 %9517, %v11474_v61  }
 0x285   : > { %9272 = vmatprep.subr.bf16.mxu1 %v11921_v0 }
 0x288   : > { %9273 = vmatpush3.bf16.msra.mxu1 %v11921_v0  ;;  %v9304_v8 = vpop.f32.mrb[16].mxu0 }
 0x289   : > { %v1925_v13 = vadd.f32 %v9304_v8, %v16725_v21  ;;  %v1916_v12 = vpop.f32.mrb[17].mxu0  ;;  %9274 = vmatprep.subr.bf16.mxu1 %v11935_v22 }
 0x28a   : > { %v1917_v51 = vadd.f32 %v1916_v12, %v16726_v53  ;;  %v9305_v40 = vpop.f32.mrb[18].mxu0  ;;  %v12021_v53 = vpop.permute.xlu0 %3843 }
 0x28b   : > { %v1937_v43 = vmin.f32 %v1925_v13, 0.0  ;;  %v1928_v61 = vadd.f32 %v9305_v40, %v16728_v54  ;;  %v1919_v4 = vpop.f32.mrb[19].mxu0  ;;  %16731 = vst [vmem:[#allocation19_spill] sm:$0xff] %v12021_v53  ;;  %v12025_v40 = vpop.permute.xlu1 %3887  ;;  %vm1933_vm4 = vcmp.gt.f32.partialorder %v1925_v13, 0.0 }
 0x28c   : > { %v1935_v27 = vmin.f32 %v1917_v51, 0.0  ;;  %v1920_v49 = vadd.f32 %v1919_v4, %v16730_v59  ;;  %9275 = vmatpush3.bf16.msra.mxu1 %v11935_v22  ;;  %16732 = vst [vmem:[#allocation17_spill] sm:$0xff] %v12025_v40  ;;  %vm1931_vm6 = vcmp.gt.f32.partialorder %v1917_v51, 0.0 }
 0x28d   : > { %v1943_v7 = vmul.f32 1.442695, %v1937_v43  ;;  %v1938_v30 = vmin.f32 %v1928_v61, 0.0  ;;  %9276 = vmatprep.subr.bf16.mxu1 %v11952_v2  ;;  %vm1934_vm5 = vcmp.gt.f32.partialorder %v1928_v61, 0.0 }
 0x28e   : > { %v1939_v50 = vmul.f32 1.442695, %v1935_v27  ;;  %v1936_v8 = vmin.f32 %v1920_v49, 0.0  ;;  %v12029_v43 = vpop.permute.xlu0 %3851  ;;  %vm1932_vm7 = vcmp.gt.f32.partialorder %v1920_v49, 0.0 }
 0x28f   : > { %9685 = vpow2.f32 %v1943_v7  ;;  %v1945_v21 = vmul.f32 1.442695, %v1938_v30  ;;  %16733 = vst [vmem:[#allocation177_spill] sm:$0xff] %v12029_v43  ;;  %v12031_v54 = vpop.permute.xlu1 %4087  ;;  %v16746_v43 = vld [vmem:[#allocation25_spill] sm:$0xff] }
 0x290   : > { %9687 = vpow2.f32 %v1939_v50  ;;  %v1941_v12 = vmul.f32 1.442695, %v1936_v8  ;;  %9277 = vmatpush3.bf16.msra.mxu1 %v11952_v2 }
 0x291   : > { %9689 = vpow2.f32 %v1945_v21  ;;  %9278 = vmatprep.subr.bf16.mxu1 %v11963_v44 }
 0x292   : > { %9691 = vpow2.f32 %v1941_v12  ;;  %v12035_v21 = vpop.permute.xlu0 %3859 }
 0x293   : > { %16734 = vst [vmem:[#allocation178_spill] sm:$0xff] %v12035_v21  ;;  %v12039_v31 = vpop.permute.xlu1 %4091 }
 0x294   : > { %9279 = vmatpush3.bf16.msra.mxu1 %v11963_v44 }
 0x295   : > { %9280 = vmatprep.subr.bf16.mxu1 %v11976_v46 }
 0x296   : > { %v12043_v58 = vpop.permute.xlu0 %3867 }
 0x297   : > { %16735 = vst [vmem:[#allocation179_spill] sm:$0xff] %v12043_v58 }
 0x298   : > { %9281 = vmatpush3.bf16.msra.mxu1 %v11976_v46 }
 0x299   : > { %v9686_v4 = vpop.eup %9685  ;;  %9306 = vmatprep.subr.bf16.mxu1 %v11873_v34 }
 0x29a   : > { %v9688_v27 = vpop.eup %9687  ;;  %v8611_v59 = vadd.f32 -1.0, %v9686_v4 }
 0x29b   : > { %v9690_v7 = vpop.eup %9689  ;;  %v8609_v30 = vadd.f32 -1.0, %v9688_v27  ;;  %9283 = vmatmul.mubr.bf16.vlgmr.msra.gmra.mrb[52].mxu1 %v1776_v18 }
 0x29c   : > { %v9692_v50 = vpop.eup %9691  ;;  %v8612_v8 = vadd.f32 -1.0, %v9690_v7  ;;  %9307 = vmatpush3.bf16.msra.mxu1 %v11873_v34  ;;  %v1953_v9 = vsel %vm1933_vm4, %v1925_v13, %v8611_v59  ;;  %v12049_v13 = vpop.permute.xlu0 %3875  ;;  %v16738_v59 = vld [vmem:[#allocation30_spill] sm:$0xff] }
 0x29d   : > { %v8610_v12 = vadd.f32 -1.0, %v9692_v50  ;;  %9308 = vmatprep.subr.bf16.mxu1 %v11890_v6  ;;  %v1951_v27 = vsel %vm1931_vm6, %v1917_v51, %v8609_v30  ;;  %v12045_v50 = vpop.permute.xlu1 %4099  ;;  %16736 = vst [vmem:[#allocation180_spill] sm:$0xff] %v12049_v13  ;;  %v16737_v51 = vld [vmem:[#allocation32_spill] sm:$0xff] }
 0x29e   : > { %v1954_v40 = vsel %vm1934_vm5, %v1928_v61, %v8612_v8 }
 0x29f   : > { %v1956_v4 = vpack.c.bf16 %v1954_v40, %v1953_v9  ;;  %v1952_v18 = vsel %vm1932_vm7, %v1920_v49, %v8610_v12 }
 0x2a0   : > { %9309 = vmatpush3.bf16.msra.mxu1 %v11890_v6  ;;  %v1955_v7 = vpack.c.bf16 %v1952_v18, %v1951_v27  ;;  %v16739_v27 = vld [vmem:[#allocation23_spill] sm:$0xff] }
 0x2a1   : > { %9310 = vmatprep.subr.bf16.mxu1 %v11910_v28  ;;  %v12054_v40 = vpop.permute.xlu1 %4107 }
 0x2a2   : > { %9322 = vmatprep.mubr.bf16.mxu1 %v1955_v7 }
 0x2a4   : > { %9311 = vmatpush3.bf16.msra.mxu1 %v11910_v28 }
 0x2a5   : > { %9312 = vmatprep.subr.bf16.mxu1 %v11921_v0 }
 0x2a8   : > { %9313 = vmatpush3.bf16.msra.mxu1 %v11921_v0  ;;  %v9344_v9 = vpop.f32.mrb[20].mxu0 }
 0x2a9   : > { %v2121_v61 = vadd.f32 %v9344_v9, %v16737_v51  ;;  %v2112_v49 = vpop.f32.mrb[21].mxu0  ;;  %9314 = vmatprep.subr.bf16.mxu1 %v11935_v22  ;;  %v12061_v9 = vpop.permute.xlu0 %3883 }
 0x2aa   : > { %v2113_v30 = vadd.f32 %v2112_v49, %v16738_v59  ;;  %v9345_v8 = vpop.f32.mrb[22].mxu0  ;;  %16741 = vst [vmem:[#allocation32_spill] sm:$0xff] %v12061_v9  ;;  %v12063_v59 = vpop.permute.xlu1 %4115 }
 0x2ab   : > { %v2133_v12 = vmin.f32 %v2121_v61, 0.0  ;;  %v2124_v18 = vadd.f32 %v9345_v8, %v16739_v27  ;;  %v2115_v7 = vpop.f32.mrb[23].mxu0  ;;  %vm2129_vm8 = vcmp.gt.f32.partialorder %v2121_v61, 0.0 }
 0x2ac   : > { %v2131_v42 = vmin.f32 %v2113_v30, 0.0  ;;  %v2116_v13 = vadd.f32 %v2115_v7, %v16740_v41  ;;  %9315 = vmatpush3.bf16.msra.mxu1 %v11935_v22  ;;  %vm2127_vm10 = vcmp.gt.f32.partialorder %v2113_v30, 0.0 }
 0x2ad   : > { %v2139_v19 = vmul.f32 1.442695, %v2133_v12  ;;  %v2134_v37 = vmin.f32 %v2124_v18, 0.0  ;;  %9316 = vmatprep.subr.bf16.mxu1 %v11952_v2  ;;  %v12067_v41 = vpop.permute.xlu0 %4083  ;;  %vm2130_vm9 = vcmp.gt.f32.partialorder %v2124_v18, 0.0 }
 0x2ae   : > { %v2135_v51 = vmul.f32 1.442695, %v2131_v42  ;;  %v2132_v21 = vmin.f32 %v2116_v13, 0.0  ;;  %v12071_v42 = vpop.permute.xlu1 %4123  ;;  %vm2128_vm11 = vcmp.gt.f32.partialorder %v2116_v13, 0.0 }
 0x2af   : > { %9693 = vpow2.f32 %v2139_v19  ;;  %v2141_v49 = vmul.f32 1.442695, %v2134_v37 }
 0x2b0   : > { %9695 = vpow2.f32 %v2135_v51  ;;  %v2137_v8 = vmul.f32 1.442695, %v2132_v21  ;;  %9317 = vmatpush3.bf16.msra.mxu1 %v11952_v2 }
 0x2b1   : > { %9697 = vpow2.f32 %v2141_v49  ;;  %9318 = vmatprep.subr.bf16.mxu1 %v11963_v44  ;;  %v12075_v12 = vpop.permute.xlu0 %4095 }
 0x2b2   : > { %9699 = vpow2.f32 %v2137_v8  ;;  %v12077_v49 = vpop.permute.xlu1 %4131 }
 0x2b4   : > { %9319 = vmatpush3.bf16.msra.mxu1 %v11963_v44 }
 0x2b5   : > { %9320 = vmatprep.subr.bf16.mxu1 %v11976_v46 }
 0x2b8   : > { %9321 = vmatpush3.bf16.msra.mxu1 %v11976_v46 }
 0x2b9   : > { %v9694_v37 = vpop.eup %9693  ;;  %9346 = vmatprep.subr.bf16.mxu1 %v11873_v34 }
 0x2ba   : > { %v9696_v19 = vpop.eup %9695  ;;  %v8623_v21 = vadd.f32 -1.0, %v9694_v37 }
 0x2bb   : > { %v9698_v27 = vpop.eup %9697  ;;  %v8621_v7 = vadd.f32 -1.0, %v9696_v19  ;;  %9323 = vmatmul.mubr.bf16.vlgmr.msra.gmra.mrb[56].mxu1 %v1956_v4  ;;  %v12081_v19 = vpop.permute.xlu0 %4103 }
 0x2bc   : > { %v9700_v51 = vpop.eup %9699  ;;  %v8624_v8 = vadd.f32 -1.0, %v9698_v27  ;;  %9347 = vmatpush3.bf16.msra.mxu1 %v11873_v34  ;;  %v2149_v58 = vsel %vm2129_vm8, %v2121_v61, %v8623_v21  ;;  %v12085_v27 = vpop.permute.xlu1 %4139 }
 0x2bd   : > { %v8622_v9 = vadd.f32 -1.0, %v9700_v51  ;;  %9348 = vmatprep.subr.bf16.mxu1 %v11890_v6  ;;  %v2147_v36 = vsel %vm2127_vm10, %v2113_v30, %v8621_v7  ;;  %v16745_v7 = vld [vmem:[#allocation27_spill] sm:$0xff] }
 0x2be   : > { %v2150_v39 = vsel %vm2130_vm9, %v2124_v18, %v8624_v8 }
 0x2bf   : > { %v2152_v37 = vpack.c.bf16 %v2150_v39, %v2149_v58  ;;  %v2148_v60 = vsel %vm2128_vm11, %v2116_v13, %v8622_v9  ;;  %v12089_v61 = vpop.permute.xlu0 %4111  ;;  %v16743_v39 = vld [vmem:[#allocation36_spill] sm:$0xff] }
 0x2c0   : > { %9349 = vmatpush3.bf16.msra.mxu1 %v11890_v6  ;;  %v2151_v4 = vpack.c.bf16 %v2148_v60, %v2147_v36  ;;  %v12091_v18 = vpop.permute.xlu1 %4147  ;;  %v16744_v60 = vld [vmem:[#allocation34_spill] sm:$0xff] }
 0x2c1   : > { %9350 = vmatprep.subr.bf16.mxu1 %v11910_v28  ;;  %16742 = vst [vmem:[#allocation30_spill] sm:$0xff] %v12091_v18 }
 0x2c2   : > { %9362 = vmatprep.mubr.bf16.mxu1 %v2151_v4 }
 0x2c3   : > { %v12098_v4 = vpop.permute.xlu0 %4119 }
 0x2c4   : > { %9351 = vmatpush3.bf16.msra.mxu1 %v11910_v28 }
 0x2c5   : > { %9352 = vmatprep.subr.bf16.mxu1 %v11921_v0 }
 0x2c8   : > { %9353 = vmatpush3.bf16.msra.mxu1 %v11921_v0  ;;  %v9384_v58 = vpop.f32.mrb[24].mxu0 }
 0x2c9   : > { %v2301_v13 = vadd.f32 %v9384_v58, %v16743_v39  ;;  %v2292_v30 = vpop.f32.mrb[25].mxu0  ;;  %9354 = vmatprep.subr.bf16.mxu1 %v11935_v22  ;;  %v12103_v58 = vpop.permute.xlu1 %4155 }
 0x2ca   : > { %v2293_v36 = vadd.f32 %v2292_v30, %v16744_v60  ;;  %v9385_v9 = vpop.f32.mrb[26].mxu0  ;;  %16747 = vst [vmem:[#allocation23_spill] sm:$0xff] %v12103_v58 }
 0x2cb   : > { %v2313_v21 = vmin.f32 %v2301_v13, 0.0  ;;  %v2304_v51 = vadd.f32 %v9385_v9, %v16745_v7  ;;  %v2295_v8 = vpop.f32.mrb[27].mxu0  ;;  %vm2309_vm12 = vcmp.gt.f32.partialorder %v2301_v13, 0.0 }
 0x2cc   : > { %v2311_v53 = vmin.f32 %v2293_v36, 0.0  ;;  %v2296_v63 = vadd.f32 %v2295_v8, %v16746_v43  ;;  %9355 = vmatpush3.bf16.msra.mxu1 %v11935_v22  ;;  %v12107_v43 = vpop.permute.xlu0 %4127  ;;  %vm2307_vm14 = vcmp.gt.f32.partialorder %v2293_v36, 0.0 }
 0x2cd   : > { %v2319_v48 = vmul.f32 1.442695, %v2313_v21  ;;  %v2314_v18 = vmin.f32 %v2304_v51, 0.0  ;;  %9356 = vmatprep.subr.bf16.mxu1 %v11952_v2  ;;  %v12109_v21 = vpop.permute.xlu1 %4163  ;;  %vm2310_vm13 = vcmp.gt.f32.partialorder %v2304_v51, 0.0 }
 0x2ce   : > { %v2315_v39 = vmul.f32 1.442695, %v2311_v53  ;;  %v2312_v30 = vmin.f32 %v2296_v63, 0.0  ;;  %16748 = vst [vmem:[#allocation21_spill] sm:$0xff] %v12109_v21  ;;  %vm2308_vm15 = vcmp.gt.f32.partialorder %v2296_v63, 0.0 }
 0x2cf   : > { %9701 = vpow2.f32 %v2319_v48  ;;  %v2321_v60 = vmul.f32 1.442695, %v2314_v18 }
 0x2d0   : > { %9703 = vpow2.f32 %v2315_v39  ;;  %v2317_v9 = vmul.f32 1.442695, %v2312_v30  ;;  %9357 = vmatpush3.bf16.msra.mxu1 %v11952_v2  ;;  %v12113_v53 = vpop.permute.xlu0 %4135 }
 0x2d1   : > { %9705 = vpow2.f32 %v2321_v60  ;;  %9358 = vmatprep.subr.bf16.mxu1 %v11963_v44  ;;  %16749 = vst [vmem:[#allocation36_spill] sm:$0xff] %v12113_v53  ;;  %v12117_v7 = vpop.permute.xlu1 %4171 }
 0x2d2   : > { %9707 = vpow2.f32 %v2317_v9  ;;  %16750 = vst [vmem:[#allocation34_spill] sm:$0xff] %v12117_v7 }
 0x2d4   : > { %9359 = vmatpush3.bf16.msra.mxu1 %v11963_v44  ;;  %v12121_v17 = vpop.permute.xlu0 %4143 }
 0x2d5   : > { %9360 = vmatprep.subr.bf16.mxu1 %v11976_v46 }
 0x2d8   : > { %9361 = vmatpush3.bf16.msra.mxu1 %v11976_v46 }
 0x2d9   : > { %v9702_v48 = vpop.eup %9701  ;;  %9386 = vmatprep.subr.bf16.mxu1 %v11873_v34 }
 0x2da   : > { %v9704_v18 = vpop.eup %9703  ;;  %v8635_v8 = vadd.f32 -1.0, %v9702_v48 }
 0x2db   : > { %v9706_v39 = vpop.eup %9705  ;;  %v8633_v30 = vadd.f32 -1.0, %v9704_v18  ;;  %9363 = vmatmul.mubr.bf16.vlgmr.msra.gmra.mrb[60].mxu1 %v2152_v37  ;;  %v12123_v18 = vpop.permute.xlu1 %4179 }
 0x2dc   : > { %v9708_v60 = vpop.eup %9707  ;;  %v8636_v9 = vadd.f32 -1.0, %v9706_v39  ;;  %9387 = vmatpush3.bf16.msra.mxu1 %v11873_v34  ;;  %v2329_v58 = vsel %vm2309_vm12, %v2301_v13, %v8635_v8  ;;  %v12127_v34 = vpop.permute.xlu0 %4151 }
 0x2dd   : > { %v8634_v21 = vadd.f32 -1.0, %v9708_v60  ;;  %9388 = vmatprep.subr.bf16.mxu1 %v11890_v6  ;;  %v2327_v48 = vsel %vm2307_vm14, %v2293_v36, %v8633_v30 }
 0x2de   : > { %v2330_v20 = vsel %vm2310_vm13, %v2304_v51, %v8636_v9 }
 0x2df   : > { %v2332_v7 = vpack.c.bf16 %v2330_v20, %v2329_v58  ;;  %v2328_v53 = vsel %vm2308_vm15, %v2296_v63, %v8634_v21  ;;  %v12131_v13 = vpop.permute.xlu1 %4187 }
 0x2e0   : > { %9389 = vmatpush3.bf16.msra.mxu1 %v11890_v6  ;;  %v2331_v37 = vpack.c.bf16 %v2328_v53, %v2327_v48  ;;  %v12135_v63 = vpop.permute.xlu0 %4159  ;;  %v16751_v53 = vld [vmem:[#allocation139_spill] sm:$0xff] }
 0x2e1   : > { %9390 = vmatprep.subr.bf16.mxu1 %v11910_v28 }
 0x2e2   : > { %9402 = vmatprep.mubr.bf16.mxu1 %v2331_v37 }
 0x2e3   : > { %v12137_v20 = vpop.permute.xlu1 %4195 }
 0x2e4   : > { %9391 = vmatpush3.bf16.msra.mxu1 %v11910_v28  ;;  %v12142_v36 = vpop.permute.xlu0 %4167 }
 0x2e5   : > { %9392 = vmatprep.subr.bf16.mxu1 %v11921_v0 }
 0x2e8   : > { %9393 = vmatpush3.bf16.msra.mxu1 %v11921_v0  ;;  %v12153_v58 = vpop.permute.xlu0 %4175 }
 0x2e9   : > { %9394 = vmatprep.subr.bf16.mxu1 %v11935_v22 }
 0x2ec   : > { %9395 = vmatpush3.bf16.msra.mxu1 %v11935_v22  ;;  %v12148_v22 = vpop.permute.xlu1 %4203  ;;  %v12162_v9 = vpop.permute.xlu0 %4183 }
 0x2ed   : > { %9396 = vmatprep.subr.bf16.mxu1 %v11952_v2 }
 0x2ee   : > { %v9124_v6 = vpop.f32.mrb[36].mxu1 }
 0x2ef   : > { %1076 = vst.msk [vmem:[#allocation2 + $0x10] sm:$0xff] %vm1073_vm0, %v9124_v6  ;;  %v1058_v28 = vpop.f32.mrb[37].mxu1 }
 0x2f0   : > { %1074 = vst.msk [vmem:[#allocation2] sm:$0xff] %vm1073_vm0, %v1058_v28  ;;  %9397 = vmatpush3.bf16.msra.mxu1 %v11952_v2  ;;  %v9125_v0 = vpop.f32.mrb[38].mxu1  ;;  %v16752_v2 = vld [vmem:[#allocation98_spill] sm:$0xff]  ;;  %v4404_v30 = vpop.permute.xlu1 %4403 }
 0x2f1   : > { %1077 = vst.msk [vmem:[#allocation2 + $0x18] sm:$0xff] %vm1073_vm0, %v9125_v0  ;;  %v1061_v51 = vpop.f32.mrb[39].mxu1  ;;  %9398 = vmatprep.subr.bf16.mxu1 %v11963_v44  ;;  %v16754_v28 = vld [vmem:[#allocation102_spill] sm:$0xff] }
 0x2f2   : > { %1075 = vst.msk [vmem:[#allocation2 + $0x8] sm:$0xff] %vm1073_vm0, %v1061_v51 }
 0x2f4   : > { %9399 = vmatpush3.bf16.msra.mxu1 %v11963_v44  ;;  %v4412_v48 = vpop.permute.xlu1 %4411 }
 0x2f5   : > { %9400 = vmatprep.subr.bf16.mxu1 %v11976_v46 }
 0x2f6   : > { %v2388_v21 = vld [vmem:[#allocation2 + $0x10] sm:$0xff] }
 0x2f7   : > { %v3252_v8 = vmul.f32 %v16751_v53, %v2388_v21  ;;  %v2932_v39 = vmul.f32 %v16752_v2, %v2388_v21  ;;  %v3892_v44 = vmul.f32 %v11817_v52, %v2388_v21  ;;  %v3572_v60 = vmul.f32 %v11642_v33, %v2388_v21  ;;  %v2386_v6 = vld [vmem:[#allocation2] sm:$0xff]  ;;  %v12169_v52 = vpop.permute.xlu0 %4191  ;;  %v16753_v33 = vld [vmem:[#allocation137_spill] sm:$0xff] }
 0x2f8   : > { %9401 = vmatpush3.bf16.msra.mxu1 %v11976_v46  ;;  %v4532_v37 = vmul.f32 %v4412_v48, %v2388_v21  ;;  %v4212_v46 = vmul.f32 %v12039_v31, %v2388_v21  ;;  %v2930_v0 = vmul.f32 %v16754_v28, %v2386_v6  ;;  %v3890_v51 = vmul.f32 %v11808_v14, %v2386_v6  ;;  %v2389_v2 = vld [vmem:[#allocation2 + $0x18] sm:$0xff] }
 0x2f9   : > { %3318 = vrot.lane.b32.xlu0 %v3252_v8, %s10065_s29  ;;  %2998 = vrot.lane.b32.xlu1 %v2932_v39, %s10065_s29  ;;  %v3570_v31 = vmul.f32 %v11637_v47, %v2386_v6  ;;  %v4530_v53 = vmul.f32 %v4404_v30, %v2386_v6  ;;  %v4210_v8 = vmul.f32 %v12067_v41, %v2386_v6  ;;  %v16755_v14 = vld [vmem:[#allocation141_spill] sm:$0xff] }
 0x2fa   : > { %v16756_v48 = vld [vmem:[#allocation105_spill] sm:$0xff] }
 0x2fb   : > { %9403 = vmatmul.mubr.bf16.vlgmr.msra.gmra.mrb[64].mxu1 %v2332_v7  ;;  %v3250_v7 = vmul.f32 %v16753_v33, %v2386_v6  ;;  %v12177_v21 = vpop.permute.xlu0 %4199  ;;  %v4416_v6 = vpop.permute.xlu1 %4415  ;;  %v3893_v33 = vmul.f32 %v11825_v26, %v2389_v2  ;;  %v16758_v26 = vld [vmem:[#allocation95_spill] sm:$0xff] }
 0x2fc   : > { %v4533_v28 = vmul.f32 %v4416_v6, %v2389_v2  ;;  %v16759_v6 = vld [vmem:[#allocation104_spill] sm:$0xff] }
 0x2fd   : > { %3958 = vrot.lane.b32.xlu0 %v3892_v44, %s10066_s11  ;;  %3638 = vrot.lane.b32.xlu1 %v3572_v60, %s10066_s11  ;;  %v3253_v60 = vmul.f32 %v16755_v14, %v2389_v2 }
 0x2ff   : > { %v12184_v39 = vpop.permute.xlu0 %4207 }
 0x301   : > { %4598 = vrot.lane.b32.xlu0 %v4532_v37, %s10067_s13  ;;  %4278 = vrot.lane.b32.xlu1 %v4212_v46, %s10067_s13  ;;  %v2933_v37 = vmul.f32 %v16756_v48, %v2389_v2 }
 0x303   : > { %v4408_v46 = vpop.permute.xlu0 %4407 }
 0x305   : > { %3314 = vrot.lane.b32.xlu0 %v3250_v7, %s10065_s29  ;;  %2994 = vrot.lane.b32.xlu1 %v2930_v0, %s10065_s29  ;;  %v3573_v7 = vmul.f32 %v11652_v23, %v2389_v2  ;;  %v4213_v0 = vmul.f32 %v12075_v12, %v2389_v2 }
 0x309   : > { %3954 = vrot.lane.b32.xlu0 %v3890_v51, %s10066_s11  ;;  %3634 = vrot.lane.b32.xlu1 %v3570_v31, %s10066_s11  ;;  %v4420_v51 = vpop.permute.xlu0 %4419  ;;  %v2387_v31 = vld [vmem:[#allocation2 + $0x8] sm:$0xff] }
 0x30a   : > { %v3891_v12 = vmul.f32 %v11876_v10, %v2387_v31  ;;  %v3571_v2 = vmul.f32 %v11633_v25, %v2387_v31  ;;  %v4211_v48 = vmul.f32 %v12031_v54, %v2387_v31 }
 0x30d   : > { %4594 = vrot.lane.b32.xlu0 %v4530_v53, %s10067_s13  ;;  %4274 = vrot.lane.b32.xlu1 %v4210_v8, %s10067_s13  ;;  %v12199_v53 = vpop.permute.xlu1 %4423  ;;  %v16757_v8 = vld [vmem:[#allocation142_spill] sm:$0xff]  ;;  %v4428_v23 = vpop.permute.xlu0 %4427 }
 0x30e   : > { %v9164_v44 = vpop.f32.mrb[40].mxu1 }
 0x30f   : > { %1256 = vst.msk [vmem:[#allocation2 + $0x30] sm:$0xff] %vm1073_vm0, %v9164_v44  ;;  %v1239_v47 = vpop.f32.mrb[41].mxu1  ;;  %v3251_v44 = vmul.f32 %v16757_v8, %v2387_v31 }
 0x310   : > { %1254 = vst.msk [vmem:[#allocation2 + $0x20] sm:$0xff] %vm1073_vm0, %v1239_v47  ;;  %v9165_v30 = vpop.f32.mrb[42].mxu1  ;;  %v2931_v47 = vmul.f32 %v16758_v26, %v2387_v31 }
 0x311   : > { %1257 = vst.msk [vmem:[#allocation2 + $0x38] sm:$0xff] %vm1073_vm0, %v9165_v30  ;;  %v1242_v41 = vpop.f32.mrb[43].mxu1  ;;  %3320 = vrot.lane.b32.xlu1 %v3253_v60, %s10065_s29  ;;  %3000 = vrot.lane.b32.xlu0 %v2933_v37, %s10065_s29  ;;  %v12207_v14 = vpop.permute.xlu1 %4431  ;;  %v4531_v60 = vmul.f32 %v4408_v46, %v2387_v31 }
 0x312   : > { %1255 = vst.msk [vmem:[#allocation2 + $0x28] sm:$0xff] %vm1073_vm0, %v1242_v41  ;;  %v12214_v37 = vpop.permute.xlu0 %4435 }
 0x315   : > { %3960 = vrot.lane.b32.xlu1 %v3893_v33, %s10066_s11  ;;  %3640 = vrot.lane.b32.xlu0 %v3573_v7, %s10066_s11  ;;  %v12216_v41 = vpop.permute.xlu1 %4439  ;;  %v16760_v33 = vld [vmem:[#allocation146_spill] sm:$0xff] }
 0x316   : > { %v2392_v30 = vld [vmem:[#allocation2 + $0x30] sm:$0xff]  ;;  %v12224_v46 = vpop.permute.xlu0 %4443 }
 0x317   : > { %v2936_v10 = vmul.f32 %v16759_v6, %v2392_v30  ;;  %v3256_v25 = vmul.f32 %v16760_v33, %v2392_v30  ;;  %v3576_v7 = vmul.f32 %v11670_v56, %v2392_v30  ;;  %v4216_v8 = vmul.f32 %v12054_v40, %v2392_v30 }
 0x319   : > { %4600 = vrot.lane.b32.xlu1 %v4533_v28, %s10067_s13  ;;  %4280 = vrot.lane.b32.xlu0 %v4213_v0, %s10067_s13  ;;  %v12226_v54 = vpop.permute.xlu1 %4447  ;;  %v3896_v28 = vmul.f32 %v11924_v57, %v2392_v30 }
 0x31a   : > { %v12234_v26 = vpop.permute.xlu0 %4451 }
 0x31d   : > { %3316 = vrot.lane.b32.xlu1 %v3251_v44, %s10065_s29  ;;  %2996 = vrot.lane.b32.xlu0 %v2931_v47, %s10065_s29  ;;  %v4536_v44 = vmul.f32 %v4428_v23, %v2392_v30  ;;  %v2390_v47 = vld [vmem:[#allocation2 + $0x20] sm:$0xff]  ;;  %v12237_v56 = vpop.permute.xlu1 %4455  ;;  %v16762_v23 = vld [vmem:[#allocation144_spill] sm:$0xff] }
 0x31e   : > { %v3574_v6 = vmul.f32 %v11660_v29, %v2390_v47  ;;  %v4214_v33 = vmul.f32 %v12045_v50, %v2390_v47 }
 0x321   : > { %3956 = vrot.lane.b32.xlu1 %v3891_v12, %s10066_s11  ;;  %3636 = vrot.lane.b32.xlu0 %v3571_v2, %s10066_s11  ;;  %v16761_v2 = vld [vmem:[#allocation101_spill] sm:$0xff]  ;;  %v12249_v30 = vpop.permute.xlu1 %4463 }
 0x322   : > { %v2934_v40 = vmul.f32 %v16761_v2, %v2390_v47 }
 0x325   : > { %4596 = vrot.lane.b32.xlu1 %v4531_v60, %s10067_s13  ;;  %4276 = vrot.lane.b32.xlu0 %v4211_v48, %s10067_s13  ;;  %v3254_v60 = vmul.f32 %v16762_v23, %v2390_v47  ;;  %v12247_v48 = vpop.permute.xlu0 %4459 }
 0x329   : > { %3006 = vrot.lane.b32.xlu1 %v2936_v10, %s10065_s29  ;;  %3326 = vrot.lane.b32.xlu0 %v3256_v25, %s10065_s29  ;;  %v3894_v10 = vmul.f32 %v11904_v5, %v2390_v47  ;;  %v4534_v25 = vmul.f32 %v4420_v51, %v2390_v47 }
 0x32d   : > { %3646 = vrot.lane.b32.xlu1 %v3576_v7, %s10066_s11  ;;  %3966 = vrot.lane.b32.xlu0 %v3896_v28, %s10066_s11  ;;  %v12256_v7 = vpop.permute.xlu0 %4467  ;;  %v2393_v28 = vld [vmem:[#allocation2 + $0x38] sm:$0xff] }
 0x32e   : > { %v9204_v0 = vpop.f32.mrb[44].mxu1  ;;  %v3897_v51 = vmul.f32 %v11849_v24, %v2393_v28  ;;  %v3577_v47 = vmul.f32 %v11688_v16, %v2393_v28  ;;  %v16765_v24 = vld [vmem:[#allocation143_spill] sm:$0xff]  ;;  %v16766_v16 = vld [vmem:[#allocation109_spill] sm:$0xff] }
 0x32f   : > { %1452 = vst.msk [vmem:[#allocation2 + $0x50] sm:$0xff] %vm1073_vm0, %v9204_v0  ;;  %v1435_v31 = vpop.f32.mrb[45].mxu1  ;;  %v12258_v0 = vpop.permute.xlu1 %4471 }
 0x330   : > { %1450 = vst.msk [vmem:[#allocation2 + $0x40] sm:$0xff] %vm1073_vm0, %v1435_v31  ;;  %v9205_v12 = vpop.f32.mrb[46].mxu1  ;;  %v16763_v31 = vld [vmem:[#allocation145_spill] sm:$0xff] }
 0x331   : > { %1453 = vst.msk [vmem:[#allocation2 + $0x58] sm:$0xff] %vm1073_vm0, %v9205_v12  ;;  %v1438_v57 = vpop.f32.mrb[47].mxu1  ;;  %4286 = vrot.lane.b32.xlu1 %v4216_v8, %s10067_s13  ;;  %4606 = vrot.lane.b32.xlu0 %v4536_v44, %s10067_s13  ;;  %v3257_v29 = vmul.f32 %v16763_v31, %v2393_v28  ;;  %v16764_v8 = vld [vmem:[#allocation113_spill] sm:$0xff]  ;;  %v12266_v44 = vpop.permute.xlu0 %4475  ;;  %v4537_v12 = vmul.f32 %v12207_v14, %v2393_v28 }
 0x332   : > { %1451 = vst.msk [vmem:[#allocation2 + $0x48] sm:$0xff] %vm1073_vm0, %v1438_v57  ;;  %v2937_v5 = vmul.f32 %v16764_v8, %v2393_v28  ;;  %v4217_v57 = vmul.f32 %v12089_v61, %v2393_v28 }
 0x333   : > { %v12268_v50 = vpop.permute.xlu1 %4479 }
 0x335   : > { %3002 = vrot.lane.b32.xlu1 %v2934_v40, %s10065_s29  ;;  %3322 = vrot.lane.b32.xlu0 %v3254_v60, %s10065_s29  ;;  %v12276_v2 = vpop.permute.xlu0 %4483  ;;  %v2391_v40 = vld [vmem:[#allocation2 + $0x28] sm:$0xff] }
 0x336   : > { %v3255_v60 = vmul.f32 %v16765_v24, %v2391_v40  ;;  %v3575_v28 = vmul.f32 %v11664_v55, %v2391_v40  ;;  %v4535_v8 = vmul.f32 %v12199_v53, %v2391_v40 }
 0x337   : > { %v12278_v23 = vpop.permute.xlu1 %4487 }
 0x339   : > { %3642 = vrot.lane.b32.xlu1 %v3574_v6, %s10066_s11  ;;  %3962 = vrot.lane.b32.xlu0 %v3894_v10, %s10066_s11  ;;  %v2935_v6 = vmul.f32 %v16766_v16, %v2391_v40  ;;  %v12286_v14 = vpop.permute.xlu0 %4491 }
 0x33b   : > { %v12288_v10 = vpop.permute.xlu1 %4495 }
 0x33d   : > { %4282 = vrot.lane.b32.xlu1 %v4214_v33, %s10067_s13  ;;  %4602 = vrot.lane.b32.xlu0 %v4534_v25, %s10067_s13  ;;  %v3895_v25 = vmul.f32 %v11839_v3, %v2391_v40  ;;  %v12302_v55 = vpop.permute.xlu0 %4499 }
 0x33f   : > { %v12300_v3 = vpop.permute.xlu1 %4503 }
 0x341   : > { %3328 = vrot.lane.b32.xlu1 %v3257_v29, %s10065_s29  ;;  %3008 = vrot.lane.b32.xlu0 %v2937_v5, %s10065_s29  ;;  %v4215_v5 = vmul.f32 %v12081_v19, %v2391_v40  ;;  %v12312_v19 = vpop.permute.xlu0 %4507  ;;  %v16769_v40 = vld [vmem:[#allocation7_spill] sm:$0xff] }
 0x343   : > { %v12310_v53 = vpop.permute.xlu1 %4511 }
 0x345   : > { %3968 = vrot.lane.b32.xlu1 %v3897_v51, %s10066_s11  ;;  %3648 = vrot.lane.b32.xlu0 %v3577_v47, %s10066_s11  ;;  %v2396_v51 = vld [vmem:[#allocation2 + $0x50] sm:$0xff] }
 0x346   : > { %v16767_v47 = vld [vmem:[#allocation112_spill] sm:$0xff]  ;;  %v3900_v16 = vmul.f32 %v11966_v32, %v2396_v51 }
 0x347   : > { %v16771_v32 = vld [vmem:[#allocation148_spill] sm:$0xff] }
 0x349   : > { %4608 = vrot.lane.b32.xlu1 %v4537_v12, %s10067_s13  ;;  %4288 = vrot.lane.b32.xlu0 %v4217_v57, %s10067_s13  ;;  %v2940_v12 = vmul.f32 %v16767_v47, %v2396_v51  ;;  %v16768_v57 = vld [vmem:[#allocation150_spill] sm:$0xff] }
 0x34a   : > { %v3260_v24 = vmul.f32 %v16768_v57, %v2396_v51 }
 0x34d   : > { %3324 = vrot.lane.b32.xlu1 %v3255_v60, %s10065_s29  ;;  %3004 = vrot.lane.b32.xlu0 %v2935_v6, %s10065_s29  ;;  %v3580_v60 = vmul.f32 %v16769_v40, %v2396_v51  ;;  %v4220_v6 = vmul.f32 %v12071_v42, %v2396_v51 }
 0x34e   : > { %v9244_v61 = vpop.f32.mrb[48].mxu1 }
 0x34f   : > { %1632 = vst.msk [vmem:[#allocation2 + $0x70] sm:$0xff] %vm1073_vm0, %v9244_v61  ;;  %v1615_v33 = vpop.f32.mrb[49].mxu1  ;;  %v4540_v61 = vmul.f32 %v12224_v46, %v2396_v51 }
 0x350   : > { %1630 = vst.msk [vmem:[#allocation2 + $0x60] sm:$0xff] %vm1073_vm0, %v1615_v33  ;;  %v9245_v31 = vpop.f32.mrb[50].mxu1  ;;  %v2394_v33 = vld [vmem:[#allocation2 + $0x40] sm:$0xff] }
 0x351   : > { %1633 = vst.msk [vmem:[#allocation2 + $0x78] sm:$0xff] %vm1073_vm0, %v9245_v31  ;;  %v1618_v29 = vpop.f32.mrb[51].mxu1  ;;  %3964 = vrot.lane.b32.xlu1 %v3895_v25, %s10066_s11  ;;  %3644 = vrot.lane.b32.xlu0 %v3575_v28, %s10066_s11  ;;  %v12320_v25 = vpop.permute.xlu1 %4519  ;;  %v16770_v31 = vld [vmem:[#allocation108_spill] sm:$0xff]  ;;  %v3898_v47 = vmul.f32 %v11946_v38, %v2394_v33  ;;  %v4538_v40 = vmul.f32 %v12214_v37, %v2394_v33 }
 0x352   : > { %1631 = vst.msk [vmem:[#allocation2 + $0x68] sm:$0xff] %vm1073_vm0, %v1618_v29  ;;  %v12322_v28 = vpop.permute.xlu0 %4515  ;;  %v2938_v29 = vmul.f32 %v16770_v31, %v2394_v33 }
 0x355   : > { %4604 = vrot.lane.b32.xlu1 %v4535_v8, %s10067_s13  ;;  %4284 = vrot.lane.b32.xlu0 %v4215_v5, %s10067_s13  ;;  %v3258_v8 = vmul.f32 %v16771_v32, %v2394_v33  ;;  %v12330_v42 = vpop.permute.xlu1 %4527  ;;  %v16772_v5 = vld [vmem:[#allocation11_spill] sm:$0xff] }
 0x356   : > { %v12332_v46 = vpop.permute.xlu0 %4523  ;;  %v3578_v51 = vmul.f32 %v16772_v5, %v2394_v33 }
 0x359   : > { %3014 = vrot.lane.b32.xlu1 %v2940_v12, %s10065_s29  ;;  %3334 = vrot.lane.b32.xlu0 %v3260_v24, %s10065_s29  ;;  %v4218_v24 = vmul.f32 %v12063_v59, %v2394_v33 }
 0x35d   : > { %3654 = vrot.lane.b32.xlu1 %v3580_v60, %s10066_s11  ;;  %3974 = vrot.lane.b32.xlu0 %v3900_v16, %s10066_s11  ;;  %v2397_v60 = vld [vmem:[#allocation2 + $0x58] sm:$0xff] }
 0x35e   : > { %v3901_v5 = vmul.f32 %v11863_v62, %v2397_v60 }
 0x361   : > { %4294 = vrot.lane.b32.xlu1 %v4220_v6, %s10067_s13  ;;  %4614 = vrot.lane.b32.xlu0 %v4540_v61, %s10067_s13  ;;  %v16776_v61 = vld [vmem:[#allocation149_spill] sm:$0xff] }
 0x362   : > { %v3261_v31 = vmul.f32 %v16776_v61, %v2397_v60  ;;  %v2395_v61 = vld [vmem:[#allocation2 + $0x48] sm:$0xff] }
 0x365   : > { %3010 = vrot.lane.b32.xlu1 %v2938_v29, %s10065_s29  ;;  %3330 = vrot.lane.b32.xlu0 %v3258_v8, %s10065_s29  ;;  %v16777_v29 = vld [vmem:[#allocation119_spill] sm:$0xff] }
 0x366   : > { %v2941_v32 = vmul.f32 %v16777_v29, %v2397_v60  ;;  %v16785_v29 = vld [vmem:[#allocation147_spill] sm:$0xff] }
 0x369   : > { %3650 = vrot.lane.b32.xlu1 %v3578_v51, %s10066_s11  ;;  %3970 = vrot.lane.b32.xlu0 %v3898_v47, %s10066_s11  ;;  %v16780_v51 = vld [vmem:[#allocation171_spill] sm:$0xff] }
 0x36a   : > { %v3581_v47 = vmul.f32 %v16780_v51, %v2397_v60 }
 0x36b   : > { %v12338_v12 = vpop.permute.xlu0 %3318  ;;  %v12340_v57 = vpop.permute.xlu1 %2998 }
 0x36c   : > { %16773 = vst [vmem:[#allocation27_spill] sm:$0xff] %v12338_v12  ;;  %16774 = vst [vmem:[#allocation25_spill] sm:$0xff] %v12340_v57 }
 0x36d   : > { %4290 = vrot.lane.b32.xlu1 %v4218_v24, %s10067_s13  ;;  %4610 = vrot.lane.b32.xlu0 %v4538_v40, %s10067_s13 }
 0x36e   : > { %v9284_v16 = vpop.f32.mrb[52].mxu1 }
 0x36f   : > { %1828 = vst.msk [vmem:[#allocation2 + $0x90] sm:$0xff] %vm1073_vm0, %v9284_v16  ;;  %v1811_v38 = vpop.f32.mrb[53].mxu1  ;;  %v12347_v6 = vpop.permute.xlu0 %3958  ;;  %v4541_v16 = vmul.f32 %v12226_v54, %v2397_v60  ;;  %v3899_v54 = vmul.f32 %v11857_v15, %v2395_v61 }
 0x370   : > { %16775 = vst [vmem:[#allocation139_spill] sm:$0xff] %v12347_v6  ;;  %1826 = vst.msk [vmem:[#allocation2 + $0x80] sm:$0xff] %vm1073_vm0, %v1811_v38  ;;  %v12352_v59 = vpop.permute.xlu1 %3638  ;;  %v9285_v37 = vpop.f32.mrb[54].mxu1  ;;  %v4221_v38 = vmul.f32 %v12107_v43, %v2397_v60  ;;  %v16789_v60 = vld [vmem:[#allocation6_spill] sm:$0xff] }
 0x371   : > { %16778 = vst [vmem:[#allocation98_spill] sm:$0xff] %v12352_v59  ;;  %1829 = vst.msk [vmem:[#allocation2 + $0x98] sm:$0xff] %vm1073_vm0, %v9285_v37  ;;  %v1814_v33 = vpop.f32.mrb[55].mxu1  ;;  %3336 = vrot.lane.b32.xlu1 %v3261_v31, %s10065_s29  ;;  %3016 = vrot.lane.b32.xlu0 %v2941_v32, %s10065_s29  ;;  %v3259_v32 = vmul.f32 %v16785_v29, %v2395_v61  ;;  %v16786_v37 = vld [vmem:[#allocation116_spill] sm:$0xff]  ;;  %v3579_v51 = vmul.f32 %v16789_v60, %v2395_v61 }
 0x372   : > { %1827 = vst.msk [vmem:[#allocation2 + $0x88] sm:$0xff] %vm1073_vm0, %v1814_v33  ;;  %v2939_v33 = vmul.f32 %v16786_v37, %v2395_v61  ;;  %v4219_v29 = vmul.f32 %v12098_v4, %v2395_v61 }
 0x373   : > { %v12358_v8 = vpop.permute.xlu0 %4598 }
 0x374   : > { %16779 = vst [vmem:[#allocation137_spill] sm:$0xff] %v12358_v8  ;;  %v12362_v24 = vpop.permute.xlu1 %4278 }
 0x375   : > { %16781 = vst [vmem:[#allocation102_spill] sm:$0xff] %v12362_v24  ;;  %3976 = vrot.lane.b32.xlu1 %v3901_v5, %s10066_s11  ;;  %3656 = vrot.lane.b32.xlu0 %v3581_v47, %s10066_s11 }
 0x377   : > { %v12366_v40 = vpop.permute.xlu0 %3314 }
 0x378   : > { %16782 = vst [vmem:[#allocation141_spill] sm:$0xff] %v12366_v40  ;;  %v12370_v31 = vpop.permute.xlu1 %2994 }
 0x379   : > { %16783 = vst [vmem:[#allocation105_spill] sm:$0xff] %v12370_v31  ;;  %4616 = vrot.lane.b32.xlu1 %v4541_v16, %s10067_s13  ;;  %4296 = vrot.lane.b32.xlu0 %v4221_v38, %s10067_s13  ;;  %v4539_v38 = vmul.f32 %v12216_v41, %v2395_v61  ;;  %v16798_v41 = vld [vmem:[#allocation111_spill] sm:$0xff] }
 0x37b   : > { %v12374_v62 = vpop.permute.xlu0 %3954 }
 0x37c   : > { %16784 = vst [vmem:[#allocation142_spill] sm:$0xff] %v12374_v62  ;;  %v12378_v5 = vpop.permute.xlu1 %3634 }
 0x37d   : > { %16787 = vst [vmem:[#allocation95_spill] sm:$0xff] %v12378_v5  ;;  %3332 = vrot.lane.b32.xlu1 %v3259_v32, %s10065_s29  ;;  %3012 = vrot.lane.b32.xlu0 %v2939_v33, %s10065_s29  ;;  %v2400_v32 = vld [vmem:[#allocation2 + $0x70] sm:$0xff]  ;;  %v16794_v33 = vld [vmem:[#allocation118_spill] sm:$0xff] }
 0x37e   : > { %v2944_v60 = vmul.f32 %v16794_v33, %v2400_v32  ;;  %v3584_v61 = vmul.f32 %v16798_v41, %v2400_v32 }
 0x37f   : > { %v12382_v43 = vpop.permute.xlu0 %4594 }
 0x380   : > { %16788 = vst [vmem:[#allocation104_spill] sm:$0xff] %v12382_v43  ;;  %v12386_v47 = vpop.permute.xlu1 %4274 }
 0x381   : > { %16790 = vst [vmem:[#allocation146_spill] sm:$0xff] %v12386_v47  ;;  %3972 = vrot.lane.b32.xlu1 %v3899_v54, %s10066_s11  ;;  %3652 = vrot.lane.b32.xlu0 %v3579_v51, %s10066_s11  ;;  %v16795_v54 = vld [vmem:[#allocation154_spill] sm:$0xff] }
 0x382   : > { %v3264_v24 = vmul.f32 %v16795_v54, %v2400_v32 }
 0x383   : > { %v12390_v16 = vpop.permute.xlu0 %3000 }
 0x384   : > { %16791 = vst [vmem:[#allocation101_spill] sm:$0xff] %v12390_v16  ;;  %v12394_v37 = vpop.permute.xlu1 %3320 }
 0x385   : > { %16792 = vst [vmem:[#allocation144_spill] sm:$0xff] %v12394_v37  ;;  %4612 = vrot.lane.b32.xlu1 %v4539_v38, %s10067_s13  ;;  %4292 = vrot.lane.b32.xlu0 %v4219_v29, %s10067_s13  ;;  %v3904_v38 = vmul.f32 %v11994_v45, %v2400_v32 }
 0x387   : > { %v12398_v15 = vpop.permute.xlu0 %3640 }
 0x388   : > { %16793 = vst [vmem:[#allocation145_spill] sm:$0xff] %v12398_v15  ;;  %v12402_v51 = vpop.permute.xlu1 %3960 }
 0x389   : > { %16796 = vst [vmem:[#allocation113_spill] sm:$0xff] %v12402_v51  ;;  %3022 = vrot.lane.b32.xlu1 %v2944_v60, %s10065_s29  ;;  %3342 = vrot.lane.b32.xlu0 %v3264_v24, %s10065_s29  ;;  %v4224_v24 = vmul.f32 %v12085_v27, %v2400_v32  ;;  %v4544_v60 = vmul.f32 %v12247_v48, %v2400_v32  ;;  %v16803_v27 = vld [vmem:[#allocation115_spill] sm:$0xff]  ;;  %v16804_v48 = vld [vmem:[#allocation152_spill] sm:$0xff] }
 0x38b   : > { %v12406_v4 = vpop.permute.xlu0 %4280 }
 0x38c   : > { %16797 = vst [vmem:[#allocation143_spill] sm:$0xff] %v12406_v4  ;;  %v12410_v59 = vpop.permute.xlu1 %4600  ;;  %v2398_v4 = vld [vmem:[#allocation2 + $0x60] sm:$0xff] }
 0x38d   : > { %16799 = vst [vmem:[#allocation109_spill] sm:$0xff] %v12410_v59  ;;  %3662 = vrot.lane.b32.xlu1 %v3584_v61, %s10066_s11  ;;  %3982 = vrot.lane.b32.xlu0 %v3904_v38, %s10066_s11  ;;  %v3262_v32 = vmul.f32 %v16804_v48, %v2398_v4  ;;  %v12446_v48 = vld [vmem:[#allocation2 + $0x78] sm:$0xff] }
 0x38e   : > { %v9324_v29 = vpop.f32.mrb[56].mxu1 }
 0x38f   : > { %2008 = vst.msk [vmem:[#allocation2 + $0xb0] sm:$0xff] %vm1073_vm0, %v9324_v29  ;;  %v1991_v33 = vpop.f32.mrb[57].mxu1  ;;  %v12415_v54 = vpop.permute.xlu0 %2996  ;;  %v2942_v29 = vmul.f32 %v16803_v27, %v2398_v4  ;;  %v4222_v27 = vmul.f32 %v12077_v49, %v2398_v4 }
 0x390   : > { %16800 = vst [vmem:[#allocation112_spill] sm:$0xff] %v12415_v54  ;;  %2006 = vst.msk [vmem:[#allocation2 + $0xa0] sm:$0xff] %vm1073_vm0, %v1991_v33  ;;  %v9325_v45 = vpop.f32.mrb[58].mxu1  ;;  %v12420_v41 = vpop.permute.xlu1 %3316 }
 0x391   : > { %16801 = vst [vmem:[#allocation150_spill] sm:$0xff] %v12420_v41  ;;  %2009 = vst.msk [vmem:[#allocation2 + $0xb8] sm:$0xff] %vm1073_vm0, %v9325_v45  ;;  %v1994_v61 = vpop.f32.mrb[59].mxu1  ;;  %4302 = vrot.lane.b32.xlu1 %v4224_v24, %s10067_s13  ;;  %4622 = vrot.lane.b32.xlu0 %v4544_v60, %s10067_s13  ;;  %v16807_v45 = vld [vmem:[#allocation107_spill] sm:$0xff]  ;;  %v3902_v60 = vmul.f32 %v11981_v11, %v2398_v4 }
 0x392   : > { %2007 = vst.msk [vmem:[#allocation2 + $0xa8] sm:$0xff] %vm1073_vm0, %v1994_v61  ;;  %v3582_v24 = vmul.f32 %v16807_v45, %v2398_v4  ;;  %v16812_v45 = vld [vmem:[#allocation153_spill] sm:$0xff] }
 0x393   : > { %v12426_v38 = vpop.permute.xlu0 %3636 }
 0x394   : > { %16802 = vst [vmem:[#allocation7_spill] sm:$0xff] %v12426_v38  ;;  %v12430_v15 = vpop.permute.xlu1 %3956  ;;  %v12536_v38 = vld [vmem:[#allocation2 + $0x80] sm:$0xff] }
 0x395   : > { %16805 = vst [vmem:[#allocation108_spill] sm:$0xff] %v12430_v15  ;;  %3018 = vrot.lane.b32.xlu1 %v2942_v29, %s10065_s29  ;;  %3338 = vrot.lane.b32.xlu0 %v3262_v32, %s10065_s29  ;;  %v4542_v29 = vmul.f32 %v12234_v26, %v2398_v4  ;;  %v3905_v26 = vmul.f32 %v11913_v1, %v12446_v48  ;;  %v16816_v4 = vld [vmem:[#allocation106_spill] sm:$0xff] }
 0x397   : > { %v12434_v33 = vpop.permute.xlu0 %4276 }
 0x398   : > { %16806 = vst [vmem:[#allocation148_spill] sm:$0xff] %v12434_v33  ;;  %v12438_v16 = vpop.permute.xlu1 %4596 }
 0x399   : > { %16808 = vst [vmem:[#allocation11_spill] sm:$0xff] %v12438_v16  ;;  %3658 = vrot.lane.b32.xlu1 %v3582_v24, %s10066_s11  ;;  %3978 = vrot.lane.b32.xlu0 %v3902_v60, %s10066_s11  ;;  %v3265_v24 = vmul.f32 %v16812_v45, %v12446_v48  ;;  %v16813_v60 = vld [vmem:[#allocation124_spill] sm:$0xff] }
 0x39a   : > { %v2945_v57 = vmul.f32 %v16813_v60, %v12446_v48  ;;  %v12478_v60 = vld [vmem:[#allocation2 + $0x68] sm:$0xff] }
 0x39b   : > { %v12442_v61 = vpop.permute.xlu0 %3326 }
 0x39c   : > { %16809 = vst [vmem:[#allocation149_spill] sm:$0xff] %v12442_v61  ;;  %v12448_v32 = vpop.permute.xlu1 %3006 }
 0x39d   : > { %16810 = vst [vmem:[#allocation119_spill] sm:$0xff] %v12448_v32  ;;  %4298 = vrot.lane.b32.xlu1 %v4222_v27, %s10067_s13  ;;  %4618 = vrot.lane.b32.xlu0 %v4542_v29, %s10067_s13  ;;  %v3585_v27 = vmul.f32 %v16816_v4, %v12446_v48 }
 0x39f   : > { %v12452_v11 = vpop.permute.xlu0 %3966 }
 0x3a0   : > { %16811 = vst [vmem:[#allocation171_spill] sm:$0xff] %v12452_v11  ;;  %v12458_v33 = vpop.permute.xlu1 %3646 }
 0x3a1   : > { %16814 = vst [vmem:[#allocation147_spill] sm:$0xff] %v12458_v33  ;;  %3344 = vrot.lane.b32.xlu1 %v3265_v24, %s10065_s29  ;;  %3024 = vrot.lane.b32.xlu0 %v2945_v57, %s10065_s29  ;;  %v4545_v24 = vmul.f32 %v12249_v30, %v12446_v48  ;;  %v4225_v57 = vmul.f32 %v12121_v17, %v12446_v48 }
 0x3a3   : > { %v12462_v49 = vpop.permute.xlu0 %4606 }
 0x3a4   : > { %16815 = vst [vmem:[#allocation116_spill] sm:$0xff] %v12462_v49  ;;  %v12468_v29 = vpop.permute.xlu1 %4286 }
 0x3a5   : > { %16817 = vst [vmem:[#allocation6_spill] sm:$0xff] %v12468_v29  ;;  %3984 = vrot.lane.b32.xlu1 %v3905_v26, %s10066_s11  ;;  %3664 = vrot.lane.b32.xlu0 %v3585_v27, %s10066_s11  ;;  %v16821_v26 = vld [vmem:[#allocation151_spill] sm:$0xff]  ;;  %v16822_v29 = vld [vmem:[#allocation122_spill] sm:$0xff] }
 0x3a6   : > { %v3263_v27 = vmul.f32 %v16821_v26, %v12478_v60  ;;  %v2943_v33 = vmul.f32 %v16822_v29, %v12478_v60  ;;  %v16825_v26 = vld [vmem:[#allocation100_spill] sm:$0xff] }
 0x3a7   : > { %v12472_v45 = vpop.permute.xlu0 %3322 }
 0x3a8   : > { %16818 = vst [vmem:[#allocation118_spill] sm:$0xff] %v12472_v45  ;;  %v12480_v1 = vpop.permute.xlu1 %3002 }
 0x3a9   : > { %16819 = vst [vmem:[#allocation154_spill] sm:$0xff] %v12480_v1  ;;  %4624 = vrot.lane.b32.xlu1 %v4545_v24, %s10067_s13  ;;  %4304 = vrot.lane.b32.xlu0 %v4225_v57, %s10067_s13  ;;  %v3903_v57 = vmul.f32 %v11882_v35, %v12478_v60  ;;  %v3583_v1 = vmul.f32 %v16825_v26, %v12478_v60  ;;  %v12514_v26 = vld [vmem:[#allocation2 + $0x90] sm:$0xff] }
 0x3aa   : > { %v4543_v35 = vmul.f32 %v12237_v56, %v12478_v60 }
 0x3ab   : > { %v12484_v4 = vpop.permute.xlu0 %3962 }
 0x3ac   : > { %16820 = vst [vmem:[#allocation111_spill] sm:$0xff] %v12484_v4  ;;  %v12490_v30 = vpop.permute.xlu1 %3642 }
 0x3ad   : > { %16823 = vst [vmem:[#allocation115_spill] sm:$0xff] %v12490_v30  ;;  %3340 = vrot.lane.b32.xlu1 %v3263_v27, %s10065_s29  ;;  %3020 = vrot.lane.b32.xlu0 %v2943_v33, %s10065_s29 }
 0x3ae   : > { %v9364_v17 = vpop.f32.mrb[60].mxu1 }
 0x3af   : > { %2204 = vst.msk [vmem:[#allocation2 + $0xd0] sm:$0xff] %vm1073_vm0, %v9364_v17  ;;  %v2187_v24 = vpop.f32.mrb[61].mxu1  ;;  %v12495_v32 = vpop.permute.xlu0 %4602  ;;  %v16828_v17 = vld [vmem:[#allocation36_spill] sm:$0xff] }
 0x3b0   : > { %16824 = vst [vmem:[#allocation152_spill] sm:$0xff] %v12495_v32  ;;  %2202 = vst.msk [vmem:[#allocation2 + $0xc0] sm:$0xff] %vm1073_vm0, %v2187_v24  ;;  %v9365_v29 = vpop.f32.mrb[62].mxu1  ;;  %v12502_v30 = vpop.permute.xlu1 %4282  ;;  %v4223_v24 = vmul.f32 %v16828_v17, %v12478_v60 }
 0x3b1   : > { %16826 = vst [vmem:[#allocation107_spill] sm:$0xff] %v12502_v30  ;;  %2205 = vst.msk [vmem:[#allocation2 + $0xd8] sm:$0xff] %vm1073_vm0, %v9365_v29  ;;  %v2190_v33 = vpop.f32.mrb[63].mxu1  ;;  %3980 = vrot.lane.b32.xlu1 %v3903_v57, %s10066_s11  ;;  %3660 = vrot.lane.b32.xlu0 %v3583_v1, %s10066_s11  ;;  %v16831_v1 = vld [vmem:[#allocation123_spill] sm:$0xff] }
 0x3b2   : > { %2203 = vst.msk [vmem:[#allocation2 + $0xc8] sm:$0xff] %vm1073_vm0, %v2190_v33  ;;  %v2948_v29 = vmul.f32 %v16831_v1, %v12514_v26  ;;  %v16832_v33 = vld [vmem:[#allocation158_spill] sm:$0xff] }
 0x3b3   : > { %v12508_v27 = vpop.permute.xlu0 %3008 }
 0x3b4   : > { %16827 = vst [vmem:[#allocation153_spill] sm:$0xff] %v12508_v27  ;;  %v12516_v30 = vpop.permute.xlu1 %3328  ;;  %v3268_v27 = vmul.f32 %v16832_v33, %v12514_v26 }
 0x3b5   : > { %16829 = vst [vmem:[#allocation124_spill] sm:$0xff] %v12516_v30  ;;  %4620 = vrot.lane.b32.xlu1 %v4543_v35, %s10067_s13  ;;  %4300 = vrot.lane.b32.xlu0 %v4223_v24, %s10067_s13  ;;  %v16835_v35 = vld [vmem:[#allocation172_spill] sm:$0xff] }
 0x3b6   : > { %v3588_v47 = vmul.f32 %v16835_v35, %v12514_v26  ;;  %v16836_v24 = vld [vmem:[#allocation28_spill] sm:$0xff] }
 0x3b7   : > { %v12520_v57 = vpop.permute.xlu0 %3648 }
 0x3b8   : > { %16830 = vst [vmem:[#allocation106_spill] sm:$0xff] %v12520_v57  ;;  %v12526_v56 = vpop.permute.xlu1 %3968  ;;  %v3908_v57 = vmul.f32 %v16836_v24, %v12514_v26 }
 0x3b9   : > { %16833 = vst [vmem:[#allocation151_spill] sm:$0xff] %v12526_v56  ;;  %3030 = vrot.lane.b32.xlu1 %v2948_v29, %s10065_s29  ;;  %3350 = vrot.lane.b32.xlu0 %v3268_v27, %s10065_s29  ;;  %v16839_v27 = vld [vmem:[#allocation23_spill] sm:$0xff] }
 0x3ba   : > { %v4228_v29 = vmul.f32 %v16839_v27, %v12514_v26  ;;  %v16847_v27 = vld [vmem:[#allocation97_spill] sm:$0xff] }
 0x3bb   : > { %v12530_v17 = vpop.permute.xlu0 %4288 }
 0x3bc   : > { %16834 = vst [vmem:[#allocation122_spill] sm:$0xff] %v12530_v17  ;;  %v12538_v1 = vpop.permute.xlu1 %4608  ;;  %v16840_v17 = vld [vmem:[#allocation156_spill] sm:$0xff] }
 0x3bd   : > { %16837 = vst [vmem:[#allocation100_spill] sm:$0xff] %v12538_v1  ;;  %3670 = vrot.lane.b32.xlu1 %v3588_v47, %s10066_s11  ;;  %3990 = vrot.lane.b32.xlu0 %v3908_v57, %s10066_s11  ;;  %v3266_v5 = vmul.f32 %v16840_v17, %v12536_v38  ;;  %v16843_v47 = vld [vmem:[#allocation121_spill] sm:$0xff]  ;;  %v16844_v57 = vld [vmem:[#allocation175_spill] sm:$0xff] }
 0x3be   : > { %v2946_v54 = vmul.f32 %v16843_v47, %v12536_v38 }
 0x3bf   : > { %v12542_v33 = vpop.permute.xlu0 %3004 }
 0x3c0   : > { %16838 = vst [vmem:[#allocation36_spill] sm:$0xff] %v12542_v33  ;;  %v12548_v35 = vpop.permute.xlu1 %3324  ;;  %v3906_v33 = vmul.f32 %v16844_v57, %v12536_v38 }
 0x3c1   : > { %16841 = vst [vmem:[#allocation123_spill] sm:$0xff] %v12548_v35  ;;  %4310 = vrot.lane.b32.xlu1 %v4228_v29, %s10067_s13  ;;  %3346 = vrot.lane.b32.xlu0 %v3266_v5, %s10065_s29  ;;  %v3586_v29 = vmul.f32 %v16847_v27, %v12536_v38  ;;  %v4546_v5 = vmul.f32 %v12256_v7, %v12536_v38  ;;  %v12680_v35 = vld [vmem:[#allocation2 + $0xb8] sm:$0xff] }
 0x3c3   : > { %v12552_v24 = vpop.permute.xlu0 %3644 }
 0x3c4   : > { %16842 = vst [vmem:[#allocation158_spill] sm:$0xff] %v12552_v24  ;;  %v12558_v31 = vpop.permute.xlu1 %3964  ;;  %v12568_v24 = vld [vmem:[#allocation2 + $0x98] sm:$0xff] }
 0x3c5   : > { %16845 = vst [vmem:[#allocation172_spill] sm:$0xff] %v12558_v31  ;;  %3026 = vrot.lane.b32.xlu1 %v2946_v54, %s10065_s29  ;;  %3986 = vrot.lane.b32.xlu0 %v3906_v33, %s10066_s11  ;;  %v16850_v54 = vld [vmem:[#allocation30_spill] sm:$0xff] }
 0x3c6   : > { %v4226_v33 = vmul.f32 %v16850_v54, %v12536_v38  ;;  %v16855_v54 = vld [vmem:[#allocation8_spill] sm:$0xff]  ;;  %v12658_v31 = vld [vmem:[#allocation2 + $0xa0] sm:$0xff] }
 0x3c7   : > { %v12562_v17 = vpop.permute.xlu0 %4284 }
 0x3c8   : > { %16846 = vst [vmem:[#allocation28_spill] sm:$0xff] %v12562_v17  ;;  %v12570_v47 = vpop.permute.xlu1 %4604  ;;  %v16851_v17 = vld [vmem:[#allocation128_spill] sm:$0xff] }
 0x3c9   : > { %16848 = vst [vmem:[#allocation23_spill] sm:$0xff] %v12570_v47  ;;  %3666 = vrot.lane.b32.xlu1 %v3586_v29, %s10066_s11  ;;  %4626 = vrot.lane.b32.xlu0 %v4546_v5, %s10067_s13  ;;  %v2949_v1 = vmul.f32 %v16851_v17, %v12568_v24  ;;  %v16854_v5 = vld [vmem:[#allocation157_spill] sm:$0xff]  ;;  %v3589_v47 = vmul.f32 %v16855_v54, %v12568_v24  ;;  %v12604_v54 = vld [vmem:[#allocation2 + $0x88] sm:$0xff] }
 0x3ca   : > { %v3269_v30 = vmul.f32 %v16854_v5, %v12568_v24 }
 0x3cb   : > { %v12574_v57 = vpop.permute.xlu0 %3334 }
 0x3cc   : > { %16849 = vst [vmem:[#allocation156_spill] sm:$0xff] %v12574_v57  ;;  %v12580_v27 = vpop.permute.xlu1 %3014 }
 0x3cd   : > { %16852 = vst [vmem:[#allocation121_spill] sm:$0xff] %v12580_v27  ;;  %4306 = vrot.lane.b32.xlu1 %v4226_v33, %s10067_s13  ;;  %3032 = vrot.lane.b32.xlu0 %v2949_v1, %s10065_s29 }
 0x3ce   : > { %v9404_v7 = vpop.f32.mrb[64].mxu1 }
 0x3cf   : > { %2384 = vst.msk [vmem:[#allocation2 + $0xf0] sm:$0xff] %vm1073_vm0, %v9404_v7  ;;  %v2367_v29 = vpop.f32.mrb[65].mxu1  ;;  %v12585_v56 = vpop.permute.xlu0 %3974  ;;  %v16858_v7 = vld [vmem:[#allocation24_spill] sm:$0xff] }
 0x3d0   : > { %16853 = vst [vmem:[#allocation175_spill] sm:$0xff] %v12585_v56  ;;  %2382 = vst.msk [vmem:[#allocation2 + $0xe0] sm:$0xff] %vm1073_vm0, %v2367_v29  ;;  %v12592_v17 = vpop.permute.xlu1 %3654  ;;  %v9405_v27 = vpop.f32.mrb[66].mxu1  ;;  %v3909_v5 = vmul.f32 %v16858_v7, %v12568_v24  ;;  %v4229_v29 = vmul.f32 %v12135_v63, %v12568_v24 }
 0x3d1   : > { %16856 = vst [vmem:[#allocation97_spill] sm:$0xff] %v12592_v17  ;;  %2385 = vst.msk [vmem:[#allocation2 + $0xf8] sm:$0xff] %vm1073_vm0, %v9405_v27  ;;  %v2370_v1 = vpop.f32.mrb[67].mxu1  ;;  %3352 = vrot.lane.b32.xlu1 %v3269_v30, %s10065_s29  ;;  %3672 = vrot.lane.b32.xlu0 %v3589_v47, %s10066_s11  ;;  %v16861_v47 = vld [vmem:[#allocation155_spill] sm:$0xff] }
 0x3d2   : > { %2383 = vst.msk [vmem:[#allocation2 + $0xe8] sm:$0xff] %vm1073_vm0, %v2370_v1  ;;  %v3267_v27 = vmul.f32 %v16861_v47, %v12604_v54  ;;  %v16862_v1 = vld [vmem:[#allocation126_spill] sm:$0xff] }
 0x3d3   : > { %v12598_v33 = vpop.permute.xlu0 %4614 }
 0x3d4   : > { %16857 = vst [vmem:[#allocation30_spill] sm:$0xff] %v12598_v33  ;;  %v12606_v17 = vpop.permute.xlu1 %4294  ;;  %v2947_v33 = vmul.f32 %v16862_v1, %v12604_v54  ;;  %v12636_v1 = vld [vmem:[#allocation2 + $0xb0] sm:$0xff] }
 0x3d5   : > { %16859 = vst [vmem:[#allocation128_spill] sm:$0xff] %v12606_v17  ;;  %3992 = vrot.lane.b32.xlu1 %v3909_v5, %s10066_s11  ;;  %4312 = vrot.lane.b32.xlu0 %v4229_v29, %s10067_s13  ;;  %v16865_v5 = vld [vmem:[#allocation10_spill] sm:$0xff] }
 0x3d6   : > { %v3907_v17 = vmul.f32 %v16865_v5, %v12604_v54  ;;  %v16866_v29 = vld [vmem:[#allocation110_spill] sm:$0xff] }
 0x3d7   : > { %v12610_v30 = vpop.permute.xlu0 %3330  ;;  %v3587_v56 = vmul.f32 %v16866_v29, %v12604_v54 }
 0x3d8   : > { %16860 = vst [vmem:[#allocation157_spill] sm:$0xff] %v12610_v30  ;;  %v12616_v7 = vpop.permute.xlu1 %3010  ;;  %v12874_v30 = vld [vmem:[#allocation2 + $0xe0] sm:$0xff]  ;;  %v12896_v37 = vld [vmem:[#allocation2 + $0xf8] sm:$0xff] }
 0x3d9   : > { %16863 = vst [vmem:[#allocation8_spill] sm:$0xff] %v12616_v7  ;;  %3348 = vrot.lane.b32.xlu1 %v3267_v27, %s10065_s29  ;;  %3028 = vrot.lane.b32.xlu0 %v2947_v33, %s10065_s29  ;;  %v4547_v27 = vmul.f32 %v12258_v0, %v12604_v54  ;;  %v4227_v33 = vmul.f32 %v12127_v34, %v12604_v54 }
 0x3db   : > { %v12620_v63 = vpop.permute.xlu0 %3970 }
 0x3dc   : > { %16864 = vst [vmem:[#allocation24_spill] sm:$0xff] %v12620_v63  ;;  %v12626_v57 = vpop.permute.xlu1 %3650 }
 0x3dd   : > { %16867 = vst [vmem:[#allocation155_spill] sm:$0xff] %v12626_v57  ;;  %3988 = vrot.lane.b32.xlu1 %v3907_v17, %s10066_s11  ;;  %3668 = vrot.lane.b32.xlu0 %v3587_v56, %s10066_s11  ;;  %v16871_v56 = vld [vmem:[#allocation127_spill] sm:$0xff]  ;;  %v16872_v57 = vld [vmem:[#allocation162_spill] sm:$0xff] }
 0x3de   : > { %v2952_v17 = vmul.f32 %v16871_v56, %v12636_v1  ;;  %v3272_v7 = vmul.f32 %v16872_v57, %v12636_v1 }
 0x3df   : > { %v12630_v47 = vpop.permute.xlu0 %4610 }
 0x3e0   : > { %16868 = vst [vmem:[#allocation126_spill] sm:$0xff] %v12630_v47  ;;  %v12638_v5 = vpop.permute.xlu1 %4290 }
 0x3e1   : > { %16869 = vst [vmem:[#allocation10_spill] sm:$0xff] %v12638_v5  ;;  %4628 = vrot.lane.b32.xlu1 %v4547_v27, %s10067_s13  ;;  %4308 = vrot.lane.b32.xlu0 %v4227_v33, %s10067_s13  ;;  %v16875_v27 = vld [vmem:[#allocation16_spill] sm:$0xff]  ;;  %v16876_v33 = vld [vmem:[#allocation177_spill] sm:$0xff] }
 0x3e2   : > { %v3592_v5 = vmul.f32 %v16875_v27, %v12636_v1 }
 0x3e3   : > { %v12642_v29 = vpop.permute.xlu0 %3016 }
 0x3e4   : > { %16870 = vst [vmem:[#allocation110_spill] sm:$0xff] %v12642_v29  ;;  %v12648_v0 = vpop.permute.xlu1 %3336  ;;  %v3912_v29 = vmul.f32 %v16876_v33, %v12636_v1 }
 0x3e5   : > { %16873 = vst [vmem:[#allocation127_spill] sm:$0xff] %v12648_v0  ;;  %3038 = vrot.lane.b32.xlu1 %v2952_v17, %s10065_s29  ;;  %3358 = vrot.lane.b32.xlu0 %v3272_v7, %s10065_s29  ;;  %v16879_v7 = vld [vmem:[#allocation34_spill] sm:$0xff] }
 0x3e6   : > { %v4232_v17 = vmul.f32 %v16879_v7, %v12636_v1 }
 0x3e7   : > { %v12652_v34 = vpop.permute.xlu0 %3656 }
 0x3e8   : > { %16874 = vst [vmem:[#allocation162_spill] sm:$0xff] %v12652_v34  ;;  %v12660_v56 = vpop.permute.xlu1 %3976  ;;  %v16880_v34 = vld [vmem:[#allocation160_spill] sm:$0xff] }
 0x3e9   : > { %16877 = vst [vmem:[#allocation16_spill] sm:$0xff] %v12660_v56  ;;  %3678 = vrot.lane.b32.xlu1 %v3592_v5, %s10066_s11  ;;  %3998 = vrot.lane.b32.xlu0 %v3912_v29, %s10066_s11  ;;  %v3270_v0 = vmul.f32 %v16880_v34, %v12658_v31  ;;  %v16883_v5 = vld [vmem:[#allocation125_spill] sm:$0xff]  ;;  %v16884_v29 = vld [vmem:[#allocation19_spill] sm:$0xff] }
 0x3ea   : > { %v2950_v56 = vmul.f32 %v16883_v5, %v12658_v31 }
 0x3eb   : > { %v12664_v57 = vpop.permute.xlu0 %4296 }
 0x3ec   : > { %16878 = vst [vmem:[#allocation177_spill] sm:$0xff] %v12664_v57  ;;  %v12670_v27 = vpop.permute.xlu1 %4616  ;;  %v3910_v57 = vmul.f32 %v16884_v29, %v12658_v31 }
 0x3ed   : > { %16881 = vst [vmem:[#allocation34_spill] sm:$0xff] %v12670_v27  ;;  %4318 = vrot.lane.b32.xlu1 %v4232_v17, %s10067_s13  ;;  %3354 = vrot.lane.b32.xlu0 %v3270_v0, %s10065_s29  ;;  %v16887_v0 = vld [vmem:[#allocation103_spill] sm:$0xff] }
 0x3ee   : > { %v3590_v17 = vmul.f32 %v16887_v0, %v12658_v31 }
 0x3ef   : > { %v12674_v33 = vpop.permute.xlu0 %3012 }
 0x3f0   : > { %16882 = vst [vmem:[#allocation160_spill] sm:$0xff] %v12674_v33  ;;  %v12682_v7 = vpop.permute.xlu1 %3332  ;;  %v16888_v33 = vld [vmem:[#allocation132_spill] sm:$0xff] }
 0x3f1   : > { %16885 = vst [vmem:[#allocation125_spill] sm:$0xff] %v12682_v7  ;;  %3034 = vrot.lane.b32.xlu1 %v2950_v56, %s10065_s29  ;;  %3994 = vrot.lane.b32.xlu0 %v3910_v57, %s10066_s11  ;;  %v2953_v27 = vmul.f32 %v16888_v33, %v12680_v35  ;;  %v16891_v56 = vld [vmem:[#allocation21_spill] sm:$0xff]  ;;  %v10068_v33 = vmov 8  }
 0x3f2   : > { %v4230_v7 = vmul.f32 %v16891_v56, %v12658_v31  ;;  %v16892_v57 = vld [vmem:[#allocation173_spill] sm:$0xff]  ;;  %9520 = vset.pattern.permute.xlu1 %v10068_v33  ;;  %9519 = vset.pattern.permute.xlu0 %v10068_v33  ;;  %v4233_v56 = vmul.f32 %v12153_v58, %v12680_v35 }
 0x3f3   : > { %v12686_v34 = vpop.permute.xlu0 %3652 }
 0x3f4   : > { %16886 = vst [vmem:[#allocation19_spill] sm:$0xff] %v12686_v34  ;;  %v12692_v5 = vpop.permute.xlu1 %3972  ;;  %v3593_v34 = vmul.f32 %v16892_v57, %v12680_v35 }
 0x3f5   : > { %16889 = vst [vmem:[#allocation103_spill] sm:$0xff] %v12692_v5  ;;  %3674 = vrot.lane.b32.xlu1 %v3590_v17, %s10066_s11  ;;  %3040 = vrot.lane.b32.xlu0 %v2953_v27, %s10065_s29  ;;  %v16895_v27 = vld [vmem:[#allocation161_spill] sm:$0xff] }
 0x3f6   : > { %v3273_v17 = vmul.f32 %v16895_v27, %v12680_v35 }
 0x3f7   : > { %v12696_v29 = vpop.permute.xlu0 %4292 }
 0x3f8   : > { %16890 = vst [vmem:[#allocation132_spill] sm:$0xff] %v12696_v29  ;;  %v12702_v47 = vpop.permute.xlu1 %4612  ;;  %v12712_v29 = vld [vmem:[#allocation2 + $0xa8] sm:$0xff] }
 0x3f9   : > { %16893 = vst [vmem:[#allocation21_spill] sm:$0xff] %v12702_v47  ;;  %4314 = vrot.lane.b32.xlu1 %v4230_v7, %s10067_s13  ;;  %3680 = vrot.lane.b32.xlu0 %v3593_v34, %s10066_s11  ;;  %v16898_v34 = vld [vmem:[#allocation15_spill] sm:$0xff]  ;;  %v16899_v47 = vld [vmem:[#allocation130_spill] sm:$0xff] }
 0x3fa   : > { %v3913_v33 = vmul.f32 %v16898_v34, %v12680_v35  ;;  %v2951_v5 = vmul.f32 %v16899_v47, %v12712_v29  ;;  %v16906_v34 = vld [vmem:[#allocation22_spill] sm:$0xff] }
 0x3fb   : > { %v12706_v0 = vpop.permute.xlu0 %3342 }
 0x3fc   : > { %16894 = vst [vmem:[#allocation173_spill] sm:$0xff] %v12706_v0  ;;  %v12714_v57 = vpop.permute.xlu1 %3022 }
 0x3fd   : > { %16896 = vst [vmem:[#allocation161_spill] sm:$0xff] %v12714_v57  ;;  %3360 = vrot.lane.b32.xlu1 %v3273_v17, %s10065_s29  ;;  %4320 = vrot.lane.b32.xlu0 %v4233_v56, %s10067_s13  ;;  %v16902_v17 = vld [vmem:[#allocation159_spill] sm:$0xff]  ;;  %v16903_v56 = vld [vmem:[#allocation117_spill] sm:$0xff] }
 0x3fe   : > { %v3271_v57 = vmul.f32 %v16902_v17, %v12712_v29 }
 0x3ff   : > { %v12718_v7 = vpop.permute.xlu0 %3982 }
 0x400   : > { %16897 = vst [vmem:[#allocation181_spill] sm:$0xff] %v12718_v7  ;;  %v12724_v27 = vpop.permute.xlu1 %3662  ;;  %v3591_v7 = vmul.f32 %v16903_v56, %v12712_v29 }
 0x401   : > { %16900 = vst [vmem:[#allocation15_spill] sm:$0xff] %v12724_v27  ;;  %4000 = vrot.lane.b32.xlu1 %v3913_v33, %s10066_s11  ;;  %3036 = vrot.lane.b32.xlu0 %v2951_v5, %s10065_s29  ;;  %v3911_v33 = vmul.f32 %v16906_v34, %v12712_v29  ;;  %v4231_v5 = vmul.f32 %v12142_v36, %v12712_v29  ;;  %v12744_v27 = vld [vmem:[#allocation2 + $0xd0] sm:$0xff] }
 0x403   : > { %v12728_v58 = vpop.permute.xlu0 %4622 }
 0x404   : > { %16901 = vst [vmem:[#allocation130_spill] sm:$0xff] %v12728_v58  ;;  %v12734_v0 = vpop.permute.xlu1 %4302 }
 0x405   : > { %16904 = vst [vmem:[#allocation159_spill] sm:$0xff] %v12734_v0  ;;  %3356 = vrot.lane.b32.xlu1 %v3271_v57, %s10065_s29  ;;  %3676 = vrot.lane.b32.xlu0 %v3591_v7, %s10066_s11  ;;  %v16909_v57 = vld [vmem:[#allocation131_spill] sm:$0xff]  ;;  %v16910_v0 = vld [vmem:[#allocation166_spill] sm:$0xff] }
 0x406   : > { %v2956_v7 = vmul.f32 %v16909_v57, %v12744_v27  ;;  %v3276_v58 = vmul.f32 %v16910_v0, %v12744_v27 }
 0x407   : > { %v12738_v47 = vpop.permute.xlu0 %3338 }
 0x408   : > { %16905 = vst [vmem:[#allocation117_spill] sm:$0xff] %v12738_v47  ;;  %v12746_v17 = vpop.permute.xlu1 %3018  ;;  %v12766_v47 = vld [vmem:[#allocation2 + $0xc0] sm:$0xff] }
 0x409   : > { %16907 = vst [vmem:[#allocation22_spill] sm:$0xff] %v12746_v17  ;;  %3996 = vrot.lane.b32.xlu1 %v3911_v33, %s10066_s11  ;;  %4316 = vrot.lane.b32.xlu0 %v4231_v5, %s10067_s13  ;;  %v16913_v33 = vld [vmem:[#allocation9_spill] sm:$0xff]  ;;  %v16914_v5 = vld [vmem:[#allocation179_spill] sm:$0xff] }
 0x40a   : > { %v3596_v17 = vmul.f32 %v16913_v33, %v12744_v27 }
 0x40b   : > { %v12750_v56 = vpop.permute.xlu0 %3978 }
 0x40c   : > { %16908 = vst [vmem:[#allocation182_spill] sm:$0xff] %v12750_v56  ;;  %v12756_v34 = vpop.permute.xlu1 %3658  ;;  %v3916_v56 = vmul.f32 %v16914_v5, %v12744_v27 }
 0x40d   : > { %16911 = vst [vmem:[#allocation131_spill] sm:$0xff] %v12756_v34  ;;  %3046 = vrot.lane.b32.xlu1 %v2956_v7, %s10065_s29  ;;  %3366 = vrot.lane.b32.xlu0 %v3276_v58, %s10065_s29  ;;  %v4236_v58 = vmul.f32 %v12131_v13, %v12744_v27  ;;  %v16917_v7 = vld [vmem:[#allocation164_spill] sm:$0xff] }
 0x40e   : > { %v3274_v34 = vmul.f32 %v16917_v7, %v12766_v47 }
 0x40f   : > { %v12760_v36 = vpop.permute.xlu0 %4618 }
 0x410   : > { %16912 = vst [vmem:[#allocation166_spill] sm:$0xff] %v12760_v36  ;;  %v12768_v57 = vpop.permute.xlu1 %4298  ;;  %v12788_v36 = vld [vmem:[#allocation2 + $0xd8] sm:$0xff] }
 0x411   : > { %16915 = vst [vmem:[#allocation9_spill] sm:$0xff] %v12768_v57  ;;  %3686 = vrot.lane.b32.xlu1 %v3596_v17, %s10066_s11  ;;  %4006 = vrot.lane.b32.xlu0 %v3916_v56, %s10066_s11  ;;  %v16920_v17 = vld [vmem:[#allocation129_spill] sm:$0xff]  ;;  %v16921_v56 = vld [vmem:[#allocation178_spill] sm:$0xff] }
 0x412   : > { %v2954_v57 = vmul.f32 %v16920_v17, %v12766_v47 }
 0x413   : > { %v12772_v0 = vpop.permute.xlu0 %3024 }
 0x414   : > { %16916 = vst [vmem:[#allocation179_spill] sm:$0xff] %v12772_v0  ;;  %v12778_v33 = vpop.permute.xlu1 %3344  ;;  %v3914_v0 = vmul.f32 %v16921_v56, %v12766_v47 }
 0x415   : > { %16918 = vst [vmem:[#allocation164_spill] sm:$0xff] %v12778_v33  ;;  %4326 = vrot.lane.b32.xlu1 %v4236_v58, %s10067_s13  ;;  %3362 = vrot.lane.b32.xlu0 %v3274_v34, %s10065_s29  ;;  %v16924_v34 = vld [vmem:[#allocation14_spill] sm:$0xff] }
 0x416   : > { %v3594_v58 = vmul.f32 %v16924_v34, %v12766_v47  ;;  %v16931_v34 = vld [vmem:[#allocation165_spill] sm:$0xff] }
 0x417   : > { %v12782_v5 = vpop.permute.xlu0 %3664 }
 0x418   : > { %16919 = vst [vmem:[#allocation183_spill] sm:$0xff] %v12782_v5  ;;  %v12790_v13 = vpop.permute.xlu1 %3984  ;;  %v16925_v5 = vld [vmem:[#allocation136_spill] sm:$0xff] }
 0x419   : > { %16922 = vst [vmem:[#allocation129_spill] sm:$0xff] %v12790_v13  ;;  %3042 = vrot.lane.b32.xlu1 %v2954_v57, %s10065_s29  ;;  %4002 = vrot.lane.b32.xlu0 %v3914_v0, %s10066_s11  ;;  %v2957_v33 = vmul.f32 %v16925_v5, %v12788_v36  ;;  %v4234_v57 = vmul.f32 %v12123_v18, %v12766_v47  ;;  %v16928_v0 = vld [vmem:[#allocation20_spill] sm:$0xff] }
 0x41b   : > { %v12794_v7 = vpop.permute.xlu0 %4304 }
 0x41c   : > { %16923 = vst [vmem:[#allocation178_spill] sm:$0xff] %v12794_v7  ;;  %v12800_v17 = vpop.permute.xlu1 %4624  ;;  %v3597_v7 = vmul.f32 %v16928_v0, %v12788_v36 }
 0x41d   : > { %16926 = vst [vmem:[#allocation14_spill] sm:$0xff] %v12800_v17  ;;  %3682 = vrot.lane.b32.xlu1 %v3594_v58, %s10066_s11  ;;  %3048 = vrot.lane.b32.xlu0 %v2957_v33, %s10065_s29  ;;  %v3277_v58 = vmul.f32 %v16931_v34, %v12788_v36  ;;  %v4237_v33 = vmul.f32 %v12169_v52, %v12788_v36 }
 0x41f   : > { %v12804_v56 = vpop.permute.xlu0 %3020 }
 0x420   : > { %16927 = vst [vmem:[#allocation136_spill] sm:$0xff] %v12804_v56  ;;  %v12810_v13 = vpop.permute.xlu1 %3340  ;;  %v12820_v56 = vld [vmem:[#allocation2 + $0xc8] sm:$0xff] }
 0x421   : > { %16929 = vst [vmem:[#allocation20_spill] sm:$0xff] %v12810_v13  ;;  %4322 = vrot.lane.b32.xlu1 %v4234_v57, %s10067_s13  ;;  %3688 = vrot.lane.b32.xlu0 %v3597_v7, %s10066_s11  ;;  %v16934_v7 = vld [vmem:[#allocation176_spill] sm:$0xff] }
 0x422   : > { %v3917_v57 = vmul.f32 %v16934_v7, %v12788_v36  ;;  %v16942_v7 = vld [vmem:[#allocation13_spill] sm:$0xff] }
 0x423   : > { %v12814_v5 = vpop.permute.xlu0 %3660 }
 0x424   : > { %16930 = vst [vmem:[#allocation184_spill] sm:$0xff] %v12814_v5  ;;  %v12822_v18 = vpop.permute.xlu1 %3980  ;;  %v16935_v5 = vld [vmem:[#allocation134_spill] sm:$0xff] }
 0x425   : > { %16932 = vst [vmem:[#allocation165_spill] sm:$0xff] %v12822_v18  ;;  %3368 = vrot.lane.b32.xlu1 %v3277_v58, %s10065_s29  ;;  %4328 = vrot.lane.b32.xlu0 %v4237_v33, %s10067_s13  ;;  %v2955_v17 = vmul.f32 %v16935_v5, %v12820_v56  ;;  %v16938_v58 = vld [vmem:[#allocation163_spill] sm:$0xff]  ;;  %v16939_v33 = vld [vmem:[#allocation174_spill] sm:$0xff] }
 0x426   : > { %v3275_v18 = vmul.f32 %v16938_v58, %v12820_v56 }
 0x427   : > { %v12826_v0 = vpop.permute.xlu0 %4300 }
 0x428   : > { %16933 = vst [vmem:[#allocation185_spill] sm:$0xff] %v12826_v0  ;;  %v12832_v34 = vpop.permute.xlu1 %4620  ;;  %v3595_v0 = vmul.f32 %v16939_v33, %v12820_v56 }
 0x429   : > { %16936 = vst [vmem:[#allocation176_spill] sm:$0xff] %v12832_v34  ;;  %4008 = vrot.lane.b32.xlu1 %v3917_v57, %s10066_s11  ;;  %3044 = vrot.lane.b32.xlu0 %v2955_v17, %s10065_s29  ;;  %v3915_v57 = vmul.f32 %v16942_v7, %v12820_v56  ;;  %v4235_v17 = vmul.f32 %v12162_v9, %v12820_v56  ;;  %v12852_v34 = vld [vmem:[#allocation2 + $0xf0] sm:$0xff] }
 0x42b   : > { %v12836_v52 = vpop.permute.xlu0 %3350 }
 0x42c   : > { %16937 = vst [vmem:[#allocation134_spill] sm:$0xff] %v12836_v52  ;;  %v12842_v13 = vpop.permute.xlu1 %3030 }
 0x42d   : > { %16940 = vst [vmem:[#allocation163_spill] sm:$0xff] %v12842_v13  ;;  %3364 = vrot.lane.b32.xlu1 %v3275_v18, %s10065_s29  ;;  %3684 = vrot.lane.b32.xlu0 %v3595_v0, %s10066_s11  ;;  %v16945_v18 = vld [vmem:[#allocation170_spill] sm:$0xff]  ;;  %v16946_v13 = vld [vmem:[#allocation135_spill] sm:$0xff] }
 0x42e   : > { %v3280_v0 = vmul.f32 %v16945_v18, %v12852_v34  ;;  %v2960_v63 = vmul.f32 %v16946_v13, %v12852_v34 }
 0x42f   : > { %v12846_v5 = vpop.permute.xlu0 %3990 }
 0x430   : > { %16941 = vst [vmem:[#allocation174_spill] sm:$0xff] %v12846_v5  ;;  %v12854_v58 = vpop.permute.xlu1 %3670 }
 0x431   : > { %16943 = vst [vmem:[#allocation13_spill] sm:$0xff] %v12854_v58  ;;  %4004 = vrot.lane.b32.xlu1 %v3915_v57, %s10066_s11  ;;  %4324 = vrot.lane.b32.xlu0 %v4235_v17, %s10067_s13  ;;  %v16949_v57 = vld [vmem:[#allocation32_spill] sm:$0xff] }
 0x432   : > { %v3920_v58 = vmul.f32 %v16949_v57, %v12852_v34  ;;  %v16950_v17 = vld [vmem:[#allocation120_spill] sm:$0xff] }
 0x433   : > { %v12858_v33 = vpop.permute.xlu0 %3346  ;;  %v3600_v59 = vmul.f32 %v16950_v17, %v12852_v34 }
 0x434   : > { %16944 = vst [vmem:[#allocation186_spill] sm:$0xff] %v12858_v33  ;;  %v12864_v7 = vpop.permute.xlu1 %4310 }
 0x435   : > { %16947 = vst [vmem:[#allocation170_spill] sm:$0xff] %v12864_v7  ;;  %3374 = vrot.lane.b32.xlu0 %v3280_v0, %s10065_s29  ;;  %3054 = vrot.lane.b32.xlu1 %v2960_v63, %s10065_s29  ;;  %v4240_v63 = vmul.f32 %v12148_v22, %v12852_v34  ;;  %v16953_v0 = vld [vmem:[#allocation168_spill] sm:$0xff] }
 0x436   : > { %v3278_v7 = vmul.f32 %v16953_v0, %v12874_v30 }
 0x437   : > { %v12868_v9 = vpop.permute.xlu0 %3986 }
 0x438   : > { %16948 = vst [vmem:[#allocation135_spill] sm:$0xff] %v12868_v9  ;;  %v12876_v18 = vpop.permute.xlu1 %3026  ;;  %v13358_v9 = vld [vmem:[#allocation2 + $0x20] sm:$0xff] }
 0x439   : > { %16951 = vst [vmem:[#allocation32_spill] sm:$0xff] %v12876_v18  ;;  %4014 = vrot.lane.b32.xlu0 %v3920_v58, %s10066_s11  ;;  %3694 = vrot.lane.b32.xlu1 %v3600_v59, %s10066_s11  ;;  %v16956_v58 = vld [vmem:[#allocation180_spill] sm:$0xff]  ;;  %v16957_v59 = vld [vmem:[#allocation133_spill] sm:$0xff]  ;;  %17054 = vst [vmem:[#allocation264_spill] sm:$0xff] %v13358_v9 }
 0x43a   : > { %v3918_v18 = vmul.f32 %v16956_v58, %v12874_v30  ;;  %v2958_v51 = vmul.f32 %v16957_v59, %v12874_v30 }
 0x43b   : > { %v12880_v13 = vpop.permute.xlu0 %4626 }
 0x43c   : > { %16952 = vst [vmem:[#allocation120_spill] sm:$0xff] %v12880_v13  ;;  %v12886_v57 = vpop.permute.xlu1 %3666  ;;  %v13342_v13 = vld [vmem:[#allocation2 + $0x8] sm:$0xff] }
 0x43d   : > { %16954 = vst [vmem:[#allocation168_spill] sm:$0xff] %v12886_v57  ;;  %4334 = vrot.lane.b32.xlu1 %v4240_v63, %s10067_s13  ;;  %3370 = vrot.lane.b32.xlu0 %v3278_v7, %s10065_s29  ;;  %v16960_v7 = vld [vmem:[#allocation114_spill] sm:$0xff] }
 0x43e   : > { %v3598_v63 = vmul.f32 %v16960_v7, %v12874_v30  ;;  %v16967_v7 = vld [vmem:[#allocation169_spill] sm:$0xff] }
 0x43f   : > { %v12890_v17 = vpop.permute.xlu0 %3032 }
 0x440   : > { %16955 = vst [vmem:[#allocation187_spill] sm:$0xff] %v12890_v17  ;;  %v12898_v22 = vpop.permute.xlu1 %4306  ;;  %v16961_v17 = vld [vmem:[#allocation140_spill] sm:$0xff] }
 0x441   : > { %16958 = vst [vmem:[#allocation180_spill] sm:$0xff] %v12898_v22  ;;  %4010 = vrot.lane.b32.xlu0 %v3918_v18, %s10066_s11  ;;  %3050 = vrot.lane.b32.xlu1 %v2958_v51, %s10065_s29  ;;  %v2961_v57 = vmul.f32 %v16961_v17, %v12896_v37  ;;  %v4238_v18 = vmul.f32 %v12137_v20, %v12874_v30  ;;  %v16964_v51 = vld [vmem:[#allocation12_spill] sm:$0xff] }
 0x443   : > { %v12902_v0 = vpop.permute.xlu0 %3672 }
 0x444   : > { %16959 = vst [vmem:[#allocation133_spill] sm:$0xff] %v12902_v0  ;;  %v12908_v58 = vpop.permute.xlu1 %3352  ;;  %v3601_v0 = vmul.f32 %v16964_v51, %v12896_v37 }
 0x445   : > { %16962 = vst [vmem:[#allocation114_spill] sm:$0xff] %v12908_v58  ;;  %3690 = vrot.lane.b32.xlu1 %v3598_v63, %s10066_s11  ;;  %3056 = vrot.lane.b32.xlu0 %v2961_v57, %s10065_s29  ;;  %v3281_v63 = vmul.f32 %v16967_v7, %v12896_v37  ;;  %v4241_v57 = vmul.f32 %v12184_v39, %v12896_v37 }
 0x447   : > { %v12912_v59 = vpop.permute.xlu0 %4312 }
 0x448   : > { %16963 = vst [vmem:[#allocation140_spill] sm:$0xff] %v12912_v59  ;;  %v12918_v22 = vpop.permute.xlu1 %3992  ;;  %v12928_v59 = vld [vmem:[#allocation2 + $0xe8] sm:$0xff] }
 0x449   : > { %16965 = vst [vmem:[#allocation12_spill] sm:$0xff] %v12918_v22  ;;  %4330 = vrot.lane.b32.xlu1 %v4238_v18, %s10067_s13  ;;  %3696 = vrot.lane.b32.xlu0 %v3601_v0, %s10066_s11  ;;  %v16970_v0 = vld [vmem:[#allocation17_spill] sm:$0xff] }
 0x44a   : > { %v3921_v18 = vmul.f32 %v16970_v0, %v12896_v37  ;;  %v16978_v0 = vld [vmem:[#allocation26_spill] sm:$0xff] }
 0x44b   : > { %v12922_v17 = vpop.permute.xlu0 %3028 }
 0x44c   : > { %16966 = vst [vmem:[#allocation188_spill] sm:$0xff] %v12922_v17  ;;  %v12930_v20 = vpop.permute.xlu1 %3348  ;;  %v16971_v17 = vld [vmem:[#allocation138_spill] sm:$0xff] }
 0x44d   : > { %16968 = vst [vmem:[#allocation169_spill] sm:$0xff] %v12930_v20  ;;  %3376 = vrot.lane.b32.xlu1 %v3281_v63, %s10065_s29  ;;  %4336 = vrot.lane.b32.xlu0 %v4241_v57, %s10067_s13  ;;  %v2959_v22 = vmul.f32 %v16971_v17, %v12928_v59  ;;  %v16974_v63 = vld [vmem:[#allocation167_spill] sm:$0xff]  ;;  %v16975_v57 = vld [vmem:[#allocation18_spill] sm:$0xff] }
 0x44e   : > { %v3279_v58 = vmul.f32 %v16974_v63, %v12928_v59 }
 0x44f   : > { %v12934_v51 = vpop.permute.xlu0 %3668 }
 0x450   : > { %16969 = vst [vmem:[#allocation189_spill] sm:$0xff] %v12934_v51  ;;  %v12940_v7 = vpop.permute.xlu1 %3988  ;;  %v3599_v51 = vmul.f32 %v16975_v57, %v12928_v59 }
 0x451   : > { %16972 = vst [vmem:[#allocation17_spill] sm:$0xff] %v12940_v7  ;;  %4016 = vrot.lane.b32.xlu1 %v3921_v18, %s10066_s11  ;;  %3052 = vrot.lane.b32.xlu0 %v2959_v22, %s10065_s29  ;;  %v3919_v18 = vmul.f32 %v16978_v0, %v12928_v59  ;;  %v4239_v22 = vmul.f32 %v12177_v21, %v12928_v59 }
 0x452   : > { %v4551_v0 = vmul.f32 %v12278_v23, %v12712_v29  ;;  %v4555_v23 = vmul.f32 %v12300_v3, %v12820_v56 }
 0x453   : > { %v12944_v39 = vpop.permute.xlu0 %4308 }
 0x454   : > { %16973 = vst [vmem:[#allocation138_spill] sm:$0xff] %v12944_v39  ;;  %v12950_v16 = vpop.permute.xlu1 %4628 }
 0x455   : > { %16976 = vst [vmem:[#allocation167_spill] sm:$0xff] %v12950_v16  ;;  %3372 = vrot.lane.b32.xlu1 %v3279_v58, %s10065_s29  ;;  %3692 = vrot.lane.b32.xlu0 %v3599_v51, %s10066_s11  ;;  %v4549_v58 = vmul.f32 %v12268_v50, %v12568_v24  ;;  %v4548_v51 = vmul.f32 %v12266_v44, %v12514_v26 }
 0x456   : > { %v4553_v50 = vmul.f32 %v12288_v10, %v12680_v35  ;;  %v4557_v10 = vmul.f32 %v12310_v53, %v12788_v36 }
 0x457   : > { %v12954_v17 = vpop.permute.xlu0 %3358 }
 0x458   : > { %16977 = vst [vmem:[#allocation18_spill] sm:$0xff] %v12954_v17  ;;  %v12960_v39 = vpop.permute.xlu1 %3038 }
 0x459   : > { %16979 = vst [vmem:[#allocation26_spill] sm:$0xff] %v12960_v39  ;;  %4012 = vrot.lane.b32.xlu1 %v3919_v18, %s10066_s11  ;;  %4332 = vrot.lane.b32.xlu0 %v4239_v22, %s10067_s13  ;;  %v4550_v18 = vmul.f32 %v12276_v2, %v12658_v31 }
 0x45b   : > { %v12964_v63 = vpop.permute.xlu0 %3998 }
 0x45c   : > { %16980 = vst [vmem:[#allocation190_spill] sm:$0xff] %v12964_v63  ;;  %v12970_v57 = vpop.permute.xlu1 %3678 }
 0x45d   : > { %16981 = vst [vmem:[#allocation191_spill] sm:$0xff] %v12970_v57  ;;  %4632 = vrot.lane.b32.xlu1 %v4549_v58, %s10067_s13  ;;  %4630 = vrot.lane.b32.xlu0 %v4548_v51, %s10067_s13  ;;  %v4552_v58 = vmul.f32 %v12286_v14, %v12636_v1  ;;  %v13079_v57 = vld [vmem:[%s16363_s5 + $0x28] sm:$0xff] }
 0x45f   : > { %v12974_v21 = vpop.permute.xlu0 %3354 }
 0x460   : > { %16982 = vst [vmem:[#allocation192_spill] sm:$0xff] %v12974_v21  ;;  %v12980_v22 = vpop.permute.xlu1 %4318 }
 0x461   : > { %16983 = vst [vmem:[#allocation193_spill] sm:$0xff] %v12980_v22  ;;  %4636 = vrot.lane.b32.xlu1 %v4551_v0, %s10067_s13  ;;  %4634 = vrot.lane.b32.xlu0 %v4550_v18, %s10067_s13  ;;  %v4554_v0 = vmul.f32 %v12302_v55, %v12766_v47  ;;  %v4559_v55 = vmul.f32 %v12320_v25, %v12928_v59 }
 0x463   : > { %v12984_v44 = vpop.permute.xlu0 %3994 }
 0x464   : > { %16984 = vst [vmem:[#allocation194_spill] sm:$0xff] %v12984_v44  ;;  %v12990_v51 = vpop.permute.xlu1 %3034 }
 0x465   : > { %16985 = vst [vmem:[#allocation195_spill] sm:$0xff] %v12990_v51  ;;  %4640 = vrot.lane.b32.xlu1 %v4553_v50, %s10067_s13  ;;  %4638 = vrot.lane.b32.xlu0 %v4552_v58, %s10067_s13  ;;  %v4556_v50 = vmul.f32 %v12312_v19, %v12744_v27  ;;  %v4561_v19 = vmul.f32 %v12330_v42, %v12896_v37  ;;  %v13047_v42 = vld [vmem:[%s16363_s5] sm:$0xff] }
 0x467   : > { %v12994_v2 = vpop.permute.xlu0 %3040 }
 0x468   : > { %16986 = vst [vmem:[#allocation196_spill] sm:$0xff] %v12994_v2  ;;  %v13000_v18 = vpop.permute.xlu1 %3674 }
 0x469   : > { %16987 = vst [vmem:[#allocation197_spill] sm:$0xff] %v13000_v18  ;;  %4644 = vrot.lane.b32.xlu1 %v4555_v23, %s10067_s13  ;;  %4642 = vrot.lane.b32.xlu0 %v4554_v0, %s10067_s13  ;;  %v4558_v23 = vmul.f32 %v12322_v28, %v12874_v30  ;;  %v13111_v18 = vld [vmem:[%s16363_s5 + $0x48] sm:$0xff] }
 0x46b   : > { %v13004_v14 = vpop.permute.xlu0 %3680 }
 0x46c   : > { %16988 = vst [vmem:[#allocation198_spill] sm:$0xff] %v13004_v14  ;;  %v13010_v58 = vpop.permute.xlu1 %4314  ;;  %v13073_v14 = vld [vmem:[%s16363_s5 + $0x20] sm:$0xff] }
 0x46d   : > { %16989 = vst [vmem:[#allocation199_spill] sm:$0xff] %v13010_v58  ;;  %4648 = vrot.lane.b32.xlu1 %v4557_v10, %s10067_s13  ;;  %4646 = vrot.lane.b32.xlu0 %v4556_v50, %s10067_s13  ;;  %v4560_v10 = vmul.f32 %v12332_v46, %v12852_v34 }
 0x46f   : > { %v13014_v3 = vpop.permute.xlu0 %4320 }
 0x470   : > { %16990 = vst [vmem:[#allocation200_spill] sm:$0xff] %v13014_v3  ;;  %v13020_v0 = vpop.permute.xlu1 %3360 }
 0x471   : > { %16991 = vst [vmem:[#allocation201_spill] sm:$0xff] %v13020_v0  ;;  %4652 = vrot.lane.b32.xlu1 %v4559_v55, %s10067_s13  ;;  %4650 = vrot.lane.b32.xlu0 %v4558_v23, %s10067_s13  ;;  %v13041_v55 = vld [vmem:[%s16363_s5 + $0x8] sm:$0xff] }
 0x473   : > { %v13024_v53 = vpop.permute.xlu0 %3036 }
 0x474   : > { %16992 = vst [vmem:[#allocation202_spill] sm:$0xff] %v13024_v53  ;;  %v13030_v50 = vpop.permute.xlu1 %4000 }
 0x475   : > { %16993 = vst [vmem:[#allocation203_spill] sm:$0xff] %v13030_v50  ;;  %4656 = vrot.lane.b32.xlu1 %v4561_v19, %s10067_s13  ;;  %4654 = vrot.lane.b32.xlu0 %v4560_v10, %s10067_s13  ;;  %v13057_v19 = vld [vmem:[%s16363_s5 + $0x10] sm:$0xff]  ;;  %v13063_v10 = vld [vmem:[%s16363_s5 + $0x18] sm:$0xff]  ;;  %s10078_s13 = smov 114  }
 0x476   : > { %v13127_v50 = vld [vmem:[%s16363_s5 + $0x58] sm:$0xff] }
 0x477   : > { %v13034_v25 = vpop.permute.xlu0 %3676 }
 0x478   : > { %16994 = vst [vmem:[#allocation204_spill] sm:$0xff] %v13034_v25  ;;  %v13036_v28 = vpop.permute.xlu1 %3356 }
 0x479   : > { %16995 = vst [vmem:[#allocation205_spill] sm:$0xff] %v13036_v28  ;;  %4727 = vperm.xlu1 %9520, %v13041_v55   ;;  %4723 = vperm.xlu0 %9519, %v13047_v42  }
 0x47b   : > { %v13050_v46 = vpop.permute.xlu0 %4316 }
 0x47c   : > { %16996 = vst [vmem:[#allocation206_spill] sm:$0xff] %v13050_v46  ;;  %v13052_v23 = vpop.permute.xlu1 %3996  ;;  %v13095_v46 = vld [vmem:[%s16363_s5 + $0x38] sm:$0xff] }
 0x47d   : > { %16997 = vst [vmem:[#allocation207_spill] sm:$0xff] %v13052_v23  ;;  %4731 = vperm.xlu1 %9520, %v13057_v19   ;;  %4735 = vperm.xlu0 %9519, %v13063_v10  }
 0x47f   : > { %v13066_v3 = vpop.permute.xlu0 %3366 }
 0x480   : > { %16998 = vst [vmem:[#allocation208_spill] sm:$0xff] %v13066_v3  ;;  %v13068_v22 = vpop.permute.xlu1 %3046  ;;  %v13143_v3 = vld [vmem:[%s16363_s5 + $0x68] sm:$0xff] }
 0x481   : > { %16999 = vst [vmem:[#allocation209_spill] sm:$0xff] %v13068_v22  ;;  %4739 = vperm.xlu1 %9520, %v13073_v14   ;;  %4743 = vperm.xlu0 %9519, %v13079_v57   ;;  %v13089_v22 = vld [vmem:[%s16363_s5 + $0x30] sm:$0xff] }
 0x483   : > { %v13082_v2 = vpop.permute.xlu0 %4006 }
 0x484   : > { %17000 = vst [vmem:[#allocation210_spill] sm:$0xff] %v13082_v2  ;;  %v13084_v39 = vpop.permute.xlu1 %3686 }
 0x485   : > { %17001 = vst [vmem:[#allocation211_spill] sm:$0xff] %v13084_v39  ;;  %4747 = vperm.xlu1 %9520, %v13089_v22   ;;  %4751 = vperm.xlu0 %9519, %v13095_v46   ;;  %v13105_v39 = vld [vmem:[%s16363_s5 + $0x40] sm:$0xff] }
 0x487   : > { %v13098_v58 = vpop.permute.xlu0 %3362 }
 0x488   : > { %17002 = vst [vmem:[#allocation212_spill] sm:$0xff] %v13098_v58  ;;  %v13100_v25 = vpop.permute.xlu1 %4326 }
 0x489   : > { %17003 = vst [vmem:[#allocation213_spill] sm:$0xff] %v13100_v25  ;;  %4755 = vperm.xlu1 %9520, %v13105_v39   ;;  %4759 = vperm.xlu0 %9519, %v13111_v18   ;;  %v13121_v25 = vld [vmem:[%s16363_s5 + $0x50] sm:$0xff] }
 0x48b   : > { %v13114_v53 = vpop.permute.xlu0 %4002 }
 0x48c   : > { %17004 = vst [vmem:[#allocation214_spill] sm:$0xff] %v13114_v53  ;;  %v13116_v51 = vpop.permute.xlu1 %3042 }
 0x48d   : > { %17005 = vst [vmem:[#allocation215_spill] sm:$0xff] %v13116_v51  ;;  %4763 = vperm.xlu1 %9520, %v13121_v25   ;;  %4767 = vperm.xlu0 %9519, %v13127_v50   ;;  %v13137_v51 = vld [vmem:[%s16363_s5 + $0x60] sm:$0xff] }
 0x48f   : > { %v13130_v0 = vpop.permute.xlu0 %3048 }
 0x490   : > { %17006 = vst [vmem:[#allocation216_spill] sm:$0xff] %v13130_v0  ;;  %v13132_v2 = vpop.permute.xlu1 %3682  ;;  %v13153_v0 = vld [vmem:[%s16363_s5 + $0x70] sm:$0xff] }
 0x491   : > { %17007 = vst [vmem:[#allocation217_spill] sm:$0xff] %v13132_v2  ;;  %4771 = vperm.xlu1 %9520, %v13137_v51   ;;  %4775 = vperm.xlu0 %9519, %v13143_v3   ;;  %v13159_v2 = vld [vmem:[%s16363_s5 + $0x78] sm:$0xff] }
 0x493   : > { %v13146_v23 = vpop.permute.xlu0 %3688 }
 0x494   : > { %17008 = vst [vmem:[#allocation218_spill] sm:$0xff] %v13146_v23  ;;  %v13148_v28 = vpop.permute.xlu1 %4322  ;;  %v13169_v23 = vld [vmem:[%s16363_s5 + $0x80] sm:$0xff] }
 0x495   : > { %17009 = vst [vmem:[#allocation219_spill] sm:$0xff] %v13148_v28  ;;  %4779 = vperm.xlu1 %9520, %v13153_v0   ;;  %4783 = vperm.xlu0 %9519, %v13159_v2   ;;  %v13175_v28 = vld [vmem:[%s16363_s5 + $0x88] sm:$0xff] }
 0x497   : > { %v13162_v53 = vpop.permute.xlu0 %4328 }
 0x498   : > { %17010 = vst [vmem:[#allocation220_spill] sm:$0xff] %v13162_v53  ;;  %v13164_v58 = vpop.permute.xlu1 %3368  ;;  %v13185_v53 = vld [vmem:[%s16363_s5 + $0x90] sm:$0xff] }
 0x499   : > { %17011 = vst [vmem:[#allocation221_spill] sm:$0xff] %v13164_v58  ;;  %4787 = vperm.xlu1 %9520, %v13169_v23   ;;  %4791 = vperm.xlu0 %9519, %v13175_v28   ;;  %v13191_v58 = vld [vmem:[%s16363_s5 + $0x98] sm:$0xff] }
 0x49b   : > { %v13178_v15 = vpop.permute.xlu0 %3044 }
 0x49c   : > { %17012 = vst [vmem:[#allocation222_spill] sm:$0xff] %v13178_v15  ;;  %v13180_v41 = vpop.permute.xlu1 %4008  ;;  %v13201_v15 = vld [vmem:[%s16363_s5 + $0xa0] sm:$0xff] }
 0x49d   : > { %17013 = vst [vmem:[#allocation223_spill] sm:$0xff] %v13180_v41  ;;  %4795 = vperm.xlu1 %9520, %v13185_v53   ;;  %4799 = vperm.xlu0 %9519, %v13191_v58   ;;  %v13207_v41 = vld [vmem:[%s16363_s5 + $0xa8] sm:$0xff] }
 0x49f   : > { %v13194_v16 = vpop.permute.xlu0 %3684 }
 0x4a0   : > { %17014 = vst [vmem:[#allocation224_spill] sm:$0xff] %v13194_v16  ;;  %v13196_v49 = vpop.permute.xlu1 %3364  ;;  %v13217_v16 = vld [vmem:[%s16363_s5 + $0xb0] sm:$0xff] }
 0x4a1   : > { %17015 = vst [vmem:[#allocation225_spill] sm:$0xff] %v13196_v49  ;;  %4803 = vperm.xlu1 %9520, %v13201_v15   ;;  %4807 = vperm.xlu0 %9519, %v13207_v41   ;;  %v13223_v49 = vld [vmem:[%s16363_s5 + $0xb8] sm:$0xff] }
 0x4a3   : > { %v13210_v7 = vpop.permute.xlu0 %4324 }
 0x4a4   : > { %17016 = vst [vmem:[#allocation226_spill] sm:$0xff] %v13210_v7  ;;  %v13212_v11 = vpop.permute.xlu1 %4004  ;;  %v13233_v7 = vld [vmem:[%s16363_s5 + $0xc0] sm:$0xff] }
 0x4a5   : > { %17017 = vst [vmem:[#allocation227_spill] sm:$0xff] %v13212_v11  ;;  %4811 = vperm.xlu1 %9520, %v13217_v16   ;;  %4815 = vperm.xlu0 %9519, %v13223_v49   ;;  %v13239_v11 = vld [vmem:[%s16363_s5 + $0xc8] sm:$0xff] }
 0x4a7   : > { %v13226_v20 = vpop.permute.xlu0 %3374 }
 0x4a8   : > { %17018 = vst [vmem:[#allocation228_spill] sm:$0xff] %v13226_v20  ;;  %v13228_v61 = vpop.permute.xlu1 %3054  ;;  %v13255_v20 = vld [vmem:[%s16363_s5 + $0xd8] sm:$0xff] }
 0x4a9   : > { %17019 = vst [vmem:[#allocation229_spill] sm:$0xff] %v13228_v61  ;;  %4819 = vperm.xlu1 %9520, %v13233_v7   ;;  %4823 = vperm.xlu0 %9519, %v13239_v11   ;;  %v13249_v61 = vld [vmem:[%s16363_s5 + $0xd0] sm:$0xff] }
 0x4ab   : > { %v13242_v63 = vpop.permute.xlu0 %4014 }
 0x4ac   : > { %17020 = vst [vmem:[#allocation230_spill] sm:$0xff] %v13242_v63  ;;  %v13244_v17 = vpop.permute.xlu1 %3694  ;;  %v13271_v63 = vld [vmem:[%s16363_s5 + $0xe8] sm:$0xff] }
 0x4ad   : > { %17021 = vst [vmem:[#allocation231_spill] sm:$0xff] %v13244_v17  ;;  %4827 = vperm.xlu1 %9520, %v13249_v61   ;;  %4831 = vperm.xlu0 %9519, %v13255_v20   ;;  %v13265_v17 = vld [vmem:[%s16363_s5 + $0xe0] sm:$0xff] }
 0x4af   : > { %v13258_v32 = vpop.permute.xlu0 %3370 }
 0x4b0   : > { %17022 = vst [vmem:[#allocation232_spill] sm:$0xff] %v13258_v32  ;;  %v13260_v4 = vpop.permute.xlu1 %4334  ;;  %v13287_v32 = vld [vmem:[%s16363_s5 + $0xf8] sm:$0xff] }
 0x4b1   : > { %17023 = vst [vmem:[#allocation233_spill] sm:$0xff] %v13260_v4  ;;  %4835 = vperm.xlu1 %9520, %v13265_v17   ;;  %4839 = vperm.xlu0 %9519, %v13271_v63   ;;  %v13281_v4 = vld [vmem:[%s16363_s5 + $0xf0] sm:$0xff] }
 0x4b3   : > { %v13274_v45 = vpop.permute.xlu0 %4010 }
 0x4b4   : > { %17024 = vst [vmem:[#allocation234_spill] sm:$0xff] %v13274_v45  ;;  %v13276_v44 = vpop.permute.xlu1 %3050  ;;  %v10069_v45 = vmov 9  }
 0x4b5   : > { %17025 = vst [vmem:[#allocation235_spill] sm:$0xff] %v13276_v44  ;;  %4843 = vperm.xlu1 %9520, %v13281_v4   ;;  %4847 = vperm.xlu0 %9519, %v13287_v32  }
 0x4b7   : > { %v13290_v21 = vpop.permute.xlu0 %3056 }
 0x4b8   : > { %17026 = vst [vmem:[#allocation236_spill] sm:$0xff] %v13290_v21  ;;  %v13292_v8 = vpop.permute.xlu1 %3690 }
 0x4b9   : > { %17027 = vst [vmem:[#allocation237_spill] sm:$0xff] %v13292_v8  ;;  %9521 = vset.pattern.permute.xlu1 %v10069_v45  ;;  %9522 = vset.pattern.permute.xlu0 %v10069_v45 }
 0x4bb   : > { %v13294_v44 = vpop.permute.xlu0 %3696 }
 0x4bc   : > { %17028 = vst [vmem:[#allocation238_spill] sm:$0xff] %v13294_v44  ;;  %v13296_v6 = vpop.permute.xlu1 %4330 }
 0x4bd   : > { %17029 = vst [vmem:[#allocation239_spill] sm:$0xff] %v13296_v6 }
 0x4bf   : > { %v13298_v12 = vpop.permute.xlu0 %4336 }
 0x4c0   : > { %17030 = vst [vmem:[#allocation240_spill] sm:$0xff] %v13298_v12  ;;  %v13300_v5 = vpop.permute.xlu1 %3376 }
 0x4c1   : > { %17031 = vst [vmem:[#allocation241_spill] sm:$0xff] %v13300_v5 }
 0x4c3   : > { %v13302_v52 = vpop.permute.xlu0 %3052 }
 0x4c4   : > { %17032 = vst [vmem:[#allocation242_spill] sm:$0xff] %v13302_v52  ;;  %v13304_v43 = vpop.permute.xlu1 %4016 }
 0x4c5   : > { %17033 = vst [vmem:[#allocation243_spill] sm:$0xff] %v13304_v43 }
 0x4c7   : > { %v13306_v62 = vpop.permute.xlu0 %3692 }
 0x4c8   : > { %17034 = vst [vmem:[#allocation244_spill] sm:$0xff] %v13306_v62  ;;  %v13308_v21 = vpop.permute.xlu1 %3372 }
 0x4c9   : > { %17035 = vst [vmem:[#allocation245_spill] sm:$0xff] %v13308_v21 }
 0x4cb   : > { %v13310_v8 = vpop.permute.xlu0 %4332 }
 0x4cc   : > { %17036 = vst [vmem:[#allocation246_spill] sm:$0xff] %v13310_v8  ;;  %v13312_v40 = vpop.permute.xlu1 %4012 }
 0x4cd   : > { %17037 = vst [vmem:[#allocation247_spill] sm:$0xff] %v13312_v40 }
 0x4cf   : > { %v13316_v44 = vpop.permute.xlu0 %4630 }
 0x4d0   : > { %v13314_v45 = vpop.permute.xlu1 %4632  ;;  %17039 = vst [vmem:[#allocation249_spill] sm:$0xff] %v13316_v44 }
 0x4d1   : > { %17038 = vst [vmem:[#allocation248_spill] sm:$0xff] %v13314_v45 }
 0x4d3   : > { %v13320_v12 = vpop.permute.xlu0 %4634 }
 0x4d4   : > { %v13318_v6 = vpop.permute.xlu1 %4636  ;;  %17041 = vst [vmem:[#allocation251_spill] sm:$0xff] %v13320_v12 }
 0x4d5   : > { %17040 = vst [vmem:[#allocation250_spill] sm:$0xff] %v13318_v6 }
 0x4d7   : > { %v13324_v52 = vpop.permute.xlu0 %4638 }
 0x4d8   : > { %v13322_v5 = vpop.permute.xlu1 %4640  ;;  %17043 = vst [vmem:[#allocation253_spill] sm:$0xff] %v13324_v52  ;;  %v13345_v52 = vld [vmem:[#allocation2] sm:$0xff] }
 0x4d9   : > { %17042 = vst [vmem:[#allocation252_spill] sm:$0xff] %v13322_v5 }
 0x4db   : > { %v13328_v62 = vpop.permute.xlu0 %4642 }
 0x4dc   : > { %v13326_v43 = vpop.permute.xlu1 %4644  ;;  %17045 = vst [vmem:[#allocation255_spill] sm:$0xff] %v13328_v62 }
 0x4dd   : > { %17044 = vst [vmem:[#allocation254_spill] sm:$0xff] %v13326_v43 }
 0x4df   : > { %v13332_v8 = vpop.permute.xlu0 %4646 }
 0x4e0   : > { %v13330_v21 = vpop.permute.xlu1 %4648  ;;  %17047 = vst [vmem:[#allocation257_spill] sm:$0xff] %v13332_v8  ;;  %v13353_v8 = vld [vmem:[#allocation2 + $0x18] sm:$0xff] }
 0x4e1   : > { %17046 = vst [vmem:[#allocation256_spill] sm:$0xff] %v13330_v21  ;;  %17053 = vst [vmem:[#allocation263_spill] sm:$0xff] %v13353_v8 }
 0x4e3   : > { %v13336_v45 = vpop.permute.xlu0 %4650 }
 0x4e4   : > { %v13334_v40 = vpop.permute.xlu1 %4652  ;;  %17049 = vst [vmem:[#allocation259_spill] sm:$0xff] %v13336_v45 }
 0x4e5   : > { %17048 = vst [vmem:[#allocation258_spill] sm:$0xff] %v13334_v40 }
 0x4e7   : > { %v13340_v6 = vpop.permute.xlu0 %4654 }
 0x4e8   : > { %v13338_v44 = vpop.permute.xlu1 %4656  ;;  %17051 = vst [vmem:[#allocation261_spill] sm:$0xff] %v13340_v6 }
 0x4e9   : > { %17050 = vst [vmem:[#allocation260_spill] sm:$0xff] %v13338_v44  ;;  %v13350_v44 = vld [vmem:[#allocation2 + $0x10] sm:$0xff] }
 0x4ea   : > { %17052 = vst [vmem:[#allocation262_spill] sm:$0xff] %v13350_v44 }
 0x4f8   : > { %v4728_v12 = vpop.permute.xlu1 %4727  ;;  %v4724_v5 = vpop.permute.xlu0 %4723 }
 0x4f9   : > { %v4851_v43 = vmul.f32 %v13342_v13, %v4728_v12  ;;  %v4850_v21 = vmul.f32 %v13345_v52, %v4724_v5 }
 0x4fb   : > { %4916 = vrot.lane.b32.xlu0 %v4851_v43, %s10070_s21  ;;  %4914 = vrot.lane.b32.xlu1 %v4850_v21, %s10070_s21  ;;  %v13361_v21 = vld [vmem:[#allocation2 + $0x28] sm:$0xff] }
 0x4fc   : > { %v4732_v40 = vpop.permute.xlu1 %4731  ;;  %v4736_v45 = vpop.permute.xlu0 %4735  ;;  %17055 = vst [vmem:[#allocation265_spill] sm:$0xff] %v13361_v21 }
 0x4fd   : > { %v4852_v6 = vmul.f32 %v13350_v44, %v4732_v40  ;;  %v4853_v62 = vmul.f32 %v13353_v8, %v4736_v45  ;;  %v13366_v8 = vld [vmem:[#allocation2 + $0x30] sm:$0xff] }
 0x4fe   : > { %17056 = vst [vmem:[#allocation266_spill] sm:$0xff] %v13366_v8 }
 0x4ff   : > { %4918 = vrot.lane.b32.xlu1 %v4852_v6, %s10070_s21  ;;  %4920 = vrot.lane.b32.xlu0 %v4853_v62, %s10070_s21  ;;  %v13369_v62 = vld [vmem:[#allocation2 + $0x38] sm:$0xff] }
 0x500   : > { %v4740_v12 = vpop.permute.xlu1 %4739  ;;  %v4744_v5 = vpop.permute.xlu0 %4743  ;;  %17057 = vst [vmem:[#allocation267_spill] sm:$0xff] %v13369_v62 }
 0x501   : > { %v4854_v43 = vmul.f32 %v13358_v9, %v4740_v12  ;;  %v4855_v33 = vmul.f32 %v13361_v21, %v4744_v5  ;;  %v13374_v21 = vld [vmem:[#allocation2 + $0x40] sm:$0xff] }
 0x502   : > { %17058 = vst [vmem:[#allocation268_spill] sm:$0xff] %v13374_v21 }
 0x503   : > { %4922 = vrot.lane.b32.xlu1 %v4854_v43, %s10070_s21  ;;  %4924 = vrot.lane.b32.xlu0 %v4855_v33, %s10070_s21  ;;  %v13377_v43 = vld [vmem:[#allocation2 + $0x48] sm:$0xff] }
 0x504   : > { %v4748_v40 = vpop.permute.xlu1 %4747  ;;  %v4752_v45 = vpop.permute.xlu0 %4751  ;;  %17059 = vst [vmem:[#allocation269_spill] sm:$0xff] %v13377_v43 }
 0x505   : > { %v4856_v6 = vmul.f32 %v13366_v8, %v4748_v40  ;;  %v4857_v44 = vmul.f32 %v13369_v62, %v4752_v45  ;;  %v13382_v62 = vld [vmem:[#allocation2 + $0x50] sm:$0xff] }
 0x506   : > { %17060 = vst [vmem:[#allocation270_spill] sm:$0xff] %v13382_v62 }
 0x507   : > { %4926 = vrot.lane.b32.xlu1 %v4856_v6, %s10070_s21  ;;  %4928 = vrot.lane.b32.xlu0 %v4857_v44, %s10070_s21  ;;  %v13385_v6 = vld [vmem:[#allocation2 + $0x58] sm:$0xff] }
 0x508   : > { %v4756_v12 = vpop.permute.xlu1 %4755  ;;  %v4760_v5 = vpop.permute.xlu0 %4759 }
 0x509   : > { %v4858_v33 = vmul.f32 %v13374_v21, %v4756_v12  ;;  %v4859_v9 = vmul.f32 %v13377_v43, %v4760_v5  ;;  %v13390_v43 = vld [vmem:[#allocation2 + $0x60] sm:$0xff]  ;;  %v13396_v21 = vld [vmem:[#allocation2 + $0x70] sm:$0xff] }
 0x50a   : > { %17061 = vst [vmem:[#allocation271_spill] sm:$0xff] %v13390_v43  ;;  %17062 = vst [vmem:[#allocation272_spill] sm:$0xff] %v13396_v21 }
 0x50b   : > { %4930 = vrot.lane.b32.xlu1 %v4858_v33, %s10070_s21  ;;  %4932 = vrot.lane.b32.xlu0 %v4859_v9, %s10070_s21 }
 0x50c   : > { %v4764_v40 = vpop.permute.xlu1 %4763  ;;  %v4768_v45 = vpop.permute.xlu0 %4767 }
 0x50d   : > { %v4860_v44 = vmul.f32 %v13382_v62, %v4764_v40  ;;  %v4861_v8 = vmul.f32 %v13385_v6, %v4768_v45 }
 0x50f   : > { %4934 = vrot.lane.b32.xlu1 %v4860_v44, %s10070_s21  ;;  %4936 = vrot.lane.b32.xlu0 %v4861_v8, %s10070_s21 }
 0x510   : > { %v4772_v12 = vpop.permute.xlu1 %4771  ;;  %v4776_v5 = vpop.permute.xlu0 %4775 }
 0x511   : > { %v4862_v9 = vmul.f32 %v13390_v43, %v4772_v12  ;;  %v4863_v33 = vmul.f32 %v4776_v5, %v12478_v60 }
 0x513   : > { %4938 = vrot.lane.b32.xlu1 %v4862_v9, %s10070_s21  ;;  %4940 = vrot.lane.b32.xlu0 %v4863_v33, %s10070_s21 }
 0x514   : > { %v4780_v40 = vpop.permute.xlu1 %4779  ;;  %v4784_v62 = vpop.permute.xlu0 %4783 }
 0x515   : > { %v4864_v45 = vmul.f32 %v13396_v21, %v4780_v40  ;;  %v4865_v8 = vmul.f32 %v4784_v62, %v12446_v48 }
 0x517   : > { %4942 = vrot.lane.b32.xlu1 %v4864_v45, %s10070_s21  ;;  %4944 = vrot.lane.b32.xlu0 %v4865_v8, %s10070_s21 }
 0x518   : > { %v4788_v44 = vpop.permute.xlu1 %4787  ;;  %v4792_v12 = vpop.permute.xlu0 %4791 }
 0x519   : > { %v4866_v60 = vmul.f32 %v4788_v44, %v12536_v38  ;;  %v4867_v5 = vmul.f32 %v4792_v12, %v12604_v54 }
 0x51b   : > { %4946 = vrot.lane.b32.xlu1 %v4866_v60, %s10070_s21  ;;  %4948 = vrot.lane.b32.xlu0 %v4867_v5, %s10070_s21 }
 0x51c   : > { %v4796_v9 = vpop.permute.xlu1 %4795  ;;  %v4800_v33 = vpop.permute.xlu0 %4799 }
 0x51d   : > { %v4868_v40 = vmul.f32 %v4796_v9, %v12514_v26  ;;  %v4869_v48 = vmul.f32 %v4800_v33, %v12568_v24 }
 0x51f   : > { %4950 = vrot.lane.b32.xlu1 %v4868_v40, %s10070_s21  ;;  %4952 = vrot.lane.b32.xlu0 %v4869_v48, %s10070_s21 }
 0x520   : > { %v4804_v62 = vpop.permute.xlu1 %4803  ;;  %v4808_v45 = vpop.permute.xlu0 %4807 }
 0x521   : > { %v4870_v38 = vmul.f32 %v4804_v62, %v12658_v31  ;;  %v4871_v54 = vmul.f32 %v4808_v45, %v12712_v29 }
 0x523   : > { %4954 = vrot.lane.b32.xlu1 %v4870_v38, %s10070_s21  ;;  %4956 = vrot.lane.b32.xlu0 %v4871_v54, %s10070_s21 }
 0x524   : > { %v4812_v8 = vpop.permute.xlu1 %4811  ;;  %v4816_v44 = vpop.permute.xlu0 %4815 }
 0x525   : > { %v4872_v26 = vmul.f32 %v4812_v8, %v12636_v1  ;;  %v4873_v24 = vmul.f32 %v4816_v44, %v12680_v35 }
 0x527   : > { %4958 = vrot.lane.b32.xlu1 %v4872_v26, %s10070_s21  ;;  %4960 = vrot.lane.b32.xlu0 %v4873_v24, %s10070_s21 }
 0x528   : > { %v4820_v12 = vpop.permute.xlu1 %4819  ;;  %v4824_v60 = vpop.permute.xlu0 %4823 }
 0x529   : > { %v4874_v31 = vmul.f32 %v4820_v12, %v12766_v47  ;;  %v4875_v29 = vmul.f32 %v4824_v60, %v12820_v56 }
 0x52b   : > { %4962 = vrot.lane.b32.xlu1 %v4874_v31, %s10070_s21  ;;  %4964 = vrot.lane.b32.xlu0 %v4875_v29, %s10070_s21 }
 0x52c   : > { %v4828_v5 = vpop.permute.xlu1 %4827  ;;  %v4832_v9 = vpop.permute.xlu0 %4831 }
 0x52d   : > { %v4876_v1 = vmul.f32 %v4828_v5, %v12744_v27  ;;  %v4877_v35 = vmul.f32 %v4832_v9, %v12788_v36  ;;  %v10071_v9 = vmov 10  }
 0x52f   : > { %4966 = vrot.lane.b32.xlu1 %v4876_v1, %s10070_s21  ;;  %4968 = vrot.lane.b32.xlu0 %v4877_v35, %s10070_s21 }
 0x530   : > { %v4836_v33 = vpop.permute.xlu1 %4835  ;;  %v4840_v40 = vpop.permute.xlu0 %4839 }
 0x531   : > { %v4878_v48 = vmul.f32 %v4836_v33, %v12874_v30  ;;  %v4879_v62 = vmul.f32 %v4840_v40, %v12928_v59 }
 0x533   : > { %4970 = vrot.lane.b32.xlu1 %v4878_v48, %s10070_s21  ;;  %4972 = vrot.lane.b32.xlu0 %v4879_v62, %s10070_s21 }
 0x534   : > { %v4844_v45 = vpop.permute.xlu1 %4843  ;;  %v4848_v38 = vpop.permute.xlu0 %4847 }
 0x535   : > { %v4880_v54 = vmul.f32 %v4844_v45, %v12852_v34  ;;  %v4881_v8 = vmul.f32 %v4848_v38, %v12896_v37 }
 0x537   : > { %4974 = vrot.lane.b32.xlu1 %v4880_v54, %s10070_s21  ;;  %4976 = vrot.lane.b32.xlu0 %v4881_v8, %s10070_s21 }
 0x53b   : > { %5043 = vperm.xlu1 %9521, %v13047_v42   ;;  %5047 = vperm.xlu0 %9522, %v13041_v55  }
 0x53f   : > { %5051 = vperm.xlu1 %9521, %v13057_v19   ;;  %5059 = vperm.xlu0 %9522, %v13073_v14  }
 0x543   : > { %5055 = vperm.xlu1 %9521, %v13063_v10   ;;  %5067 = vperm.xlu0 %9522, %v13089_v22  }
 0x547   : > { %5063 = vperm.xlu1 %9521, %v13079_v57   ;;  %5075 = vperm.xlu0 %9522, %v13105_v39  }
 0x54b   : > { %5071 = vperm.xlu1 %9521, %v13095_v46   ;;  %5083 = vperm.xlu0 %9522, %v13121_v25  }
 0x54f   : > { %5079 = vperm.xlu1 %9521, %v13111_v18   ;;  %5091 = vperm.xlu0 %9522, %v13137_v51  }
 0x553   : > { %5087 = vperm.xlu1 %9521, %v13127_v50   ;;  %5099 = vperm.xlu0 %9522, %v13153_v0  }
 0x557   : > { %5095 = vperm.xlu1 %9521, %v13143_v3   ;;  %5107 = vperm.xlu0 %9522, %v13169_v23  }
 0x55b   : > { %5103 = vperm.xlu1 %9521, %v13159_v2   ;;  %5115 = vperm.xlu0 %9522, %v13185_v53  }
 0x55f   : > { %5111 = vperm.xlu1 %9521, %v13175_v28   ;;  %5123 = vperm.xlu0 %9522, %v13201_v15  }
 0x563   : > { %5119 = vperm.xlu1 %9521, %v13191_v58   ;;  %5131 = vperm.xlu0 %9522, %v13217_v16  }
 0x567   : > { %5127 = vperm.xlu1 %9521, %v13207_v41   ;;  %5139 = vperm.xlu0 %9522, %v13233_v7  }
 0x56b   : > { %5135 = vperm.xlu1 %9521, %v13223_v49   ;;  %5147 = vperm.xlu0 %9522, %v13249_v61  }
 0x56d   : > { %v13460_v44 = vpop.permute.xlu1 %4914  ;;  %v13462_v26 = vpop.permute.xlu0 %4916 }
 0x56e   : > { %17063 = vst [vmem:[#allocation273_spill] sm:$0xff] %v13460_v44  ;;  %17064 = vst [vmem:[#allocation274_spill] sm:$0xff] %v13462_v26  ;;  %v17100_v44 = vld [vmem:[#allocation268_spill] sm:$0xff] }
 0x56f   : > { %5143 = vperm.xlu1 %9521, %v13239_v11   ;;  %5155 = vperm.xlu0 %9522, %v13265_v17  }
 0x571   : > { %v13466_v24 = vpop.permute.xlu1 %4918  ;;  %v13468_v12 = vpop.permute.xlu0 %4920 }
 0x572   : > { %17065 = vst [vmem:[#allocation275_spill] sm:$0xff] %v13466_v24  ;;  %17066 = vst [vmem:[#allocation276_spill] sm:$0xff] %v13468_v12  ;;  %v17096_v12 = vld [vmem:[#allocation264_spill] sm:$0xff]  ;;  %v17097_v24 = vld [vmem:[#allocation263_spill] sm:$0xff] }
 0x573   : > { %5151 = vperm.xlu1 %9521, %v13255_v20   ;;  %5163 = vperm.xlu0 %9522, %v13281_v4  }
 0x575   : > { %v13472_v60 = vpop.permute.xlu1 %4922  ;;  %v13474_v31 = vpop.permute.xlu0 %4924 }
 0x576   : > { %17067 = vst [vmem:[#allocation277_spill] sm:$0xff] %v13472_v60  ;;  %17068 = vst [vmem:[#allocation278_spill] sm:$0xff] %v13474_v31 }
 0x577   : > { %5159 = vperm.xlu1 %9521, %v13271_v63   ;;  %9523 = vset.pattern.permute.xlu0 %v10071_v9 }
 0x579   : > { %v13477_v29 = vpop.permute.xlu1 %4926  ;;  %v13479_v5 = vpop.permute.xlu0 %4928 }
 0x57a   : > { %17069 = vst [vmem:[#allocation279_spill] sm:$0xff] %v13477_v29  ;;  %17070 = vst [vmem:[#allocation280_spill] sm:$0xff] %v13479_v5 }
 0x57b   : > { %5167 = vperm.xlu1 %9521, %v13287_v32  }
 0x57d   : > { %v13482_v1 = vpop.permute.xlu1 %4930  ;;  %v13484_v35 = vpop.permute.xlu0 %4932 }
 0x57e   : > { %17071 = vst [vmem:[#allocation281_spill] sm:$0xff] %v13482_v1  ;;  %17072 = vst [vmem:[#allocation282_spill] sm:$0xff] %v13484_v35 }
 0x57f   : > { %9524 = vset.pattern.permute.xlu1 %v10071_v9 }
 0x581   : > { %v13486_v33 = vpop.permute.xlu1 %4934  ;;  %v13488_v40 = vpop.permute.xlu0 %4936 }
 0x582   : > { %17073 = vst [vmem:[#allocation283_spill] sm:$0xff] %v13486_v33  ;;  %17074 = vst [vmem:[#allocation284_spill] sm:$0xff] %v13488_v40 }
 0x585   : > { %v13490_v48 = vpop.permute.xlu1 %4938  ;;  %v13492_v62 = vpop.permute.xlu0 %4940 }
 0x586   : > { %17075 = vst [vmem:[#allocation285_spill] sm:$0xff] %v13490_v48  ;;  %17076 = vst [vmem:[#allocation286_spill] sm:$0xff] %v13492_v62 }
 0x589   : > { %v13494_v45 = vpop.permute.xlu1 %4942  ;;  %v13496_v38 = vpop.permute.xlu0 %4944 }
 0x58a   : > { %17077 = vst [vmem:[#allocation287_spill] sm:$0xff] %v13494_v45  ;;  %17078 = vst [vmem:[#allocation288_spill] sm:$0xff] %v13496_v38 }
 0x58d   : > { %v13498_v54 = vpop.permute.xlu1 %4946  ;;  %v13500_v8 = vpop.permute.xlu0 %4948 }
 0x58e   : > { %17079 = vst [vmem:[#allocation289_spill] sm:$0xff] %v13498_v54  ;;  %17080 = vst [vmem:[#allocation290_spill] sm:$0xff] %v13500_v8  ;;  %v17101_v8 = vld [vmem:[#allocation267_spill] sm:$0xff]  ;;  %v17102_v54 = vld [vmem:[#allocation270_spill] sm:$0xff] }
 0x591   : > { %v13502_v1 = vpop.permute.xlu1 %4950  ;;  %v13504_v35 = vpop.permute.xlu0 %4952 }
 0x592   : > { %17081 = vst [vmem:[#allocation291_spill] sm:$0xff] %v13502_v1  ;;  %17082 = vst [vmem:[#allocation292_spill] sm:$0xff] %v13504_v35  ;;  %v17099_v1 = vld [vmem:[#allocation265_spill] sm:$0xff] }
 0x595   : > { %v13506_v9 = vpop.permute.xlu1 %4954  ;;  %v13508_v33 = vpop.permute.xlu0 %4956 }
 0x596   : > { %17083 = vst [vmem:[#allocation293_spill] sm:$0xff] %v13506_v9  ;;  %17084 = vst [vmem:[#allocation294_spill] sm:$0xff] %v13508_v33 }
 0x599   : > { %v13510_v40 = vpop.permute.xlu1 %4958  ;;  %v13512_v48 = vpop.permute.xlu0 %4960 }
 0x59a   : > { %17085 = vst [vmem:[#allocation295_spill] sm:$0xff] %v13510_v40  ;;  %17086 = vst [vmem:[#allocation296_spill] sm:$0xff] %v13512_v48 }
 0x59d   : > { %v13514_v62 = vpop.permute.xlu1 %4962  ;;  %v13516_v45 = vpop.permute.xlu0 %4964 }
 0x59e   : > { %17087 = vst [vmem:[#allocation297_spill] sm:$0xff] %v13514_v62  ;;  %17088 = vst [vmem:[#allocation298_spill] sm:$0xff] %v13516_v45  ;;  %v17095_v45 = vld [vmem:[#allocation262_spill] sm:$0xff] }
 0x5a1   : > { %v13518_v38 = vpop.permute.xlu1 %4966  ;;  %v13520_v5 = vpop.permute.xlu0 %4968 }
 0x5a2   : > { %17089 = vst [vmem:[#allocation299_spill] sm:$0xff] %v13518_v38  ;;  %17090 = vst [vmem:[#allocation300_spill] sm:$0xff] %v13520_v5 }
 0x5a5   : > { %v13522_v29 = vpop.permute.xlu1 %4970  ;;  %v13524_v31 = vpop.permute.xlu0 %4972 }
 0x5a6   : > { %17091 = vst [vmem:[#allocation301_spill] sm:$0xff] %v13522_v29  ;;  %17092 = vst [vmem:[#allocation302_spill] sm:$0xff] %v13524_v31 }
 0x5a9   : > { %v13526_v60 = vpop.permute.xlu1 %4974  ;;  %v13528_v9 = vpop.permute.xlu0 %4976 }
 0x5aa   : > { %17093 = vst [vmem:[#allocation303_spill] sm:$0xff] %v13526_v60  ;;  %17094 = vst [vmem:[#allocation304_spill] sm:$0xff] %v13528_v9 }
 0x5ba   : > { %v5044_v33 = vpop.permute.xlu1 %5043  ;;  %v5048_v40 = vpop.permute.xlu0 %5047 }
 0x5bb   : > { %v5170_v48 = vmul.f32 %v13345_v52, %v5044_v33  ;;  %v5171_v62 = vmul.f32 %v13342_v13, %v5048_v40 }
 0x5bd   : > { %5234 = vrot.lane.b32.xlu0 %v5170_v48, %s10070_s21  ;;  %5236 = vrot.lane.b32.xlu1 %v5171_v62, %s10070_s21  ;;  %v17098_v48 = vld [vmem:[#allocation266_spill] sm:$0xff] }
 0x5be   : > { %v5052_v38 = vpop.permute.xlu1 %5051  ;;  %v5060_v5 = vpop.permute.xlu0 %5059 }
 0x5bf   : > { %v5172_v29 = vmul.f32 %v17095_v45, %v5052_v38  ;;  %v5174_v9 = vmul.f32 %v17096_v12, %v5060_v5 }
 0x5c1   : > { %5238 = vrot.lane.b32.xlu0 %v5172_v29, %s10070_s21 }
 0x5c2   : > { %v5056_v31 = vpop.permute.xlu1 %5055  ;;  %v5068_v60 = vpop.permute.xlu0 %5067 }
 0x5c3   : > { %v5173_v35 = vmul.f32 %v17097_v24, %v5056_v31  ;;  %v5176_v62 = vmul.f32 %v17098_v48, %v5068_v60  ;;  %v17103_v48 = vld [vmem:[#allocation269_spill] sm:$0xff] }
 0x5c5   : > { %5240 = vrot.lane.b32.xlu1 %v5173_v35, %s10070_s21  ;;  %5242 = vrot.lane.b32.xlu0 %v5174_v9, %s10070_s21 }
 0x5c6   : > { %v5064_v33 = vpop.permute.xlu1 %5063  ;;  %v5076_v40 = vpop.permute.xlu0 %5075 }
 0x5c7   : > { %v5175_v26 = vmul.f32 %v17099_v1, %v5064_v33  ;;  %v5178_v5 = vmul.f32 %v17100_v44, %v5076_v40 }
 0x5c9   : > { %5244 = vrot.lane.b32.xlu1 %v5175_v26, %s10070_s21  ;;  %5246 = vrot.lane.b32.xlu0 %v5176_v62, %s10070_s21 }
 0x5ca   : > { %v5072_v29 = vpop.permute.xlu1 %5071  ;;  %v5084_v38 = vpop.permute.xlu0 %5083 }
 0x5cb   : > { %v5177_v31 = vmul.f32 %v17101_v8, %v5072_v29  ;;  %v5180_v60 = vmul.f32 %v17102_v54, %v5084_v38  ;;  %v13557_v54 = vld [vmem:[#allocation2 + $0x68] sm:$0xff] }
 0x5cd   : > { %5248 = vrot.lane.b32.xlu1 %v5177_v31, %s10070_s21  ;;  %5250 = vrot.lane.b32.xlu0 %v5178_v5, %s10070_s21 }
 0x5ce   : > { %v5080_v35 = vpop.permute.xlu1 %5079  ;;  %v5092_v9 = vpop.permute.xlu0 %5091 }
 0x5cf   : > { %v5179_v33 = vmul.f32 %v17103_v48, %v5080_v35  ;;  %v5182_v40 = vmul.f32 %v13390_v43, %v5092_v9 }
 0x5d1   : > { %5252 = vrot.lane.b32.xlu1 %v5179_v33, %s10070_s21  ;;  %5254 = vrot.lane.b32.xlu0 %v5180_v60, %s10070_s21  ;;  %v13562_v33 = vld [vmem:[#allocation2 + $0x80] sm:$0xff] }
 0x5d2   : > { %v5088_v26 = vpop.permute.xlu1 %5087  ;;  %v5100_v62 = vpop.permute.xlu0 %5099  ;;  %17104 = vst [vmem:[#allocation262_spill] sm:$0xff] %v13562_v33 }
 0x5d3   : > { %v5181_v29 = vmul.f32 %v13385_v6, %v5088_v26  ;;  %v5184_v38 = vmul.f32 %v13396_v21, %v5100_v62  ;;  %v13570_v21 = vld [vmem:[#allocation2 + $0x90] sm:$0xff] }
 0x5d4   : > { %17106 = vst [vmem:[#allocation263_spill] sm:$0xff] %v13570_v21 }
 0x5d5   : > { %5256 = vrot.lane.b32.xlu1 %v5181_v29, %s10070_s21  ;;  %5258 = vrot.lane.b32.xlu0 %v5182_v40, %s10070_s21  ;;  %v13565_v29 = vld [vmem:[#allocation2 + $0x78] sm:$0xff] }
 0x5d6   : > { %v5096_v5 = vpop.permute.xlu1 %5095  ;;  %v5108_v31 = vpop.permute.xlu0 %5107  ;;  %17105 = vst [vmem:[#allocation264_spill] sm:$0xff] %v13565_v29 }
 0x5d7   : > { %v5183_v35 = vmul.f32 %v13557_v54, %v5096_v5  ;;  %v5186_v26 = vmul.f32 %v13562_v33, %v5108_v31  ;;  %v13578_v33 = vld [vmem:[#allocation2 + $0xa0] sm:$0xff] }
 0x5d8   : > { %17108 = vst [vmem:[#allocation268_spill] sm:$0xff] %v13578_v33 }
 0x5d9   : > { %5260 = vrot.lane.b32.xlu1 %v5183_v35, %s10070_s21  ;;  %5262 = vrot.lane.b32.xlu0 %v5184_v38, %s10070_s21  ;;  %v13573_v35 = vld [vmem:[#allocation2 + $0x88] sm:$0xff] }
 0x5da   : > { %v5104_v60 = vpop.permute.xlu1 %5103  ;;  %v5116_v9 = vpop.permute.xlu0 %5115  ;;  %17107 = vst [vmem:[#allocation265_spill] sm:$0xff] %v13573_v35 }
 0x5db   : > { %v5185_v40 = vmul.f32 %v13565_v29, %v5104_v60  ;;  %v5188_v38 = vmul.f32 %v13570_v21, %v5116_v9  ;;  %v13586_v21 = vld [vmem:[#allocation2 + $0xb0] sm:$0xff] }
 0x5dc   : > { %17109 = vst [vmem:[#allocation267_spill] sm:$0xff] %v13586_v21 }
 0x5dd   : > { %5264 = vrot.lane.b32.xlu1 %v5185_v40, %s10070_s21  ;;  %5266 = vrot.lane.b32.xlu0 %v5186_v26, %s10070_s21  ;;  %v13581_v40 = vld [vmem:[#allocation2 + $0x98] sm:$0xff] }
 0x5de   : > { %v5112_v62 = vpop.permute.xlu1 %5111  ;;  %v5124_v5 = vpop.permute.xlu0 %5123 }
 0x5df   : > { %v5187_v43 = vmul.f32 %v13573_v35, %v5112_v62  ;;  %v5190_v26 = vmul.f32 %v13578_v33, %v5124_v5  ;;  %v13595_v33 = vld [vmem:[#allocation2 + $0xb8] sm:$0xff] }
 0x5e0   : > { %17110 = vst [vmem:[#allocation269_spill] sm:$0xff] %v13595_v33 }
 0x5e1   : > { %5268 = vrot.lane.b32.xlu1 %v5187_v43, %s10070_s21  ;;  %5270 = vrot.lane.b32.xlu0 %v5188_v38, %s10070_s21  ;;  %v13589_v38 = vld [vmem:[#allocation2 + $0xa8] sm:$0xff] }
 0x5e2   : > { %v5120_v31 = vpop.permute.xlu1 %5119  ;;  %v5132_v60 = vpop.permute.xlu0 %5131 }
 0x5e3   : > { %v5189_v29 = vmul.f32 %v13581_v40, %v5120_v31  ;;  %v5192_v43 = vmul.f32 %v13586_v21, %v5132_v60 }
 0x5e5   : > { %5272 = vrot.lane.b32.xlu1 %v5189_v29, %s10070_s21  ;;  %5274 = vrot.lane.b32.xlu0 %v5190_v26, %s10070_s21 }
 0x5e6   : > { %v5128_v9 = vpop.permute.xlu1 %5127  ;;  %v5140_v62 = vpop.permute.xlu0 %5139 }
 0x5e7   : > { %v5191_v35 = vmul.f32 %v13589_v38, %v5128_v9  ;;  %v5194_v29 = vmul.f32 %v5140_v62, %v12766_v47 }
 0x5e9   : > { %5276 = vrot.lane.b32.xlu1 %v5191_v35, %s10070_s21  ;;  %5278 = vrot.lane.b32.xlu0 %v5192_v43, %s10070_s21 }
 0x5ea   : > { %v5136_v5 = vpop.permute.xlu1 %5135  ;;  %v5148_v31 = vpop.permute.xlu0 %5147 }
 0x5eb   : > { %v5193_v26 = vmul.f32 %v13595_v33, %v5136_v5  ;;  %v5196_v9 = vmul.f32 %v5148_v31, %v12744_v27 }
 0x5ed   : > { %5280 = vrot.lane.b32.xlu1 %v5193_v26, %s10070_s21  ;;  %5282 = vrot.lane.b32.xlu0 %v5194_v29, %s10070_s21 }
 0x5ee   : > { %v5144_v60 = vpop.permute.xlu1 %5143  ;;  %v5156_v21 = vpop.permute.xlu0 %5155 }
 0x5ef   : > { %v5195_v35 = vmul.f32 %v5144_v60, %v12820_v56  ;;  %v5198_v47 = vmul.f32 %v5156_v21, %v12874_v30 }
 0x5f1   : > { %5284 = vrot.lane.b32.xlu1 %v5195_v35, %s10070_s21  ;;  %5286 = vrot.lane.b32.xlu0 %v5196_v9, %s10070_s21 }
 0x5f2   : > { %v5152_v43 = vpop.permute.xlu1 %5151  ;;  %v5164_v5 = vpop.permute.xlu0 %5163 }
 0x5f3   : > { %v5197_v62 = vmul.f32 %v5152_v43, %v12788_v36  ;;  %v5200_v26 = vmul.f32 %v5164_v5, %v12852_v34 }
 0x5f5   : > { %5288 = vrot.lane.b32.xlu1 %v5197_v62, %s10070_s21  ;;  %5290 = vrot.lane.b32.xlu0 %v5198_v47, %s10070_s21 }
 0x5f6   : > { %v5160_v29 = vpop.permute.xlu1 %5159 }
 0x5f7   : > { %v5199_v27 = vmul.f32 %v5160_v29, %v12928_v59 }
 0x5f9   : > { %5292 = vrot.lane.b32.xlu1 %v5199_v27, %s10070_s21  ;;  %5294 = vrot.lane.b32.xlu0 %v5200_v26, %s10070_s21 }
 0x5fa   : > { %v5168_v56 = vpop.permute.xlu1 %5167 }
 0x5fb   : > { %v5201_v31 = vmul.f32 %v5168_v56, %v12896_v37 }
 0x5fd   : > { %5296 = vrot.lane.b32.xlu1 %v5201_v31, %s10070_s21  ;;  %5363 = vperm.xlu0 %9523, %v13047_v42   ;;  %s8508_s21 = sshll.u32 %s17745_s20, 3 }
 0x5fe   : > { %s349_s24 = scalar_lea.vmem %s16367_s9, %s8508_s21 }
 0x601   : > { %5367 = vperm.xlu1 %9524, %v13041_v55   ;;  %5375 = vperm.xlu0 %9523, %v13063_v10   ;;  %v10072_v10 = vmov 11  }
 0x605   : > { %5371 = vperm.xlu1 %9524, %v13057_v19   ;;  %5383 = vperm.xlu0 %9523, %v13079_v57  }
 0x609   : > { %5379 = vperm.xlu1 %9524, %v13073_v14   ;;  %5391 = vperm.xlu0 %9523, %v13095_v46  }
 0x60d   : > { %5387 = vperm.xlu1 %9524, %v13089_v22   ;;  %5399 = vperm.xlu0 %9523, %v13111_v18  }
 0x611   : > { %5395 = vperm.xlu1 %9524, %v13105_v39   ;;  %5407 = vperm.xlu0 %9523, %v13127_v50  }
 0x615   : > { %5403 = vperm.xlu1 %9524, %v13121_v25   ;;  %5415 = vperm.xlu0 %9523, %v13143_v3  }
 0x619   : > { %5411 = vperm.xlu1 %9524, %v13137_v51   ;;  %5423 = vperm.xlu0 %9523, %v13159_v2  }
 0x61d   : > { %5419 = vperm.xlu1 %9524, %v13153_v0   ;;  %5431 = vperm.xlu0 %9523, %v13175_v28  }
 0x621   : > { %5427 = vperm.xlu1 %9524, %v13169_v23   ;;  %5439 = vperm.xlu0 %9523, %v13191_v58  }
 0x625   : > { %5435 = vperm.xlu1 %9524, %v13185_v53   ;;  %5447 = vperm.xlu0 %9523, %v13207_v41  }
 0x629   : > { %5443 = vperm.xlu1 %9524, %v13201_v15   ;;  %5455 = vperm.xlu0 %9523, %v13223_v49  }
 0x62d   : > { %5451 = vperm.xlu1 %9524, %v13217_v16   ;;  %5463 = vperm.xlu0 %9523, %v13239_v11  }
 0x62f   : > { %v13639_v37 = vpop.permute.xlu0 %5234  ;;  %v13643_v30 = vpop.permute.xlu1 %5236 }
 0x630   : > { %17111 = vst [vmem:[#allocation305_spill] sm:$0xff] %v13639_v37  ;;  %17112 = vst [vmem:[#allocation306_spill] sm:$0xff] %v13643_v30  ;;  %v17145_v30 = vld [vmem:[#allocation271_spill] sm:$0xff] }
 0x631   : > { %5459 = vperm.xlu1 %9524, %v13233_v7   ;;  %5471 = vperm.xlu0 %9523, %v13255_v20   ;;  %v13758_v37 = vld [vmem:[#allocation2 + $0xc8] sm:$0xff] }
 0x633   : > { %v13645_v36 = vpop.permute.xlu0 %5238 }
 0x634   : > { %17113 = vst [vmem:[#allocation307_spill] sm:$0xff] %v13645_v36  ;;  %v17151_v36 = vld [vmem:[#allocation268_spill] sm:$0xff] }
 0x635   : > { %5467 = vperm.xlu1 %9524, %v13249_v61   ;;  %5479 = vperm.xlu0 %9523, %v13271_v63  }
 0x637   : > { %v13649_v34 = vpop.permute.xlu1 %5240  ;;  %v13651_v59 = vpop.permute.xlu0 %5242 }
 0x638   : > { %17114 = vst [vmem:[#allocation308_spill] sm:$0xff] %v13649_v34  ;;  %17115 = vst [vmem:[#allocation309_spill] sm:$0xff] %v13651_v59  ;;  %v17149_v59 = vld [vmem:[#allocation262_spill] sm:$0xff] }
 0x639   : > { %5475 = vperm.xlu1 %9524, %v13265_v17   ;;  %5487 = vperm.xlu0 %9523, %v13287_v32  }
 0x63b   : > { %v13655_v57 = vpop.permute.xlu1 %5244  ;;  %v13657_v55 = vpop.permute.xlu0 %5246 }
 0x63c   : > { %17116 = vst [vmem:[#allocation310_spill] sm:$0xff] %v13655_v57  ;;  %17117 = vst [vmem:[#allocation311_spill] sm:$0xff] %v13657_v55  ;;  %v17147_v55 = vld [vmem:[#allocation272_spill] sm:$0xff] }
 0x63d   : > { %5483 = vperm.xlu1 %9524, %v13281_v4   ;;  %9526 = vset.pattern.permute.xlu0 %v10072_v10 }
 0x63f   : > { %v13660_v42 = vpop.permute.xlu1 %5248  ;;  %v13662_v19 = vpop.permute.xlu0 %5250 }
 0x640   : > { %17118 = vst [vmem:[#allocation312_spill] sm:$0xff] %v13660_v42  ;;  %17119 = vst [vmem:[#allocation313_spill] sm:$0xff] %v13662_v19 }
 0x641   : > { %9525 = vset.pattern.permute.xlu1 %v10072_v10 }
 0x643   : > { %v13664_v21 = vpop.permute.xlu1 %5252  ;;  %v13666_v60 = vpop.permute.xlu0 %5254 }
 0x644   : > { %17120 = vst [vmem:[#allocation314_spill] sm:$0xff] %v13664_v21  ;;  %17121 = vst [vmem:[#allocation315_spill] sm:$0xff] %v13666_v60 }
 0x647   : > { %v13668_v9 = vpop.permute.xlu1 %5256  ;;  %v13670_v35 = vpop.permute.xlu0 %5258 }
 0x648   : > { %17122 = vst [vmem:[#allocation316_spill] sm:$0xff] %v13668_v9  ;;  %17123 = vst [vmem:[#allocation317_spill] sm:$0xff] %v13670_v35 }
 0x64b   : > { %v13672_v43 = vpop.permute.xlu1 %5260  ;;  %v13674_v47 = vpop.permute.xlu0 %5262 }
 0x64c   : > { %17124 = vst [vmem:[#allocation318_spill] sm:$0xff] %v13672_v43  ;;  %17125 = vst [vmem:[#allocation319_spill] sm:$0xff] %v13674_v47 }
 0x64f   : > { %v13676_v62 = vpop.permute.xlu1 %5264  ;;  %v13678_v5 = vpop.permute.xlu0 %5266 }
 0x650   : > { %17126 = vst [vmem:[#allocation320_spill] sm:$0xff] %v13676_v62  ;;  %17127 = vst [vmem:[#allocation321_spill] sm:$0xff] %v13678_v5 }
 0x653   : > { %v13680_v29 = vpop.permute.xlu1 %5268  ;;  %v13682_v26 = vpop.permute.xlu0 %5270 }
 0x654   : > { %17128 = vst [vmem:[#allocation322_spill] sm:$0xff] %v13680_v29  ;;  %17129 = vst [vmem:[#allocation323_spill] sm:$0xff] %v13682_v26  ;;  %v17146_v29 = vld [vmem:[#allocation264_spill] sm:$0xff]  ;;  %v17152_v26 = vld [vmem:[#allocation267_spill] sm:$0xff] }
 0x657   : > { %v13684_v27 = vpop.permute.xlu1 %5272  ;;  %v13686_v56 = vpop.permute.xlu0 %5274 }
 0x658   : > { %17130 = vst [vmem:[#allocation324_spill] sm:$0xff] %v13684_v27  ;;  %17131 = vst [vmem:[#allocation325_spill] sm:$0xff] %v13686_v56  ;;  %v17144_v27 = vld [vmem:[#allocation270_spill] sm:$0xff]  ;;  %v17150_v56 = vld [vmem:[#allocation263_spill] sm:$0xff] }
 0x65b   : > { %v13688_v31 = vpop.permute.xlu1 %5276  ;;  %v13690_v10 = vpop.permute.xlu0 %5278 }
 0x65c   : > { %17132 = vst [vmem:[#allocation326_spill] sm:$0xff] %v13688_v31  ;;  %17133 = vst [vmem:[#allocation327_spill] sm:$0xff] %v13690_v10  ;;  %v17148_v10 = vld [vmem:[#allocation265_spill] sm:$0xff] }
 0x65f   : > { %v13692_v9 = vpop.permute.xlu1 %5280  ;;  %v13694_v43 = vpop.permute.xlu0 %5282 }
 0x660   : > { %17134 = vst [vmem:[#allocation328_spill] sm:$0xff] %v13692_v9  ;;  %17135 = vst [vmem:[#allocation329_spill] sm:$0xff] %v13694_v43  ;;  %v17143_v43 = vld [vmem:[#allocation266_spill] sm:$0xff] }
 0x661   : > { %17153 = vst [vmem:[#allocation266_spill] sm:$0xff] %v13758_v37 }
 0x663   : > { %v13696_v21 = vpop.permute.xlu1 %5284  ;;  %v13698_v62 = vpop.permute.xlu0 %5286 }
 0x664   : > { %17136 = vst [vmem:[#allocation330_spill] sm:$0xff] %v13696_v21  ;;  %17137 = vst [vmem:[#allocation331_spill] sm:$0xff] %v13698_v62 }
 0x667   : > { %v13700_v47 = vpop.permute.xlu1 %5288  ;;  %v13702_v35 = vpop.permute.xlu0 %5290 }
 0x668   : > { %17138 = vst [vmem:[#allocation332_spill] sm:$0xff] %v13700_v47  ;;  %17139 = vst [vmem:[#allocation333_spill] sm:$0xff] %v13702_v35 }
 0x66b   : > { %v13704_v42 = vpop.permute.xlu1 %5292  ;;  %v13706_v60 = vpop.permute.xlu0 %5294 }
 0x66c   : > { %17140 = vst [vmem:[#allocation334_spill] sm:$0xff] %v13704_v42  ;;  %17141 = vst [vmem:[#allocation335_spill] sm:$0xff] %v13706_v60 }
 0x66f   : > { %v13708_v57 = vpop.permute.xlu1 %5296 }
 0x670   : > { %17142 = vst [vmem:[#allocation336_spill] sm:$0xff] %v13708_v57 }
 0x67c   : > { %v5364_v31 = vpop.permute.xlu0 %5363 }
 0x67d   : > { %v5490_v19 = vmul.f32 %v13345_v52, %v5364_v31 }
 0x67f   : > { %5554 = vrot.lane.b32.xlu1 %v5490_v19, %s10073_s22 }
 0x680   : > { %v5368_v9 = vpop.permute.xlu1 %5367  ;;  %v5376_v21 = vpop.permute.xlu0 %5375 }
 0x681   : > { %v5491_v62 = vmul.f32 %v13342_v13, %v5368_v9  ;;  %v5493_v42 = vmul.f32 %v17097_v24, %v5376_v21 }
 0x683   : > { %5556 = vrot.lane.b32.xlu0 %v5491_v62, %s10073_s22 }
 0x684   : > { %v5372_v47 = vpop.permute.xlu1 %5371  ;;  %v5384_v35 = vpop.permute.xlu0 %5383 }
 0x685   : > { %v5492_v60 = vmul.f32 %v17095_v45, %v5372_v47  ;;  %v5495_v19 = vmul.f32 %v17099_v1, %v5384_v35 }
 0x687   : > { %5558 = vrot.lane.b32.xlu1 %v5492_v60, %s10073_s22  ;;  %5560 = vrot.lane.b32.xlu0 %v5493_v42, %s10073_s22 }
 0x688   : > { %v5380_v31 = vpop.permute.xlu1 %5379  ;;  %v5392_v57 = vpop.permute.xlu0 %5391 }
 0x689   : > { %v5494_v34 = vmul.f32 %v17096_v12, %v5380_v31  ;;  %v5497_v21 = vmul.f32 %v17101_v8, %v5392_v57 }
 0x68b   : > { %5562 = vrot.lane.b32.xlu1 %v5494_v34, %s10073_s22  ;;  %5564 = vrot.lane.b32.xlu0 %v5495_v19, %s10073_s22 }
 0x68c   : > { %v5388_v9 = vpop.permute.xlu1 %5387  ;;  %v5400_v62 = vpop.permute.xlu0 %5399 }
 0x68d   : > { %v5496_v47 = vmul.f32 %v17143_v43, %v5388_v9  ;;  %v5499_v35 = vmul.f32 %v17103_v48, %v5400_v62 }
 0x68f   : > { %5566 = vrot.lane.b32.xlu1 %v5496_v47, %s10073_s22  ;;  %5568 = vrot.lane.b32.xlu0 %v5497_v21, %s10073_s22 }
 0x690   : > { %v5396_v42 = vpop.permute.xlu1 %5395  ;;  %v5408_v60 = vpop.permute.xlu0 %5407 }
 0x691   : > { %v5498_v31 = vmul.f32 %v17100_v44, %v5396_v42  ;;  %v5501_v57 = vmul.f32 %v13385_v6, %v5408_v60 }
 0x693   : > { %5570 = vrot.lane.b32.xlu1 %v5498_v31, %s10073_s22  ;;  %5572 = vrot.lane.b32.xlu0 %v5499_v35, %s10073_s22 }
 0x694   : > { %v5404_v34 = vpop.permute.xlu1 %5403  ;;  %v5416_v19 = vpop.permute.xlu0 %5415 }
 0x695   : > { %v5500_v9 = vmul.f32 %v17144_v27, %v5404_v34  ;;  %v5503_v62 = vmul.f32 %v13557_v54, %v5416_v19 }
 0x697   : > { %5574 = vrot.lane.b32.xlu1 %v5500_v9, %s10073_s22  ;;  %5576 = vrot.lane.b32.xlu0 %v5501_v57, %s10073_s22 }
 0x698   : > { %v5412_v21 = vpop.permute.xlu1 %5411  ;;  %v5424_v47 = vpop.permute.xlu0 %5423 }
 0x699   : > { %v5502_v42 = vmul.f32 %v17145_v30, %v5412_v21  ;;  %v5505_v60 = vmul.f32 %v17146_v29, %v5424_v47 }
 0x69b   : > { %5578 = vrot.lane.b32.xlu1 %v5502_v42, %s10073_s22  ;;  %5580 = vrot.lane.b32.xlu0 %v5503_v62, %s10073_s22 }
 0x69c   : > { %v5420_v35 = vpop.permute.xlu1 %5419  ;;  %v5432_v31 = vpop.permute.xlu0 %5431 }
 0x69d   : > { %v5504_v34 = vmul.f32 %v17147_v55, %v5420_v35  ;;  %v5507_v19 = vmul.f32 %v17148_v10, %v5432_v31 }
 0x69f   : > { %5582 = vrot.lane.b32.xlu1 %v5504_v34, %s10073_s22  ;;  %5584 = vrot.lane.b32.xlu0 %v5505_v60, %s10073_s22 }
 0x6a0   : > { %v5428_v57 = vpop.permute.xlu1 %5427  ;;  %v5440_v9 = vpop.permute.xlu0 %5439 }
 0x6a1   : > { %v5506_v21 = vmul.f32 %v17149_v59, %v5428_v57  ;;  %v5509_v47 = vmul.f32 %v13581_v40, %v5440_v9 }
 0x6a3   : > { %5586 = vrot.lane.b32.xlu1 %v5506_v21, %s10073_s22  ;;  %5588 = vrot.lane.b32.xlu0 %v5507_v19, %s10073_s22 }
 0x6a4   : > { %v5436_v62 = vpop.permute.xlu1 %5435  ;;  %v5448_v42 = vpop.permute.xlu0 %5447 }
 0x6a5   : > { %v5508_v35 = vmul.f32 %v17150_v56, %v5436_v62  ;;  %v5511_v31 = vmul.f32 %v13589_v38, %v5448_v42 }
 0x6a7   : > { %5590 = vrot.lane.b32.xlu1 %v5508_v35, %s10073_s22  ;;  %5592 = vrot.lane.b32.xlu0 %v5509_v47, %s10073_s22 }
 0x6a8   : > { %v5444_v60 = vpop.permute.xlu1 %5443  ;;  %v5456_v34 = vpop.permute.xlu0 %5455 }
 0x6a9   : > { %v5510_v57 = vmul.f32 %v17151_v36, %v5444_v60  ;;  %v5513_v9 = vmul.f32 %v13595_v33, %v5456_v34  ;;  %v13761_v60 = vld [vmem:[#allocation2 + $0xc0] sm:$0xff] }
 0x6aa   : > { %17154 = vst [vmem:[#allocation270_spill] sm:$0xff] %v13761_v60 }
 0x6ab   : > { %5594 = vrot.lane.b32.xlu1 %v5510_v57, %s10073_s22  ;;  %5596 = vrot.lane.b32.xlu0 %v5511_v31, %s10073_s22 }
 0x6ac   : > { %v5452_v19 = vpop.permute.xlu1 %5451  ;;  %v5464_v21 = vpop.permute.xlu0 %5463 }
 0x6ad   : > { %v5512_v62 = vmul.f32 %v17152_v26, %v5452_v19  ;;  %v5515_v42 = vmul.f32 %v13758_v37, %v5464_v21  ;;  %v13766_v19 = vld [vmem:[#allocation2 + $0xd8] sm:$0xff] }
 0x6ae   : > { %17155 = vst [vmem:[#allocation271_spill] sm:$0xff] %v13766_v19 }
 0x6af   : > { %5598 = vrot.lane.b32.xlu1 %v5512_v62, %s10073_s22  ;;  %5600 = vrot.lane.b32.xlu0 %v5513_v9, %s10073_s22  ;;  %v13769_v62 = vld [vmem:[#allocation2 + $0xd0] sm:$0xff] }
 0x6b0   : > { %v5460_v47 = vpop.permute.xlu1 %5459  ;;  %v5472_v35 = vpop.permute.xlu0 %5471 }
 0x6b1   : > { %v5514_v31 = vmul.f32 %v13761_v60, %v5460_v47  ;;  %v5517_v9 = vmul.f32 %v13766_v19, %v5472_v35  ;;  %v9881_v47 = vld [vmem:[#allocation2 + $0xe8] sm:$0xff]  ;;  %v9883_v19 = vld [vmem:[#allocation2 + $0xf8] sm:$0xff] }
 0x6b3   : > { %5602 = vrot.lane.b32.xlu1 %v5514_v31, %s10073_s22  ;;  %5604 = vrot.lane.b32.xlu0 %v5515_v42, %s10073_s22  ;;  %v13774_v31 = vld [vmem:[#allocation2 + $0xe0] sm:$0xff] }
 0x6b4   : > { %v5468_v34 = vpop.permute.xlu1 %5467  ;;  %v5480_v57 = vpop.permute.xlu0 %5479 }
 0x6b5   : > { %v5516_v5 = vmul.f32 %v13769_v62, %v5468_v34  ;;  %v5519_v37 = vmul.f32 %v9881_v47, %v5480_v57  ;;  %v13779_v34 = vld [vmem:[#allocation2 + $0xf0] sm:$0xff]  ;;  %v13787_v57 = vld [vmem:[%s16363_s5] sm:$0xff] }
 0x6b7   : > { %5606 = vrot.lane.b32.xlu1 %v5516_v5, %s10073_s22  ;;  %5608 = vrot.lane.b32.xlu0 %v5517_v9, %s10073_s22 }
 0x6b8   : > { %v5476_v21 = vpop.permute.xlu1 %5475  ;;  %v5488_v33 = vpop.permute.xlu0 %5487 }
 0x6b9   : > { %v5518_v42 = vmul.f32 %v13774_v31, %v5476_v21  ;;  %v5521_v60 = vmul.f32 %v9883_v19, %v5488_v33  ;;  %v13799_v33 = vld [vmem:[%s16363_s5 + $0x10] sm:$0xff]  ;;  %v13813_v19 = vld [vmem:[%s16363_s5 + $0x28] sm:$0xff] }
 0x6bb   : > { %5610 = vrot.lane.b32.xlu1 %v5518_v42, %s10073_s22  ;;  %5612 = vrot.lane.b32.xlu0 %v5519_v37, %s10073_s22  ;;  %v13793_v37 = vld [vmem:[%s16363_s5 + $0x8] sm:$0xff] }
 0x6bc   : > { %v5484_v35 = vpop.permute.xlu1 %5483 }
 0x6bd   : > { %v5520_v5 = vmul.f32 %v13779_v34, %v5484_v35 }
 0x6bf   : > { %5614 = vrot.lane.b32.xlu1 %v5520_v5, %s10073_s22  ;;  %5616 = vrot.lane.b32.xlu0 %v5521_v60, %s10073_s22  ;;  %v13806_v60 = vld [vmem:[%s16363_s5 + $0x18] sm:$0xff] }
 0x6c3   : > { %5683 = vperm.xlu1 %9525, %v13787_v57   ;;  %5687 = vperm.xlu0 %9526, %v13793_v37  }
 0x6c7   : > { %5691 = vperm.xlu1 %9525, %v13799_v33   ;;  %5699 = vperm.xlu0 %9526, %v13073_v14  }
 0x6cb   : > { %5695 = vperm.xlu1 %9525, %v13806_v60   ;;  %5707 = vperm.xlu0 %9526, %v13089_v22  }
 0x6cf   : > { %5703 = vperm.xlu1 %9525, %v13813_v19   ;;  %5715 = vperm.xlu0 %9526, %v13105_v39  }
 0x6d3   : > { %5711 = vperm.xlu1 %9525, %v13095_v46   ;;  %5723 = vperm.xlu0 %9526, %v13121_v25  }
 0x6d7   : > { %5719 = vperm.xlu1 %9525, %v13111_v18   ;;  %5731 = vperm.xlu0 %9526, %v13137_v51  }
 0x6db   : > { %5727 = vperm.xlu1 %9525, %v13127_v50   ;;  %5739 = vperm.xlu0 %9526, %v13153_v0  }
 0x6df   : > { %5735 = vperm.xlu1 %9525, %v13143_v3   ;;  %5747 = vperm.xlu0 %9526, %v13169_v23  }
 0x6e3   : > { %5743 = vperm.xlu1 %9525, %v13159_v2   ;;  %5755 = vperm.xlu0 %9526, %v13185_v53  }
 0x6e7   : > { %5751 = vperm.xlu1 %9525, %v13175_v28   ;;  %5763 = vperm.xlu0 %9526, %v13201_v15  }
 0x6eb   : > { %5759 = vperm.xlu1 %9525, %v13191_v58   ;;  %5771 = vperm.xlu0 %9526, %v13217_v16  }
 0x6ef   : > { %5767 = vperm.xlu1 %9525, %v13207_v41   ;;  %5779 = vperm.xlu0 %9526, %v13233_v7  }
 0x6f1   : > { %v13835_v39 = vpop.permute.xlu1 %5554 }
 0x6f2   : > { %17156 = vst [vmem:[#allocation264_spill] sm:$0xff] %v13835_v39 }
 0x6f3   : > { %5775 = vperm.xlu1 %9525, %v13223_v49   ;;  %5787 = vperm.xlu0 %9526, %v13249_v61   ;;  %v16430_v61 = vmov 13  }
 0x6f5   : > { %v13837_v22 = vpop.permute.xlu0 %5556 }
 0x6f6   : > { %17157 = vst [vmem:[#allocation272_spill] sm:$0xff] %v13837_v22  ;;  %v16434_v22 = vmov 12  }
 0x6f7   : > { %5783 = vperm.xlu1 %9525, %v13239_v11   ;;  %5795 = vperm.xlu0 %9526, %v13265_v17  }
 0x6f9   : > { %v13841_v15 = vpop.permute.xlu1 %5558  ;;  %v13843_v51 = vpop.permute.xlu0 %5560 }
 0x6fa   : > { %17158 = vst [vmem:[#allocation265_spill] sm:$0xff] %v13841_v15  ;;  %17159 = vst [vmem:[#allocation262_spill] sm:$0xff] %v13843_v51  ;;  %v14165_v15 = vld [vmem:[%s16363_s5 + $0xf0] sm:$0xff] }
 0x6fb   : > { %5791 = vperm.xlu1 %9525, %v13255_v20   ;;  %5803 = vperm.xlu0 %9526, %v13281_v4  }
 0x6fd   : > { %v13847_v16 = vpop.permute.xlu1 %5562  ;;  %v13849_v41 = vpop.permute.xlu0 %5564 }
 0x6fe   : > { %17160 = vst [vmem:[#allocation263_spill] sm:$0xff] %v13847_v16  ;;  %17161 = vst [vmem:[#allocation268_spill] sm:$0xff] %v13849_v41 }
 0x6ff   : > { %5799 = vperm.xlu1 %9525, %v13271_v63   ;;  %9528 = vset.pattern.permute.xlu0 %v16430_v61 }
 0x701   : > { %v13853_v11 = vpop.permute.xlu1 %5566  ;;  %v13855_v49 = vpop.permute.xlu0 %5568 }
 0x702   : > { %17162 = vst [vmem:[#allocation267_spill] sm:$0xff] %v13853_v11  ;;  %17163 = vst [vmem:[#allocation337_spill] sm:$0xff] %v13855_v49  ;;  %v17208_v49 = vmov 15  }
 0x703   : > { %5807 = vperm.xlu1 %9525, %v13287_v32  }
 0x705   : > { %v13858_v7 = vpop.permute.xlu1 %5570  ;;  %v13860_v20 = vpop.permute.xlu0 %5572 }
 0x706   : > { %17164 = vst [vmem:[#allocation338_spill] sm:$0xff] %v13858_v7  ;;  %17165 = vst [vmem:[#allocation339_spill] sm:$0xff] %v13860_v20  ;;  %v14119_v20 = vld [vmem:[%s16363_s5 + $0xd0] sm:$0xff] }
 0x707   : > { %9527 = vset.pattern.permute.xlu1 %v16430_v61 }
 0x709   : > { %v13863_v4 = vpop.permute.xlu1 %5574  ;;  %v13865_v17 = vpop.permute.xlu0 %5576 }
 0x70a   : > { %17166 = vst [vmem:[#allocation340_spill] sm:$0xff] %v13863_v4  ;;  %17167 = vst [vmem:[#allocation341_spill] sm:$0xff] %v13865_v17 }
 0x70d   : > { %v13867_v63 = vpop.permute.xlu1 %5578  ;;  %v13869_v2 = vpop.permute.xlu0 %5580 }
 0x70e   : > { %17168 = vst [vmem:[#allocation342_spill] sm:$0xff] %v13867_v63  ;;  %17169 = vst [vmem:[#allocation343_spill] sm:$0xff] %v13869_v2 }
 0x711   : > { %v13871_v18 = vpop.permute.xlu1 %5582  ;;  %v13873_v14 = vpop.permute.xlu0 %5584 }
 0x712   : > { %17170 = vst [vmem:[#allocation344_spill] sm:$0xff] %v13871_v18  ;;  %17171 = vst [vmem:[#allocation345_spill] sm:$0xff] %v13873_v14 }
 0x715   : > { %v13875_v58 = vpop.permute.xlu1 %5586  ;;  %v13877_v32 = vpop.permute.xlu0 %5588 }
 0x716   : > { %17172 = vst [vmem:[#allocation346_spill] sm:$0xff] %v13875_v58  ;;  %17173 = vst [vmem:[#allocation347_spill] sm:$0xff] %v13877_v32 }
 0x719   : > { %v13879_v3 = vpop.permute.xlu1 %5590  ;;  %v13881_v0 = vpop.permute.xlu0 %5592 }
 0x71a   : > { %17174 = vst [vmem:[#allocation348_spill] sm:$0xff] %v13879_v3  ;;  %17175 = vst [vmem:[#allocation349_spill] sm:$0xff] %v13881_v0  ;;  %v14181_v3 = vld [vmem:[%s16363_s5 + $0x78] sm:$0xff] }
 0x71b   : > { %17217 = vst [vmem:[#allocation381_spill] sm:$0xff] %v14181_v3 }
 0x71d   : > { %v13883_v53 = vpop.permute.xlu1 %5594  ;;  %v13885_v50 = vpop.permute.xlu0 %5596 }
 0x71e   : > { %17176 = vst [vmem:[#allocation350_spill] sm:$0xff] %v13883_v53  ;;  %17177 = vst [vmem:[#allocation351_spill] sm:$0xff] %v13885_v50  ;;  %v14153_v50 = vld [vmem:[%s16363_s5 + $0x68] sm:$0xff] }
 0x721   : > { %v13887_v25 = vpop.permute.xlu1 %5598  ;;  %v13889_v28 = vpop.permute.xlu0 %5600 }
 0x722   : > { %17178 = vst [vmem:[#allocation352_spill] sm:$0xff] %v13887_v25  ;;  %17179 = vst [vmem:[#allocation353_spill] sm:$0xff] %v13889_v28  ;;  %v14142_v25 = vld [vmem:[%s16363_s5 + $0xe0] sm:$0xff] }
 0x725   : > { %v13891_v46 = vpop.permute.xlu1 %5602  ;;  %v13893_v23 = vpop.permute.xlu0 %5604 }
 0x726   : > { %17180 = vst [vmem:[#allocation354_spill] sm:$0xff] %v13891_v46  ;;  %17181 = vst [vmem:[#allocation355_spill] sm:$0xff] %v13893_v23  ;;  %v14130_v46 = vld [vmem:[%s16363_s5 + $0x58] sm:$0xff] }
 0x729   : > { %v13895_v9 = vpop.permute.xlu1 %5606  ;;  %v13897_v21 = vpop.permute.xlu0 %5608 }
 0x72a   : > { %17182 = vst [vmem:[#allocation356_spill] sm:$0xff] %v13895_v9  ;;  %17183 = vst [vmem:[#allocation357_spill] sm:$0xff] %v13897_v21 }
 0x72d   : > { %v13899_v47 = vpop.permute.xlu1 %5610  ;;  %v13901_v42 = vpop.permute.xlu0 %5612 }
 0x72e   : > { %17184 = vst [vmem:[#allocation358_spill] sm:$0xff] %v13899_v47  ;;  %17185 = vst [vmem:[#allocation359_spill] sm:$0xff] %v13901_v42 }
 0x731   : > { %v13903_v35 = vpop.permute.xlu1 %5614  ;;  %v13905_v5 = vpop.permute.xlu0 %5616 }
 0x732   : > { %17186 = vst [vmem:[#allocation360_spill] sm:$0xff] %v13903_v35  ;;  %17187 = vst [vmem:[#allocation361_spill] sm:$0xff] %v13905_v5 }
 0x742   : > { %v5684_v61 = vpop.permute.xlu1 %5683  ;;  %v5688_v14 = vpop.permute.xlu0 %5687 }
 0x743   : > { %v5810_v18 = vmul.f32 %v13345_v52, %v5684_v61  ;;  %v5811_v2 = vmul.f32 %v13342_v13, %v5688_v14 }
 0x745   : > { %5874 = vrot.lane.b32.xlu0 %v5810_v18, %s10073_s22  ;;  %5876 = vrot.lane.b32.xlu1 %v5811_v2, %s10073_s22 }
 0x746   : > { %v5692_v63 = vpop.permute.xlu1 %5691  ;;  %v5700_v17 = vpop.permute.xlu0 %5699 }
 0x747   : > { %v5812_v47 = vmul.f32 %v17095_v45, %v5692_v63  ;;  %v5814_v5 = vmul.f32 %v17096_v12, %v5700_v17 }
 0x749   : > { %5878 = vrot.lane.b32.xlu0 %v5812_v47, %s10073_s22 }
 0x74a   : > { %v5696_v42 = vpop.permute.xlu1 %5695  ;;  %v5708_v35 = vpop.permute.xlu0 %5707 }
 0x74b   : > { %v5813_v4 = vmul.f32 %v17097_v24, %v5696_v42  ;;  %v5816_v61 = vmul.f32 %v17143_v43, %v5708_v35 }
 0x74d   : > { %5880 = vrot.lane.b32.xlu1 %v5813_v4, %s10073_s22  ;;  %5882 = vrot.lane.b32.xlu0 %v5814_v5, %s10073_s22 }
 0x74e   : > { %v5704_v52 = vpop.permute.xlu1 %5703  ;;  %v5716_v13 = vpop.permute.xlu0 %5715 }
 0x74f   : > { %v5815_v2 = vmul.f32 %v17099_v1, %v5704_v52  ;;  %v5818_v12 = vmul.f32 %v17100_v44, %v5716_v13 }
 0x751   : > { %5884 = vrot.lane.b32.xlu1 %v5815_v2, %s10073_s22  ;;  %5886 = vrot.lane.b32.xlu0 %v5816_v61, %s10073_s22 }
 0x752   : > { %v5712_v45 = vpop.permute.xlu1 %5711  ;;  %v5724_v63 = vpop.permute.xlu0 %5723 }
 0x753   : > { %v5817_v24 = vmul.f32 %v17101_v8, %v5712_v45  ;;  %v5820_v43 = vmul.f32 %v17144_v27, %v5724_v63 }
 0x755   : > { %5888 = vrot.lane.b32.xlu1 %v5817_v24, %s10073_s22  ;;  %5890 = vrot.lane.b32.xlu0 %v5818_v12, %s10073_s22 }
 0x756   : > { %v5720_v4 = vpop.permute.xlu1 %5719  ;;  %v5732_v17 = vpop.permute.xlu0 %5731 }
 0x757   : > { %v5819_v1 = vmul.f32 %v17103_v48, %v5720_v4  ;;  %v5822_v44 = vmul.f32 %v17145_v30, %v5732_v17 }
 0x759   : > { %5892 = vrot.lane.b32.xlu1 %v5819_v1, %s10073_s22  ;;  %5894 = vrot.lane.b32.xlu0 %v5820_v43, %s10073_s22  ;;  %v17188_v1 = vld [vmem:[#allocation270_spill] sm:$0xff] }
 0x75a   : > { %v5728_v18 = vpop.permute.xlu1 %5727  ;;  %v5740_v14 = vpop.permute.xlu0 %5739 }
 0x75b   : > { %v5821_v8 = vmul.f32 %v13385_v6, %v5728_v18  ;;  %v5824_v27 = vmul.f32 %v17147_v55, %v5740_v14  ;;  %v17189_v18 = vld [vmem:[#allocation269_spill] sm:$0xff] }
 0x75d   : > { %5896 = vrot.lane.b32.xlu1 %v5821_v8, %s10073_s22  ;;  %5898 = vrot.lane.b32.xlu0 %v5822_v44, %s10073_s22 }
 0x75e   : > { %v5736_v47 = vpop.permute.xlu1 %5735  ;;  %v5748_v42 = vpop.permute.xlu0 %5747 }
 0x75f   : > { %v5823_v48 = vmul.f32 %v13557_v54, %v5736_v47  ;;  %v5826_v30 = vmul.f32 %v17149_v59, %v5748_v42 }
 0x761   : > { %5900 = vrot.lane.b32.xlu1 %v5823_v48, %s10073_s22  ;;  %5902 = vrot.lane.b32.xlu0 %v5824_v27, %s10073_s22  ;;  %v17191_v48 = vld [vmem:[#allocation271_spill] sm:$0xff] }
 0x762   : > { %v5744_v35 = vpop.permute.xlu1 %5743  ;;  %v5756_v5 = vpop.permute.xlu0 %5755 }
 0x763   : > { %v5825_v6 = vmul.f32 %v17146_v29, %v5744_v35  ;;  %v5828_v55 = vmul.f32 %v17150_v56, %v5756_v5  ;;  %v13968_v5 = vld [vmem:[%s16363_s5 + $0x80] sm:$0xff] }
 0x765   : > { %5904 = vrot.lane.b32.xlu1 %v5825_v6, %s10073_s22  ;;  %5906 = vrot.lane.b32.xlu0 %v5826_v30, %s10073_s22  ;;  %v13974_v30 = vld [vmem:[%s16363_s5 + $0x88] sm:$0xff]  ;;  %v13981_v6 = vld [vmem:[%s16363_s5 + $0x98] sm:$0xff] }
 0x766   : > { %v5752_v52 = vpop.permute.xlu1 %5751  ;;  %v5764_v13 = vpop.permute.xlu0 %5763 }
 0x767   : > { %v5827_v54 = vmul.f32 %v17148_v10, %v5752_v52  ;;  %v5830_v45 = vmul.f32 %v17151_v36, %v5764_v13  ;;  %v13988_v52 = vld [vmem:[%s16363_s5 + $0xa8] sm:$0xff]  ;;  %v16432_v13 = vmov 15  }
 0x769   : > { %5908 = vrot.lane.b32.xlu1 %v5827_v54, %s10073_s22  ;;  %5910 = vrot.lane.b32.xlu0 %v5828_v55, %s10073_s22  ;;  %v13995_v55 = vld [vmem:[%s16363_s5 + $0xb8] sm:$0xff]  ;;  %v14002_v54 = vld [vmem:[%s16363_s5 + $0xc8] sm:$0xff] }
 0x76a   : > { %v5760_v61 = vpop.permute.xlu1 %5759  ;;  %v5772_v2 = vpop.permute.xlu0 %5771 }
 0x76b   : > { %v5829_v29 = vmul.f32 %v13581_v40, %v5760_v61  ;;  %v5832_v24 = vmul.f32 %v17152_v26, %v5772_v2  ;;  %v17190_v26 = vld [vmem:[#allocation266_spill] sm:$0xff]  ;;  %v14009_v61 = vld [vmem:[%s16363_s5 + $0xd8] sm:$0xff]  ;;  %v17193_v2 = vmov 13  }
 0x76c   : > { %17192 = vst [vmem:[#allocation270_spill] sm:$0xff] %v14009_v61 }
 0x76d   : > { %5912 = vrot.lane.b32.xlu1 %v5829_v29, %s10073_s22  ;;  %5914 = vrot.lane.b32.xlu0 %v5830_v45, %s10073_s22  ;;  %v14016_v45 = vld [vmem:[%s16363_s5 + $0x90] sm:$0xff]  ;;  %v14022_v29 = vld [vmem:[%s16363_s5 + $0xe8] sm:$0xff] }
 0x76e   : > { %v5768_v63 = vpop.permute.xlu1 %5767  ;;  %v5780_v12 = vpop.permute.xlu0 %5779  ;;  %17194 = vst [vmem:[#allocation269_spill] sm:$0xff] %v14022_v29 }
 0x76f   : > { %v5831_v4 = vmul.f32 %v13589_v38, %v5768_v63  ;;  %v5834_v36 = vmul.f32 %v17188_v1, %v5780_v12  ;;  %v14029_v63 = vld [vmem:[%s16363_s5 + $0xf8] sm:$0xff]  ;;  %v14044_v12 = vld [vmem:[%s16363_s5 + $0xa0] sm:$0xff] }
 0x771   : > { %5916 = vrot.lane.b32.xlu1 %v5831_v4, %s10073_s22  ;;  %5918 = vrot.lane.b32.xlu0 %v5832_v24, %s10073_s22  ;;  %v14053_v4 = vld [vmem:[%s16363_s5 + $0x20] sm:$0xff] }
 0x772   : > { %v5776_v17 = vpop.permute.xlu1 %5775  ;;  %v5788_v43 = vpop.permute.xlu0 %5787 }
 0x773   : > { %v5833_v14 = vmul.f32 %v17189_v18, %v5776_v17  ;;  %v5836_v8 = vmul.f32 %v13769_v62, %v5788_v43  ;;  %v14070_v18 = vld [vmem:[%s16363_s5 + $0xb0] sm:$0xff] }
 0x775   : > { %5920 = vrot.lane.b32.xlu1 %v5833_v14, %s10073_s22  ;;  %5922 = vrot.lane.b32.xlu0 %v5834_v36, %s10073_s22 }
 0x776   : > { %v5784_v44 = vpop.permute.xlu1 %5783  ;;  %v5796_v38 = vpop.permute.xlu0 %5795 }
 0x777   : > { %v5835_v47 = vmul.f32 %v17190_v26, %v5784_v44  ;;  %v5838_v27 = vmul.f32 %v13774_v31, %v5796_v38 }
 0x779   : > { %5924 = vrot.lane.b32.xlu1 %v5835_v47, %s10073_s22  ;;  %5926 = vrot.lane.b32.xlu0 %v5836_v8, %s10073_s22  ;;  %v14081_v8 = vld [vmem:[%s16363_s5 + $0x38] sm:$0xff] }
 0x77a   : > { %v5792_v42 = vpop.permute.xlu1 %5791  ;;  %v14057_v17 = vpop.permute.xlu0 %5803 }
 0x77b   : > { %v5837_v35 = vmul.f32 %v17191_v48, %v5792_v42  ;;  %v14092_v42 = vld [vmem:[%s16363_s5 + $0xc0] sm:$0xff] }
 0x77d   : > { %5928 = vrot.lane.b32.xlu1 %v5837_v35, %s10073_s22  ;;  %5930 = vrot.lane.b32.xlu0 %v5838_v27, %s10073_s22  ;;  %v14103_v35 = vld [vmem:[%s16363_s5 + $0x48] sm:$0xff] }
 0x77e   : > { %v14048_v24 = vpop.permute.xlu1 %5799 }
 0x77f   : > { %17195 = vst [vmem:[#allocation266_spill] sm:$0xff] %v14048_v24 }
 0x781   : > { %6387 = vperm.xlu1 %9527, %v13968_v5   ;;  %6391 = vperm.xlu0 %9528, %v13974_v30  }
 0x782   : > { %v14061_v43 = vpop.permute.xlu1 %5807 }
 0x783   : > { %17196 = vst [vmem:[#allocation271_spill] sm:$0xff] %v14061_v43 }
 0x785   : > { %6323 = vperm.xlu1 %9527, %v13787_v57   ;;  %6399 = vperm.xlu0 %9528, %v13981_v6  }
 0x789   : > { %6327 = vperm.xlu1 %9527, %v13793_v37   ;;  %6407 = vperm.xlu0 %9528, %v13988_v52  }
 0x78d   : > { %9529 = vset.pattern.permute.xlu1 %v16432_v13  ;;  %6415 = vperm.xlu0 %9528, %v13995_v55  }
 0x78e   : > { %7031 = vperm.xlu1 %9529, %v13974_v30  }
 0x791   : > { %6423 = vperm.xlu0 %9528, %v14002_v54  }
 0x792   : > { %6963 = vperm.xlu1 %9529, %v13787_v57  }
 0x795   : > { %6431 = vperm.xlu0 %9528, %v14009_v61  }
 0x796   : > { %9530 = vset.pattern.permute.xlu1 %v17193_v2 }
 0x797   : > { %6395 = vperm.xlu1 %9530, %v14016_v45  }
 0x799   : > { %6439 = vperm.xlu0 %9528, %v14022_v29  }
 0x79b   : > { %6331 = vperm.xlu1 %9530, %v13799_v33  }
 0x79d   : > { %6447 = vperm.xlu0 %9528, %v14029_v63  }
 0x79f   : > { %6335 = vperm.xlu1 %9530, %v13806_v60  }
 0x7a1   : > { %9543 = vset.pattern.permute.xlu0 %v16432_v13 }
 0x7a2   : > { %7027 = vperm.xlu0 %9543, %v13968_v5  }
 0x7a3   : > { %9531 = vset.pattern.permute.xlu1 %v16432_v13 }
 0x7a4   : > { %7039 = vperm.xlu1 %9531, %v13981_v6  }
 0x7a6   : > { %6967 = vperm.xlu0 %9543, %v13793_v37  }
 0x7a8   : > { %6971 = vperm.xlu1 %9531, %v13799_v33  }
 0x7aa   : > { %7035 = vperm.xlu0 %9543, %v14016_v45  }
 0x7ac   : > { %9532 = vset.pattern.permute.xlu1 %v17193_v2 }
 0x7ad   : > { %6403 = vperm.xlu1 %9532, %v14044_v12  }
 0x7ae   : > { %6975 = vperm.xlu0 %9543, %v13806_v60  }
 0x7b1   : > { %6339 = vperm.xlu1 %9532, %v14053_v4  }
 0x7b2   : > { %7043 = vperm.xlu0 %9543, %v14044_v12  }
 0x7b5   : > { %6343 = vperm.xlu1 %9532, %v13813_v19  }
 0x7b6   : > { %6983 = vperm.xlu0 %9543, %v13813_v19  }
 0x7b7   : > { %v14063_v36 = vpop.permute.xlu0 %5874  ;;  %v14073_v14 = vpop.permute.xlu1 %5876 }
 0x7b8   : > { %17197 = vst [vmem:[#allocation362_spill] sm:$0xff] %v14063_v36  ;;  %17198 = vst [vmem:[#allocation363_spill] sm:$0xff] %v14073_v14 }
 0x7b9   : > { %9533 = vset.pattern.permute.xlu1 %v16432_v13  ;;  %v14109_v13 = vld [vmem:[%s16363_s5 + $0x30] sm:$0xff] }
 0x7ba   : > { %7047 = vperm.xlu1 %9533, %v13988_v52   ;;  %7051 = vperm.xlu0 %9543, %v14070_v18  }
 0x7bb   : > { %v14075_v44 = vpop.permute.xlu0 %5878 }
 0x7bc   : > { %17199 = vst [vmem:[#allocation364_spill] sm:$0xff] %v14075_v44  ;;  %v14308_v44 = vld [vmem:[#allocation2 + $0x20] sm:$0xff] }
 0x7be   : > { %6979 = vperm.xlu1 %9533, %v14053_v4   ;;  %6991 = vperm.xlu0 %9543, %v14081_v8  }
 0x7bf   : > { %v14084_v47 = vpop.permute.xlu1 %5880  ;;  %v14086_v38 = vpop.permute.xlu0 %5882 }
 0x7c0   : > { %17200 = vst [vmem:[#allocation365_spill] sm:$0xff] %v14084_v47  ;;  %17201 = vst [vmem:[#allocation366_spill] sm:$0xff] %v14086_v38 }
 0x7c2   : > { %9534 = vset.pattern.permute.xlu1 %v17193_v2  ;;  %7059 = vperm.xlu0 %9543, %v14092_v42  }
 0x7c3   : > { %6411 = vperm.xlu1 %9534, %v14070_v18   ;;  %v14096_v27 = vpop.permute.xlu1 %5884  ;;  %v14098_v48 = vpop.permute.xlu0 %5886 }
 0x7c4   : > { %17202 = vst [vmem:[#allocation367_spill] sm:$0xff] %v14096_v27  ;;  %17203 = vst [vmem:[#allocation368_spill] sm:$0xff] %v14098_v48 }
 0x7c6   : > { %6999 = vperm.xlu0 %9543, %v14103_v35  }
 0x7c7   : > { %6347 = vperm.xlu1 %9534, %v14109_v13   ;;  %v14112_v21 = vpop.permute.xlu1 %5888  ;;  %v14114_v9 = vpop.permute.xlu0 %5890 }
 0x7c8   : > { %17204 = vst [vmem:[#allocation369_spill] sm:$0xff] %v14112_v21  ;;  %17205 = vst [vmem:[#allocation370_spill] sm:$0xff] %v14114_v9 }
 0x7ca   : > { %7067 = vperm.xlu0 %9543, %v14119_v20  }
 0x7cb   : > { %6351 = vperm.xlu1 %9534, %v14081_v8   ;;  %v14123_v7 = vpop.permute.xlu1 %5892  ;;  %v14125_v23 = vpop.permute.xlu0 %5894 }
 0x7cc   : > { %17206 = vst [vmem:[#allocation371_spill] sm:$0xff] %v14123_v7  ;;  %17207 = vst [vmem:[#allocation372_spill] sm:$0xff] %v14125_v23 }
 0x7ce   : > { %7007 = vperm.xlu0 %9543, %v14130_v46  }
 0x7cf   : > { %9535 = vset.pattern.permute.xlu1 %v17208_v49  ;;  %v14134_v11 = vpop.permute.xlu1 %5896  ;;  %v14136_v28 = vpop.permute.xlu0 %5898 }
 0x7d0   : > { %17209 = vst [vmem:[#allocation373_spill] sm:$0xff] %v14134_v11  ;;  %17210 = vst [vmem:[#allocation374_spill] sm:$0xff] %v14136_v28  ;;  %7055 = vperm.xlu1 %9535, %v13995_v55  }
 0x7d2   : > { %7075 = vperm.xlu0 %9543, %v14142_v25  }
 0x7d3   : > { %v14145_v41 = vpop.permute.xlu1 %5900  ;;  %v14147_v16 = vpop.permute.xlu0 %5902 }
 0x7d4   : > { %17211 = vst [vmem:[#allocation375_spill] sm:$0xff] %v14145_v41  ;;  %17212 = vst [vmem:[#allocation376_spill] sm:$0xff] %v14147_v16  ;;  %6987 = vperm.xlu1 %9535, %v14109_v13   ;;  %v14171_v41 = vld [vmem:[%s16363_s5 + $0x40] sm:$0xff]  ;;  %v14209_v16 = vld [vmem:[%s16363_s5 + $0x50] sm:$0xff] }
 0x7d5   : > { %17224 = vst [vmem:[#allocation388_spill] sm:$0xff] %v14209_v16 }
 0x7d6   : > { %7015 = vperm.xlu0 %9543, %v14153_v50  }
 0x7d7   : > { %v14156_v53 = vpop.permute.xlu1 %5904  ;;  %v14158_v51 = vpop.permute.xlu0 %5906 }
 0x7d8   : > { %17213 = vst [vmem:[#allocation377_spill] sm:$0xff] %v14156_v53  ;;  %17214 = vst [vmem:[#allocation378_spill] sm:$0xff] %v14158_v51  ;;  %9536 = vset.pattern.permute.xlu1 %v17193_v2  ;;  %v14320_v51 = vld [vmem:[#allocation2 + $0xa8] sm:$0xff] }
 0x7d9   : > { %6419 = vperm.xlu1 %9536, %v14092_v42   ;;  %17237 = vst [vmem:[#allocation400_spill] sm:$0xff] %v14320_v51 }
 0x7da   : > { %7083 = vperm.xlu0 %9543, %v14165_v15  }
 0x7db   : > { %v14174_v53 = vpop.permute.xlu1 %5908  ;;  %v14176_v0 = vpop.permute.xlu0 %5910 }
 0x7dc   : > { %17215 = vst [vmem:[#allocation379_spill] sm:$0xff] %v14174_v53  ;;  %17216 = vst [vmem:[#allocation380_spill] sm:$0xff] %v14176_v0 }
 0x7dd   : > { %6355 = vperm.xlu1 %9536, %v14171_v41  }
 0x7de   : > { %7023 = vperm.xlu0 %9543, %v14181_v3  }
 0x7df   : > { %v14187_v39 = vpop.permute.xlu1 %5912  ;;  %v14189_v11 = vpop.permute.xlu0 %5914 }
 0x7e0   : > { %17218 = vst [vmem:[#allocation382_spill] sm:$0xff] %v14187_v39  ;;  %17219 = vst [vmem:[#allocation383_spill] sm:$0xff] %v14189_v11  ;;  %v14278_v11 = vld [vmem:[%s16363_s5 + $0x70] sm:$0xff] }
 0x7e1   : > { %6359 = vperm.xlu1 %9536, %v14103_v35  }
 0x7e2   : > { %9546 = vset.pattern.permute.xlu0 %v16434_v22 }
 0x7e3   : > { %6071 = vperm.xlu0 %9546, %v13974_v30   ;;  %v14194_v32 = vpop.permute.xlu1 %5916  ;;  %v14196_v58 = vpop.permute.xlu0 %5918 }
 0x7e4   : > { %17220 = vst [vmem:[#allocation384_spill] sm:$0xff] %v14194_v32  ;;  %17221 = vst [vmem:[#allocation385_spill] sm:$0xff] %v14196_v58  ;;  %v14270_v58 = vld [vmem:[#allocation2 + $0x10] sm:$0xff] }
 0x7e5   : > { %9537 = vset.pattern.permute.xlu1 %v17208_v49 }
 0x7e6   : > { %7063 = vperm.xlu1 %9537, %v14002_v54  }
 0x7e7   : > { %6079 = vperm.xlu0 %9546, %v13981_v6   ;;  %v14202_v22 = vpop.permute.xlu1 %5920  ;;  %v14204_v7 = vpop.permute.xlu0 %5922 }
 0x7e8   : > { %17222 = vst [vmem:[#allocation386_spill] sm:$0xff] %v14202_v22  ;;  %17223 = vst [vmem:[#allocation387_spill] sm:$0xff] %v14204_v7 }
 0x7ea   : > { %6995 = vperm.xlu1 %9537, %v14171_v41  }
 0x7eb   : > { %6087 = vperm.xlu0 %9546, %v13988_v52   ;;  %v14212_v28 = vpop.permute.xlu1 %5924  ;;  %v14214_v21 = vpop.permute.xlu0 %5926 }
 0x7ec   : > { %17225 = vst [vmem:[#allocation389_spill] sm:$0xff] %v14212_v28  ;;  %17226 = vst [vmem:[#allocation390_spill] sm:$0xff] %v14214_v21 }
 0x7ee   : > { %9538 = vset.pattern.permute.xlu1 %v17193_v2 }
 0x7ef   : > { %6427 = vperm.xlu1 %9538, %v14119_v20   ;;  %v14218_v23 = vpop.permute.xlu1 %5928  ;;  %v14220_v22 = vpop.permute.xlu0 %5930 }
 0x7f0   : > { %17227 = vst [vmem:[#allocation391_spill] sm:$0xff] %v14218_v23  ;;  %17228 = vst [vmem:[#allocation392_spill] sm:$0xff] %v14220_v22  ;;  %v14231_v23 = vld [vmem:[#allocation2] sm:$0xff] }
 0x7f3   : > { %6363 = vperm.xlu1 %9538, %v14209_v16  }
 0x7f7   : > { %6367 = vperm.xlu1 %9538, %v14130_v46  }
 0x7fb   : > { %9539 = vset.pattern.permute.xlu1 %v17208_v49 }
 0x7fc   : > { %7071 = vperm.xlu1 %9539, %v14009_v61  }
 0x800   : > { %7003 = vperm.xlu1 %9539, %v14209_v16   ;;  %v6388_v27 = vpop.permute.xlu1 %6387  ;;  %v14224_v32 = vpop.permute.xlu0 %6391 }
 0x801   : > { %v6466_v9 = vmul.f32 %v17149_v59, %v6388_v27  ;;  %v14243_v59 = vld [vmem:[%s16363_s5 + $0x60] sm:$0xff] }
 0x802   : > { %17229 = vst [vmem:[#allocation393_spill] sm:$0xff] %v14243_v59 }
 0x803   : > { %6546 = vrot.lane.b32.xlu0 %v6466_v9, %s10077_s28 }
 0x804   : > { %9540 = vset.pattern.permute.xlu1 %v17193_v2  ;;  %v6324_v28 = vpop.permute.xlu1 %6323  ;;  %v14229_v21 = vpop.permute.xlu0 %6399 }
 0x805   : > { %v6450_v22 = vmul.f32 %v14231_v23, %v6324_v28  ;;  %6435 = vperm.xlu1 %9540, %v14142_v25  }
 0x807   : > { %6514 = vrot.lane.b32.xlu0 %v6450_v22, %s10077_s28 }
 0x808   : > { %v14236_v47 = vpop.permute.xlu1 %6327  ;;  %v14238_v7 = vpop.permute.xlu0 %6407 }
 0x809   : > { %6371 = vperm.xlu1 %9540, %v14243_v59  }
 0x80c   : > { %v14246_v9 = vpop.permute.xlu0 %6415 }
 0x80d   : > { %17230 = vst [vmem:[#allocation394_spill] sm:$0xff] %v14246_v9  ;;  %6375 = vperm.xlu1 %9540, %v14153_v50   ;;  %v7032_v28 = vpop.permute.xlu1 %7031 }
 0x80e   : > { %v7107_v27 = vmul.f32 %v17148_v10, %v7032_v28 }
 0x810   : > { %7188 = vrot.lane.b32.xlu0 %v7107_v27, %s10078_s13  ;;  %v14251_v22 = vpop.permute.xlu0 %6423 }
 0x811   : > { %17231 = vst [vmem:[#allocation395_spill] sm:$0xff] %v14251_v22  ;;  %9541 = vset.pattern.permute.xlu1 %v17208_v49  ;;  %v14254_v39 = vpop.permute.xlu1 %6963 }
 0x812   : > { %7079 = vperm.xlu1 %9541, %v14022_v29  }
 0x814   : > { %6095 = vperm.xlu0 %9546, %v13995_v55   ;;  %v14258_v14 = vpop.permute.xlu0 %6431 }
 0x815   : > { %17232 = vst [vmem:[#allocation396_spill] sm:$0xff] %v14258_v14 }
 0x816   : > { %7011 = vperm.xlu1 %9541, %v14243_v59   ;;  %v6396_v53 = vpop.permute.xlu1 %6395 }
 0x817   : > { %v6468_v28 = vmul.f32 %v17150_v56, %v6396_v53 }
 0x818   : > { %6027 = vperm.xlu0 %9546, %v14109_v13   ;;  %v14262_v10 = vpop.permute.xlu0 %6439 }
 0x819   : > { %17233 = vst [vmem:[#allocation397_spill] sm:$0xff] %v14262_v10 }
 0x81a   : > { %9542 = vset.pattern.permute.xlu1 %v17193_v2  ;;  %v6332_v27 = vpop.permute.xlu1 %6331 }
 0x81b   : > { %6443 = vperm.xlu1 %9542, %v14165_v15   ;;  %v6452_v38 = vmul.f32 %v14270_v58, %v6332_v27 }
 0x81c   : > { %6550 = vrot.lane.b32.xlu0 %v6468_v28, %s10077_s28  ;;  %v14268_v48 = vpop.permute.xlu0 %6447 }
 0x81d   : > { %17234 = vst [vmem:[#allocation398_spill] sm:$0xff] %v14268_v48 }
 0x81e   : > { %v14273_v43 = vpop.permute.xlu1 %6335 }
 0x81f   : > { %6379 = vperm.xlu1 %9542, %v14278_v11  }
 0x820   : > { %6518 = vrot.lane.b32.xlu0 %v6452_v38, %s10077_s28 }
 0x821   : > { %v14282_v56 = vpop.permute.xlu0 %7027 }
 0x823   : > { %6383 = vperm.xlu1 %9542, %v14181_v3   ;;  %v7040_v53 = vpop.permute.xlu1 %7039 }
 0x824   : > { %v7109_v2 = vmul.f32 %v13581_v40, %v7040_v53  ;;  %v14300_v40 = vld [vmem:[#allocation2 + $0xa0] sm:$0xff] }
 0x825   : > { %v14286_v28 = vpop.permute.xlu0 %6967 }
 0x826   : > { %7192 = vrot.lane.b32.xlu0 %v7109_v2, %s10078_s13 }
 0x827   : > { %9544 = vset.pattern.permute.xlu1 %v17208_v49  ;;  %v14290_v27 = vpop.permute.xlu1 %6971  ;;  %v17235_v49 = vmov 12  }
 0x828   : > { %7087 = vperm.xlu1 %9544, %v14029_v63  }
 0x829   : > { %v14293_v48 = vpop.permute.xlu0 %7035 }
 0x82a   : > { %6103 = vperm.xlu0 %9546, %v14002_v54  }
 0x82c   : > { %7019 = vperm.xlu1 %9544, %v14278_v11   ;;  %v6404_v38 = vpop.permute.xlu1 %6403 }
 0x82d   : > { %v14297_v10 = vpop.permute.xlu0 %6975  ;;  %v6470_v53 = vmul.f32 %v14300_v40, %v6404_v38 }
 0x82e   : > { %6035 = vperm.xlu0 %9546, %v14171_v41  }
 0x830   : > { %9545 = vset.pattern.permute.xlu1 %v17235_v49  ;;  %v6340_v2 = vpop.permute.xlu1 %6339 }
 0x831   : > { %6067 = vperm.xlu1 %9545, %v13968_v5   ;;  %v14305_v24 = vpop.permute.xlu0 %7043  ;;  %v6454_v14 = vmul.f32 %v14308_v44, %v6340_v2  ;;  %v16438_v2 = vmov 14  }
 0x832   : > { %6554 = vrot.lane.b32.xlu0 %v6470_v53, %s10077_s28 }
 0x834   : > { %v14311_v3 = vpop.permute.xlu1 %6343 }
 0x835   : > { %6003 = vperm.xlu1 %9545, %v13787_v57   ;;  %v14314_v0 = vpop.permute.xlu0 %6983 }
 0x836   : > { %6522 = vrot.lane.b32.xlu0 %v6454_v14, %s10077_s28 }
 0x839   : > { %6007 = vperm.xlu1 %9545, %v13793_v37   ;;  %v7048_v38 = vpop.permute.xlu1 %7047  ;;  %v14318_v36 = vpop.permute.xlu0 %7051 }
 0x83a   : > { %17236 = vst [vmem:[#allocation399_spill] sm:$0xff] %v14318_v36  ;;  %v7111_v53 = vmul.f32 %v14320_v51, %v7048_v38  ;;  %v14335_v38 = vld [vmem:[#allocation2 + $0xb0] sm:$0xff] }
 0x83b   : > { %17240 = vst [vmem:[#allocation403_spill] sm:$0xff] %v14335_v38 }
 0x83c   : > { %7196 = vrot.lane.b32.xlu0 %v7111_v53, %s10078_s13 }
 0x83d   : > { %9547 = vset.pattern.permute.xlu1 %v16438_v2  ;;  %v14325_v22 = vpop.permute.xlu1 %6979  ;;  %v14328_v9 = vpop.permute.xlu0 %6991 }
 0x83e   : > { %6711 = vperm.xlu1 %9547, %v13974_v30   ;;  %17238 = vst [vmem:[#allocation401_spill] sm:$0xff] %v14328_v9  ;;  %v14341_v30 = vld [vmem:[#allocation2 + $0x30] sm:$0xff] }
 0x83f   : > { %17241 = vst [vmem:[#allocation404_spill] sm:$0xff] %v14341_v30 }
 0x840   : > { %6111 = vperm.xlu0 %9546, %v14009_v61  }
 0x841   : > { %v14333_v36 = vpop.permute.xlu0 %7059 }
 0x842   : > { %6643 = vperm.xlu1 %9547, %v13787_v57   ;;  %v6412_v14 = vpop.permute.xlu1 %6411  ;;  %17239 = vst [vmem:[#allocation402_spill] sm:$0xff] %v14333_v36  ;;  %v14351_v36 = vld [vmem:[#allocation2 + $0xb8] sm:$0xff] }
 0x843   : > { %v6472_v53 = vmul.f32 %v14335_v38, %v6412_v14 }
 0x844   : > { %6043 = vperm.xlu0 %9546, %v14209_v16  }
 0x845   : > { %v14346_v16 = vpop.permute.xlu0 %6999 }
 0x846   : > { %9548 = vset.pattern.permute.xlu1 %v17235_v49  ;;  %v6348_v2 = vpop.permute.xlu1 %6347  ;;  %17242 = vst [vmem:[#allocation405_spill] sm:$0xff] %v14346_v16 }
 0x847   : > { %6075 = vperm.xlu1 %9548, %v14016_v45   ;;  %v6456_v57 = vmul.f32 %v14341_v30, %v6348_v2  ;;  %v17243_v2 = vmov 14  }
 0x848   : > { %6558 = vrot.lane.b32.xlu0 %v6472_v53, %s10077_s28 }
 0x849   : > { %v14354_v53 = vpop.permute.xlu0 %7067 }
 0x84a   : > { %v14344_v9 = vpop.permute.xlu1 %6351 }
 0x84b   : > { %6011 = vperm.xlu1 %9548, %v13799_v33  }
 0x84c   : > { %6526 = vrot.lane.b32.xlu0 %v6456_v57, %s10077_s28 }
 0x84d   : > { %v14362_v57 = vpop.permute.xlu0 %7007 }
 0x84e   : > { %17244 = vst [vmem:[#allocation406_spill] sm:$0xff] %v14362_v57 }
 0x84f   : > { %6015 = vperm.xlu1 %9548, %v13806_v60   ;;  %v7056_v14 = vpop.permute.xlu1 %7055 }
 0x850   : > { %v7113_v38 = vmul.f32 %v14351_v36, %v7056_v14 }
 0x851   : > { %v14368_v61 = vpop.permute.xlu0 %7075 }
 0x852   : > { %7200 = vrot.lane.b32.xlu0 %v7113_v38, %s10078_s13 }
 0x853   : > { %9549 = vset.pattern.permute.xlu1 %v17243_v2  ;;  %v14358_v30 = vpop.permute.xlu1 %6987 }
 0x854   : > { %6719 = vperm.xlu1 %9549, %v13981_v6   ;;  %v14372_v6 = vld [vmem:[#allocation2 + $0x40] sm:$0xff] }
 0x855   : > { %17245 = vst [vmem:[#allocation407_spill] sm:$0xff] %v14372_v6 }
 0x856   : > { %6119 = vperm.xlu0 %9546, %v14022_v29  }
 0x858   : > { %6651 = vperm.xlu1 %9549, %v13799_v33   ;;  %v6420_v16 = vpop.permute.xlu1 %6419  ;;  %v14379_v33 = vpop.permute.xlu0 %7015 }
 0x859   : > { %v6474_v14 = vmul.f32 %v17188_v1, %v6420_v16 }
 0x85a   : > { %6051 = vperm.xlu0 %9546, %v14243_v59   ;;  %v14383_v59 = vld [vmem:[#allocation2 + $0x88] sm:$0xff] }
 0x85b   : > { %17246 = vst [vmem:[#allocation408_spill] sm:$0xff] %v14383_v59 }
 0x85c   : > { %9550 = vset.pattern.permute.xlu1 %v17235_v49  ;;  %v6356_v38 = vpop.permute.xlu1 %6355 }
 0x85d   : > { %6083 = vperm.xlu1 %9550, %v14044_v12   ;;  %v6458_v57 = vmul.f32 %v14372_v6, %v6356_v38  ;;  %v14388_v38 = vpop.permute.xlu0 %7083 }
 0x85e   : > { %6562 = vrot.lane.b32.xlu0 %v6474_v14, %s10077_s28  ;;  %v6467_v14 = vmul.f32 %v14383_v59, %v14224_v32 }
 0x860   : > { %v14375_v29 = vpop.permute.xlu1 %6359 }
 0x861   : > { %6019 = vperm.xlu1 %9550, %v14053_v4  }
 0x862   : > { %6530 = vrot.lane.b32.xlu0 %v6458_v57, %s10077_s28  ;;  %v14394_v57 = vld [vmem:[#allocation2 + $0x8] sm:$0xff] }
 0x863   : > { %17247 = vst [vmem:[#allocation409_spill] sm:$0xff] %v14394_v57 }
 0x865   : > { %6023 = vperm.xlu1 %9550, %v13813_v19   ;;  %v7064_v16 = vpop.permute.xlu1 %7063 }
 0x866   : > { %v7115_v1 = vmul.f32 %v17190_v26, %v7064_v16  ;;  %v6451_v26 = vmul.f32 %v14394_v57, %v14236_v47  ;;  %v14402_v16 = vpop.permute.xlu0 %7023 }
 0x867   : > { %17248 = vst [vmem:[#allocation410_spill] sm:$0xff] %v14402_v16 }
 0x868   : > { %7204 = vrot.lane.b32.xlu0 %v7115_v1, %s10078_s13 }
 0x869   : > { %v14390_v6 = vpop.permute.xlu1 %6995  ;;  %6548 = vrot.lane.b32.xlu1 %v6467_v14, %s10077_s28 }
 0x86a   : > { %9551 = vset.pattern.permute.xlu1 %v17243_v2  ;;  %v14409_v14 = vpop.permute.xlu0 %6071 }
 0x86b   : > { %17249 = vst [vmem:[#allocation411_spill] sm:$0xff] %v14409_v14 }
 0x86c   : > { %6127 = vperm.xlu0 %9546, %v14029_v63  }
 0x86d   : > { %6516 = vrot.lane.b32.xlu1 %v6451_v26, %s10077_s28  ;;  %v14415_v26 = vld [vmem:[#allocation2 + $0x80] sm:$0xff] }
 0x86e   : > { %v14400_v32 = vpop.permute.xlu1 %6427  ;;  %v7106_v59 = vmul.f32 %v14415_v26, %v14282_v56 }
 0x870   : > { %6059 = vperm.xlu0 %9546, %v14278_v11  }
 0x871   : > { %6727 = vperm.xlu1 %9551, %v13988_v52   ;;  %v14422_v52 = vpop.permute.xlu0 %6079 }
 0x872   : > { %v14406_v1 = vpop.permute.xlu1 %6363  ;;  %17250 = vst [vmem:[#allocation412_spill] sm:$0xff] %v14422_v52 }
 0x874   : > { %9561 = vset.pattern.permute.xlu0 %v17243_v2 }
 0x875   : > { %6659 = vperm.xlu1 %9551, %v14053_v4   ;;  %6707 = vperm.xlu0 %9561, %v13968_v5   ;;  %v7090_v5 = vmul.f32 %v14231_v23, %v14254_v39  ;;  %v14432_v56 = vpop.permute.xlu0 %6087 }
 0x876   : > { %v14413_v47 = vpop.permute.xlu1 %6367  ;;  %17251 = vst [vmem:[#allocation413_spill] sm:$0xff] %v14432_v56 }
 0x879   : > { %6647 = vperm.xlu0 %9561, %v13793_v37   ;;  %7186 = vrot.lane.b32.xlu1 %v7106_v59, %s10078_s13  ;;  %v7091_v37 = vmul.f32 %v14394_v57, %v14286_v28  ;;  %v14440_v52 = vpop.permute.xlu0 %6546 }
 0x87a   : > { %9552 = vset.pattern.permute.xlu1 %v17235_v49 }
 0x87b   : > { %v14424_v14 = vpop.permute.xlu1 %7071 }
 0x87d   : > { %6715 = vperm.xlu0 %9561, %v14016_v45   ;;  %6091 = vperm.xlu1 %9552, %v14070_v18   ;;  %v14452_v28 = vpop.permute.xlu0 %6514 }
 0x87f   : > { %v14430_v4 = vpop.permute.xlu1 %7003 }
 0x881   : > { %6655 = vperm.xlu0 %9561, %v13806_v60   ;;  %7154 = vrot.lane.b32.xlu1 %v7090_v5, %s10078_s13  ;;  %v14448_v60 = vld [vmem:[#allocation2 + $0x98] sm:$0xff] }
 0x882   : > { %17252 = vst [vmem:[#allocation414_spill] sm:$0xff] %v14448_v60  ;;  %v6469_v45 = vmul.f32 %v14448_v60, %v14229_v21 }
 0x884   : > { %v14438_v59 = vpop.permute.xlu1 %6435 }
 0x885   : > { %6723 = vperm.xlu0 %9561, %v14044_v12   ;;  %7156 = vrot.lane.b32.xlu1 %v7091_v37, %s10078_s13  ;;  %v14459_v12 = vld [vmem:[#allocation2 + $0x18] sm:$0xff]  ;;  %v14463_v37 = vpop.permute.xlu0 %7188 }
 0x886   : > { %17253 = vst [vmem:[#allocation415_spill] sm:$0xff] %v14459_v12  ;;  %17254 = vst [vmem:[#allocation416_spill] sm:$0xff] %v14463_v37  ;;  %v14481_v37 = vld [vmem:[#allocation2 + $0x90] sm:$0xff] }
 0x888   : > { %v14444_v39 = vpop.permute.xlu1 %6371 }
 0x889   : > { %6663 = vperm.xlu0 %9561, %v13813_v19   ;;  %6031 = vperm.xlu1 %9552, %v14081_v8   ;;  %v6453_v19 = vmul.f32 %v14459_v12, %v14273_v43 }
 0x88c   : > { %v14454_v5 = vpop.permute.xlu1 %6375 }
 0x88d   : > { %6552 = vrot.lane.b32.xlu1 %v6469_v45, %s10077_s28  ;;  %6731 = vperm.xlu0 %9561, %v14070_v18  }
 0x88e   : > { %9553 = vset.pattern.permute.xlu1 %v17243_v2 }
 0x891   : > { %v14465_v56 = vpop.permute.xlu1 %7079  ;;  %6520 = vrot.lane.b32.xlu1 %v6453_v19, %s10077_s28  ;;  %6671 = vperm.xlu0 %9561, %v14081_v8   ;;  %v7108_v8 = vmul.f32 %v14481_v37, %v14293_v48  ;;  %v7092_v48 = vmul.f32 %v14270_v58, %v14290_v27  ;;  %v6476_v27 = vmul.f32 %v13769_v62, %v14400_v32 }
 0x893   : > { %v14469_v21 = vpop.permute.xlu0 %6095 }
 0x894   : > { %17255 = vst [vmem:[#allocation417_spill] sm:$0xff] %v14469_v21 }
 0x895   : > { %v14471_v45 = vpop.permute.xlu1 %7011  ;;  %6735 = vperm.xlu1 %9553, %v13995_v55   ;;  %6739 = vperm.xlu0 %9561, %v14092_v42  }
 0x897   : > { %v14475_v18 = vpop.permute.xlu0 %6027 }
 0x899   : > { %6667 = vperm.xlu1 %9553, %v14109_v13   ;;  %6679 = vperm.xlu0 %9561, %v14103_v35  }
 0x89a   : > { %v14479_v43 = vpop.permute.xlu1 %6443 }
 0x89b   : > { %v14485_v19 = vpop.permute.xlu0 %6550 }
 0x89d   : > { %7190 = vrot.lane.b32.xlu1 %v7108_v8, %s10078_s13  ;;  %6747 = vperm.xlu0 %9561, %v14119_v20   ;;  %v7093_v8 = vmul.f32 %v14459_v12, %v14297_v10  ;;  %v6471_v10 = vmul.f32 %v14320_v51, %v14238_v7 }
 0x89e   : > { %v14489_v55 = vpop.permute.xlu1 %6379  ;;  %9554 = vset.pattern.permute.xlu1 %v17235_v49 }
 0x89f   : > { %v14492_v13 = vpop.permute.xlu0 %6518 }
 0x8a1   : > { %6099 = vperm.xlu1 %9554, %v14092_v42   ;;  %6687 = vperm.xlu0 %9561, %v14130_v46  }
 0x8a2   : > { %v14496_v21 = vpop.permute.xlu1 %6383 }
 0x8a3   : > { %v14500_v60 = vpop.permute.xlu0 %7192 }
 0x8a4   : > { %17256 = vst [vmem:[#allocation418_spill] sm:$0xff] %v14500_v60  ;;  %v14522_v60 = vld [vmem:[#allocation2 + $0x50] sm:$0xff] }
 0x8a5   : > { %7158 = vrot.lane.b32.xlu1 %v7092_v48, %s10078_s13  ;;  %6755 = vperm.xlu0 %9561, %v14142_v25   ;;  %17258 = vst [vmem:[#allocation420_spill] sm:$0xff] %v14522_v60  ;;  %v7100_v12 = vmul.f32 %v14522_v60, %v14430_v4  ;;  %v14576_v4 = vld [vmem:[#allocation2 + $0x60] sm:$0xff] }
 0x8a6   : > { %17262 = vst [vmem:[#allocation424_spill] sm:$0xff] %v14576_v4 }
 0x8a7   : > { %v14506_v57 = vpop.permute.xlu1 %7087 }
 0x8a9   : > { %7160 = vrot.lane.b32.xlu1 %v7093_v8, %s10078_s13  ;;  %6695 = vperm.xlu0 %9561, %v14153_v50   ;;  %v14510_v42 = vpop.permute.xlu0 %6103  ;;  %v6460_v8 = vmul.f32 %v14522_v60, %v14406_v1 }
 0x8aa   : > { %17257 = vst [vmem:[#allocation419_spill] sm:$0xff] %v14510_v42 }
 0x8ab   : > { %v14514_v16 = vpop.permute.xlu1 %7019 }
 0x8ad   : > { %6039 = vperm.xlu1 %9554, %v14103_v35   ;;  %6566 = vrot.lane.b32.xlu0 %v6476_v27, %s10077_s28  ;;  %v14518_v48 = vpop.permute.xlu0 %6035  ;;  %v14533_v35 = vld [vmem:[#allocation2 + $0x28] sm:$0xff] }
 0x8ae   : > { %v6455_v7 = vmul.f32 %v14533_v35, %v14311_v3 }
 0x8b0   : > { %v14526_v42 = vpop.permute.xlu1 %6067 }
 0x8b1   : > { %6556 = vrot.lane.b32.xlu1 %v6471_v10, %s10077_s28  ;;  %6534 = vrot.lane.b32.xlu0 %v6460_v8, %s10077_s28  ;;  %v14530_v32 = vpop.permute.xlu0 %6554  ;;  %v7116_v8 = vmul.f32 %v13769_v62, %v14354_v53  ;;  %v6478_v62 = vmul.f32 %v13774_v31, %v14438_v59  ;;  %v7094_v53 = vmul.f32 %v14308_v44, %v14325_v22 }
 0x8b2   : > { %9555 = vset.pattern.permute.xlu1 %v17243_v2  ;;  %v7095_v59 = vmul.f32 %v14533_v35, %v14314_v0 }
 0x8b4   : > { %v14537_v27 = vpop.permute.xlu1 %6003 }
 0x8b5   : > { %6524 = vrot.lane.b32.xlu1 %v6455_v7, %s10077_s28  ;;  %6763 = vperm.xlu0 %9561, %v14165_v15   ;;  %v14541_v1 = vpop.permute.xlu0 %6522  ;;  %v7110_v7 = vmul.f32 %v14300_v40, %v14305_v24 }
 0x8b8   : > { %v14543_v10 = vpop.permute.xlu1 %6007 }
 0x8b9   : > { %6743 = vperm.xlu1 %9555, %v14002_v54   ;;  %6699 = vperm.xlu0 %9561, %v14278_v11   ;;  %v14549_v51 = vpop.permute.xlu0 %7196 }
 0x8ba   : > { %17259 = vst [vmem:[#allocation421_spill] sm:$0xff] %v14549_v51 }
 0x8bd   : > { %v14551_v3 = vpop.permute.xlu1 %6711  ;;  %6675 = vperm.xlu1 %9555, %v14171_v41   ;;  %7206 = vrot.lane.b32.xlu0 %v7116_v8, %s10078_s13 }
 0x8bf   : > { %v14559_v54 = vpop.permute.xlu0 %6111 }
 0x8c0   : > { %17260 = vst [vmem:[#allocation422_spill] sm:$0xff] %v14559_v54 }
 0x8c1   : > { %v14561_v11 = vpop.permute.xlu1 %6643  ;;  %7194 = vrot.lane.b32.xlu1 %v7110_v7, %s10078_s13  ;;  %7174 = vrot.lane.b32.xlu0 %v7100_v12, %s10078_s13  ;;  %v6462_v12 = vmul.f32 %v14576_v4, %v14444_v39  ;;  %v14596_v7 = vld [vmem:[#allocation2 + $0xe0] sm:$0xff] }
 0x8c2   : > { %9556 = vset.pattern.permute.xlu1 %v17235_v49  ;;  %17263 = vst [vmem:[#allocation425_spill] sm:$0xff] %v14596_v7 }
 0x8c3   : > { %v14568_v41 = vpop.permute.xlu0 %6043 }
 0x8c4   : > { %17261 = vst [vmem:[#allocation423_spill] sm:$0xff] %v14568_v41 }
 0x8c5   : > { %6107 = vperm.xlu1 %9556, %v14119_v20   ;;  %6570 = vrot.lane.b32.xlu0 %v6478_v62, %s10077_s28  ;;  %v5840_v20 = vmul.f32 %v13779_v34, %v14057_v17  ;;  %v7118_v62 = vmul.f32 %v14596_v7, %v14368_v61  ;;  %v17265_v34 = vld [vmem:[#allocation394_spill] sm:$0xff]  ;;  %v7102_v17 = vmul.f32 %v14576_v4, %v14471_v45  ;;  %v14615_v61 = vld [vmem:[#allocation2 + $0x38] sm:$0xff] }
 0x8c6   : > { %v14572_v24 = vpop.permute.xlu1 %6075  ;;  %v6473_v0 = vmul.f32 %v14351_v36, %v17265_v34  ;;  %17267 = vst [vmem:[#allocation427_spill] sm:$0xff] %v14615_v61  ;;  %v14629_v34 = vld [vmem:[#allocation2 + $0x70] sm:$0xff] }
 0x8c7   : > { %v14580_v8 = vpop.permute.xlu0 %6558  ;;  %17270 = vst [vmem:[#allocation430_spill] sm:$0xff] %v14629_v34 }
 0x8c9   : > { %7162 = vrot.lane.b32.xlu1 %v7094_v53, %s10078_s13  ;;  %6538 = vrot.lane.b32.xlu0 %v6462_v12, %s10077_s28 }
 0x8ca   : > { %v14584_v31 = vpop.permute.xlu1 %6011 }
 0x8cb   : > { %v14590_v22 = vpop.permute.xlu0 %6526 }
 0x8cd   : > { %7164 = vrot.lane.b32.xlu1 %v7095_v59, %s10078_s13  ;;  %5934 = vrot.lane.b32.xlu0 %v5840_v20, %s10073_s22  ;;  %v14619_v59 = vld [vmem:[#allocation2 + $0xf0] sm:$0xff] }
 0x8ce   : > { %v14594_v39 = vpop.permute.xlu1 %6015  ;;  %17268 = vst [vmem:[#allocation428_spill] sm:$0xff] %v14619_v59  ;;  %v6480_v36 = vmul.f32 %v14619_v59, %v14479_v43 }
 0x8cf   : > { %v14600_v53 = vpop.permute.xlu0 %7200 }
 0x8d0   : > { %17264 = vst [vmem:[#allocation426_spill] sm:$0xff] %v14600_v53  ;;  %v17275_v53 = vld [vmem:[#allocation403_spill] sm:$0xff] }
 0x8d1   : > { %6047 = vperm.xlu1 %9556, %v14130_v46   ;;  %7210 = vrot.lane.b32.xlu0 %v7118_v62, %s10078_s13  ;;  %v6457_v46 = vmul.f32 %v14615_v61, %v14344_v9  ;;  %v17271_v9 = vld [vmem:[#allocation270_spill] sm:$0xff] }
 0x8d3   : > { %v14608_v12 = vpop.permute.xlu1 %6719 }
 0x8d5   : > { %6560 = vrot.lane.b32.xlu1 %v6473_v0, %s10077_s28  ;;  %7178 = vrot.lane.b32.xlu0 %v7102_v17, %s10078_s13  ;;  %v14612_v20 = vpop.permute.xlu0 %6119  ;;  %v6464_v0 = vmul.f32 %v14629_v34, %v14489_v55  ;;  %v17274_v55 = vld [vmem:[#allocation399_spill] sm:$0xff] }
 0x8d6   : > { %17266 = vst [vmem:[#allocation394_spill] sm:$0xff] %v14612_v20  ;;  %9557 = vset.pattern.permute.xlu1 %v17243_v2  ;;  %v7112_v4 = vmul.f32 %v17275_v53, %v17274_v55 }
 0x8d7   : > { %v14623_v45 = vpop.permute.xlu1 %6651 }
 0x8d9   : > { %6528 = vrot.lane.b32.xlu1 %v6457_v46, %s10077_s28  ;;  %6574 = vrot.lane.b32.xlu0 %v6480_v36, %s10077_s28  ;;  %v14627_v62 = vpop.permute.xlu0 %6051  ;;  %v7120_v46 = vmul.f32 %v14619_v59, %v14388_v38  ;;  %v17272_v36 = vld [vmem:[#allocation388_spill] sm:$0xff]  ;;  %v6146_v38 = vmul.f32 %v14415_v26, %v14526_v42  ;;  %v17279_v42 = vld [vmem:[#allocation401_spill] sm:$0xff] }
 0x8da   : > { %17269 = vst [vmem:[#allocation429_spill] sm:$0xff] %v14627_v62  ;;  %v17283_v62 = vld [vmem:[#allocation186_spill] sm:$0xff] }
 0x8dc   : > { %v14633_v17 = vpop.permute.xlu1 %6083 }
 0x8dd   : > { %6751 = vperm.xlu1 %9557, %v17271_v9   ;;  %6542 = vrot.lane.b32.xlu0 %v6464_v0, %s10077_s28  ;;  %v14637_v43 = vpop.permute.xlu0 %6562  ;;  %v7104_v9 = vmul.f32 %v14629_v34, %v14514_v16  ;;  %v17277_v16 = vld [vmem:[#allocation404_spill] sm:$0xff] }
 0x8de   : > { %v7096_v55 = vmul.f32 %v17277_v16, %v14358_v30  ;;  %v17282_v30 = vld [vmem:[#allocation84_spill] sm:$0xff] }
 0x8e0   : > { %v14641_v20 = vpop.permute.xlu1 %6019 }
 0x8e1   : > { %6683 = vperm.xlu1 %9557, %v17272_v36   ;;  %7214 = vrot.lane.b32.xlu0 %v7120_v46, %s10078_s13  ;;  %v14645_v54 = vpop.permute.xlu0 %6530 }
 0x8e2   : > { %17273 = vst [vmem:[#allocation270_spill] sm:$0xff] %v14645_v54 }
 0x8e4   : > { %v14651_v0 = vpop.permute.xlu1 %6023 }
 0x8e5   : > { %7198 = vrot.lane.b32.xlu1 %v7112_v4, %s10078_s13  ;;  %7182 = vrot.lane.b32.xlu0 %v7104_v9, %s10078_s13  ;;  %v14658_v46 = vpop.permute.xlu0 %7204  ;;  %v6130_v4 = vmul.f32 %v14231_v23, %v14537_v27  ;;  %v2786_v27 = vmul.f32 %v14415_v26, %v17282_v30 }
 0x8e6   : > { %9558 = vset.pattern.permute.xlu1 %v17235_v49  ;;  %17276 = vst [vmem:[#allocation388_spill] sm:$0xff] %v14658_v46  ;;  %v7097_v46 = vmul.f32 %v14615_v61, %v17279_v42  ;;  %v14689_v61 = vld [vmem:[#allocation2 + $0xc8] sm:$0xff] }
 0x8e7   : > { %v3426_v51 = vadd.f32 %v17283_v62, %v2786_v27  ;;  %17285 = vst [vmem:[#allocation401_spill] sm:$0xff] %v14689_v61  ;;  %v6770_v62 = vmul.f32 %v14231_v23, %v14561_v11  ;;  %v17291_v11 = vld [vmem:[#allocation141_spill] sm:$0xff] }
 0x8e8   : > { %v14660_v36 = vpop.permute.xlu1 %6548 }
 0x8e9   : > { %6115 = vperm.xlu1 %9558, %v14142_v25   ;;  %6226 = vrot.lane.b32.xlu0 %v6146_v38, %s10077_s28 }
 0x8eb   : > { %v14668_v9 = vpop.permute.xlu0 %6127 }
 0x8ec   : > { %17278 = vst [vmem:[#allocation399_spill] sm:$0xff] %v14668_v9  ;;  %v14670_v34 = vpop.permute.xlu1 %6516 }
 0x8ed   : > { %7166 = vrot.lane.b32.xlu1 %v7096_v55, %s10078_s13  ;;  %6194 = vrot.lane.b32.xlu0 %v6130_v4, %s10077_s28  ;;  %v17284_v4 = vld [vmem:[#allocation135_spill] sm:$0xff] }
 0x8ee   : > { %v4066_v42 = vadd.f32 %v17284_v4, %v3426_v51  ;;  %v17288_v51 = vld [vmem:[#allocation61_spill] sm:$0xff] }
 0x8ef   : > { %v14676_v25 = vpop.permute.xlu0 %6059 }
 0x8f0   : > { %17280 = vst [vmem:[#allocation403_spill] sm:$0xff] %v14676_v25  ;;  %v14678_v38 = vpop.permute.xlu1 %6727  ;;  %v17286_v25 = vld [vmem:[#allocation395_spill] sm:$0xff] }
 0x8f1   : > { %17281 = vst [vmem:[#allocation404_spill] sm:$0xff] %v14678_v38  ;;  %7168 = vrot.lane.b32.xlu1 %v7097_v46, %s10078_s13  ;;  %v6475_v7 = vmul.f32 %v14689_v61, %v17286_v25  ;;  %v17287_v38 = vld [vmem:[#allocation120_spill] sm:$0xff]  ;;  %v14704_v25 = vld [vmem:[#allocation2 + $0x48] sm:$0xff]  ;;  %v6148_v61 = vmul.f32 %v14481_v37, %v14572_v24 }
 0x8f2   : > { %v4706_v54 = vadd.f32 %v17287_v38, %v4066_v42  ;;  %17290 = vst [vmem:[#allocation84_spill] sm:$0xff] %v14704_v25  ;;  %v6459_v27 = vmul.f32 %v14704_v25, %v14375_v29 }
 0x8f4   : > { %v14683_v59 = vpop.permute.xlu1 %6659  ;;  %v6708_v9 = vpop.permute.xlu0 %6707 }
 0x8f5   : > { %v6786_v55 = vmul.f32 %v14415_v26, %v6708_v9  ;;  %6055 = vperm.xlu1 %9558, %v14153_v50   ;;  %v2770_v50 = vmul.f32 %v14231_v23, %v17288_v51  ;;  %v17289_v26 = vld [vmem:[#allocation321_spill] sm:$0xff]  ;;  %v17293_v23 = vld [vmem:[#allocation142_spill] sm:$0xff] }
 0x8f6   : > { %v5346_v9 = vadd.f32 %v17289_v26, %v4706_v54  ;;  %v17294_v26 = vld [vmem:[#allocation104_spill] sm:$0xff] }
 0x8f7   : > { %6866 = vrot.lane.b32.xlu0 %v6786_v55, %s10078_s13  ;;  %v3410_v4 = vadd.f32 %v17291_v11, %v2770_v50  ;;  %v17295_v50 = vld [vmem:[#allocation269_spill] sm:$0xff] }
 0x8f8   : > { %v7187_v46 = vpop.permute.xlu1 %7186  ;;  %v14694_v30 = vpop.permute.xlu0 %6647 }
 0x8f9   : > { %6564 = vrot.lane.b32.xlu1 %v6475_v7, %s10077_s28  ;;  %v17292_v7 = vld [vmem:[#allocation378_spill] sm:$0xff]  ;;  %v4050_v54 = vadd.f32 %v17293_v23, %v3410_v4 }
 0x8fa   : > { %9559 = vset.pattern.permute.xlu1 %v17243_v2  ;;  %v5986_v42 = vadd.f32 %v17292_v7, %v5346_v9  ;;  %v17296_v9 = vld [vmem:[#allocation305_spill] sm:$0xff] }
 0x8fb   : > { %6834 = vrot.lane.b32.xlu0 %v6770_v62, %s10078_s13  ;;  %v4690_v60 = vadd.f32 %v17294_v26, %v4050_v54  ;;  %v17298_v7 = vld [vmem:[#allocation393_spill] sm:$0xff] }
 0x8fc   : > { %v14709_v38 = vpop.permute.xlu1 %6091  ;;  %v6716_v55 = vpop.permute.xlu0 %6715  ;;  %v6626_v51 = vadd.f32 %v14440_v52, %v5986_v42  ;;  %v17297_v52 = vld [vmem:[#allocation362_spill] sm:$0xff] }
 0x8fd   : > { %6532 = vrot.lane.b32.xlu1 %v6459_v27, %s10077_s28  ;;  %v5330_v11 = vadd.f32 %v17296_v9, %v4690_v60  ;;  %v14733_v42 = vld [vmem:[#allocation2 + $0xc0] sm:$0xff] }
 0x8fe   : > { %v7266_v41 = vadd.f32 %v7187_v46, %v6626_v51  ;;  %v17299_v46 = vld [vmem:[#allocation402_spill] sm:$0xff] }
 0x8ff   : > { %6230 = vrot.lane.b32.xlu0 %v6148_v61, %s10077_s28  ;;  %v5970_v4 = vadd.f32 %v17297_v52, %v5330_v11  ;;  %v6132_v61 = vmul.f32 %v14270_v58, %v14584_v31  ;;  %v7114_v23 = vmul.f32 %v14733_v42, %v17299_v46  ;;  %v17301_v11 = vld [vmem:[#allocation407_spill] sm:$0xff]  ;;  %v17305_v46 = vld [vmem:[#allocation405_spill] sm:$0xff] }
 0x900   : > { %v7155_v29 = vpop.permute.xlu1 %7154  ;;  %v14719_v62 = vpop.permute.xlu0 %6655 }
 0x901   : > { %6759 = vperm.xlu1 %9559, %v17295_v50   ;;  %v6610_v60 = vadd.f32 %v14452_v28, %v5970_v4  ;;  %v6788_v50 = vmul.f32 %v14481_v37, %v6716_v55  ;;  %v17300_v28 = vld [vmem:[#allocation86_spill] sm:$0xff] }
 0x902   : > { %v2788_v9 = vmul.f32 %v14481_v37, %v17300_v28  ;;  %v17303_v4 = vld [vmem:[#allocation134_spill] sm:$0xff]  ;;  %v7099_v37 = vmul.f32 %v14704_v25, %v17305_v46  ;;  %v17312_v46 = vld [vmem:[#allocation380_spill] sm:$0xff] }
 0x903   : > { %7346 = vrot.lane.b32.xlu0 %v7266_v41, %s10080_s16  ;;  %v7250_v51 = vadd.f32 %v7155_v29, %v6610_v60  ;;  %v7098_v29 = vmul.f32 %v17301_v11, %v14390_v6  ;;  %v17307_v60 = vld [vmem:[#allocation249_spill] sm:$0xff] }
 0x904   : > { %v14725_v24 = vpop.permute.xlu1 %7156  ;;  %v14727_v27 = vpop.permute.xlu0 %6723 }
 0x905   : > { %6691 = vperm.xlu1 %9559, %v17298_v7   ;;  %v6772_v7 = vmul.f32 %v14270_v58, %v14623_v45  ;;  %v17308_v45 = vld [vmem:[#allocation63_spill] sm:$0xff] }
 0x906   : > { %v2772_v28 = vmul.f32 %v14270_v58, %v17308_v45 }
 0x907   : > { %6198 = vrot.lane.b32.xlu0 %v6132_v61, %s10077_s28  ;;  %v3428_v61 = vadd.f32 %v17303_v4, %v2788_v9  ;;  %v17309_v9 = vld [vmem:[#allocation323_spill] sm:$0xff] }
 0x908   : > { %v14739_v41 = vpop.permute.xlu1 %6031  ;;  %v14741_v54 = vpop.permute.xlu0 %6663 }
 0x909   : > { %7202 = vrot.lane.b32.xlu1 %v7114_v23, %s10078_s13 }
 0x90a   : > { %9560 = vset.pattern.permute.xlu1 %v17235_v49 }
 0x90b   : > { %7314 = vrot.lane.b32.xlu0 %v7250_v51, %s10080_s16 }
 0x90c   : > { %v14746_v31 = vpop.permute.xlu1 %6552  ;;  %v14748_v26 = vpop.permute.xlu0 %6731 }
 0x90d   : > { %6123 = vperm.xlu1 %9560, %v14165_v15   ;;  %v17304_v15 = vld [vmem:[#allocation174_spill] sm:$0xff] }
 0x90e   : > { %v4068_v55 = vadd.f32 %v17304_v15, %v3428_v61 }
 0x90f   : > { %6870 = vrot.lane.b32.xlu0 %v6788_v50, %s10078_s13  ;;  %v6150_v50 = vmul.f32 %v14300_v40, %v14633_v17  ;;  %v17314_v17 = vld [vmem:[#allocation139_spill] sm:$0xff] }
 0x910   : > { %v14757_v52 = vpop.permute.xlu1 %6520  ;;  %v14759_v49 = vpop.permute.xlu0 %6671  ;;  %v4708_v51 = vadd.f32 %v17307_v60, %v4068_v55  ;;  %v17313_v60 = vld [vmem:[#allocation381_spill] sm:$0xff] }
 0x911   : > { %17302 = vst [vmem:[#allocation186_spill] sm:$0xff] %v14759_v49  ;;  %7170 = vrot.lane.b32.xlu1 %v7098_v29, %s10078_s13  ;;  %v17316_v49 = vld [vmem:[#allocation396_spill] sm:$0xff] }
 0x912   : > { %v5348_v29 = vadd.f32 %v17309_v9, %v4708_v51  ;;  %v17317_v9 = vld [vmem:[#allocation137_spill] sm:$0xff] }
 0x913   : > { %6838 = vrot.lane.b32.xlu0 %v6772_v7, %s10078_s13  ;;  %v17311_v7 = vld [vmem:[#allocation27_spill] sm:$0xff] }
 0x914   : > { %v14769_v6 = vpop.permute.xlu1 %6735  ;;  %v14771_v23 = vpop.permute.xlu0 %6739  ;;  %v3412_v15 = vadd.f32 %v17311_v7, %v2772_v28  ;;  %v5988_v55 = vadd.f32 %v17312_v46, %v5348_v29  ;;  %v17318_v28 = vld [vmem:[#allocation307_spill] sm:$0xff]  ;;  %v14800_v7 = vld [vmem:[#allocation2 + $0x58] sm:$0xff]  ;;  %v17321_v46 = vld [vmem:[#allocation364_spill] sm:$0xff] }
 0x915   : > { %17306 = vst [vmem:[#allocation135_spill] sm:$0xff] %v14769_v6  ;;  %7172 = vrot.lane.b32.xlu1 %v7099_v37, %s10078_s13  ;;  %v14789_v37 = vld [vmem:[#allocation2 + $0xd8] sm:$0xff]  ;;  %17319 = vst [vmem:[#allocation61_spill] sm:$0xff] %v14800_v7 }
 0x916   : > { %v4052_v25 = vadd.f32 %v17314_v17, %v3412_v15  ;;  %17315 = vst [vmem:[#allocation120_spill] sm:$0xff] %v14789_v37  ;;  %v6477_v58 = vmul.f32 %v14789_v37, %v17316_v49  ;;  %v6628_v51 = vadd.f32 %v14485_v19, %v5988_v55  ;;  %v6461_v15 = vmul.f32 %v14800_v7, %v14413_v47 }
 0x917   : > { %6234 = vrot.lane.b32.xlu0 %v6150_v50, %s10077_s28  ;;  %v6134_v55 = vmul.f32 %v14308_v44, %v14641_v20 }
 0x918   : > { %v14781_v4 = vpop.permute.xlu1 %6667  ;;  %v14783_v61 = vpop.permute.xlu0 %6679 }
 0x919   : > { %17310 = vst [vmem:[#allocation395_spill] sm:$0xff] %v14783_v61  ;;  %6063 = vperm.xlu1 %9560, %v17313_v60   ;;  %v4692_v61 = vadd.f32 %v17317_v9, %v4052_v25 }
 0x91b   : > { %v5332_v29 = vadd.f32 %v17318_v28, %v4692_v61  ;;  %v6774_v28 = vmul.f32 %v14308_v44, %v14683_v59  ;;  %v17326_v59 = vld [vmem:[#allocation406_spill] sm:$0xff] }
 0x91c   : > { %v7191_v50 = vpop.permute.xlu1 %7190  ;;  %v14794_v45 = vpop.permute.xlu0 %6747 }
 0x91d   : > { %v7268_v6 = vadd.f32 %v7191_v50, %v6628_v51  ;;  %6568 = vrot.lane.b32.xlu1 %v6477_v58, %s10077_s28  ;;  %v5972_v25 = vadd.f32 %v17321_v46, %v5332_v29  ;;  %v17323_v58 = vld [vmem:[#allocation266_spill] sm:$0xff]  ;;  %v7117_v29 = vmul.f32 %v14789_v37, %v14424_v14  ;;  %v6152_v46 = vmul.f32 %v17275_v53, %v14709_v38  ;;  %v17341_v37 = vld [vmem:[#allocation152_spill] sm:$0xff] }
 0x91e   : > { %9562 = vset.pattern.permute.xlu1 %v17243_v2 }
 0x91f   : > { %7350 = vrot.lane.b32.xlu0 %v7268_v6, %s10080_s16  ;;  %v6612_v2 = vadd.f32 %v14492_v13, %v5972_v25  ;;  %v14818_v6 = vld [vmem:[#allocation2 + $0xe8] sm:$0xff]  ;;  %v6790_v13 = vmul.f32 %v14300_v40, %v14727_v27  ;;  %v17325_v25 = vld [vmem:[#allocation88_spill] sm:$0xff] }
 0x920   : > { %v14805_v19 = vpop.permute.xlu1 %6099  ;;  %v14807_v49 = vpop.permute.xlu0 %6687  ;;  %17322 = vst [vmem:[#allocation141_spill] sm:$0xff] %v14818_v6  ;;  %v5839_v51 = vmul.f32 %v14818_v6, %v17323_v58  ;;  %v17329_v58 = vld [vmem:[#allocation194_spill] sm:$0xff] }
 0x921   : > { %17320 = vst [vmem:[#allocation321_spill] sm:$0xff] %v14807_v49  ;;  %6536 = vrot.lane.b32.xlu1 %v6461_v15, %s10077_s28  ;;  %v17337_v49 = vld [vmem:[#allocation383_spill] sm:$0xff] }
 0x923   : > { %6202 = vrot.lane.b32.xlu0 %v6134_v55, %s10077_s28  ;;  %v2790_v55 = vmul.f32 %v14300_v40, %v17325_v25  ;;  %v17331_v40 = vld [vmem:[#allocation251_spill] sm:$0xff]  ;;  %v17333_v25 = vld [vmem:[#allocation72_spill] sm:$0xff] }
 0x924   : > { %v7159_v61 = vpop.permute.xlu1 %7158  ;;  %v14815_v17 = vpop.permute.xlu0 %6755 }
 0x925   : > { %v7252_v47 = vadd.f32 %v7159_v61, %v6612_v2  ;;  %6767 = vperm.xlu1 %9562, %v14029_v63   ;;  %v17328_v61 = vld [vmem:[#allocation192_spill] sm:$0xff] }
 0x927   : > { %7318 = vrot.lane.b32.xlu0 %v7252_v47, %s10080_s16  ;;  %v3430_v47 = vadd.f32 %v17328_v61, %v2790_v55  ;;  %v14871_v61 = vld [vmem:[#allocation2 + $0x68] sm:$0xff] }
 0x928   : > { %v14823_v20 = vpop.permute.xlu1 %7160  ;;  %v14825_v50 = vpop.permute.xlu0 %6695  ;;  %17335 = vst [vmem:[#allocation269_spill] sm:$0xff] %v14871_v61 }
 0x929   : > { %17324 = vst [vmem:[#allocation378_spill] sm:$0xff] %v14825_v50  ;;  %5932 = vrot.lane.b32.xlu1 %v5839_v51, %s10073_s22  ;;  %v4070_v38 = vadd.f32 %v17329_v58, %v3430_v47  ;;  %v17330_v51 = vld [vmem:[#allocation397_spill] sm:$0xff]  ;;  %v17336_v58 = vld [vmem:[#allocation118_spill] sm:$0xff] }
 0x92a   : > { %v17334_v50 = vld [vmem:[#allocation325_spill] sm:$0xff] }
 0x92b   : > { %6874 = vrot.lane.b32.xlu0 %v6790_v13, %s10078_s13  ;;  %v6479_v13 = vmul.f32 %v14818_v6, %v17330_v51 }
 0x92c   : > { %v14831_v9 = vpop.permute.xlu1 %6039  ;;  %v14833_v63 = vpop.permute.xlu0 %6566 }
 0x92d   : > { %6703 = vperm.xlu1 %9562, %v17313_v60   ;;  %v7101_v60 = vmul.f32 %v14800_v7, %v17326_v59  ;;  %v2774_v59 = vmul.f32 %v14308_v44, %v17333_v25  ;;  %v14881_v7 = vld [vmem:[#allocation2 + $0xf8] sm:$0xff]  ;;  %v17340_v44 = vld [vmem:[#allocation271_spill] sm:$0xff] }
 0x92e   : > { %17339 = vst [vmem:[#allocation305_spill] sm:$0xff] %v14881_v7 }
 0x92f   : > { %6842 = vrot.lane.b32.xlu0 %v6774_v28, %s10078_s13  ;;  %v3414_v51 = vadd.f32 %v17336_v58, %v2774_v59  ;;  %v17343_v58 = vld [vmem:[#allocation366_spill] sm:$0xff] }
 0x930   : > { %v14841_v15 = vpop.permute.xlu1 %6556  ;;  %v14843_v27 = vpop.permute.xlu0 %6534 }
 0x931   : > { %7208 = vrot.lane.b32.xlu1 %v7117_v29, %s10078_s13  ;;  %v4710_v29 = vadd.f32 %v17331_v40, %v4070_v38 }
 0x933   : > { %6238 = vrot.lane.b32.xlu0 %v6152_v46, %s10077_s28  ;;  %v5350_v55 = vadd.f32 %v17334_v50, %v4710_v29  ;;  %v5841_v50 = vmul.f32 %v14881_v7, %v17340_v44 }
 0x934   : > { %v14853_v14 = vpop.permute.xlu1 %6524  ;;  %v14855_v2 = vpop.permute.xlu0 %6763 }
 0x935   : > { %17327 = vst [vmem:[#allocation142_spill] sm:$0xff] %v14855_v2  ;;  %7176 = vrot.lane.b32.xlu1 %v7101_v60, %s10078_s13  ;;  %v6463_v60 = vmul.f32 %v14871_v61, %v14454_v5  ;;  %v5990_v38 = vadd.f32 %v17337_v49, %v5350_v55  ;;  %v17342_v49 = vld [vmem:[#allocation309_spill] sm:$0xff]  ;;  %v7119_v55 = vmul.f32 %v14818_v6, %v14465_v56 }
 0x937   : > { %v6630_v29 = vadd.f32 %v14530_v32, %v5990_v38  ;;  %v6136_v32 = vmul.f32 %v17277_v16, %v14475_v18  ;;  %v7103_v38 = vmul.f32 %v14871_v61, %v14379_v33  ;;  %v6792_v33 = vmul.f32 %v17275_v53, %v14748_v26  ;;  %v17361_v61 = vld [vmem:[#allocation171_spill] sm:$0xff] }
 0x938   : > { %v14862_v28 = vpop.permute.xlu1 %6743  ;;  %v14866_v46 = vpop.permute.xlu0 %6699  ;;  %v7121_v26 = vmul.f32 %v14881_v7, %v14506_v57 }
 0x939   : > { %6572 = vrot.lane.b32.xlu1 %v6479_v13, %s10077_s28  ;;  %17332 = vst [vmem:[#allocation104_spill] sm:$0xff] %v14866_v46  ;;  %v17338_v13 = vld [vmem:[#allocation111_spill] sm:$0xff] }
 0x93a   : > { %v4054_v40 = vadd.f32 %v17338_v13, %v3414_v51  ;;  %v17344_v13 = vld [vmem:[#allocation398_spill] sm:$0xff] }
 0x93c   : > { %v14875_v47 = vpop.permute.xlu1 %6675  ;;  %v14886_v25 = vpop.permute.xlu0 %7206  ;;  %v4694_v46 = vadd.f32 %v17341_v37, %v4054_v40  ;;  %v6481_v40 = vmul.f32 %v14881_v7, %v17344_v13  ;;  %v17351_v13 = vld [vmem:[#allocation408_spill] sm:$0xff] }
 0x93d   : > { %6540 = vrot.lane.b32.xlu1 %v6463_v60, %s10077_s28 }
 0x93e   : > { %v5334_v59 = vadd.f32 %v17342_v49, %v4694_v46 }
 0x940   : > { %v7195_v5 = vpop.permute.xlu1 %7194  ;;  %v5974_v51 = vadd.f32 %v17343_v58, %v5334_v59  ;;  %v14900_v37 = vpop.permute.xlu0 %7174 }
 0x941   : > { %v7270_v2 = vadd.f32 %v7195_v5, %v6630_v29  ;;  %5936 = vrot.lane.b32.xlu1 %v5841_v50, %s10073_s22  ;;  %v6776_v5 = vmul.f32 %v17277_v16, %v14781_v4  ;;  %v17347_v4 = vld [vmem:[#allocation410_spill] sm:$0xff] }
 0x942   : > { %v6614_v46 = vadd.f32 %v14541_v1, %v5974_v51  ;;  %v14917_v1 = vld [vmem:[#allocation2 + $0x78] sm:$0xff] }
 0x943   : > { %7354 = vrot.lane.b32.xlu0 %v7270_v2, %s10080_s16  ;;  %17345 = vst [vmem:[#allocation362_spill] sm:$0xff] %v14917_v1  ;;  %v6465_v50 = vmul.f32 %v14917_v1, %v14496_v21  ;;  %v6154_v21 = vmul.f32 %v14733_v42, %v14805_v19  ;;  %v7105_v51 = vmul.f32 %v14917_v1, %v17347_v4  ;;  %v17356_v4 = vld [vmem:[#allocation327_spill] sm:$0xff] }
 0x944   : > { %v14894_v60 = vpop.permute.xlu1 %6107  ;;  %v14910_v18 = vpop.permute.xlu0 %6570 }
 0x945   : > { %7212 = vrot.lane.b32.xlu1 %v7119_v55, %s10078_s13  ;;  %v17346_v55 = vld [vmem:[#allocation90_spill] sm:$0xff] }
 0x946   : > { %v2792_v58 = vmul.f32 %v17275_v53, %v17346_v55  ;;  %v17353_v53 = vld [vmem:[#allocation253_spill] sm:$0xff]  ;;  %v17355_v55 = vld [vmem:[#allocation79_spill] sm:$0xff] }
 0x947   : > { %6206 = vrot.lane.b32.xlu0 %v6136_v32, %s10077_s28 }
 0x948   : > { %v7163_v56 = vpop.permute.xlu1 %7162  ;;  %v14927_v49 = vpop.permute.xlu0 %6538 }
 0x949   : > { %v7254_v2 = vadd.f32 %v7163_v56, %v6614_v46  ;;  %7180 = vrot.lane.b32.xlu1 %v7103_v38, %s10078_s13  ;;  %v17348_v38 = vld [vmem:[#allocation18_spill] sm:$0xff] }
 0x94a   : > { %v3432_v46 = vadd.f32 %v17348_v38, %v2792_v58  ;;  %v17349_v56 = vld [vmem:[#allocation190_spill] sm:$0xff]  ;;  %v2787_v58 = vmul.f32 %v17351_v13, %v17355_v55  ;;  %v17357_v38 = vld [vmem:[#allocation409_spill] sm:$0xff] }
 0x94b   : > { %7322 = vrot.lane.b32.xlu0 %v7254_v2, %s10080_s16  ;;  %v17350_v2 = vld [vmem:[#allocation411_spill] sm:$0xff] }
 0x94c   : > { %v14912_v44 = vpop.permute.xlu1 %7164  ;;  %v14942_v32 = vpop.permute.xlu0 %5934  ;;  %v4072_v19 = vadd.f32 %v17349_v56, %v3432_v46  ;;  %v6131_v46 = vmul.f32 %v17357_v38, %v14543_v10 }
 0x94d   : > { %6576 = vrot.lane.b32.xlu1 %v6481_v40, %s10077_s28  ;;  %v6147_v40 = vmul.f32 %v17351_v13, %v17350_v2  ;;  %v17358_v2 = vld [vmem:[#allocation149_spill] sm:$0xff] }
 0x94f   : > { %6878 = vrot.lane.b32.xlu0 %v6792_v33, %s10078_s13 }
 0x950   : > { %v14922_v29 = vpop.permute.xlu1 %6047 }
 0x951   : > { %6544 = vrot.lane.b32.xlu1 %v6465_v50, %s10077_s28  ;;  %v4712_v50 = vadd.f32 %v17353_v53, %v4072_v19  ;;  %v17359_v19 = vld [vmem:[#allocation169_spill] sm:$0xff] }
 0x952   : > { %v3427_v53 = vadd.f32 %v17359_v19, %v2787_v58 }
 0x953   : > { %6846 = vrot.lane.b32.xlu0 %v6776_v5, %s10078_s13  ;;  %v14955_v5 = vpop.permute.xlu0 %7210 }
 0x954   : > { %v14932_v59 = vpop.permute.xlu1 %6560 }
 0x955   : > { %7216 = vrot.lane.b32.xlu1 %v7121_v26, %s10078_s13  ;;  %v17354_v26 = vld [vmem:[#allocation74_spill] sm:$0xff] }
 0x957   : > { %6242 = vrot.lane.b32.xlu0 %v6154_v21, %s10077_s28  ;;  %v2776_v21 = vmul.f32 %v17277_v16, %v17354_v26  ;;  %v17362_v26 = vld [vmem:[#allocation17_spill] sm:$0xff]  ;;  %v14975_v10 = vpop.permute.xlu0 %7178 }
 0x958   : > { %v14944_v57 = vpop.permute.xlu1 %6528  ;;  %v4067_v6 = vadd.f32 %v17362_v26, %v3427_v53  ;;  %v6771_v53 = vmul.f32 %v17357_v38, %v14694_v30 }
 0x959   : > { %7184 = vrot.lane.b32.xlu1 %v7105_v51, %s10078_s13  ;;  %v5352_v51 = vadd.f32 %v17356_v4, %v4712_v50  ;;  %v3416_v1 = vadd.f32 %v17358_v2, %v2776_v21  ;;  %v6787_v50 = vmul.f32 %v17351_v13, %v14551_v3  ;;  %v17364_v2 = vld [vmem:[#allocation167_spill] sm:$0xff]  ;;  %v17368_v13 = vld [vmem:[#allocation368_spill] sm:$0xff] }
 0x95a   : > { %v4707_v58 = vadd.f32 %v17364_v2, %v4067_v6  ;;  %v17369_v6 = vld [vmem:[#allocation379_spill] sm:$0xff] }
 0x95b   : > { %v4056_v16 = vadd.f32 %v17361_v61, %v3416_v1  ;;  %v17366_v61 = vld [vmem:[#allocation322_spill] sm:$0xff]  ;;  %v14994_v26 = vpop.permute.xlu0 %6574 }
 0x95c   : > { %v14951_v33 = vpop.permute.xlu1 %6751  ;;  %v5347_v1 = vadd.f32 %v17366_v61, %v4707_v58 }
 0x95d   : > { %17352 = vst [vmem:[#allocation393_spill] sm:$0xff] %v14951_v33  ;;  %6228 = vrot.lane.b32.xlu1 %v6147_v40, %s10077_s28  ;;  %v17360_v40 = vld [vmem:[#allocation385_spill] sm:$0xff]  ;;  %v17363_v33 = vld [vmem:[#allocation116_spill] sm:$0xff] }
 0x95e   : > { %v5992_v7 = vadd.f32 %v17360_v40, %v5352_v51  ;;  %v4696_v21 = vadd.f32 %v17363_v33, %v4056_v16  ;;  %v17365_v51 = vld [vmem:[#allocation311_spill] sm:$0xff]  ;;  %v5987_v40 = vadd.f32 %v17369_v6, %v5347_v1  ;;  %v6138_v16 = vmul.f32 %v17301_v11, %v14518_v48  ;;  %v17375_v1 = vld [vmem:[#allocation416_spill] sm:$0xff] }
 0x95f   : > { %v17374_v48 = vld [vmem:[#allocation11_spill] sm:$0xff] }
 0x960   : > { %v14964_v56 = vpop.permute.xlu1 %6683  ;;  %v6632_v55 = vadd.f32 %v14580_v8, %v5992_v7  ;;  %v17367_v8 = vld [vmem:[#allocation70_spill] sm:$0xff] }
 0x961   : > { %6196 = vrot.lane.b32.xlu1 %v6131_v46, %s10077_s28  ;;  %v5336_v46 = vadd.f32 %v17365_v51, %v4696_v21  ;;  %v2771_v7 = vmul.f32 %v17357_v38, %v17367_v8  ;;  %v6627_v38 = vadd.f32 %v14660_v36, %v5987_v40  ;;  %v15007_v8 = vpop.permute.xlu0 %6542  ;;  %v17378_v40 = vld [vmem:[#allocation415_spill] sm:$0xff] }
 0x963   : > { %v5976_v33 = vadd.f32 %v17368_v13, %v5336_v46  ;;  %v6794_v13 = vmul.f32 %v14733_v42, %v14771_v23  ;;  %v17379_v23 = vld [vmem:[#allocation81_spill] sm:$0xff] }
 0x964   : > { %v7199_v4 = vpop.permute.xlu1 %7198 }
 0x965   : > { %v7272_v19 = vadd.f32 %v7199_v4, %v6632_v55  ;;  %6868 = vrot.lane.b32.xlu1 %v6787_v50, %s10078_s13  ;;  %v17370_v50 = vld [vmem:[#allocation150_spill] sm:$0xff]  ;;  %v17371_v55 = vld [vmem:[#allocation412_spill] sm:$0xff]  ;;  %v6616_v2 = vadd.f32 %v14590_v22, %v5976_v33  ;;  %v17377_v33 = vld [vmem:[#allocation363_spill] sm:$0xff] }
 0x966   : > { %v3411_v30 = vadd.f32 %v17370_v50, %v2771_v7  ;;  %v17372_v4 = vld [vmem:[#allocation414_spill] sm:$0xff] }
 0x967   : > { %7358 = vrot.lane.b32.xlu0 %v7272_v19, %s10080_s16  ;;  %v6149_v21 = vmul.f32 %v17372_v4, %v17371_v55  ;;  %v17373_v19 = vld [vmem:[#allocation108_spill] sm:$0xff]  ;;  %v17376_v22 = vld [vmem:[#allocation306_spill] sm:$0xff]  ;;  %v6778_v55 = vmul.f32 %v17301_v11, %v14875_v47 }
 0x968   : > { %v14985_v3 = vpop.permute.xlu1 %6115  ;;  %v4051_v51 = vadd.f32 %v17373_v19, %v3411_v30  ;;  %v17381_v47 = vld [vmem:[#allocation12_spill] sm:$0xff] }
 0x969   : > { %6836 = vrot.lane.b32.xlu1 %v6771_v53, %s10078_s13  ;;  %v7267_v53 = vadd.f32 %v17375_v1, %v6627_v38 }
 0x96a   : > { %v4691_v61 = vadd.f32 %v17374_v48, %v4051_v51  ;;  %v15034_v51 = vld [vmem:[#allocation2 + $0xd0] sm:$0xff] }
 0x96b   : > { %6210 = vrot.lane.b32.xlu0 %v6138_v16, %s10077_s28  ;;  %v6133_v16 = vmul.f32 %v17378_v40, %v14594_v39  ;;  %v17382_v48 = vld [vmem:[#allocation92_spill] sm:$0xff] }
 0x96c   : > { %v7167_v58 = vpop.permute.xlu1 %7166  ;;  %v5331_v36 = vadd.f32 %v17376_v22, %v4691_v61  ;;  %v2794_v61 = vmul.f32 %v14733_v42, %v17382_v48  ;;  %v17383_v22 = vld [vmem:[#allocation212_spill] sm:$0xff]  ;;  %v6773_v42 = vmul.f32 %v17378_v40, %v14719_v62 }
 0x96d   : > { %v7256_v46 = vadd.f32 %v7167_v58, %v6616_v2  ;;  %6232 = vrot.lane.b32.xlu1 %v6149_v21, %s10077_s28  ;;  %v15025_v21 = vpop.permute.xlu0 %7214  ;;  %v2789_v2 = vmul.f32 %v17372_v4, %v17379_v23  ;;  %v17380_v58 = vld [vmem:[#allocation114_spill] sm:$0xff]  ;;  %v17388_v23 = vld [vmem:[#allocation255_spill] sm:$0xff] }
 0x96e   : > { %v5971_v6 = vadd.f32 %v17377_v33, %v5331_v36  ;;  %v3434_v36 = vadd.f32 %v17383_v22, %v2794_v61  ;;  %v17385_v33 = vld [vmem:[#allocation214_spill] sm:$0xff]  ;;  %v17392_v61 = vld [vmem:[#allocation329_spill] sm:$0xff]  ;;  %v17394_v22 = vld [vmem:[#allocation400_spill] sm:$0xff] }
 0x96f   : > { %7326 = vrot.lane.b32.xlu0 %v7256_v46, %s10080_s16  ;;  %v3429_v19 = vadd.f32 %v17380_v58, %v2789_v2 }
 0x970   : > { %v15009_v7 = vpop.permute.xlu1 %7168  ;;  %v6611_v30 = vadd.f32 %v14670_v34, %v5971_v6  ;;  %v6156_v34 = vmul.f32 %v15034_v51, %v14894_v60  ;;  %v4074_v6 = vadd.f32 %v17385_v33, %v3434_v36 }
 0x971   : > { %7348 = vrot.lane.b32.xlu1 %v7267_v53, %s10080_s16  ;;  %v4069_v46 = vadd.f32 %v17381_v47, %v3429_v19  ;;  %v15045_v1 = vpop.permute.xlu0 %7182  ;;  %v17390_v19 = vld [vmem:[#allocation76_spill] sm:$0xff] }
 0x972   : > { %v7251_v38 = vadd.f32 %v14725_v24, %v6611_v30  ;;  %v6789_v24 = vmul.f32 %v17372_v4, %v14608_v12  ;;  %v17387_v4 = vld [vmem:[#allocation65_spill] sm:$0xff]  ;;  %v4714_v2 = vadd.f32 %v17388_v23, %v4074_v6 }
 0x973   : > { %6882 = vrot.lane.b32.xlu0 %v6794_v13, %s10078_s13  ;;  %v17384_v13 = vld [vmem:[#allocation248_spill] sm:$0xff]  ;;  %v17396_v6 = vld [vmem:[#allocation157_spill] sm:$0xff] }
 0x974   : > { %v15019_v50 = vpop.permute.xlu1 %6055  ;;  %v4709_v60 = vadd.f32 %v17384_v13, %v4069_v46  ;;  %v17391_v46 = vld [vmem:[#allocation144_spill] sm:$0xff]  ;;  %v5354_v62 = vadd.f32 %v17392_v61, %v4714_v2 }
 0x975   : > { %6200 = vrot.lane.b32.xlu1 %v6133_v16, %s10077_s28  ;;  %v17386_v16 = vld [vmem:[#allocation324_spill] sm:$0xff]  ;;  %v15065_v47 = vpop.permute.xlu0 %6226 }
 0x976   : > { %v5349_v30 = vadd.f32 %v17386_v16, %v4709_v60  ;;  %v17395_v60 = vld [vmem:[#allocation113_spill] sm:$0xff] }
 0x977   : > { %6850 = vrot.lane.b32.xlu0 %v6778_v55, %s10078_s13  ;;  %v2773_v55 = vmul.f32 %v17378_v40, %v17387_v4 }
 0x978   : > { %v15031_v39 = vpop.permute.xlu1 %6564 }
 0x979   : > { %7316 = vrot.lane.b32.xlu1 %v7251_v38, %s10080_s16  ;;  %v17389_v38 = vld [vmem:[#allocation382_spill] sm:$0xff]  ;;  %v3413_v48 = vadd.f32 %v17391_v46, %v2773_v55  ;;  %v17399_v55 = vld [vmem:[#allocation24_spill] sm:$0xff]  ;;  %v15082_v46 = vpop.permute.xlu0 %6194 }
 0x97a   : > { %v5989_v58 = vadd.f32 %v17389_v38, %v5349_v30  ;;  %v17397_v30 = vld [vmem:[#allocation387_spill] sm:$0xff]  ;;  %v17400_v38 = vld [vmem:[#allocation418_spill] sm:$0xff] }
 0x97b   : > { %6246 = vrot.lane.b32.xlu0 %v6156_v34, %s10077_s28  ;;  %v2778_v34 = vmul.f32 %v17301_v11, %v17390_v19  ;;  %v4053_v33 = vadd.f32 %v17395_v60, %v3413_v48  ;;  %v17398_v11 = vld [vmem:[#allocation109_spill] sm:$0xff]  ;;  %v17402_v48 = vld [vmem:[#allocation308_spill] sm:$0xff] }
 0x97c   : > { %v15047_v53 = vpop.permute.xlu1 %6532  ;;  %v6629_v40 = vadd.f32 %v14746_v31, %v5989_v58  ;;  %v17401_v58 = vld [vmem:[#allocation126_spill] sm:$0xff] }
 0x97d   : > { %6872 = vrot.lane.b32.xlu1 %v6789_v24, %s10078_s13  ;;  %v17393_v24 = vld [vmem:[#allocation413_spill] sm:$0xff]  ;;  %v3418_v16 = vadd.f32 %v17396_v6, %v2778_v34  ;;  %v4693_v4 = vadd.f32 %v17398_v11, %v4053_v33  ;;  %v6135_v33 = vmul.f32 %v14533_v35, %v14651_v0 }
 0x97e   : > { %v6151_v36 = vmul.f32 %v17394_v22, %v17393_v24  ;;  %v7269_v19 = vadd.f32 %v17400_v38, %v6629_v40  ;;  %v17405_v40 = vld [vmem:[#allocation370_spill] sm:$0xff] }
 0x97f   : > { %v4058_v23 = vadd.f32 %v17399_v55, %v3418_v16  ;;  %v5333_v24 = vadd.f32 %v17402_v48, %v4693_v4  ;;  %v17406_v16 = vld [vmem:[#allocation423_spill] sm:$0xff]  ;;  %v15099_v4 = vpop.permute.xlu0 %6866 }
 0x980   : > { %v15056_v12 = vpop.permute.xlu1 %6759  ;;  %v15101_v55 = vld [vmem:[#allocation2 + $0xa8] sm:$0xff] }
 0x981   : > { %6840 = vrot.lane.b32.xlu1 %v6773_v42, %s10078_s13  ;;  %v5994_v42 = vadd.f32 %v17397_v30, %v5354_v62  ;;  %v4698_v61 = vadd.f32 %v17401_v58, %v4058_v23  ;;  %v17403_v62 = vld [vmem:[#allocation313_spill] sm:$0xff]  ;;  %v17407_v30 = vld [vmem:[#allocation420_spill] sm:$0xff]  ;;  %v17408_v23 = vld [vmem:[#allocation83_spill] sm:$0xff] }
 0x982   : > { %v2791_v0 = vmul.f32 %v15101_v55, %v17408_v23  ;;  %v17410_v58 = vld [vmem:[#allocation205_spill] sm:$0xff] }
 0x983   : > { %v6634_v2 = vadd.f32 %v14637_v43, %v5994_v42  ;;  %v5338_v22 = vadd.f32 %v17403_v62, %v4698_v61  ;;  %v6140_v42 = vmul.f32 %v17407_v30, %v17406_v16 }
 0x984   : > { %v15072_v13 = vpop.permute.xlu1 %6691  ;;  %v3431_v61 = vadd.f32 %v17410_v58, %v2791_v0  ;;  %v17417_v0 = vld [vmem:[#allocation326_spill] sm:$0xff] }
 0x985   : > { %6236 = vrot.lane.b32.xlu1 %v6151_v36, %s10077_s28  ;;  %v17404_v36 = vld [vmem:[#allocation365_spill] sm:$0xff]  ;;  %v5978_v6 = vadd.f32 %v17405_v40, %v5338_v22  ;;  %v17413_v22 = vld [vmem:[#allocation404_spill] sm:$0xff] }
 0x986   : > { %v5973_v60 = vadd.f32 %v17404_v36, %v5333_v24  ;;  %v6791_v36 = vmul.f32 %v15101_v55, %v17413_v22 }
 0x988   : > { %v7203_v31 = vpop.permute.xlu1 %7202  ;;  %v6613_v11 = vadd.f32 %v14757_v52, %v5973_v60  ;;  %v17411_v52 = vld [vmem:[#allocation207_spill] sm:$0xff]  ;;  %v15116_v60 = vpop.permute.xlu0 %6834 }
 0x989   : > { %v7274_v34 = vadd.f32 %v7203_v31, %v6634_v2  ;;  %7352 = vrot.lane.b32.xlu1 %v7269_v19, %s10080_s16  ;;  %v17409_v2 = vld [vmem:[#allocation270_spill] sm:$0xff]  ;;  %v4071_v24 = vadd.f32 %v17411_v52, %v3431_v61  ;;  %v17419_v61 = vld [vmem:[#allocation257_spill] sm:$0xff]  ;;  %v17420_v52 = vld [vmem:[#allocation384_spill] sm:$0xff] }
 0x98a   : > { %v6618_v38 = vadd.f32 %v17409_v2, %v5978_v6  ;;  %v7253_v19 = vadd.f32 %v14823_v20, %v6613_v11  ;;  %v17415_v6 = vld [vmem:[#allocation250_spill] sm:$0xff] }
 0x98b   : > { %7362 = vrot.lane.b32.xlu0 %v7274_v34, %s10080_s16  ;;  %v17412_v34 = vld [vmem:[#allocation94_spill] sm:$0xff]  ;;  %v4711_v16 = vadd.f32 %v17415_v6, %v4071_v24 }
 0x98c   : > { %v15092_v43 = vpop.permute.xlu1 %6123  ;;  %v2796_v62 = vmul.f32 %v15034_v51, %v17412_v34  ;;  %v17416_v11 = vld [vmem:[#allocation210_spill] sm:$0xff] }
 0x98d   : > { %6204 = vrot.lane.b32.xlu1 %v6135_v33, %s10077_s28  ;;  %v17414_v33 = vld [vmem:[#allocation208_spill] sm:$0xff]  ;;  %v5351_v2 = vadd.f32 %v17417_v0, %v4711_v16  ;;  %v17421_v24 = vld [vmem:[#allocation78_spill] sm:$0xff] }
 0x98e   : > { %v3436_v40 = vadd.f32 %v17414_v33, %v2796_v62  ;;  %v2780_v34 = vmul.f32 %v17407_v30, %v17421_v24  ;;  %v17422_v62 = vld [vmem:[#allocation123_spill] sm:$0xff]  ;;  %v17428_v0 = vld [vmem:[#allocation390_spill] sm:$0xff] }
 0x98f   : > { %6214 = vrot.lane.b32.xlu0 %v6140_v42, %s10077_s28  ;;  %v6796_v42 = vmul.f32 %v15034_v51, %v14794_v45  ;;  %v5991_v45 = vadd.f32 %v17420_v52, %v5351_v2  ;;  %v6780_v51 = vmul.f32 %v17407_v30, %v14964_v56  ;;  %v17427_v30 = vld [vmem:[#allocation156_spill] sm:$0xff] }
 0x990   : > { %v7171_v31 = vpop.permute.xlu1 %7170  ;;  %v4076_v23 = vadd.f32 %v17416_v11, %v3436_v40  ;;  %v15145_v40 = vld [vmem:[#allocation2 + $0xb8] sm:$0xff] }
 0x991   : > { %v7258_v48 = vadd.f32 %v7171_v31, %v6618_v38  ;;  %7320 = vrot.lane.b32.xlu1 %v7253_v19, %s10080_s16  ;;  %v6775_v38 = vmul.f32 %v14533_v35, %v14741_v54  ;;  %v17418_v31 = vld [vmem:[#allocation67_spill] sm:$0xff]  ;;  %v15141_v54 = vpop.permute.xlu0 %6230  ;;  %17424 = vst [vmem:[#allocation402_spill] sm:$0xff] %v15145_v40  ;;  %v6631_v16 = vadd.f32 %v14841_v15, %v5991_v45  ;;  %v17432_v45 = vld [vmem:[#allocation421_spill] sm:$0xff] }
 0x992   : > { %v2775_v58 = vmul.f32 %v14533_v35, %v17418_v31  ;;  %v17425_v35 = vld [vmem:[#allocation417_spill] sm:$0xff] }
 0x993   : > { %7330 = vrot.lane.b32.xlu0 %v7258_v48, %s10080_s16  ;;  %v4716_v48 = vadd.f32 %v17419_v61, %v4076_v23  ;;  %v6153_v6 = vmul.f32 %v15145_v40, %v17425_v35  ;;  %v3420_v23 = vadd.f32 %v17427_v30, %v2780_v34  ;;  %v17435_v35 = vld [vmem:[#allocation315_spill] sm:$0xff] }
 0x994   : > { %v15118_v20 = vpop.permute.xlu1 %7172  ;;  %v3415_v22 = vadd.f32 %v17422_v62, %v2775_v58  ;;  %v17430_v58 = vld [vmem:[#allocation23_spill] sm:$0xff]  ;;  %v17433_v62 = vld [vmem:[#allocation30_spill] sm:$0xff] }
 0x995   : > { %6876 = vrot.lane.b32.xlu1 %v6791_v36, %s10078_s13  ;;  %v17423_v36 = vld [vmem:[#allocation331_spill] sm:$0xff]  ;;  %v15164_v24 = vpop.permute.xlu0 %7346 }
 0x996   : > { %v5356_v33 = vadd.f32 %v17423_v36, %v4716_v48  ;;  %v17431_v48 = vld [vmem:[#allocation175_spill] sm:$0xff]  ;;  %v17434_v36 = vld [vmem:[#allocation310_spill] sm:$0xff] }
 0x997   : > { %6886 = vrot.lane.b32.xlu0 %v6796_v42, %s10078_s13  ;;  %v17426_v42 = vld [vmem:[#allocation172_spill] sm:$0xff]  ;;  %v4060_v52 = vadd.f32 %v17431_v48, %v3420_v23  ;;  %v17441_v48 = vld [vmem:[#allocation85_spill] sm:$0xff] }
 0x998   : > { %v15130_v19 = vpop.permute.xlu1 %6063  ;;  %v4055_v11 = vadd.f32 %v17426_v42, %v3415_v22  ;;  %v5996_v2 = vadd.f32 %v17428_v0, %v5356_v33  ;;  %v17436_v42 = vld [vmem:[#allocation367_spill] sm:$0xff]  ;;  %v17438_v23 = vld [vmem:[#allocation372_spill] sm:$0xff] }
 0x999   : > { %6844 = vrot.lane.b32.xlu1 %v6775_v38, %s10078_s13  ;;  %v17429_v38 = vld [vmem:[#allocation425_spill] sm:$0xff]  ;;  %v4700_v22 = vadd.f32 %v17433_v62, %v4060_v52  ;;  %v2793_v52 = vmul.f32 %v15145_v40, %v17441_v48  ;;  %v17450_v48 = vld [vmem:[#allocation186_spill] sm:$0xff] }
 0x99a   : > { %v6158_v31 = vmul.f32 %v17429_v38, %v14985_v3  ;;  %v4695_v61 = vadd.f32 %v17430_v58, %v4055_v11  ;;  %v6636_v15 = vadd.f32 %v14833_v63, %v5996_v2  ;;  %v17439_v2 = vld [vmem:[#allocation429_spill] sm:$0xff] }
 0x99b   : > { %6854 = vrot.lane.b32.xlu0 %v6780_v51, %s10078_s13  ;;  %v7271_v51 = vadd.f32 %v17432_v45, %v6631_v16  ;;  %v17437_v16 = vld [vmem:[#allocation427_spill] sm:$0xff] }
 0x99c   : > { %v15151_v56 = vpop.permute.xlu1 %6568  ;;  %v5335_v3 = vadd.f32 %v17434_v36, %v4695_v61  ;;  %v7276_v33 = vadd.f32 %v14886_v25, %v6636_v15  ;;  %v6137_v11 = vmul.f32 %v17437_v16, %v14739_v41  ;;  %v15184_v61 = vpop.permute.xlu0 %6198 }
 0x99d   : > { %6240 = vrot.lane.b32.xlu1 %v6153_v6, %s10077_s28  ;;  %v5340_v6 = vadd.f32 %v17435_v35, %v4700_v22  ;;  %v17445_v35 = vld [vmem:[#allocation135_spill] sm:$0xff] }
 0x99e   : > { %v5975_v63 = vadd.f32 %v17436_v42, %v5335_v3  ;;  %v17444_v3 = vld [vmem:[#allocation96_spill] sm:$0xff] }
 0x99f   : > { %6250 = vrot.lane.b32.xlu0 %v6158_v31, %s10077_s28  ;;  %v5980_v0 = vadd.f32 %v17438_v23, %v5340_v6  ;;  %v17440_v31 = vld [vmem:[#allocation424_spill] sm:$0xff]  ;;  %v6798_v23 = vmul.f32 %v17429_v38, %v14815_v17 }
 0x9a0   : > { %v15166_v34 = vpop.permute.xlu1 %6536  ;;  %v6142_v58 = vmul.f32 %v17440_v31, %v17439_v2  ;;  %v6615_v25 = vadd.f32 %v14853_v14, %v5975_v63  ;;  %v17443_v14 = vld [vmem:[#allocation203_spill] sm:$0xff]  ;;  %v17446_v42 = vld [vmem:[#allocation232_spill] sm:$0xff] }
 0x9a1   : > { %7356 = vrot.lane.b32.xlu1 %v7271_v51, %s10080_s16  ;;  %v6620_v41 = vadd.f32 %v14843_v27, %v5980_v0  ;;  %v17442_v51 = vld [vmem:[#allocation201_spill] sm:$0xff]  ;;  %v6793_v27 = vmul.f32 %v15145_v40, %v17445_v35  ;;  %v17448_v0 = vld [vmem:[#allocation234_spill] sm:$0xff]  ;;  %v17455_v35 = vld [vmem:[#allocation124_spill] sm:$0xff] }
 0x9a2   : > { %v7255_v15 = vadd.f32 %v14912_v44, %v6615_v25  ;;  %v3433_v62 = vadd.f32 %v17442_v51, %v2793_v52  ;;  %v15202_v44 = vpop.permute.xlu0 %7314  ;;  %v6777_v52 = vmul.f32 %v17437_v16, %v17450_v48 }
 0x9a3   : > { %7366 = vrot.lane.b32.xlu0 %v7276_v33, %s10080_s16  ;;  %v7260_v22 = vadd.f32 %v14900_v37, %v6620_v41  ;;  %v2798_v33 = vmul.f32 %v17429_v38, %v17444_v3  ;;  %v6782_v38 = vmul.f32 %v17440_v31, %v15072_v13  ;;  %v17459_v13 = vld [vmem:[#allocation151_spill] sm:$0xff] }
 0x9a4   : > { %v15177_v30 = vpop.permute.xlu1 %6767  ;;  %v4073_v36 = vadd.f32 %v17443_v14, %v3433_v62  ;;  %v17452_v62 = vld [vmem:[#allocation259_spill] sm:$0xff]  ;;  %v17453_v14 = vld [vmem:[#allocation386_spill] sm:$0xff] }
 0x9a5   : > { %6208 = vrot.lane.b32.xlu1 %v6137_v11, %s10077_s28  ;;  %v3438_v63 = vadd.f32 %v17446_v42, %v2798_v33  ;;  %v17447_v11 = vld [vmem:[#allocation252_spill] sm:$0xff]  ;;  %v17456_v42 = vld [vmem:[#allocation333_spill] sm:$0xff] }
 0x9a6   : > { %v4713_v37 = vadd.f32 %v17447_v11, %v4073_v36  ;;  %v17454_v36 = vld [vmem:[#allocation80_spill] sm:$0xff]  ;;  %v15227_v33 = vpop.permute.xlu0 %6870  ;;  %v17457_v11 = vld [vmem:[#allocation419_spill] sm:$0xff] }
 0x9a7   : > { %6218 = vrot.lane.b32.xlu0 %v6142_v58, %s10077_s28  ;;  %v4078_v2 = vadd.f32 %v17448_v0, %v3438_v63  ;;  %v17449_v58 = vld [vmem:[#allocation328_spill] sm:$0xff]  ;;  %v2782_v3 = vmul.f32 %v17440_v31, %v17454_v36 }
 0x9a8   : > { %v15191_v45 = vpop.permute.xlu1 %5932  ;;  %v5353_v25 = vadd.f32 %v17449_v58, %v4713_v37  ;;  %v17460_v58 = vld [vmem:[#allocation117_spill] sm:$0xff]  ;;  %v17461_v31 = vld [vmem:[#allocation392_spill] sm:$0xff] }
 0x9a9   : > { %7324 = vrot.lane.b32.xlu1 %v7255_v15, %s10080_s16  ;;  %v17451_v15 = vld [vmem:[#allocation69_spill] sm:$0xff] }
 0x9aa   : > { %v2777_v51 = vmul.f32 %v17437_v16, %v17451_v15  ;;  %v5993_v17 = vadd.f32 %v17453_v14, %v5353_v25  ;;  %v17458_v16 = vld [vmem:[#allocation401_spill] sm:$0xff]  ;;  %v3422_v25 = vadd.f32 %v17460_v58, %v2782_v3  ;;  %v15248_v36 = vpop.permute.xlu0 %6838 }
 0x9ab   : > { %7334 = vrot.lane.b32.xlu0 %v7260_v22, %s10080_s16  ;;  %v4718_v22 = vadd.f32 %v17452_v62, %v4078_v2  ;;  %v6155_v37 = vmul.f32 %v17458_v16, %v17457_v11  ;;  %v17468_v11 = vld [vmem:[#allocation317_spill] sm:$0xff] }
 0x9ac   : > { %v15204_v6 = vpop.permute.xlu1 %6703 }
 0x9ad   : > { %6880 = vrot.lane.b32.xlu1 %v6793_v27, %s10078_s13  ;;  %v3417_v27 = vadd.f32 %v17455_v35, %v2777_v51  ;;  %v5358_v63 = vadd.f32 %v17456_v42, %v4718_v22  ;;  %v17463_v51 = vld [vmem:[#allocation100_spill] sm:$0xff]  ;;  %v17464_v22 = vld [vmem:[#allocation182_spill] sm:$0xff] }
 0x9ae   : > { %v4062_v14 = vadd.f32 %v17464_v22, %v3422_v25  ;;  %v17466_v35 = vld [vmem:[#allocation166_spill] sm:$0xff]  ;;  %v17467_v42 = vld [vmem:[#allocation312_spill] sm:$0xff]  ;;  %v17474_v22 = vld [vmem:[#allocation87_spill] sm:$0xff] }
 0x9af   : > { %6890 = vrot.lane.b32.xlu0 %v6798_v23, %s10078_s13  ;;  %v6633_v23 = vadd.f32 %v14932_v59, %v5993_v17  ;;  %v4057_v2 = vadd.f32 %v17459_v13, %v3417_v27  ;;  %v5998_v48 = vadd.f32 %v17461_v31, %v5358_v63  ;;  %v17465_v17 = vld [vmem:[#allocation426_spill] sm:$0xff]  ;;  %v17469_v13 = vld [vmem:[#allocation369_spill] sm:$0xff] }
 0x9b0   : > { %v15216_v41 = vpop.permute.xlu1 %7208  ;;  %v4702_v27 = vadd.f32 %v17466_v35, %v4062_v14  ;;  %v17471_v25 = vld [vmem:[#allocation374_spill] sm:$0xff]  ;;  %v2795_v14 = vmul.f32 %v17458_v16, %v17474_v22  ;;  %v17483_v22 = vld [vmem:[#allocation261_spill] sm:$0xff] }
 0x9b1   : > { %6848 = vrot.lane.b32.xlu1 %v6777_v52, %s10078_s13  ;;  %v17462_v52 = vld [vmem:[#allocation428_spill] sm:$0xff]  ;;  %v4697_v62 = vadd.f32 %v17463_v51, %v4057_v2  ;;  %v6638_v59 = vadd.f32 %v14910_v18, %v5998_v48  ;;  %v17472_v48 = vld [vmem:[#allocation403_spill] sm:$0xff] }
 0x9b2   : > { %v6160_v15 = vmul.f32 %v17462_v52, %v15092_v43 }
 0x9b3   : > { %6858 = vrot.lane.b32.xlu0 %v6782_v38, %s10078_s13  ;;  %v7273_v38 = vadd.f32 %v17465_v17, %v6633_v23  ;;  %v5337_v43 = vadd.f32 %v17467_v42, %v4697_v62  ;;  %v7278_v63 = vadd.f32 %v14955_v5, %v6638_v59  ;;  %v17470_v23 = vld [vmem:[#allocation84_spill] sm:$0xff]  ;;  %v15268_v62 = vpop.permute.xlu0 %6234  ;;  %v17475_v59 = vld [vmem:[#allocation99_spill] sm:$0xff] }
 0x9b4   : > { %v15235_v0 = vpop.permute.xlu1 %7176  ;;  %v6139_v2 = vmul.f32 %v17470_v23, %v14831_v9  ;;  %v2800_v9 = vmul.f32 %v17462_v52, %v17475_v59  ;;  %v17477_v42 = vld [vmem:[#allocation228_spill] sm:$0xff]  ;;  %v17484_v59 = vld [vmem:[#allocation142_spill] sm:$0xff] }
 0x9b5   : > { %6244 = vrot.lane.b32.xlu1 %v6155_v37, %s10077_s28  ;;  %v5342_v37 = vadd.f32 %v17468_v11, %v4702_v27  ;;  %v5977_v18 = vadd.f32 %v17469_v13, %v5337_v43  ;;  %v17476_v27 = vld [vmem:[#allocation225_spill] sm:$0xff]  ;;  %v17478_v11 = vld [vmem:[#allocation82_spill] sm:$0xff]  ;;  %v17479_v13 = vld [vmem:[#allocation227_spill] sm:$0xff] }
 0x9b6   : > { %v3440_v43 = vadd.f32 %v17477_v42, %v2800_v9  ;;  %v6800_v9 = vmul.f32 %v17462_v52, %v17484_v59  ;;  %v17488_v42 = vld [vmem:[#allocation395_spill] sm:$0xff]  ;;  %v17496_v59 = vld [vmem:[#allocation120_spill] sm:$0xff] }
 0x9b7   : > { %6254 = vrot.lane.b32.xlu0 %v6160_v15, %s10077_s28  ;;  %v5982_v31 = vadd.f32 %v17471_v25, %v5342_v37  ;;  %v17473_v15 = vld [vmem:[#allocation430_spill] sm:$0xff]  ;;  %v6617_v5 = vadd.f32 %v14944_v57, %v5977_v18  ;;  %v3435_v57 = vadd.f32 %v17476_v27, %v2795_v14  ;;  %v15290_v25 = vpop.permute.xlu0 %7350  ;;  %v17487_v27 = vld [vmem:[#allocation335_spill] sm:$0xff] }
 0x9b8   : > { %v15250_v3 = vpop.permute.xlu1 %6572  ;;  %v6144_v51 = vmul.f32 %v17473_v15, %v17472_v48  ;;  %v2784_v37 = vmul.f32 %v17473_v15, %v17478_v11  ;;  %v17481_v48 = vld [vmem:[#allocation173_spill] sm:$0xff] }
 0x9b9   : > { %7360 = vrot.lane.b32.xlu1 %v7273_v38, %s10080_s16  ;;  %v6622_v17 = vadd.f32 %v14927_v49, %v5982_v31  ;;  %v7257_v38 = vadd.f32 %v15009_v7, %v6617_v5  ;;  %v4075_v18 = vadd.f32 %v17479_v13, %v3435_v57  ;;  %v17480_v49 = vld [vmem:[#allocation230_spill] sm:$0xff]  ;;  %v6795_v7 = vmul.f32 %v17458_v16, %v14862_v28 }
 0x9ba   : > { %v17486_v28 = vld [vmem:[#allocation330_spill] sm:$0xff] }
 0x9bb   : > { %7370 = vrot.lane.b32.xlu0 %v7278_v63, %s10080_s16  ;;  %v7262_v63 = vadd.f32 %v14975_v10, %v6622_v17  ;;  %v3424_v10 = vadd.f32 %v17481_v48, %v2784_v37  ;;  %v17485_v17 = vld [vmem:[#allocation181_spill] sm:$0xff]  ;;  %v17490_v13 = vld [vmem:[#allocation130_spill] sm:$0xff] }
 0x9bc   : > { %v15261_v58 = vpop.permute.xlu1 %6540 }
 0x9bd   : > { %6212 = vrot.lane.b32.xlu1 %v6139_v2, %s10077_s28  ;;  %v4080_v2 = vadd.f32 %v17480_v49, %v3440_v43  ;;  %v6779_v43 = vmul.f32 %v17470_v23, %v17488_v42  ;;  %v17499_v42 = vld [vmem:[#allocation21_spill] sm:$0xff] }
 0x9bf   : > { %6222 = vrot.lane.b32.xlu0 %v6144_v51, %s10077_s28  ;;  %v17482_v51 = vld [vmem:[#allocation254_spill] sm:$0xff]  ;;  %v4720_v14 = vadd.f32 %v17483_v22, %v4080_v2  ;;  %v17492_v2 = vld [vmem:[#allocation104_spill] sm:$0xff]  ;;  %v17494_v22 = vld [vmem:[#allocation319_spill] sm:$0xff] }
 0x9c0   : > { %v15277_v35 = vpop.permute.xlu1 %5936  ;;  %v4715_v5 = vadd.f32 %v17482_v51, %v4075_v18  ;;  %v17491_v18 = vld [vmem:[#allocation389_spill] sm:$0xff] }
 0x9c1   : > { %7328 = vrot.lane.b32.xlu1 %v7257_v38, %s10080_s16  ;;  %v4064_v38 = vadd.f32 %v17485_v17, %v3424_v10  ;;  %v5360_v57 = vadd.f32 %v17487_v27, %v4720_v14  ;;  %v17493_v10 = vld [vmem:[#allocation125_spill] sm:$0xff] }
 0x9c2   : > { %v5355_v16 = vadd.f32 %v17486_v28, %v4715_v5  ;;  %v15317_v5 = vpop.permute.xlu0 %6202 }
 0x9c3   : > { %7338 = vrot.lane.b32.xlu0 %v7262_v63, %s10080_s16  ;;  %v17489_v63 = vld [vmem:[#allocation71_spill] sm:$0xff]  ;;  %v4704_v52 = vadd.f32 %v17490_v13, %v4064_v38  ;;  %v6000_v48 = vadd.f32 %v14942_v32, %v5360_v57 }
 0x9c4   : > { %v15292_v31 = vpop.permute.xlu1 %7212  ;;  %v2779_v11 = vmul.f32 %v17470_v23, %v17489_v63  ;;  %v5995_v49 = vadd.f32 %v17491_v18, %v5355_v16  ;;  %v17495_v23 = vld [vmem:[#allocation422_spill] sm:$0xff]  ;;  %v17497_v32 = vld [vmem:[#allocation103_spill] sm:$0xff]  ;;  %v17498_v16 = vld [vmem:[#allocation376_spill] sm:$0xff] }
 0x9c5   : > { %6884 = vrot.lane.b32.xlu1 %v6795_v7, %s10078_s13  ;;  %v6784_v7 = vmul.f32 %v17473_v15, %v17492_v2  ;;  %v5344_v14 = vadd.f32 %v17494_v22, %v4704_v52  ;;  %v6640_v17 = vadd.f32 %v14994_v26, %v6000_v48  ;;  %v17501_v52 = vld [vmem:[#allocation314_spill] sm:$0xff] }
 0x9c6   : > { %v3419_v51 = vadd.f32 %v17493_v10, %v2779_v11  ;;  %v6635_v38 = vadd.f32 %v15031_v39, %v5995_v49  ;;  %v17500_v11 = vld [vmem:[#allocation388_spill] sm:$0xff]  ;;  %v15335_v39 = vpop.permute.xlu0 %7318 }
 0x9c7   : > { %6894 = vrot.lane.b32.xlu0 %v6800_v9, %s10078_s13  ;;  %v6157_v9 = vmul.f32 %v17496_v59, %v17495_v23  ;;  %v5984_v27 = vadd.f32 %v17498_v16, %v5344_v14  ;;  %v7280_v57 = vadd.f32 %v15025_v21, %v6640_v17  ;;  %v17502_v21 = vld [vmem:[#allocation371_spill] sm:$0xff]  ;;  %v17504_v14 = vld [vmem:[#allocation89_spill] sm:$0xff] }
 0x9c8   : > { %v15308_v37 = vpop.permute.xlu1 %7180  ;;  %v4059_v28 = vadd.f32 %v17497_v32, %v3419_v51  ;;  %v7275_v26 = vadd.f32 %v17500_v11, %v6635_v38  ;;  %v2797_v23 = vmul.f32 %v17496_v59, %v17504_v14  ;;  %v17506_v17 = vld [vmem:[#allocation393_spill] sm:$0xff] }
 0x9c9   : > { %6852 = vrot.lane.b32.xlu1 %v6779_v43, %s10078_s13  ;;  %v6624_v63 = vadd.f32 %v15007_v8, %v5984_v27  ;;  %v6797_v38 = vmul.f32 %v17496_v59, %v17506_v17  ;;  %v17518_v17 = vld [vmem:[#allocation391_spill] sm:$0xff] }
 0x9ca   : > { %v4699_v43 = vadd.f32 %v17499_v42, %v4059_v28  ;;  %v15350_v51 = vpop.permute.xlu0 %6874  ;;  %v17507_v28 = vld [vmem:[#allocation223_spill] sm:$0xff] }
 0x9cb   : > { %6862 = vrot.lane.b32.xlu0 %v6784_v7, %s10078_s13  ;;  %v7264_v49 = vadd.f32 %v15045_v1, %v6624_v63  ;;  %v17503_v7 = vld [vmem:[#allocation61_spill] sm:$0xff] }
 0x9cc   : > { %v15325_v15 = vpop.permute.xlu1 %6576  ;;  %v5339_v18 = vadd.f32 %v17501_v52, %v4699_v43  ;;  %v6141_v48 = vmul.f32 %v17503_v7, %v14922_v29  ;;  %v17505_v29 = vld [vmem:[#allocation221_spill] sm:$0xff] }
 0x9cd   : > { %6248 = vrot.lane.b32.xlu1 %v6157_v9, %s10077_s28  ;;  %v3437_v9 = vadd.f32 %v17505_v29, %v2797_v23  ;;  %v17510_v43 = vld [vmem:[#allocation73_spill] sm:$0xff]  ;;  %v17516_v23 = vld [vmem:[#allocation32_spill] sm:$0xff] }
 0x9ce   : > { %v5979_v2 = vadd.f32 %v17502_v21, %v5339_v18  ;;  %v15361_v32 = vpop.permute.xlu0 %6842  ;;  %v2781_v63 = vmul.f32 %v17503_v7, %v17510_v43  ;;  %v17511_v52 = vld [vmem:[#allocation45_spill] sm:$0xff]  ;;  %v9952_v18 = vld [vmem:[#allocation2 + $0x88] sm:$0xff]  ;;  %v17521_v43 = vld [vmem:[#allocation16_spill] sm:$0xff] }
 0x9cf   : > { %7374 = vrot.lane.b32.xlu0 %v7280_v57, %s10080_s16  ;;  %v4077_v16 = vadd.f32 %v17507_v28, %v3437_v9  ;;  %v17509_v57 = vld [vmem:[#allocation321_spill] sm:$0xff]  ;;  %v17517_v9 = vld [vmem:[#allocation188_spill] sm:$0xff]  ;;  %v17519_v28 = vld [vmem:[#allocation394_spill] sm:$0xff] }
 0x9d0   : > { %v15337_v13 = vpop.permute.xlu1 %6544  ;;  %v6619_v10 = vadd.f32 %v15047_v53, %v5979_v2  ;;  %v6781_v42 = vmul.f32 %v17503_v7, %v17509_v57  ;;  %v17513_v2 = vld [vmem:[#allocation332_spill] sm:$0xff] }
 0x9d1   : > { %7364 = vrot.lane.b32.xlu1 %v7275_v26, %s10080_s16  ;;  %v9951_v26 = vld [vmem:[#allocation2 + $0x80] sm:$0xff] }
 0x9d2   : > { %v7259_v22 = vadd.f32 %v15118_v20, %v6619_v10  ;;  %v17508_v20 = vld [vmem:[#allocation256_spill] sm:$0xff]  ;;  %v2626_v59 = vmul.f32 %v9951_v26, %v17511_v52  ;;  %v17514_v10 = vld [vmem:[#allocation127_spill] sm:$0xff]  ;;  %v15377_v14 = vpop.permute.xlu0 %6238 }
 0x9d3   : > { %7342 = vrot.lane.b32.xlu0 %v7264_v49, %s10080_s16  ;;  %v4717_v27 = vadd.f32 %v17508_v20, %v4077_v16  ;;  %v17512_v49 = vld [vmem:[#allocation54_spill] sm:$0xff]  ;;  %17515 = vst [vmem:[#allocation86_spill] sm:$0xff] %v15377_v14  ;;  %v17520_v16 = vld [vmem:[#allocation141_spill] sm:$0xff]  ;;  %v17522_v52 = vld [vmem:[#allocation168_spill] sm:$0xff] }
 0x9d4   : > { %v15346_v8 = vpop.permute.xlu1 %7216  ;;  %v2627_v21 = vmul.f32 %v9952_v18, %v17512_v49  ;;  %v3106_v29 = vadd.f32 %v17516_v23, %v2626_v59  ;;  %v6159_v20 = vmul.f32 %v17520_v16, %v17519_v28  ;;  %v17523_v18 = vld [vmem:[#allocation189_spill] sm:$0xff]  ;;  %v17524_v59 = vld [vmem:[#allocation34_spill] sm:$0xff]  ;;  %v17531_v14 = vld [vmem:[#allocation316_spill] sm:$0xff] }
 0x9d5   : > { %6216 = vrot.lane.b32.xlu1 %v6141_v48, %s10077_s28  ;;  %v5357_v48 = vadd.f32 %v17513_v2, %v4717_v27  ;;  %v17525_v2 = vld [vmem:[#allocation180_spill] sm:$0xff] }
 0x9d6   : > { %v3107_v7 = vadd.f32 %v17517_v9, %v2627_v21  ;;  %v3746_v27 = vadd.f32 %v17522_v52, %v3106_v29  ;;  %v15389_v49 = vpop.permute.xlu0 %7354  ;;  %v9954_v29 = vld [vmem:[#allocation2 + $0x8] sm:$0xff] }
 0x9d8   : > { %v15353_v1 = vpop.permute.xlu1 %7184 }
 0x9d9   : > { %7332 = vrot.lane.b32.xlu1 %v7259_v22, %s10080_s16  ;;  %v3421_v22 = vadd.f32 %v17514_v10, %v2781_v63  ;;  %v17526_v10 = vld [vmem:[#allocation138_spill] sm:$0xff] }
 0x9db   : > { %v4061_v26 = vadd.f32 %v17521_v43, %v3421_v22  ;;  %v17527_v22 = vld [vmem:[#allocation38_spill] sm:$0xff]  ;;  %v17528_v43 = vld [vmem:[#allocation29_spill] sm:$0xff] }
 0x9dc   : > { %v6229_v53 = vpop.permute.xlu1 %6228 }
 0x9dd   : > { %6888 = vrot.lane.b32.xlu1 %v6797_v38, %s10078_s13  ;;  %v5997_v38 = vadd.f32 %v17518_v17, %v5357_v48  ;;  %v4701_v21 = vadd.f32 %v17524_v59, %v4061_v26  ;;  %v4386_v48 = vadd.f32 %v17525_v2, %v3746_v27  ;;  %v9953_v17 = vld [vmem:[#allocation2] sm:$0xff]  ;;  %v17532_v26 = vld [vmem:[#allocation105_spill] sm:$0xff]  ;;  %v17535_v2 = vld [vmem:[#allocation347_spill] sm:$0xff] }
 0x9de   : > { %v2610_v28 = vmul.f32 %v9953_v17, %v17527_v22  ;;  %v17536_v17 = vld [vmem:[#allocation373_spill] sm:$0xff] }
 0x9df   : > { %v6637_v63 = vadd.f32 %v15151_v56, %v5997_v38  ;;  %v17529_v56 = vld [vmem:[#allocation289_spill] sm:$0xff]  ;;  %v5341_v40 = vadd.f32 %v17531_v14, %v4701_v21  ;;  %v17539_v21 = vld [vmem:[#allocation7_spill] sm:$0xff] }
 0x9e0   : > { %v15370_v11 = vpop.permute.xlu1 %6196  ;;  %v5026_v38 = vadd.f32 %v17529_v56, %v4386_v48  ;;  %v3090_v27 = vadd.f32 %v17532_v26, %v2610_v28  ;;  %v17538_v48 = vld [vmem:[#allocation95_spill] sm:$0xff] }
 0x9e1   : > { %6856 = vrot.lane.b32.xlu1 %v6781_v42, %s10078_s13  ;;  %v3747_v42 = vadd.f32 %v17523_v18, %v3107_v7  ;;  %v7277_v9 = vadd.f32 %v15216_v41, %v6637_v63  ;;  %v2611_v7 = vmul.f32 %v9954_v29, %v17528_v43  ;;  %v17534_v41 = vld [vmem:[#allocation346_spill] sm:$0xff]  ;;  %v5981_v22 = vadd.f32 %v17536_v17, %v5341_v40  ;;  %v17537_v29 = vld [vmem:[#allocation269_spill] sm:$0xff] }
 0x9e2   : > { %v5666_v63 = vadd.f32 %v17534_v41, %v5026_v38  ;;  %v6143_v43 = vmul.f32 %v17537_v29, %v15019_v50  ;;  %v3730_v56 = vadd.f32 %v17538_v48, %v3090_v27  ;;  %v17542_v41 = vld [vmem:[#allocation91_spill] sm:$0xff]  ;;  %v17543_v17 = vld [vmem:[#allocation273_spill] sm:$0xff] }
 0x9e3   : > { %v4387_v23 = vadd.f32 %v17526_v10, %v3747_v42  ;;  %v17533_v42 = vld [vmem:[#allocation112_spill] sm:$0xff] }
 0x9e4   : > { %v6869_v57 = vpop.permute.xlu1 %6868  ;;  %v3091_v59 = vadd.f32 %v17533_v42, %v2611_v7  ;;  %v6306_v28 = vadd.f32 %v15065_v47, %v5666_v63  ;;  %v6621_v7 = vadd.f32 %v15166_v34, %v5981_v22  ;;  %v17544_v63 = vld [vmem:[#allocation274_spill] sm:$0xff]  ;;  %v17545_v22 = vld [vmem:[#allocation245_spill] sm:$0xff] }
 0x9e5   : > { %6252 = vrot.lane.b32.xlu1 %v6159_v20, %s10077_s28  ;;  %v17530_v20 = vld [vmem:[#allocation290_spill] sm:$0xff] }
 0x9e6   : > { %v5027_v18 = vadd.f32 %v17530_v20, %v4387_v23  ;;  %v15409_v23 = vpop.permute.xlu0 %6206  ;;  %v17540_v20 = vld [vmem:[#allocation146_spill] sm:$0xff]  ;;  %v6946_v50 = vadd.f32 %v15099_v4, %v6306_v28  ;;  %v7261_v27 = vadd.f32 %v15235_v0, %v6621_v7  ;;  %v17546_v4 = vld [vmem:[#allocation264_spill] sm:$0xff]  ;;  %v17548_v7 = vld [vmem:[#allocation247_spill] sm:$0xff] }
 0x9e7   : > { %v4370_v40 = vadd.f32 %v17540_v20, %v3730_v56 }
 0x9e8   : > { %v6837_v52 = vpop.permute.xlu1 %6836  ;;  %v5667_v10 = vadd.f32 %v17535_v2, %v5027_v18  ;;  %v17541_v18 = vld [vmem:[#allocation148_spill] sm:$0xff]  ;;  %v2799_v2 = vmul.f32 %v17520_v16, %v17542_v41 }
 0x9e9   : > { %7368 = vrot.lane.b32.xlu1 %v7277_v9, %s10080_s16  ;;  %v3731_v9 = vadd.f32 %v17539_v21, %v3091_v59  ;;  %v5010_v47 = vadd.f32 %v17543_v17, %v4370_v40  ;;  %v6799_v21 = vmul.f32 %v17520_v16, %v15056_v12  ;;  %v17549_v40 = vld [vmem:[#allocation258_spill] sm:$0xff]  ;;  %v17551_v16 = vld [vmem:[#allocation75_spill] sm:$0xff]  ;;  %v9955_v41 = vld [vmem:[#allocation2 + $0x90] sm:$0xff] }
 0x9ea   : > { %v6307_v38 = vadd.f32 %v6229_v53, %v5667_v10  ;;  %v7426_v53 = vadd.f32 %v15164_v24, %v6946_v50  ;;  %v15428_v48 = vpop.permute.xlu0 %7322  ;;  %v9956_v17 = vld [vmem:[#allocation2 + $0x98] sm:$0xff] }
 0x9eb   : > { %v4371_v26 = vadd.f32 %v17541_v18, %v3731_v9  ;;  %v5650_v0 = vadd.f32 %v17546_v4, %v5010_v47  ;;  %v17553_v47 = vld [vmem:[#allocation56_spill] sm:$0xff]  ;;  %v17557_v4 = vld [vmem:[#allocation187_spill] sm:$0xff] }
 0x9ec   : > { %v15411_v14 = vpop.permute.xlu1 %6232  ;;  %v6947_v42 = vadd.f32 %v6869_v57, %v6307_v38  ;;  %v17547_v57 = vld [vmem:[#allocation272_spill] sm:$0xff] }
 0x9ed   : > { %6220 = vrot.lane.b32.xlu1 %v6143_v43, %s10077_s28  ;;  %v5011_v34 = vadd.f32 %v17544_v63, %v4371_v26  ;;  %v3439_v43 = vadd.f32 %v17545_v22, %v2799_v2  ;;  %v6290_v24 = vadd.f32 %v15082_v46, %v5650_v0  ;;  %v17550_v26 = vld [vmem:[#allocation378_spill] sm:$0xff]  ;;  %v17552_v2 = vld [vmem:[#allocation47_spill] sm:$0xff]  ;;  %v2629_v63 = vmul.f32 %v9956_v17, %v17553_v47 }
 0x9ee   : > { %v6783_v50 = vmul.f32 %v17537_v29, %v17550_v26  ;;  %v15447_v46 = vpop.permute.xlu0 %6878  ;;  %v17566_v17 = vld [vmem:[#allocation31_spill] sm:$0xff] }
 0x9ef   : > { %v5651_v56 = vadd.f32 %v17547_v57, %v5011_v34  ;;  %v4079_v38 = vadd.f32 %v17548_v7, %v3439_v43  ;;  %v17554_v34 = vld [vmem:[#allocation334_spill] sm:$0xff]  ;;  %v17556_v43 = vld [vmem:[#allocation163_spill] sm:$0xff]  ;;  %v3109_v0 = vadd.f32 %v17557_v4, %v2629_v63  ;;  %v9958_v63 = vld [vmem:[#allocation2 + $0x18] sm:$0xff] }
 0x9f0   : > { %v7349_v59 = vpop.permute.xlu1 %7348  ;;  %v17558_v57 = vld [vmem:[#allocation399_spill] sm:$0xff]  ;;  %v17571_v4 = vld [vmem:[#allocation25_spill] sm:$0xff] }
 0x9f1   : > { %v7427_v10 = vadd.f32 %v7349_v59, %v6947_v42  ;;  %7336 = vrot.lane.b32.xlu1 %v7261_v27, %s10080_s16  ;;  %v6291_v20 = vadd.f32 %v15370_v11, %v5651_v56  ;;  %v4719_v18 = vadd.f32 %v17549_v40, %v4079_v38  ;;  %v6930_v27 = vadd.f32 %v15116_v60, %v6290_v24  ;;  %v17555_v60 = vld [vmem:[#allocation20_spill] sm:$0xff]  ;;  %v17559_v56 = vld [vmem:[#allocation305_spill] sm:$0xff] }
 0x9f2   : > { %v2783_v42 = vmul.f32 %v17537_v29, %v17551_v16  ;;  %v2628_v59 = vmul.f32 %v9955_v41, %v17552_v2  ;;  %v17560_v38 = vld [vmem:[#allocation165_spill] sm:$0xff] }
 0x9f3   : > { %v7482_v9 = vpack.c.bf16 %v7427_v10, %v7426_v53  ;;  %v6931_v12 = vadd.f32 %v6837_v52, %v6291_v20  ;;  %v5359_v53 = vadd.f32 %v17554_v34, %v4719_v18  ;;  %v7410_v10 = vadd.f32 %v15202_v44, %v6930_v27  ;;  %v17561_v40 = vld [vmem:[#allocation13_spill] sm:$0xff]  ;;  %v15464_v27 = vpop.permute.xlu0 %6846  ;;  %v17567_v34 = vld [vmem:[#allocation40_spill] sm:$0xff] }
 0x9f4   : > { %v15434_v28 = vpop.permute.xlu1 %6200  ;;  %v3423_v52 = vadd.f32 %v17555_v60, %v2783_v42  ;;  %v3108_v29 = vadd.f32 %v17556_v43, %v2628_v59  ;;  %v17562_v18 = vld [vmem:[#allocation133_spill] sm:$0xff]  ;;  %v17564_v42 = vld [vmem:[#allocation170_spill] sm:$0xff]  ;;  %v17569_v60 = vld [vmem:[#allocation292_spill] sm:$0xff] }
 0x9f5   : > { %6892 = vrot.lane.b32.xlu1 %v6799_v21, %s10078_s13  ;;  %8888 = vmatprep.subr.bf16.mxu0 %v7482_v9  ;;  %v6161_v21 = vmul.f32 %v17559_v56, %v17558_v57  ;;  %v5999_v9 = vadd.f32 %v15191_v45, %v5359_v53  ;;  %v3749_v26 = vadd.f32 %v17562_v18, %v3109_v0  ;;  %v17565_v45 = vld [vmem:[#allocation140_spill] sm:$0xff]  ;;  %v17570_v43 = vld [vmem:[#allocation318_spill] sm:$0xff]  ;;  %v17572_v57 = vld [vmem:[#allocation101_spill] sm:$0xff] }
 0x9f6   : > { %v4063_v24 = vadd.f32 %v17560_v38, %v3423_v52  ;;  %v3748_v44 = vadd.f32 %v17561_v40, %v3108_v29  ;;  %v2613_v53 = vmul.f32 %v9958_v63, %v17567_v34  ;;  %v17581_v63 = vld [vmem:[#allocation241_spill] sm:$0xff] }
 0x9f7   : > { %v4389_v2 = vadd.f32 %v17565_v45, %v3749_v26  ;;  %v17577_v26 = vld [vmem:[#allocation98_spill] sm:$0xff]  ;;  %v17579_v45 = vld [vmem:[#allocation145_spill] sm:$0xff] }
 0x9f8   : > { %v7317_v11 = vpop.permute.xlu1 %7316  ;;  %v4388_v41 = vadd.f32 %v17564_v42, %v3748_v44  ;;  %v17576_v44 = vld [vmem:[#allocation362_spill] sm:$0xff]  ;;  %v15486_v42 = vpop.permute.xlu0 %6242 }
 0x9f9   : > { %v7411_v22 = vadd.f32 %v7317_v11, %v6931_v12  ;;  %6860 = vrot.lane.b32.xlu1 %v6783_v50, %s10078_s13  ;;  %v6639_v50 = vadd.f32 %v15250_v3, %v5999_v9  ;;  %v17563_v12 = vld [vmem:[#allocation176_spill] sm:$0xff]  ;;  %v5029_v52 = vadd.f32 %v17569_v60, %v4389_v2  ;;  %v6145_v18 = vmul.f32 %v17576_v44, %v15130_v19  ;;  %v17580_v19 = vld [vmem:[#allocation102_spill] sm:$0xff] }
 0x9fa   : > { %v4703_v16 = vadd.f32 %v17563_v12, %v4063_v24  ;;  %v9957_v11 = vld [vmem:[#allocation2 + $0x10] sm:$0xff]  ;;  %v17575_v24 = vld [vmem:[#allocation375_spill] sm:$0xff]  ;;  %v17578_v12 = vld [vmem:[#allocation93_spill] sm:$0xff] }
 0x9fb   : > { %v7474_v7 = vpack.c.bf16 %v7411_v22, %v7410_v10  ;;  %v7279_v59 = vadd.f32 %v15292_v31, %v6639_v50  ;;  %v2612_v47 = vmul.f32 %v9957_v11, %v17566_v17  ;;  %v17568_v10 = vld [vmem:[#allocation291_spill] sm:$0xff]  ;;  %v17573_v31 = vld [vmem:[#allocation348_spill] sm:$0xff] }
 0x9fc   : > { %v6873_v20 = vpop.permute.xlu1 %6872  ;;  %v5028_v22 = vadd.f32 %v17568_v10, %v4388_v41  ;;  %v5343_v29 = vadd.f32 %v17570_v43, %v4703_v16  ;;  %v2801_v16 = vmul.f32 %v17559_v56, %v17578_v12  ;;  %v17583_v43 = vld [vmem:[#allocation77_spill] sm:$0xff] }
 0x9fd   : > { %6256 = vrot.lane.b32.xlu1 %v6161_v21, %s10077_s28  ;;  %8889 = vmatpush3.bf16.msra.mxu0 %v7474_v7  ;;  %v3092_v0 = vadd.f32 %v17571_v4, %v2612_v47  ;;  %v3093_v21 = vadd.f32 %v17572_v57, %v2613_v53  ;;  %v17574_v7 = vld [vmem:[#allocation349_spill] sm:$0xff]  ;;  %v17582_v53 = vld [vmem:[#allocation143_spill] sm:$0xff]  ;;  %v15503_v4 = vpop.permute.xlu0 %7358 }
 0x9fe   : > { %v5668_v9 = vadd.f32 %v17573_v31, %v5028_v22  ;;  %v5669_v38 = vadd.f32 %v17574_v7, %v5029_v52  ;;  %v5983_v40 = vadd.f32 %v17575_v24, %v5343_v29  ;;  %v3441_v34 = vadd.f32 %v17581_v63, %v2801_v16  ;;  %v17584_v29 = vld [vmem:[#allocation243_spill] sm:$0xff]  ;;  %v17589_v24 = vld [vmem:[#allocation265_spill] sm:$0xff] }
 0x9ff   : > { %v3732_v50 = vadd.f32 %v17577_v26, %v3092_v0  ;;  %v3733_v2 = vadd.f32 %v17579_v45, %v3093_v21  ;;  %v17585_v0 = vld [vmem:[#allocation275_spill] sm:$0xff]  ;;  %v17586_v21 = vld [vmem:[#allocation276_spill] sm:$0xff]  ;;  %v17591_v16 = vld [vmem:[#allocation129_spill] sm:$0xff] }
 0xa00   : > { %v6841_v3 = vpop.permute.xlu1 %6840  ;;  %v6623_v11 = vadd.f32 %v15261_v58, %v5983_v40  ;;  %v6309_v17 = vadd.f32 %v15411_v14, %v5669_v38  ;;  %v4081_v58 = vadd.f32 %v17584_v29, %v3441_v34 }
 0xa01   : > { %7372 = vrot.lane.b32.xlu1 %v7279_v59, %s10080_s16  ;;  %v6308_v59 = vadd.f32 %v15141_v54, %v5668_v9  ;;  %v4372_v47 = vadd.f32 %v17580_v19, %v3732_v50  ;;  %v4373_v10 = vadd.f32 %v17582_v53, %v3733_v2  ;;  %v2785_v54 = vmul.f32 %v17576_v44, %v17583_v43  ;;  %v17593_v19 = vld [vmem:[#allocation14_spill] sm:$0xff]  ;;  %v15523_v63 = vpop.permute.xlu0 %6210  ;;  %v17596_v43 = vld [vmem:[#allocation320_spill] sm:$0xff] }
 0xa02   : > { %v7263_v60 = vadd.f32 %v15308_v37, %v6623_v11  ;;  %v6949_v52 = vadd.f32 %v6873_v20, %v6309_v17  ;;  %v17588_v20 = vld [vmem:[#allocation260_spill] sm:$0xff]  ;;  %v6801_v50 = vmul.f32 %v17559_v56, %v15177_v30  ;;  %v6785_v56 = vmul.f32 %v17576_v44, %v15204_v6  ;;  %v17597_v6 = vld [vmem:[#allocation195_spill] sm:$0xff] }
 0xa03   : > { %v6948_v22 = vadd.f32 %v15227_v33, %v6308_v59  ;;  %v5012_v57 = vadd.f32 %v17585_v0, %v4372_v47  ;;  %v5013_v31 = vadd.f32 %v17586_v21, %v4373_v10  ;;  %v17587_v33 = vld [vmem:[#allocation164_spill] sm:$0xff]  ;;  %v4721_v38 = vadd.f32 %v17588_v20, %v4081_v58  ;;  %v9959_v10 = vld [vmem:[#allocation2 + $0xa0] sm:$0xff] }
 0xa04   : > { %v15488_v41 = vpop.permute.xlu1 %6236  ;;  %v3425_v37 = vadd.f32 %v17587_v33, %v2785_v54 }
 0xa05   : > { %6224 = vrot.lane.b32.xlu1 %v6145_v18, %s10077_s28  ;;  %v7428_v9 = vadd.f32 %v15290_v25, %v6948_v22  ;;  %v5652_v40 = vadd.f32 %v17589_v24, %v5012_v57  ;;  %v17590_v18 = vld [vmem:[#allocation262_spill] sm:$0xff]  ;;  %v17592_v25 = vld [vmem:[#allocation336_spill] sm:$0xff]  ;;  %v17594_v22 = vld [vmem:[#allocation49_spill] sm:$0xff] }
 0xa06   : > { %v5653_v26 = vadd.f32 %v17590_v18, %v5013_v31  ;;  %v4065_v45 = vadd.f32 %v17591_v16, %v3425_v37  ;;  %v5361_v59 = vadd.f32 %v17592_v25, %v4721_v38  ;;  %v17602_v37 = vld [vmem:[#allocation199_spill] sm:$0xff]  ;;  %v17603_v38 = vld [vmem:[#allocation206_spill] sm:$0xff]  ;;  %v17606_v25 = vld [vmem:[#allocation293_spill] sm:$0xff] }
 0xa07   : > { %v6292_v11 = vadd.f32 %v15184_v61, %v5652_v40  ;;  %v2630_v61 = vmul.f32 %v9959_v10, %v17594_v22  ;;  %v9960_v18 = vld [vmem:[#allocation2 + $0x20] sm:$0xff] }
 0xa08   : > { %v7353_v14 = vpop.permute.xlu1 %7352  ;;  %v6293_v17 = vadd.f32 %v15434_v28, %v5653_v26  ;;  %v4705_v47 = vadd.f32 %v17593_v19, %v4065_v45  ;;  %v6001_v34 = vadd.f32 %v15277_v35, %v5361_v59  ;;  %v17598_v35 = vld [vmem:[#allocation202_spill] sm:$0xff]  ;;  %v17604_v26 = vld [vmem:[#allocation33_spill] sm:$0xff] }
 0xa09   : > { %v7429_v7 = vadd.f32 %v7353_v14, %v6949_v52  ;;  %7340 = vrot.lane.b32.xlu1 %v7263_v60, %s10080_s16  ;;  %v6932_v30 = vadd.f32 %v15248_v36, %v6292_v11  ;;  %v17595_v60 = vld [vmem:[#allocation58_spill] sm:$0xff]  ;;  %v3110_v44 = vadd.f32 %v17597_v6, %v2630_v61  ;;  %v17599_v14 = vld [vmem:[#allocation377_spill] sm:$0xff]  ;;  %v17612_v61 = vld [vmem:[#allocation115_spill] sm:$0xff] }
 0xa0a   : > { %v6933_v53 = vadd.f32 %v6841_v3, %v6293_v17  ;;  %v2631_v28 = vmul.f32 %v15101_v55, %v17595_v60  ;;  %v5345_v54 = vadd.f32 %v17596_v43, %v4705_v47  ;;  %v6641_v58 = vadd.f32 %v15325_v15, %v6001_v34  ;;  %v15540_v55 = vpop.permute.xlu0 %7326  ;;  %v17605_v16 = vld [vmem:[#allocation42_spill] sm:$0xff]  ;;  %v17615_v6 = vld [vmem:[#allocation28_spill] sm:$0xff] }
 0xa0b   : > { %v7483_v12 = vpack.c.bf16 %v7429_v7, %v7428_v9  ;;  %v7412_v29 = vadd.f32 %v15335_v39, %v6932_v30  ;;  %v17600_v9 = vld [vmem:[#allocation197_spill] sm:$0xff]  ;;  %v17601_v39 = vld [vmem:[#allocation204_spill] sm:$0xff]  ;;  %v17607_v11 = vld [vmem:[#allocation294_spill] sm:$0xff] }
 0xa0c   : > { %v15516_v2 = vpop.permute.xlu1 %6204  ;;  %v3111_v3 = vadd.f32 %v17598_v35, %v2631_v28  ;;  %v5985_v0 = vadd.f32 %v17599_v14, %v5345_v54  ;;  %v7281_v57 = vadd.f32 %v15346_v8, %v6641_v58  ;;  %v3750_v7 = vadd.f32 %v17600_v9, %v3110_v44  ;;  %v17608_v19 = vld [vmem:[#allocation154_spill] sm:$0xff]  ;;  %v17609_v30 = vld [vmem:[#allocation36_spill] sm:$0xff]  ;;  %v17614_v58 = vld [vmem:[#allocation107_spill] sm:$0xff] }
 0xa0d   : > { %8890 = vmatprep.subr.bf16.mxu0 %v7483_v12  ;;  %6896 = vrot.lane.b32.xlu1 %v6801_v50, %s10078_s13  ;;  %v2614_v50 = vmul.f32 %v9960_v18, %v17604_v26  ;;  %v9961_v12 = vld [vmem:[#allocation2 + $0x28] sm:$0xff]  ;;  %v17613_v28 = vld [vmem:[#allocation158_spill] sm:$0xff] }
 0xa0e   : > { %v3751_v33 = vadd.f32 %v17601_v39, %v3111_v3  ;;  %v6625_v15 = vadd.f32 %v15337_v13, %v5985_v0  ;;  %v4390_v20 = vadd.f32 %v17602_v37, %v3750_v7  ;;  %v2615_v45 = vmul.f32 %v9961_v12, %v17605_v16  ;;  %v15554_v17 = vpop.permute.xlu0 %6882  ;;  %v17618_v39 = vld [vmem:[#allocation263_spill] sm:$0xff]  ;;  %v17621_v16 = vld [vmem:[#allocation60_spill] sm:$0xff] }
 0xa0f   : > { %v3094_v47 = vadd.f32 %v17608_v19, %v2614_v50  ;;  %v9962_v50 = vld [vmem:[#allocation2 + $0xb0] sm:$0xff] }
 0xa10   : > { %v7321_v52 = vpop.permute.xlu1 %7320  ;;  %v4391_v24 = vadd.f32 %v17603_v38, %v3751_v33  ;;  %v7265_v40 = vadd.f32 %v15353_v1, %v6625_v15  ;;  %v5030_v59 = vadd.f32 %v17606_v25, %v4390_v20  ;;  %v17610_v1 = vld [vmem:[#allocation350_spill] sm:$0xff]  ;;  %v17619_v15 = vld [vmem:[#allocation268_spill] sm:$0xff] }
 0xa11   : > { %v7413_v36 = vadd.f32 %v7321_v52, %v6933_v53  ;;  %6864 = vrot.lane.b32.xlu1 %v6785_v56, %s10078_s13  ;;  %v3095_v56 = vadd.f32 %v17609_v30, %v2615_v45  ;;  %v17611_v53 = vld [vmem:[#allocation351_spill] sm:$0xff]  ;;  %v3734_v60 = vadd.f32 %v17612_v61, %v3094_v47  ;;  %v17622_v45 = vld [vmem:[#allocation402_spill] sm:$0xff]  ;;  %v17624_v19 = vld [vmem:[#allocation196_spill] sm:$0xff] }
 0xa12   : > { %v5031_v13 = vadd.f32 %v17607_v11, %v4391_v24  ;;  %v5670_v34 = vadd.f32 %v17610_v1, %v5030_v59  ;;  %v15570_v14 = vpop.permute.xlu0 %6850  ;;  %v2633_v25 = vmul.f32 %v17622_v45, %v17621_v16  ;;  %v17626_v1 = vld [vmem:[#allocation198_spill] sm:$0xff]  ;;  %v17628_v61 = vld [vmem:[#allocation200_spill] sm:$0xff] }
 0xa13   : > { %v7475_v21 = vpack.c.bf16 %v7413_v36, %v7412_v29  ;;  %v3735_v52 = vadd.f32 %v17613_v28, %v3095_v56  ;;  %v9599_v29 = vld [vmem:[%s16362_s4 + $0x4] ss:$8 sps:$4 sm:$0xff]   ;;  %v4374_v36 = vadd.f32 %v17614_v58, %v3734_v60  ;;  %v17630_v58 = vld [vmem:[#allocation44_spill] sm:$0xff] }
 0xa14   : > { %v6877_v31 = vpop.permute.xlu1 %6876  ;;  %v5671_v10 = vadd.f32 %v17611_v53, %v5031_v13  ;;  %v6310_v43 = vadd.f32 %v15268_v62, %v5670_v34  ;;  %7810 = vmatprep.mubr.bf16.mxu0 %v9599_v29  ;;  %v17617_v62 = vld [vmem:[#allocation278_spill] sm:$0xff]  ;;  %v3113_v47 = vadd.f32 %v17624_v19, %v2633_v25  ;;  %v17627_v53 = vld [vmem:[#allocation193_spill] sm:$0xff] }
 0xa15   : > { %8891 = vmatpush3.bf16.msra.mxu0 %v7475_v21  ;;  %7376 = vrot.lane.b32.xlu1 %v7281_v57, %s10080_s16  ;;  %v4375_v44 = vadd.f32 %v17615_v6, %v3735_v52  ;;  %v17616_v57 = vld [vmem:[#allocation277_spill] sm:$0xff]  ;;  %v9963_v52 = vld [vmem:[#allocation2 + $0x30] sm:$0xff]  ;;  %v17631_v6 = vld [vmem:[#allocation295_spill] sm:$0xff] }
 0xa16   : > { %v6311_v54 = vadd.f32 %v15488_v41, %v5671_v10  ;;  %v6950_v35 = vadd.f32 %v15350_v51, %v6310_v43  ;;  %v5014_v21 = vadd.f32 %v17616_v57, %v4374_v36  ;;  %v15579_v24 = vpop.permute.xlu0 %6246  ;;  %v3753_v34 = vadd.f32 %v17626_v1, %v3113_v47  ;;  %v17629_v43 = vld [vmem:[#allocation35_spill] sm:$0xff]  ;;  %v9964_v29 = vld [vmem:[#allocation2 + $0x38] sm:$0xff] }
 0xa17   : > { %v5015_v9 = vadd.f32 %v17617_v62, %v4375_v44  ;;  %v2617_v36 = vmul.f32 %v9964_v29, %v17630_v58  ;;  %v9966_v29 = vld [vmem:[#allocation2 + $0xc8] sm:$0xff]  ;;  %v17647_v58 = vld [vmem:[#allocation62_spill] sm:$0xff] }
 0xa18   : > { %v6845_v8 = vpop.permute.xlu1 %6844  ;;  %v6951_v3 = vadd.f32 %v6877_v31, %v6311_v54  ;;  %v7430_v41 = vadd.f32 %v15389_v49, %v6950_v35  ;;  %v5654_v33 = vadd.f32 %v17618_v39, %v5014_v21  ;;  %v17620_v49 = vld [vmem:[#allocation51_spill] sm:$0xff]  ;;  %v4393_v60 = vadd.f32 %v17628_v61, %v3753_v34  ;;  %v17632_v35 = vld [vmem:[#allocation296_spill] sm:$0xff]  ;;  %v17634_v21 = vld [vmem:[#allocation153_spill] sm:$0xff] }
 0xa19   : > { %7344 = vrot.lane.b32.xlu1 %v7265_v40, %s10080_s16  ;;  %v5655_v37 = vadd.f32 %v17619_v15, %v5015_v9  ;;  %v2632_v12 = vmul.f32 %v9962_v50, %v17620_v49  ;;  %v2616_v54 = vmul.f32 %v9963_v52, %v17629_v43  ;;  %v3097_v62 = vadd.f32 %v17634_v21, %v2617_v36  ;;  %v17635_v9 = vld [vmem:[#allocation352_spill] sm:$0xff]  ;;  %v17637_v15 = vld [vmem:[#allocation147_spill] sm:$0xff]  ;;  %v17640_v50 = vld [vmem:[#allocation6_spill] sm:$0xff] }
 0xa1a   : > { %v6294_v51 = vadd.f32 %v15317_v5, %v5654_v33  ;;  %v15586_v13 = vpop.permute.xlu0 %7362  ;;  %v17623_v5 = vld [vmem:[#allocation26_spill] sm:$0xff]  ;;  %v2635_v36 = vmul.f32 %v9966_v29, %v17647_v58 }
 0xa1b   : > { %v6295_v31 = vadd.f32 %v15516_v2, %v5655_v37  ;;  %v3112_v2 = vadd.f32 %v17623_v5, %v2632_v12  ;;  %v17641_v12 = vld [vmem:[#allocation122_spill] sm:$0xff] }
 0xa1c   : > { %v6241_v22 = vpop.permute.xlu1 %6240  ;;  %v6934_v40 = vadd.f32 %v15361_v32, %v6294_v51  ;;  %v17625_v32 = vld [vmem:[#allocation191_spill] sm:$0xff]  ;;  %v9965_v43 = vld [vmem:[#allocation2 + $0xc0] sm:$0xff] }
 0xa1d   : > { %v6935_v18 = vadd.f32 %v6845_v8, %v6295_v31  ;;  %v3752_v8 = vadd.f32 %v17625_v32, %v3112_v2  ;;  %v17639_v31 = vld [vmem:[#allocation86_spill] sm:$0xff]  ;;  %v17643_v2 = vld [vmem:[#allocation280_spill] sm:$0xff]  ;;  %v17644_v32 = vld [vmem:[#allocation267_spill] sm:$0xff] }
 0xa1e   : > { %v7414_v59 = vadd.f32 %v15428_v48, %v6934_v40  ;;  %v15594_v28 = vpop.permute.xlu0 %6214 }
 0xa1f   : > { %v4392_v10 = vadd.f32 %v17627_v53, %v3752_v8 }
 0xa20   : > { %v7357_v0 = vpop.permute.xlu1 %7356 }
 0xa21   : > { %v7431_v7 = vadd.f32 %v7357_v0, %v6951_v3  ;;  %v5032_v44 = vadd.f32 %v17631_v6, %v4392_v10  ;;  %v5033_v3 = vadd.f32 %v17632_v35, %v4393_v60  ;;  %v17633_v0 = vld [vmem:[#allocation119_spill] sm:$0xff] }
 0xa22   : > { %v3096_v57 = vadd.f32 %v17633_v0, %v2616_v54  ;;  %v17646_v54 = vld [vmem:[#allocation53_spill] sm:$0xff] }
 0xa23   : > { %v7484_v20 = vpack.c.bf16 %v7431_v7, %v7430_v41  ;;  %v5672_v41 = vadd.f32 %v17635_v9, %v5032_v44  ;;  %v17636_v7 = vld [vmem:[#allocation353_spill] sm:$0xff] }
 0xa24   : > { %v6209_v38 = vpop.permute.xlu1 %6208  ;;  %v5673_v39 = vadd.f32 %v17636_v7, %v5033_v3  ;;  %v3736_v37 = vadd.f32 %v17637_v15, %v3096_v57  ;;  %v17648_v3 = vld [vmem:[#allocation215_spill] sm:$0xff] }
 0xa25   : > { %8892 = vmatprep.subr.bf16.mxu0 %v7484_v20  ;;  %v17638_v20 = vld [vmem:[#allocation106_spill] sm:$0xff]  ;;  %v6312_v40 = vadd.f32 %v17639_v31, %v5672_v41  ;;  %v17652_v41 = vld [vmem:[#allocation219_spill] sm:$0xff] }
 0xa26   : > { %v3737_v51 = vadd.f32 %v17638_v20, %v3097_v62  ;;  %v4376_v49 = vadd.f32 %v17640_v50, %v3736_v37  ;;  %v17651_v62 = vld [vmem:[#allocation224_spill] sm:$0xff]  ;;  %v9967_v20 = vld [vmem:[#allocation2 + $0x40] sm:$0xff] }
 0xa27   : > { %v6952_v45 = vadd.f32 %v15447_v46, %v6312_v40  ;;  %v9968_v40 = vld [vmem:[#allocation2 + $0x48] sm:$0xff] }
 0xa28   : > { %v7325_v26 = vpop.permute.xlu1 %7324  ;;  %v4377_v16 = vadd.f32 %v17641_v12, %v3737_v51  ;;  %v17654_v51 = vld [vmem:[#allocation37_spill] sm:$0xff] }
 0xa29   : > { %v7415_v11 = vadd.f32 %v7325_v26, %v6935_v18  ;;  %v6313_v18 = vadd.f32 %v6241_v22, %v5673_v39  ;;  %v15607_v26 = vpop.permute.xlu0 %7330  ;;  %v7432_v47 = vadd.f32 %v15503_v4, %v6952_v45  ;;  %v17645_v22 = vld [vmem:[#allocation337_spill] sm:$0xff]  ;;  %v2634_v4 = vmul.f32 %v9965_v43, %v17646_v54  ;;  %v17653_v39 = vld [vmem:[#allocation226_spill] sm:$0xff]  ;;  %v17665_v43 = vld [vmem:[#allocation132_spill] sm:$0xff] }
 0xa2a   : > { %v5017_v19 = vadd.f32 %v17643_v2, %v4377_v16  ;;  %v2618_v31 = vmul.f32 %v9967_v20, %v17654_v51  ;;  %v17657_v16 = vld [vmem:[#allocation298_spill] sm:$0xff]  ;;  %v9970_v20 = vld [vmem:[#allocation2 + $0xd8] sm:$0xff]  ;;  %v17671_v51 = vld [vmem:[#allocation64_spill] sm:$0xff] }
 0xa2b   : > { %v7476_v30 = vpack.c.bf16 %v7415_v11, %v7414_v59  ;;  %v17642_v11 = vld [vmem:[#allocation279_spill] sm:$0xff]  ;;  %v3114_v0 = vadd.f32 %v17648_v3, %v2634_v4  ;;  %v17660_v2 = vld [vmem:[#allocation354_spill] sm:$0xff] }
 0xa2c   : > { %v6881_v56 = vpop.permute.xlu1 %6880  ;;  %v5016_v5 = vadd.f32 %v17642_v11, %v4376_v49  ;;  %v5657_v1 = vadd.f32 %v17645_v22, %v5017_v19  ;;  %v17656_v49 = vld [vmem:[#allocation297_spill] sm:$0xff]  ;;  %v17659_v11 = vld [vmem:[#allocation160_spill] sm:$0xff] }
 0xa2d   : > { %8893 = vmatpush3.bf16.msra.mxu0 %v7476_v30  ;;  %v6953_v25 = vadd.f32 %v6881_v56, %v6313_v18  ;;  %v15617_v53 = vpop.permute.xlu0 %6886  ;;  %v17655_v18 = vld [vmem:[#allocation46_spill] sm:$0xff] }
 0xa2e   : > { %v5656_v8 = vadd.f32 %v17644_v32, %v5016_v5  ;;  %v6297_v46 = vadd.f32 %v6209_v38, %v5657_v1  ;;  %v2619_v50 = vmul.f32 %v9968_v40, %v17655_v18  ;;  %v17663_v1 = vld [vmem:[#allocation19_spill] sm:$0xff] }
 0xa30   : > { %v6849_v48 = vpop.permute.xlu1 %6848  ;;  %v6296_v61 = vadd.f32 %v15409_v23, %v5656_v8  ;;  %v17649_v23 = vld [vmem:[#allocation222_spill] sm:$0xff]  ;;  %v3099_v5 = vadd.f32 %v17659_v11, %v2619_v50  ;;  %v17662_v8 = vld [vmem:[#allocation155_spill] sm:$0xff]  ;;  %v17676_v11 = vld [vmem:[#allocation213_spill] sm:$0xff] }
 0xa31   : > { %v6937_v60 = vadd.f32 %v6849_v48, %v6297_v46  ;;  %v15624_v35 = vpop.permute.xlu0 %6854  ;;  %v3115_v38 = vadd.f32 %v17649_v23, %v2635_v36  ;;  %v17666_v36 = vld [vmem:[#allocation281_spill] sm:$0xff] }
 0xa32   : > { %v6936_v56 = vadd.f32 %v15464_v27, %v6296_v61  ;;  %v17650_v27 = vld [vmem:[#allocation217_spill] sm:$0xff] }
 0xa33   : > { %v3754_v48 = vadd.f32 %v17650_v27, %v3114_v0  ;;  %v3755_v9 = vadd.f32 %v17651_v62, %v3115_v38  ;;  %v17668_v38 = vld [vmem:[#allocation338_spill] sm:$0xff] }
 0xa34   : > { %v6245_v33 = vpop.permute.xlu1 %6244  ;;  %v7416_v6 = vadd.f32 %v15540_v55, %v6936_v56 }
 0xa35   : > { %v4394_v7 = vadd.f32 %v17652_v41, %v3754_v48  ;;  %v4395_v15 = vadd.f32 %v17653_v39, %v3755_v9  ;;  %v15632_v37 = vpop.permute.xlu0 %6250  ;;  %v9969_v39 = vld [vmem:[#allocation2 + $0xd0] sm:$0xff] }
 0xa37   : > { %v5034_v12 = vadd.f32 %v17656_v49, %v4394_v7  ;;  %v5035_v45 = vadd.f32 %v17657_v16, %v4395_v15  ;;  %v17670_v15 = vld [vmem:[#allocation55_spill] sm:$0xff]  ;;  %v17672_v49 = vld [vmem:[#allocation209_spill] sm:$0xff]  ;;  %v17673_v16 = vld [vmem:[#allocation216_spill] sm:$0xff] }
 0xa38   : > { %v7361_v59 = vpop.permute.xlu1 %7360 }
 0xa39   : > { %v7433_v30 = vadd.f32 %v7361_v59, %v6953_v25  ;;  %v17658_v25 = vld [vmem:[#allocation8_spill] sm:$0xff]  ;;  %v5674_v19 = vadd.f32 %v17660_v2, %v5034_v12  ;;  %v7367_v56 = vpop.permute.xlu0 %7366 }
 0xa3a   : > { %v3098_v59 = vadd.f32 %v17658_v25, %v2618_v31  ;;  %v2637_v31 = vmul.f32 %v9970_v20, %v17671_v51  ;;  %v17674_v25 = vld [vmem:[#allocation211_spill] sm:$0xff]  ;;  %v17677_v2 = vld [vmem:[#allocation220_spill] sm:$0xff] }
 0xa3b   : > { %v7485_v34 = vpack.c.bf16 %v7433_v30, %v7432_v47  ;;  %v17661_v47 = vld [vmem:[#allocation355_spill] sm:$0xff]  ;;  %v6314_v61 = vadd.f32 %v15486_v42, %v5674_v19 }
 0xa3c   : > { %v6213_v10 = vpop.permute.xlu1 %6212  ;;  %v5675_v30 = vadd.f32 %v17661_v47, %v5035_v45  ;;  %v3738_v22 = vadd.f32 %v17662_v8, %v3098_v59  ;;  %v17669_v42 = vld [vmem:[#allocation339_spill] sm:$0xff] }
 0xa3d   : > { %8894 = vmatprep.subr.bf16.mxu0 %v7485_v34  ;;  %v3739_v34 = vadd.f32 %v17663_v1, %v3099_v5  ;;  %v6954_v4 = vadd.f32 %v15554_v17, %v6314_v61  ;;  %v15653_v48 = vpop.permute.xlu0 %6218  ;;  %v17678_v8 = vld [vmem:[#allocation39_spill] sm:$0xff]  ;;  %v9972_v1 = vld [vmem:[#allocation2 + $0x58] sm:$0xff] }
 0xa3e   : > { %v6315_v46 = vadd.f32 %v6245_v33, %v5675_v30  ;;  %v9971_v30 = vld [vmem:[#allocation2 + $0x50] sm:$0xff]  ;;  %v17690_v20 = vld [vmem:[#allocation283_spill] sm:$0xff] }
 0xa3f   : > { %v4379_v54 = vadd.f32 %v17665_v43, %v3739_v34  ;;  %v7434_v0 = vadd.f32 %v15586_v13, %v6954_v4  ;;  %v2636_v13 = vmul.f32 %v9969_v39, %v17670_v15  ;;  %v17679_v34 = vld [vmem:[#allocation48_spill] sm:$0xff] }
 0xa40   : > { %v7329_v52 = vpop.permute.xlu1 %7328  ;;  %v2621_v61 = vmul.f32 %v9972_v1, %v17679_v34  ;;  %v10081_v1 = vmov 17  }
 0xa41   : > { %v7417_v44 = vadd.f32 %v7329_v52, %v6937_v60  ;;  %v17664_v60 = vld [vmem:[#allocation10_spill] sm:$0xff]  ;;  %v7335_v50 = vpop.permute.xlu0 %7334  ;;  %v3116_v12 = vadd.f32 %v17672_v49, %v2636_v13  ;;  %9564 = vset.pattern.permute.xlu1 %v10081_v1  ;;  %9563 = vset.pattern.permute.xlu0 %v10081_v1 }
 0xa42   : > { %v4378_v52 = vadd.f32 %v17664_v60, %v3738_v22  ;;  %v2620_v22 = vmul.f32 %v9971_v30, %v17678_v8 }
 0xa43   : > { %v7477_v57 = vpack.c.bf16 %v7417_v44, %v7416_v6  ;;  %v17667_v44 = vld [vmem:[#allocation282_spill] sm:$0xff] }
 0xa44   : > { %v6885_v21 = vpop.permute.xlu1 %6884  ;;  %v5018_v6 = vadd.f32 %v17666_v36, %v4378_v52  ;;  %v5019_v3 = vadd.f32 %v17667_v44, %v4379_v54  ;;  %v17681_v52 = vld [vmem:[#allocation300_spill] sm:$0xff]  ;;  %v17682_v54 = vld [vmem:[#allocation121_spill] sm:$0xff] }
 0xa45   : > { %8895 = vmatpush3.bf16.msra.mxu0 %v7477_v57  ;;  %v6955_v29 = vadd.f32 %v6885_v21, %v6315_v46  ;;  %v15666_v47 = vpop.permute.xlu0 %6890  ;;  %v17680_v46 = vld [vmem:[#allocation299_spill] sm:$0xff]  ;;  %v3100_v4 = vadd.f32 %v17682_v54, %v2620_v22  ;;  %v17684_v36 = vld [vmem:[#allocation356_spill] sm:$0xff]  ;;  %v17685_v44 = vld [vmem:[#allocation357_spill] sm:$0xff] }
 0xa46   : > { %v5658_v57 = vadd.f32 %v17668_v38, %v5018_v6  ;;  %v5659_v33 = vadd.f32 %v17669_v42, %v5019_v3  ;;  %v17699_v54 = vld [vmem:[#allocation244_spill] sm:$0xff] }
 0xa48   : > { %v6853_v55 = vpop.permute.xlu1 %6852  ;;  %v6298_v9 = vadd.f32 %v15523_v63, %v5658_v57  ;;  %v6299_v17 = vadd.f32 %v6213_v10, %v5659_v33  ;;  %v3117_v63 = vadd.f32 %v17673_v16, %v2637_v31  ;;  %v17687_v57 = vld [vmem:[#allocation162_spill] sm:$0xff]  ;;  %v17691_v31 = vld [vmem:[#allocation284_spill] sm:$0xff] }
 0xa4a   : > { %v6938_v21 = vadd.f32 %v15570_v14, %v6298_v9  ;;  %v6939_v41 = vadd.f32 %v6853_v55, %v6299_v17  ;;  %v3756_v14 = vadd.f32 %v17674_v25, %v3116_v12  ;;  %v17675_v55 = vld [vmem:[#allocation218_spill] sm:$0xff]  ;;  %v15681_v9 = vpop.permute.xlu0 %6858  ;;  %v17688_v17 = vld [vmem:[#allocation128_spill] sm:$0xff] }
 0xa4b   : > { %v3757_v59 = vadd.f32 %v17675_v55, %v3117_v63  ;;  %v17692_v12 = vld [vmem:[#allocation340_spill] sm:$0xff] }
 0xa4c   : > { %v6249_v32 = vpop.permute.xlu1 %6248  ;;  %v7418_v40 = vadd.f32 %v15607_v26, %v6938_v21  ;;  %v4396_v5 = vadd.f32 %v17676_v11, %v3756_v14  ;;  %v17694_v11 = vld [vmem:[#allocation57_spill] sm:$0xff] }
 0xa4d   : > { %v4397_v19 = vadd.f32 %v17677_v2, %v3757_v59  ;;  %v9973_v59 = vld [vmem:[#allocation2 + $0xe0] sm:$0xff]  ;;  %v9974_v2 = vld [vmem:[#allocation2 + $0xe8] sm:$0xff] }
 0xa4e   : > { %v5036_v60 = vadd.f32 %v17680_v46, %v4396_v5 }
 0xa4f   : > { %v5037_v43 = vadd.f32 %v17681_v52, %v4397_v19  ;;  %v17695_v19 = vld [vmem:[#allocation66_spill] sm:$0xff]  ;;  %v17698_v52 = vld [vmem:[#allocation237_spill] sm:$0xff] }
 0xa50   : > { %v7365_v58 = vpop.permute.xlu1 %7364  ;;  %v5676_v6 = vadd.f32 %v17684_v36, %v5036_v60  ;;  %v2639_v30 = vmul.f32 %v9974_v2, %v17695_v19  ;;  %v17700_v36 = vld [vmem:[#allocation239_spill] sm:$0xff]  ;;  %v17712_v2 = vld [vmem:[#allocation9_spill] sm:$0xff] }
 0xa51   : > { %v7435_v23 = vadd.f32 %v7365_v58, %v6955_v29  ;;  %v17683_v29 = vld [vmem:[#allocation110_spill] sm:$0xff]  ;;  %v5677_v3 = vadd.f32 %v17685_v44, %v5037_v43 }
 0xa52   : > { %v3101_v58 = vadd.f32 %v17683_v29, %v2621_v61  ;;  %v6316_v33 = vadd.f32 %v15579_v24, %v5676_v6  ;;  %v17693_v24 = vld [vmem:[#allocation341_spill] sm:$0xff]  ;;  %v17697_v61 = vld [vmem:[#allocation242_spill] sm:$0xff] }
 0xa53   : > { %v7486_v27 = vpack.c.bf16 %v7435_v23, %v7434_v0  ;;  %v17686_v23 = vld [vmem:[#allocation97_spill] sm:$0xff]  ;;  %v3119_v46 = vadd.f32 %v17697_v61, %v2639_v30  ;;  %v9977_v29 = vld [vmem:[%s16363_s5] sm:$0xff] }
 0xa54   : > { %v6217_v62 = vpop.permute.xlu1 %6216  ;;  %v3740_v38 = vadd.f32 %v17686_v23, %v3100_v4  ;;  %v3741_v42 = vadd.f32 %v17687_v57, %v3101_v58  ;;  %v6956_v39 = vadd.f32 %v15617_v53, %v6316_v33  ;;  %v9978_v58 = vld [vmem:[%s16363_s5 + $0x8] sm:$0xff]  ;;  %v17701_v44 = vld [vmem:[#allocation246_spill] sm:$0xff]  ;;  %v17713_v30 = vld [vmem:[#allocation185_spill] sm:$0xff] }
 0xa55   : > { %8896 = vmatprep.subr.bf16.mxu0 %v7486_v27  ;;  %v6317_v27 = vadd.f32 %v6249_v32, %v5677_v3  ;;  %v3759_v4 = vadd.f32 %v17699_v54, %v3119_v46  ;;  %v9979_v57 = vld [vmem:[#allocation2 + $0x60] sm:$0xff] }
 0xa56   : > { %v4380_v21 = vadd.f32 %v17688_v17, %v3740_v38  ;;  %v17703_v17 = vld [vmem:[#allocation50_spill] sm:$0xff] }
 0xa57   : > { %v4399_v3 = vadd.f32 %v17701_v44, %v3759_v4  ;;  %v9985_v46 = vld [vmem:[%s16363_s5 + $0xa0] sm:$0xff]  ;;  %v17719_v44 = vld [vmem:[#allocation68_spill] sm:$0xff] }
 0xa58   : > { %v7333_v7 = vpop.permute.xlu1 %7332  ;;  %v5020_v51 = vadd.f32 %v17690_v20, %v4380_v21  ;;  %v9982_v20 = vld [vmem:[%s16363_s5 + $0x98] sm:$0xff] }
 0xa59   : > { %v7419_v18 = vadd.f32 %v7333_v7, %v6939_v41  ;;  %v17689_v41 = vld [vmem:[#allocation177_spill] sm:$0xff] }
 0xa5a   : > { %v4381_v7 = vadd.f32 %v17689_v41, %v3741_v42  ;;  %v5660_v16 = vadd.f32 %v17692_v12, %v5020_v51  ;;  %v17702_v42 = vld [vmem:[#allocation41_spill] sm:$0xff]  ;;  %v17706_v51 = vld [vmem:[#allocation22_spill] sm:$0xff] }
 0xa5b   : > { %v7478_v10 = vpack.c.bf16 %v7419_v18, %v7418_v40  ;;  %v7436_v18 = vadd.f32 %v7367_v56, %v6956_v39  ;;  %v2638_v56 = vmul.f32 %v9973_v59, %v17694_v11  ;;  %v2622_v33 = vmul.f32 %v9979_v57, %v17702_v42  ;;  %v17704_v41 = vld [vmem:[#allocation301_spill] sm:$0xff]  ;;  %v17705_v39 = vld [vmem:[#allocation302_spill] sm:$0xff] }
 0xa5c   : > { %v6889_v45 = vpop.permute.xlu1 %6888  ;;  %v5021_v40 = vadd.f32 %v17691_v31, %v4381_v7  ;;  %v6300_v14 = vadd.f32 %v15594_v28, %v5660_v16  ;;  %v9975_v28 = vld [vmem:[%s16363_s5 + $0x88] sm:$0xff] }
 0xa5d   : > { %8897 = vmatpush3.bf16.msra.mxu0 %v7478_v10  ;;  %v6957_v15 = vadd.f32 %v6889_v45, %v6317_v27  ;;  %v15690_v10 = vpop.permute.xlu0 %6254  ;;  %7559 = vperm.xlu1 %9564, %v9975_v28   ;;  %v9980_v27 = vld [vmem:[#allocation2 + $0x68] sm:$0xff]  ;;  %v3102_v31 = vadd.f32 %v17706_v51, %v2622_v33  ;;  %v9989_v33 = vld [vmem:[%s16363_s5 + $0x20] sm:$0xff]  ;;  %v17723_v51 = vld [vmem:[#allocation52_spill] sm:$0xff] }
 0xa5e   : > { %v5661_v32 = vadd.f32 %v17693_v24, %v5021_v40  ;;  %v6940_v45 = vadd.f32 %v15624_v35, %v6300_v14  ;;  %v9976_v35 = vld [vmem:[%s16363_s5 + $0x80] sm:$0xff]  ;;  %v2623_v21 = vmul.f32 %v9980_v27, %v17703_v17  ;;  %v17707_v40 = vld [vmem:[#allocation136_spill] sm:$0xff]  ;;  %v17709_v16 = vld [vmem:[#allocation359_spill] sm:$0xff] }
 0xa5f   : > { %7555 = vperm.xlu0 %9563, %v9976_v35   ;;  %v17715_v35 = vld [vmem:[#allocation286_spill] sm:$0xff]  ;;  %v9990_v27 = vld [vmem:[%s16363_s5 + $0x28] sm:$0xff]  ;;  %v17720_v17 = vld [vmem:[#allocation229_spill] sm:$0xff] }
 0xa60   : > { %v6857_v26 = vpop.permute.xlu1 %6856  ;;  %v6301_v53 = vadd.f32 %v6217_v62, %v5661_v32  ;;  %v7420_v8 = vadd.f32 %v7335_v50, %v6940_v45  ;;  %v17696_v62 = vld [vmem:[#allocation235_spill] sm:$0xff] }
 0xa61   : > { %v7371_v34 = vpop.permute.xlu0 %7370  ;;  %7491 = vperm.xlu1 %9564, %v9977_v29  }
 0xa62   : > { %v6941_v55 = vadd.f32 %v6857_v26, %v6301_v53  ;;  %v3118_v26 = vadd.f32 %v17696_v62, %v2638_v56  ;;  %v17711_v53 = vld [vmem:[#allocation184_spill] sm:$0xff] }
 0xa63   : > { %7495 = vperm.xlu0 %9563, %v9978_v58   ;;  %v9983_v56 = vld [vmem:[%s16363_s5 + $0x10] sm:$0xff]  ;;  %v17718_v58 = vld [vmem:[#allocation59_spill] sm:$0xff] }
 0xa64   : > { %v15676_v0 = vpop.permute.xlu1 %6252  ;;  %v3758_v43 = vadd.f32 %v17698_v52, %v3118_v26  ;;  %v17716_v52 = vld [vmem:[#allocation342_spill] sm:$0xff] }
 0xa65   : > { %v15716_v23 = vpop.permute.xlu0 %6222 }
 0xa66   : > { %v4398_v6 = vadd.f32 %v17700_v36, %v3758_v43 }
 0xa67   : > { %7567 = vperm.xlu0 %9563, %v9982_v20   ;;  %v9992_v20 = vld [vmem:[#allocation2 + $0x78] sm:$0xff] }
 0xa68   : > { %v7369_v13 = vpop.permute.xlu1 %7368  ;;  %v5038_v7 = vadd.f32 %v17704_v41, %v4398_v6  ;;  %v9988_v6 = vld [vmem:[#allocation2 + $0xf8] sm:$0xff]  ;;  %v17721_v41 = vld [vmem:[#allocation236_spill] sm:$0xff] }
 0xa69   : > { %v7437_v49 = vadd.f32 %v7369_v13, %v6957_v15  ;;  %v5039_v15 = vadd.f32 %v17705_v39, %v4399_v3  ;;  %v9981_v13 = vld [vmem:[%s16363_s5 + $0x90] sm:$0xff]  ;;  %v7339_v11 = vpop.permute.xlu0 %7338  ;;  %v2641_v3 = vmul.f32 %v9988_v6, %v17719_v44  ;;  %v17738_v6 = vld [vmem:[#allocation287_spill] sm:$0xff] }
 0xa6a   : > { %7563 = vperm.xlu1 %9564, %v9981_v13  }
 0xa6b   : > { %v7487_v63 = vpack.c.bf16 %v7437_v49, %v7436_v18  ;;  %v3103_v18 = vadd.f32 %v17707_v40, %v2623_v21  ;;  %v17708_v49 = vld [vmem:[#allocation358_spill] sm:$0xff]  ;;  %v5679_v24 = vadd.f32 %v17709_v16, %v5039_v15  ;;  %v9991_v15 = vld [vmem:[#allocation2 + $0x70] sm:$0xff] }
 0xa6c   : > { %v15692_v25 = vpop.permute.xlu1 %6220  ;;  %v5678_v12 = vadd.f32 %v17708_v49, %v5038_v7  ;;  %v3121_v7 = vadd.f32 %v17721_v41, %v2641_v3  ;;  %v17739_v3 = vld [vmem:[#allocation288_spill] sm:$0xff] }
 0xa6d   : > { %8898 = vmatprep.subr.bf16.mxu0 %v7487_v63  ;;  %v17710_v63 = vld [vmem:[#allocation131_spill] sm:$0xff]  ;;  %v3743_v45 = vadd.f32 %v17711_v53, %v3103_v18  ;;  %v6319_v59 = vadd.f32 %v15676_v0, %v5679_v24  ;;  %v17714_v0 = vld [vmem:[#allocation285_spill] sm:$0xff]  ;;  %v6895_v4 = vpop.permute.xlu0 %6894 }
 0xa6e   : > { %v3742_v14 = vadd.f32 %v17710_v63, %v3102_v31  ;;  %7499 = vperm.xlu1 %9564, %v9983_v56   ;;  %v2625_v31 = vmul.f32 %v9992_v20, %v17723_v51  ;;  %v17724_v18 = vld [vmem:[#allocation231_spill] sm:$0xff]  ;;  %v17728_v56 = vld [vmem:[#allocation233_spill] sm:$0xff] }
 0xa70   : > { %v7337_v5 = vpop.permute.xlu1 %7336  ;;  %v4382_v19 = vadd.f32 %v17712_v2, %v3742_v14  ;;  %v17726_v14 = vld [vmem:[#allocation161_spill] sm:$0xff]  ;;  %v17729_v2 = vld [vmem:[#allocation240_spill] sm:$0xff] }
 0xa71   : > { %v7421_v22 = vadd.f32 %v7337_v5, %v6941_v55  ;;  %v6318_v55 = vadd.f32 %v15632_v37, %v5678_v12  ;;  %v9984_v5 = vld [vmem:[%s16363_s5 + $0x18] sm:$0xff]  ;;  %v17725_v12 = vld [vmem:[#allocation238_spill] sm:$0xff] }
 0xa72   : > { %7503 = vperm.xlu0 %9563, %v9984_v5   ;;  %v5022_v28 = vadd.f32 %v17714_v0, %v4382_v19  ;;  %7571 = vperm.xlu1 %9564, %v9985_v46   ;;  %v3761_v16 = vadd.f32 %v17725_v12, %v3121_v7  ;;  %v17732_v0 = vld [vmem:[#allocation303_spill] sm:$0xff]  ;;  %v17741_v7 = vld [vmem:[#allocation345_spill] sm:$0xff] }
 0xa73   : > { %v7479_v50 = vpack.c.bf16 %v7421_v22, %v7420_v8  ;;  %v4383_v8 = vadd.f32 %v17713_v30, %v3743_v45  ;;  %v6958_v22 = vadd.f32 %v15666_v47, %v6318_v55  ;;  %v6863_v45 = vpop.permute.xlu0 %6862  ;;  %v17727_v55 = vld [vmem:[#allocation179_spill] sm:$0xff] }
 0xa74   : > { %v6893_v60 = vpop.permute.xlu1 %6892  ;;  %v5662_v47 = vadd.f32 %v17716_v52, %v5022_v28  ;;  %v17734_v46 = vld [vmem:[#allocation159_spill] sm:$0xff]  ;;  %v17735_v52 = vld [vmem:[#allocation178_spill] sm:$0xff] }
 0xa75   : > { %8899 = vmatpush3.bf16.msra.mxu0 %v7479_v50  ;;  %v6959_v37 = vadd.f32 %v6893_v60, %v6319_v59  ;;  %v5023_v62 = vadd.f32 %v17715_v35, %v4383_v8  ;;  %v7438_v26 = vadd.f32 %v7371_v34, %v6958_v22  ;;  %v9986_v50 = vld [vmem:[%s16363_s5 + $0xa8] sm:$0xff]  ;;  %v9987_v34 = vld [vmem:[#allocation2 + $0xf0] sm:$0xff]  ;;  %v3105_v59 = vadd.f32 %v17727_v55, %v2625_v31  ;;  %v9999_v31 = vld [vmem:[%s16363_s5 + $0x40] sm:$0xff] }
 0xa76   : > { %7575 = vperm.xlu0 %9563, %v9986_v50   ;;  %v17717_v60 = vld [vmem:[#allocation343_spill] sm:$0xff]  ;;  %v2640_v36 = vmul.f32 %v9987_v34, %v17718_v58  ;;  %v6302_v57 = vadd.f32 %v15653_v48, %v5662_v47  ;;  %7507 = vperm.xlu1 %9564, %v9989_v33   ;;  %v17733_v35 = vld [vmem:[#allocation304_spill] sm:$0xff] }
 0xa77   : > { %v5663_v43 = vadd.f32 %v17717_v60, %v5023_v62  ;;  %v17730_v8 = vld [vmem:[#allocation15_spill] sm:$0xff]  ;;  %v17736_v60 = vld [vmem:[#allocation360_spill] sm:$0xff]  ;;  %v7375_v58 = vpop.permute.xlu0 %7374 }
 0xa78   : > { %v6861_v38 = vpop.permute.xlu1 %6860  ;;  %v3120_v21 = vadd.f32 %v17720_v17, %v2640_v36  ;;  %v6942_v39 = vadd.f32 %v15681_v9, %v6302_v57  ;;  %v9993_v9 = vld [vmem:[%s16363_s5 + $0xb0] sm:$0xff]  ;;  %v9998_v17 = vld [vmem:[%s16363_s5 + $0xc8] sm:$0xff] }
 0xa79   : > { %v6303_v42 = vadd.f32 %v15692_v25, %v5663_v43  ;;  %v17722_v25 = vld [vmem:[#allocation43_spill] sm:$0xff] }
 0xa7a   : > { %7511 = vperm.xlu0 %9563, %v9990_v27   ;;  %v2624_v13 = vmul.f32 %v9991_v15, %v17722_v25  ;;  %v3760_v49 = vadd.f32 %v17724_v18, %v3120_v21  ;;  %v7422_v24 = vadd.f32 %v7339_v11, %v6942_v39  ;;  %7579 = vperm.xlu1 %9564, %v9993_v9   ;;  %v9997_v27 = vld [vmem:[%s16363_s5 + $0xc0] sm:$0xff]  ;;  %v17740_v21 = vld [vmem:[#allocation344_spill] sm:$0xff]  ;;  %v10004_v9 = vld [vmem:[%s16363_s5 + $0x58] sm:$0xff] }
 0xa7b   : > { %v6943_v48 = vadd.f32 %v6861_v38, %v6303_v42  ;;  %v9994_v38 = vld [vmem:[%s16363_s5 + $0xb8] sm:$0xff]  ;;  %v4401_v11 = vadd.f32 %v17729_v2, %v3761_v16  ;;  %v7343_v51 = vpop.permute.xlu0 %7342  ;;  %v10006_v55 = vld [vmem:[%s16363_s5 + $0xe8] sm:$0xff] }
 0xa7c   : > { %v15732_v32 = vpop.permute.xlu1 %6256  ;;  %v3104_v53 = vadd.f32 %v17726_v14, %v2624_v13  ;;  %v4400_v5 = vadd.f32 %v17728_v56, %v3760_v49  ;;  %v9597_v14 = vld [vmem:[%s16362_s4] ss:$8 sps:$4 sm:$0xff]   ;;  %v9603_v56 = vld [vmem:[%s16362_s4 + $0x24] ss:$8 sps:$4 sm:$0xff]  }
 0xa7d   : > { %v5041_v62 = vadd.f32 %v17733_v35, %v4401_v11  ;;  %v10008_v2 = vld [vmem:[%s16363_s5 + $0x68] sm:$0xff]  ;;  %v10009_v11 = vld [vmem:[%s16363_s5 + $0xf0] sm:$0xff] }
 0xa7e   : > { %7583 = vperm.xlu0 %9563, %v9994_v38   ;;  %v3744_v22 = vadd.f32 %v17730_v8, %v3104_v53  ;;  %v5040_v28 = vadd.f32 %v17732_v0, %v4400_v5  ;;  %v9600_v53 = vld [vmem:[%s16362_s4 + $0x14] ss:$8 sps:$4 sm:$0xff]   ;;  %v10005_v38 = vld [vmem:[%s16363_s5 + $0xe0] sm:$0xff] }
 0xa7f   : > { %v10007_v5 = vld [vmem:[%s16363_s5 + $0x60] sm:$0xff]  ;;  %v9606_v8 = vld [vmem:[%s16362_s4 + $0x34] ss:$8 sps:$4 sm:$0xff]  }
 0xa80   : > { %v7373_v1 = vpop.permute.xlu1 %7372  ;;  %v4384_v50 = vadd.f32 %v17734_v46, %v3744_v22  ;;  %v5680_v43 = vadd.f32 %v17736_v60, %v5040_v28  ;;  %v10011_v22 = vld [vmem:[%s16363_s5 + $0x70] sm:$0xff]  ;;  %v9609_v0 = vld [vmem:[%s16362_s4 + $0x44] ss:$8 sps:$4 sm:$0xff]   ;;  %v9611_v28 = vld [vmem:[%s16362_s4 + $0x40] ss:$8 sps:$4 sm:$0xff]  }
 0xa81   : > { %v7439_v61 = vadd.f32 %v7373_v1, %v6959_v37  ;;  %v17731_v37 = vld [vmem:[#allocation183_spill] sm:$0xff]  ;;  %v9612_v35 = vld [vmem:[%s16362_s4 + $0x54] ss:$8 sps:$4 sm:$0xff]  }
 0xa82   : > { %v3745_v1 = vadd.f32 %v17731_v37, %v3105_v59  ;;  %v5024_v44 = vadd.f32 %v17738_v6, %v4384_v50  ;;  %v6320_v42 = vadd.f32 %v15690_v10, %v5680_v43  ;;  %v9602_v59 = vld [vmem:[%s16362_s4 + $0x10] ss:$8 sps:$4 sm:$0xff]   ;;  %v9618_v46 = vld [vmem:[%s16362_s4 + $0x74] ss:$8 sps:$4 sm:$0xff]   ;;  %v9633_v6 = vld [vmem:[%s16362_s4 + $0xc4] ss:$8 sps:$4 sm:$0xff]  }
 0xa83   : > { %v7488_v54 = vpack.c.bf16 %v7439_v61, %v7438_v26  ;;  %v9995_v26 = vld [vmem:[%s16363_s5 + $0x30] sm:$0xff]  ;;  %v9996_v61 = vld [vmem:[%s16363_s5 + $0x38] sm:$0xff] }
 0xa84   : > { %v15757_v29 = vpop.permute.xlu1 %6224  ;;  %7515 = vperm.xlu1 %9564, %v9995_v26   ;;  %7519 = vperm.xlu0 %9563, %v9996_v61   ;;  %v4385_v47 = vadd.f32 %v17735_v52, %v3745_v1  ;;  %v5664_v41 = vadd.f32 %v17740_v21, %v5024_v44  ;;  %v10012_v37 = vld [vmem:[%s16363_s5 + $0x78] sm:$0xff]  ;;  %v9615_v26 = vld [vmem:[%s16362_s4 + $0x64] ss:$8 sps:$4 sm:$0xff]   ;;  %v9617_v61 = vld [vmem:[%s16362_s4 + $0x60] ss:$8 sps:$4 sm:$0xff]  }
 0xa85   : > { %8900 = vmatprep.subr.bf16.mxu0 %v7488_v54  ;;  %v17737_v54 = vld [vmem:[#allocation361_spill] sm:$0xff]  ;;  %v9621_v52 = vld [vmem:[%s16362_s4 + $0x84] ss:$8 sps:$4 sm:$0xff]   ;;  %v9635_v44 = vld [vmem:[%s16362_s4 + $0xc0] ss:$8 sps:$4 sm:$0xff]  }
 0xa86   : > { %v5681_v34 = vadd.f32 %v17737_v54, %v5041_v62  ;;  %v5025_v57 = vadd.f32 %v17739_v3, %v4385_v47  ;;  %v6304_v10 = vadd.f32 %v15716_v23, %v5664_v41  ;;  %v9608_v1 = vld [vmem:[%s16362_s4 + $0x30] ss:$8 sps:$4 sm:$0xff]   ;;  %v9623_v47 = vld [vmem:[%s16362_s4 + $0x80] ss:$8 sps:$4 sm:$0xff]   ;;  %v9624_v60 = vld [vmem:[%s16362_s4 + $0x94] ss:$8 sps:$4 sm:$0xff]  }
 0xa87   : > { %v9614_v62 = vld [vmem:[%s16362_s4 + $0x50] ss:$8 sps:$4 sm:$0xff]   ;;  %v9627_v54 = vld [vmem:[%s16362_s4 + $0xa4] ss:$8 sps:$4 sm:$0xff]   ;;  %v9636_v3 = vld [vmem:[%s16362_s4 + $0xd4] ss:$8 sps:$4 sm:$0xff]  }
 0xa88   : > { %v7341_v40 = vpop.permute.xlu1 %7340  ;;  %v6321_v33 = vadd.f32 %v15732_v32, %v5681_v34  ;;  %7587 = vperm.xlu1 %9564, %v9997_v27   ;;  %7591 = vperm.xlu0 %9563, %v9998_v17   ;;  %v5665_v39 = vadd.f32 %v17741_v7, %v5025_v57  ;;  %v9620_v50 = vld [vmem:[%s16362_s4 + $0x70] ss:$8 sps:$4 sm:$0xff]   ;;  %v9629_v34 = vld [vmem:[%s16362_s4 + $0xa0] ss:$8 sps:$4 sm:$0xff]   ;;  %v9642_v27 = vld [vmem:[%s16362_s4 + $0xf4] ss:$8 sps:$4 sm:$0xff]  }
 0xa89   : > { %v7423_v63 = vadd.f32 %v7341_v40, %v6943_v48  ;;  %v6960_v48 = vadd.f32 %v6895_v4, %v6320_v42  ;;  %v10000_v40 = vld [vmem:[%s16363_s5 + $0x48] sm:$0xff]  ;;  %v6944_v4 = vadd.f32 %v6863_v45, %v6304_v10  ;;  %v10003_v45 = vld [vmem:[%s16363_s5 + $0x50] sm:$0xff] }
 0xa8a   : > { %v6305_v13 = vadd.f32 %v15757_v29, %v5665_v39  ;;  %v10001_v29 = vld [vmem:[%s16363_s5 + $0xd0] sm:$0xff]  ;;  %v9639_v42 = vld [vmem:[%s16362_s4 + $0xe4] ss:$8 sps:$4 sm:$0xff]  }
 0xa8b   : > { %v7480_v19 = vpack.c.bf16 %v7423_v63, %v7422_v24  ;;  %v7440_v32 = vadd.f32 %v7375_v58, %v6960_v48  ;;  %v7424_v23 = vadd.f32 %v7343_v51, %v6944_v4  ;;  %v10002_v24 = vld [vmem:[%s16363_s5 + $0xd8] sm:$0xff] }
 0xa8c   : > { %v6897_v30 = vpop.permute.xlu1 %6896  ;;  %7523 = vperm.xlu1 %9564, %v9999_v31   ;;  %7527 = vperm.xlu0 %9563, %v10000_v40   ;;  %v9626_v43 = vld [vmem:[%s16362_s4 + $0x90] ss:$8 sps:$4 sm:$0xff]   ;;  %v9630_v58 = vld [vmem:[%s16362_s4 + $0xb4] ss:$8 sps:$4 sm:$0xff]  }
 0xa8d   : > { %8901 = vmatpush3.bf16.msra.mxu0 %v7480_v19  ;;  %v6961_v15 = vadd.f32 %v6897_v30, %v6321_v33  ;;  %v10010_v19 = vld [vmem:[%s16363_s5 + $0xf8] sm:$0xff]  ;;  %v9605_v30 = vld [vmem:[%s16362_s4 + $0x20] ss:$8 sps:$4 sm:$0xff]  }
 0xa8e   : > { %v9638_v57 = vld [vmem:[%s16362_s4 + $0xd0] ss:$8 sps:$4 sm:$0xff]   ;;  %v9641_v33 = vld [vmem:[%s16362_s4 + $0xe0] ss:$8 sps:$4 sm:$0xff]  }
 0xa8f   : > { %v9644_v17 = vld [vmem:[%s16362_s4 + $0xf0] ss:$8 sps:$4 sm:$0xff]  }
 0xa90   : > { %v6865_v36 = vpop.permute.xlu1 %6864  ;;  %7595 = vperm.xlu1 %9564, %v10001_v29   ;;  %7599 = vperm.xlu0 %9563, %v10002_v24  }
 0xa91   : > { %v6945_v18 = vadd.f32 %v6865_v36, %v6305_v13  ;;  %v9632_v36 = vld [vmem:[%s16362_s4 + $0xb0] ss:$8 sps:$4 sm:$0xff]  }
 0xa94   : > { %v7377_v25 = vpop.permute.xlu1 %7376  ;;  %7531 = vperm.xlu1 %9564, %v10003_v45   ;;  %7535 = vperm.xlu0 %9563, %v10004_v9  }
 0xa95   : > { %v7441_v20 = vadd.f32 %v7377_v25, %v6961_v15 }
 0xa97   : > { %v7489_v49 = vpack.c.bf16 %v7441_v20, %v7440_v32 }
 0xa98   : > { %v7345_v12 = vpop.permute.xlu1 %7344  ;;  %7603 = vperm.xlu1 %9564, %v10005_v38   ;;  %7607 = vperm.xlu0 %9563, %v10006_v55  }
 0xa99   : > { %v7425_v16 = vadd.f32 %v7345_v12, %v6945_v18  ;;  %8902 = vmatprep.subr.bf16.mxu0 %v7489_v49 }
 0xa9b   : > { %v7481_v63 = vpack.c.bf16 %v7425_v16, %v7424_v23 }
 0xa9c   : > { %7539 = vperm.xlu1 %9564, %v10007_v5   ;;  %7543 = vperm.xlu0 %9563, %v10008_v2  }
 0xa9d   : > { %8903 = vmatpush3.bf16.msra.mxu0 %v7481_v63 }
 0xaa0   : > { %7811 = vmatmul.mubr.bf16.vlgmr.msra.gmra.mrb[28].mxu0 %v9597_v14  ;;  %7611 = vperm.xlu1 %9564, %v10009_v11  }
 0xaa1   : > { %7818 = vmatprep.mubr.bf16.mxu0 %v9600_v53  ;;  %7615 = vperm.xlu0 %9563, %v10010_v19  }
 0xaa4   : > { %7547 = vperm.xlu1 %9564, %v10011_v22  }
 0xaa5   : > { %7551 = vperm.xlu0 %9563, %v10012_v37  }
 0xaa8   : > { %7819 = vmatmul.mubr.bf16.gmra.mrb[32].mxu0 %v9602_v59 }
 0xaa9   : > { %7826 = vmatprep.mubr.bf16.mxu0 %v9603_v56 }
 0xab0   : > { %7827 = vmatmul.mubr.bf16.gmra.mrb[36].mxu0 %v9605_v30 }
 0xab1   : > { %7834 = vmatprep.mubr.bf16.mxu0 %v9606_v8 }
 0xab8   : > { %7835 = vmatmul.mubr.bf16.gmra.mrb[40].mxu0 %v9608_v1 }
 0xab9   : > { %7842 = vmatprep.mubr.bf16.mxu0 %v9609_v0 }
 0xac0   : > { %7843 = vmatmul.mubr.bf16.gmra.mrb[44].mxu0 %v9611_v28 }
 0xac1   : > { %7850 = vmatprep.mubr.bf16.mxu0 %v9612_v35 }
 0xac8   : > { %7851 = vmatmul.mubr.bf16.gmra.mrb[48].mxu0 %v9614_v62 }
 0xac9   : > { %7858 = vmatprep.mubr.bf16.mxu0 %v9615_v26 }
 0xad0   : > { %7859 = vmatmul.mubr.bf16.gmra.mrb[52].mxu0 %v9617_v61 }
 0xad1   : > { %7866 = vmatprep.mubr.bf16.mxu0 %v9618_v46 }
 0xad8   : > { %7867 = vmatmul.mubr.bf16.gmra.mrb[56].mxu0 %v9620_v50 }
 0xad9   : > { %7874 = vmatprep.mubr.bf16.mxu0 %v9621_v52 }
 0xadc   : > { %v15955_v23 = vpop.permute.xlu1 %7559 }
 0xade   : > { %v7556_v16 = vpop.permute.xlu0 %7555 }
 0xae0   : > { %7875 = vmatmul.mubr.bf16.gmra.mrb[60].mxu0 %v9623_v47  ;;  %v7492_v9 = vpop.permute.xlu1 %7491 }
 0xae1   : > { %7882 = vmatprep.mubr.bf16.mxu0 %v9624_v60 }
 0xae2   : > { %v7496_v38 = vpop.permute.xlu0 %7495 }
 0xae6   : > { %v15965_v19 = vpop.permute.xlu0 %7567 }
 0xae8   : > { %7883 = vmatmul.mubr.bf16.gmra.mrb[64].mxu0 %v9626_v43 }
 0xae9   : > { %7890 = vmatprep.mubr.bf16.mxu0 %v9627_v54  ;;  %v15963_v2 = vpop.permute.xlu1 %7563 }
 0xaed   : > { %v7500_v22 = vpop.permute.xlu1 %7499 }
 0xaf0   : > { %7891 = vmatmul.mubr.bf16.gmra.mrb[68].mxu0 %v9629_v34 }
 0xaf1   : > { %7898 = vmatprep.mubr.bf16.mxu0 %v9630_v58  ;;  %v7504_v1 = vpop.permute.xlu0 %7503  ;;  %v15973_v26 = vpop.permute.xlu1 %7571 }
 0xaf5   : > { %v15975_v61 = vpop.permute.xlu0 %7575  ;;  %v7508_v54 = vpop.permute.xlu1 %7507 }
 0xaf8   : > { %7899 = vmatmul.mubr.bf16.gmra.mrb[72].mxu0 %v9632_v36 }
 0xaf9   : > { %7906 = vmatprep.mubr.bf16.mxu0 %v9633_v6  ;;  %v7512_v34 = vpop.permute.xlu0 %7511 }
 0xb00   : > { %7907 = vmatmul.mubr.bf16.gmra.mrb[76].mxu0 %v9635_v44 }
 0xb01   : > { %7914 = vmatprep.mubr.bf16.mxu0 %v9636_v3 }
 0xb08   : > { %7915 = vmatmul.mubr.bf16.gmra.mrb[80].mxu0 %v9638_v57  ;;  %v15985_v57 = vpop.permute.xlu1 %7579 }
 0xb09   : > { %7922 = vmatprep.mubr.bf16.mxu0 %v9639_v42 }
 0xb10   : > { %7923 = vmatmul.mubr.bf16.gmra.mrb[84].mxu0 %v9641_v33 }
 0xb11   : > { %7930 = vmatprep.mubr.bf16.mxu0 %v9642_v27  ;;  %v15989_v27 = vpop.permute.xlu0 %7583 }
 0xb18   : > { %7931 = vmatmul.mubr.bf16.gmra.mrb[88].mxu0 %v9644_v17 }
 0xb73   : > { %v8904_v21 = vpop.f32.mrb[28].mxu0 }
 0xb74   : > { %v8905_v41 = vpop.f32.mrb[29].mxu0 }
 0xb75   : > { %v8906_v7 = vadd.f32 %v8905_v41, %v8904_v21  ;;  %v8907_v39 = vpop.f32.mrb[30].mxu0 }
 0xb76   : > { %v8908_v48 = vpop.f32.mrb[31].mxu0 }
 0xb77   : > { %v8909_v15 = vadd.f32 %v8908_v48, %v8907_v39  ;;  %v15987_v33 = vadd.f32 %v8906_v7, %v7492_v9 }
 0xb79   : > { %v15981_v6 = vadd.f32 %v8909_v15, %v7496_v38  ;;  %v7971_v41 = vmin.f32 %v15987_v33, 0.0  ;;  %v7516_v15 = vpop.permute.xlu1 %7515  ;;  %vm7939_vm2 = vcmp.gt.f32.partialorder %v15987_v33, 0.0 }
 0xb7b   : > { %v8910_v25 = vpop.f32.mrb[32].mxu0  ;;  %v7972_v21 = vmin.f32 %v15981_v6, 0.0  ;;  %vm7940_vm3 = vcmp.gt.f32.partialorder %v15981_v6, 0.0 }
 0xb7c   : > { %v8911_v10 = vpop.f32.mrb[33].mxu0 }
 0xb7d   : > { %v8912_v32 = vadd.f32 %v8911_v10, %v8910_v25  ;;  %v8913_v13 = vpop.f32.mrb[34].mxu0  ;;  %v8005_v10 = vmul.f32 1.442695, %v7972_v21 }
 0xb7e   : > { %v8914_v20 = vpop.f32.mrb[35].mxu0 }
 0xb7f   : > { %v15949_v51 = vadd.f32 %v8914_v20, %v8913_v13  ;;  %v15995_v48 = vadd.f32 %v8912_v32, %v7500_v22  ;;  %v7520_v13 = vpop.permute.xlu0 %7519  ;;  %9709 = vpow2.f32 %v8005_v10 }
 0xb81   : > { %v15998_v7 = vadd.f32 %v15949_v51, %v7504_v1  ;;  %v16011_v51 = vpop.permute.xlu1 %7587  ;;  %vm7941_vm5 = vcmp.gt.f32.partialorder %v15995_v48, 0.0 }
 0xb83   : > { %v8916_v31 = vpop.f32.mrb[36].mxu0  ;;  %v16013_v38 = vpop.permute.xlu0 %7591  ;;  %vm7942_vm6 = vcmp.gt.f32.partialorder %v15998_v7, 0.0 }
 0xb84   : > { %v8917_v40 = vpop.f32.mrb[37].mxu0 }
 0xb85   : > { %v15951_v4 = vadd.f32 %v8917_v40, %v8916_v31  ;;  %v8919_v18 = vpop.f32.mrb[38].mxu0 }
 0xb86   : > { %v8920_v49 = vpop.f32.mrb[39].mxu0 }
 0xb87   : > { %v15953_v12 = vadd.f32 %v8920_v49, %v8919_v18  ;;  %v8003_v18 = vmul.f32 1.442695, %v7971_v41  ;;  %v16009_v9 = vadd.f32 %v15951_v4, %v7508_v54 }
 0xb89   : > { %9711 = vpow2.f32 %v8003_v18  ;;  %v7975_v1 = vmin.f32 %v16009_v9, 0.0  ;;  %vm7943_vm8 = vcmp.gt.f32.partialorder %v16009_v9, 0.0 }
 0xb8b   : > { %v8922_v29 = vpop.f32.mrb[40].mxu0 }
 0xb8c   : > { %v8923_v24 = vpop.f32.mrb[41].mxu0 }
 0xb8d   : > { %v15957_v63 = vadd.f32 %v8923_v24, %v8922_v29  ;;  %v8925_v14 = vpop.f32.mrb[42].mxu0  ;;  %v7973_v24 = vmin.f32 %v15995_v48, 0.0 }
 0xb8e   : > { %v8926_v53 = vpop.f32.mrb[43].mxu0 }
 0xb8f   : > { %v15959_v45 = vadd.f32 %v8926_v53, %v8925_v14  ;;  %v7974_v53 = vmin.f32 %v15998_v7, 0.0 }
 0xb91   : > { %v8009_v4 = vmul.f32 1.442695, %v7974_v53  ;;  %v16035_v21 = vadd.f32 %v15959_v45, %v7520_v13 }
 0xb93   : > { %v8928_v55 = vpop.f32.mrb[44].mxu0  ;;  %vm7946_vm15 = vcmp.gt.f32.partialorder %v16035_v21, 0.0 }
 0xb94   : > { %v8929_v59 = vpop.f32.mrb[45].mxu0 }
 0xb95   : > { %v15961_v56 = vadd.f32 %v8929_v59, %v8928_v55  ;;  %v8931_v5 = vpop.f32.mrb[46].mxu0 }
 0xb96   : > { %v8932_v11 = vpop.f32.mrb[47].mxu0 }
 0xb97   : > { %v15967_v30 = vadd.f32 %v8932_v11, %v8931_v5  ;;  %v8007_v5 = vmul.f32 1.442695, %v7973_v24  ;;  %v7978_v24 = vmin.f32 %v16035_v21, 0.0 }
 0xb9b   : > { %v8934_v8 = vpop.f32.mrb[48].mxu0 }
 0xb9c   : > { %v8935_v37 = vpop.f32.mrb[49].mxu0 }
 0xb9d   : > { %v15969_v0 = vadd.f32 %v8935_v37, %v8934_v8  ;;  %v8937_v28 = vpop.f32.mrb[50].mxu0  ;;  %v16017_v8 = vadd.f32 %v15953_v12, %v7512_v34  ;;  %v8011_v34 = vmul.f32 1.442695, %v7975_v1 }
 0xb9e   : > { %v8938_v35 = vpop.f32.mrb[51].mxu0 }
 0xb9f   : > { %v15971_v62 = vadd.f32 %v8938_v35, %v8937_v28  ;;  %vm7944_vm11 = vcmp.gt.f32.partialorder %v16017_v8, 0.0 }
 0xba3   : > { %v8940_v46 = vpop.f32.mrb[52].mxu0 }
 0xba4   : > { %v8941_v50 = vpop.f32.mrb[53].mxu0 }
 0xba5   : > { %v15977_v52 = vadd.f32 %v8941_v50, %v8940_v46  ;;  %v8943_v47 = vpop.f32.mrb[54].mxu0  ;;  %v7524_v50 = vpop.permute.xlu1 %7523 }
 0xba6   : > { %v8944_v60 = vpop.f32.mrb[55].mxu0 }
 0xba7   : > { %v15979_v43 = vadd.f32 %v8944_v60, %v8943_v47  ;;  %v7976_v47 = vmin.f32 %v16017_v8, 0.0  ;;  %v16024_v60 = vpop.permute.xlu0 %7527 }
 0xbab   : > { %v8946_v58 = vpop.f32.mrb[56].mxu0 }
 0xbac   : > { %v8947_v36 = vpop.f32.mrb[57].mxu0 }
 0xbad   : > { %v15983_v44 = vadd.f32 %v8947_v36, %v8946_v58  ;;  %v8949_v3 = vpop.f32.mrb[58].mxu0  ;;  %v16031_v58 = vadd.f32 %v15957_v63, %v7516_v15  ;;  %v9710_v36 = vpop.eup %9709 }
 0xbae   : > { %v8950_v42 = vpop.f32.mrb[59].mxu0  ;;  %v16038_v63 = vpop.permute.xlu1 %7595 }
 0xbaf   : > { %v15991_v17 = vadd.f32 %v8950_v42, %v8949_v3  ;;  %vm7945_vm12 = vcmp.gt.f32.partialorder %v16031_v58, 0.0 }
 0xbb3   : > { %v8952_v39 = vpop.f32.mrb[60].mxu0 }
 0xbb4   : > { %v8953_v25 = vpop.f32.mrb[61].mxu0 }
 0xbb5   : > { %v8954_v20 = vadd.f32 %v8953_v25, %v8952_v39  ;;  %v8955_v31 = vpop.f32.mrb[62].mxu0  ;;  %v9712_v39 = vpop.eup %9711  ;;  %v8013_v25 = vmul.f32 1.442695, %v7976_v47  ;;  %v16061_v47 = vadd.f32 %v15961_v56, %v7524_v50  ;;  %v16074_v56 = vadd.f32 %v15967_v30, %v16024_v60 }
 0xbb6   : > { %v8956_v40 = vpop.f32.mrb[63].mxu0  ;;  %v8669_v53 = vadd.f32 -1.0, %v9712_v39 }
 0xbb7   : > { %v16000_v49 = vadd.f32 %v8954_v20, %v7556_v16  ;;  %v8957_v29 = vadd.f32 %v8956_v40, %v8955_v31  ;;  %v7977_v31 = vmin.f32 %v16031_v58, 0.0  ;;  %v8670_v40 = vadd.f32 -1.0, %v9710_v36 }
 0xbb9   : > { %v7987_v32 = vmin.f32 %v16000_v49, 0.0  ;;  %v16005_v14 = vadd.f32 %v8957_v29, %v15955_v23  ;;  %v16040_v29 = vpop.permute.xlu0 %7599  ;;  %vm7955_vm4 = vcmp.gt.f32.partialorder %v16000_v49, 0.0 }
 0xbbb   : > { %v8035_v16 = vmul.f32 1.442695, %v7987_v32  ;;  %v7988_v55 = vmin.f32 %v16005_v14, 0.0  ;;  %v8958_v59 = vpop.f32.mrb[64].mxu0  ;;  %vm7956_vm7 = vcmp.gt.f32.partialorder %v16005_v14, 0.0 }
 0xbbc   : > { %v8959_v11 = vpop.f32.mrb[65].mxu0 }
 0xbbd   : > { %9713 = vpow2.f32 %v8035_v16  ;;  %v8037_v23 = vmul.f32 1.442695, %v7988_v55  ;;  %v8960_v22 = vadd.f32 %v8959_v11, %v8958_v59  ;;  %v8961_v37 = vpop.f32.mrb[66].mxu0  ;;  %v16069_v36 = vpop.permute.xlu0 %7535 }
 0xbbe   : > { %v8962_v28 = vpop.f32.mrb[67].mxu0 }
 0xbbf   : > { %9715 = vpow2.f32 %v8037_v23  ;;  %v16021_v35 = vadd.f32 %v8960_v22, %v15963_v2  ;;  %v8963_v46 = vadd.f32 %v8962_v28, %v8961_v37  ;;  %v8100_v23 = vsel %vm7940_vm3, %v15981_v6, %v8670_v40 }
 0xbc0   : > { %9717 = vpow2.f32 %v8007_v5 }
 0xbc1   : > { %v7989_v12 = vmin.f32 %v16021_v35, 0.0  ;;  %v16028_v54 = vadd.f32 %v8963_v46, %v15965_v19  ;;  %9719 = vpow2.f32 %v8009_v4  ;;  %v8017_v46 = vmul.f32 1.442695, %v7978_v24 }
 0xbc2   : > { %vm7957_vm9 = vcmp.gt.f32.partialorder %v16021_v35, 0.0 }
 0xbc3   : > { %v8039_v2 = vmul.f32 1.442695, %v7989_v12  ;;  %v7990_v3 = vmin.f32 %v16028_v54, 0.0  ;;  %v8964_v42 = vpop.f32.mrb[68].mxu0  ;;  %vm7958_vm10 = vcmp.gt.f32.partialorder %v16028_v54, 0.0 }
 0xbc4   : > { %v8965_v41 = vpop.f32.mrb[69].mxu0 }
 0xbc5   : > { %9721 = vpow2.f32 %v8039_v2  ;;  %v8041_v10 = vmul.f32 1.442695, %v7990_v3  ;;  %v8966_v19 = vadd.f32 %v8965_v41, %v8964_v42  ;;  %v8967_v20 = vpop.f32.mrb[70].mxu0 }
 0xbc6   : > { %9723 = vpow2.f32 %v8011_v34  ;;  %v8968_v15 = vpop.f32.mrb[71].mxu0  ;;  %v8099_v34 = vsel %vm7939_vm2, %v15987_v33, %v8669_v53  ;;  %vm7947_vm2 = vcmp.gt.f32.partialorder %v16061_v47, 0.0 }
 0xbc7   : > { %v9714_v18 = vpop.eup %9713  ;;  %9725 = vpow2.f32 %v8041_v10  ;;  %v16043_v45 = vadd.f32 %v8966_v19, %v15973_v26  ;;  %v8969_v13 = vadd.f32 %v8968_v15, %v8967_v20  ;;  %v8015_v26 = vmul.f32 1.442695, %v7977_v31 }
 0xbc8   : > { %v8685_v32 = vadd.f32 -1.0, %v9714_v18  ;;  %9727 = vpow2.f32 %v8013_v25  ;;  %v7979_v31 = vmin.f32 %v16061_v47, 0.0  ;;  %v8132_v15 = vsel %vm8131_vm1, %v8099_v34, 0.0 }
 0xbc9   : > { %v9716_v16 = vpop.eup %9715  ;;  %v7991_v55 = vmin.f32 %v16043_v45, 0.0  ;;  %v16050_v59 = vadd.f32 %v8969_v13, %v15975_v61  ;;  %vm7959_vm13 = vcmp.gt.f32.partialorder %v16043_v45, 0.0 }
 0xbca   : > { %v8115_v5 = vsel %vm7955_vm4, %v16000_v49, %v8685_v32  ;;  %v8686_v11 = vadd.f32 -1.0, %v9716_v16  ;;  %v9718_v22 = vpop.eup %9717  ;;  %v16063_v49 = vpop.permute.xlu1 %7531  ;;  %vm7948_vm4 = vcmp.gt.f32.partialorder %v16074_v56, 0.0 }
 0xbcb   : > { %v8043_v37 = vmul.f32 1.442695, %v7991_v55  ;;  %v7992_v4 = vmin.f32 %v16050_v59, 0.0  ;;  %v8970_v1 = vpop.f32.mrb[72].mxu0  ;;  %v8180_v61 = vsel %vm8131_vm1, %v8115_v5, 0.0  ;;  %v9720_v28 = vpop.eup %9719  ;;  %v8671_v39 = vadd.f32 -1.0, %v9718_v22 }
 0xbcc   : > { %v8971_v12 = vpop.f32.mrb[73].mxu0  ;;  %8181 = vadd.xlane.f32.xlu1 %v8180_v61  ;;  %v8116_v6 = vsel %vm7956_vm7, %v16005_v14, %v8686_v11  ;;  %v8135_v14 = vsel %vm8131_vm1, %v8100_v23, 0.0  ;;  %v8672_v19 = vadd.f32 -1.0, %v9720_v28  ;;  %v16095_v55 = vpop.permute.xlu0 %7607  ;;  %v8019_v23 = vmul.f32 1.442695, %v7979_v31 }
 0xbcd   : > { %9729 = vpow2.f32 %v8043_v37  ;;  %v8045_v2 = vmul.f32 1.442695, %v7992_v4  ;;  %v8972_v3 = vadd.f32 %v8971_v12, %v8970_v1  ;;  %v8973_v42 = vpop.f32.mrb[74].mxu0  ;;  %v8183_v41 = vsel %vm8131_vm1, %v8116_v6, 0.0 }
 0xbce   : > { %9731 = vpow2.f32 %v8015_v26  ;;  %v8974_v50 = vpop.f32.mrb[75].mxu0  ;;  %8184 = vadd.xlane.f32.xlu0 %v8183_v41  ;;  %v16089_v13 = vpop.permute.xlu1 %7603  ;;  %v8101_v53 = vsel %vm7941_vm5, %v15995_v48, %v8671_v39  ;;  %v8102_v11 = vsel %vm7942_vm6, %v15998_v7, %v8672_v19  ;;  %v16116_v41 = vadd.f32 %v15971_v62, %v16069_v36 }
 0xbcf   : > { %v9722_v25 = vpop.eup %9721  ;;  %9733 = vpow2.f32 %v8045_v2  ;;  %v16078_v33 = vadd.f32 %v8972_v3, %v15985_v57  ;;  %v8975_v10 = vadd.f32 %v8974_v50, %v8973_v42  ;;  %v7980_v57 = vmin.f32 %v16074_v56, 0.0 }
 0xbd0   : > { %v9724_v20 = vpop.eup %9723  ;;  %8136 = vadd.xlane.f32.xlu1 %v8135_v14  ;;  %v8687_v30 = vadd.f32 -1.0, %v9722_v25  ;;  %9735 = vpow2.f32 %v8017_v46  ;;  %v8138_v6 = vsel %vm8131_vm1, %v8101_v53, 0.0  ;;  %v8141_v14 = vsel %vm8131_vm1, %v8102_v11, 0.0 }
 0xbd1   : > { %v9726_v60 = vpop.eup %9725  ;;  %v7993_v40 = vmin.f32 %v16078_v33, 0.0  ;;  %v16085_v18 = vadd.f32 %v8975_v10, %v15989_v27  ;;  %v8673_v48 = vadd.f32 -1.0, %v9724_v20  ;;  %v8021_v46 = vmul.f32 1.442695, %v7980_v57 }
 0xbd2   : > { %8133 = vadd.xlane.f32.xlu0 %v8132_v15  ;;  %v8688_v24 = vadd.f32 -1.0, %v9726_v60  ;;  %v8117_v32 = vsel %vm7957_vm9, %v16021_v35, %v8687_v30  ;;  %v9728_v16 = vpop.eup %9727  ;;  %v7540_v50 = vpop.permute.xlu1 %7539  ;;  %vm7960_vm14 = vcmp.gt.f32.partialorder %v16050_v59, 0.0  ;;  %v7982_v30 = vmin.f32 %v16116_v41, 0.0 }
 0xbd3   : > { %v8047_v26 = vmul.f32 1.442695, %v7993_v40  ;;  %v7994_v27 = vmin.f32 %v16085_v18, 0.0  ;;  %v8976_v5 = vpop.f32.mrb[76].mxu0  ;;  %v8186_v37 = vsel %vm8131_vm1, %v8117_v32, 0.0  ;;  %v8674_v7 = vadd.f32 -1.0, %v9728_v16 }
 0xbd4   : > { %v8977_v22 = vpop.f32.mrb[77].mxu0  ;;  %v8118_v35 = vsel %vm7958_vm10, %v16028_v54, %v8688_v24  ;;  %v16109_v54 = vadd.f32 %v15969_v0, %v16063_v49  ;;  %v8103_v25 = vsel %vm7943_vm8, %v16009_v9, %v8673_v48  ;;  %v16140_v16 = vadd.f32 %v15977_v52, %v7540_v50 }
 0xbd5   : > { %9737 = vpow2.f32 %v8047_v26  ;;  %v8049_v4 = vmul.f32 1.442695, %v7994_v27  ;;  %v8978_v1 = vadd.f32 %v8977_v22, %v8976_v5  ;;  %v8979_v61 = vpop.f32.mrb[78].mxu0  ;;  %v8189_v28 = vsel %vm8131_vm1, %v8118_v35, 0.0 }
 0xbd6   : > { %v8980_v12 = vpop.f32.mrb[79].mxu0  ;;  %8190 = vadd.xlane.f32.xlu1 %v8189_v28  ;;  %8187 = vadd.xlane.f32.xlu0 %v8186_v37  ;;  %v8104_v9 = vsel %vm7944_vm11, %v16017_v8, %v8674_v7  ;;  %v7981_v20 = vmin.f32 %v16109_v54, 0.0  ;;  %v16142_v26 = vpop.permute.xlu1 %7611  ;;  %v8144_v5 = vsel %vm8131_vm1, %v8103_v25, 0.0  ;;  %v8025_v37 = vmul.f32 1.442695, %v7982_v30 }
 0xbd7   : > { %v9730_v34 = vpop.eup %9729  ;;  %9739 = vpow2.f32 %v8049_v4  ;;  %v16112_v2 = vadd.f32 %v8978_v1, %v16011_v51  ;;  %v8981_v3 = vadd.f32 %v8980_v12, %v8979_v61  ;;  %v7544_v51 = vpop.permute.xlu0 %7543  ;;  %v8147_v4 = vsel %vm8131_vm1, %v8104_v9, 0.0 }
 0xbd8   : > { %v9732_v42 = vpop.eup %9731  ;;  %v8689_v39 = vadd.f32 -1.0, %v9730_v34  ;;  %9741 = vpow2.f32 %v8019_v23  ;;  %v8023_v23 = vmul.f32 1.442695, %v7981_v20  ;;  %v16152_v48 = vadd.f32 %v15979_v43, %v7544_v51 }
 0xbd9   : > { %v9734_v0 = vpop.eup %9733  ;;  %v7995_v49 = vmin.f32 %v16112_v2, 0.0  ;;  %v16125_v10 = vadd.f32 %v8981_v3, %v16013_v38  ;;  %9743 = vpow2.f32 %v8021_v46  ;;  %v8675_v57 = vadd.f32 -1.0, %v9732_v42 }
 0xbda   : > { %8142 = vadd.xlane.f32.xlu1 %v8141_v14  ;;  %8139 = vadd.xlane.f32.xlu0 %v8138_v6  ;;  %v8690_v62 = vadd.f32 -1.0, %v9734_v0  ;;  %v8119_v36 = vsel %vm7959_vm13, %v16043_v45, %v8689_v39  ;;  %v9736_v19 = vpop.eup %9735  ;;  %vm7961_vm0 = vcmp.gt.f32.partialorder %v16078_v33, 0.0  ;;  %v7983_v43 = vmin.f32 %v16140_v16, 0.0  ;;  %v7548_v14 = vpop.permute.xlu1 %7547 }
 0xbdb   : > { %v8051_v31 = vmul.f32 1.442695, %v7995_v49  ;;  %v7996_v15 = vmin.f32 %v16125_v10, 0.0  ;;  %v8982_v38 = vpop.f32.mrb[80].mxu0  ;;  %v8192_v45 = vsel %vm8131_vm1, %v8119_v36, 0.0  ;;  %v16146_v22 = vpop.permute.xlu0 %7615  ;;  %vm7962_vm3 = vcmp.gt.f32.partialorder %v16085_v18, 0.0 }
 0xbdc   : > { %v8983_v60 = vpop.f32.mrb[81].mxu0  ;;  %v8120_v40 = vsel %vm7960_vm14, %v16050_v59, %v8690_v62  ;;  %v8676_v59 = vadd.f32 -1.0, %v9736_v19  ;;  %v7984_v50 = vmin.f32 %v16152_v48, 0.0  ;;  %v8027_v36 = vmul.f32 1.442695, %v7983_v43 }
 0xbdd   : > { %9745 = vpow2.f32 %v8051_v31  ;;  %v8053_v24 = vmul.f32 1.442695, %v7996_v15  ;;  %v8984_v8 = vadd.f32 %v8983_v60, %v8982_v38  ;;  %v8985_v32 = vpop.f32.mrb[82].mxu0  ;;  %v8195_v53 = vsel %vm8131_vm1, %v8120_v40, 0.0 }
 0xbde   : > { %v8986_v27 = vpop.f32.mrb[83].mxu0  ;;  %8196 = vadd.xlane.f32.xlu1 %v8195_v53  ;;  %8193 = vadd.xlane.f32.xlu0 %v8192_v45  ;;  %v8029_v30 = vmul.f32 1.442695, %v7984_v50  ;;  %vm7963_vm5 = vcmp.gt.f32.partialorder %v16112_v2, 0.0  ;;  %vm7964_vm6 = vcmp.gt.f32.partialorder %v16125_v10, 0.0  ;;  %vm7950_vm9 = vcmp.gt.f32.partialorder %v16116_v41, 0.0 }
 0xbdf   : > { %v9738_v11 = vpop.eup %9737  ;;  %9747 = vpow2.f32 %v8053_v24  ;;  %v16149_v35 = vadd.f32 %v8984_v8, %v16038_v63  ;;  %v8987_v52 = vadd.f32 %v8986_v27, %v8985_v32  ;;  %v8105_v63 = vsel %vm7945_vm12, %v16031_v58, %v8675_v57  ;;  %v7552_v0 = vpop.permute.xlu0 %7551 }
 0xbe0   : > { %v8691_v1 = vadd.f32 -1.0, %v9738_v11  ;;  %9749 = vpow2.f32 %v8023_v23  ;;  %v8150_v19 = vsel %vm8131_vm1, %v8105_v63, 0.0  ;;  %v16184_v60 = vadd.f32 %v15991_v17, %v7552_v0 }
 0xbe1   : > { %v9740_v61 = vpop.eup %9739  ;;  %v7997_v28 = vmin.f32 %v16149_v35, 0.0  ;;  %v16157_v46 = vadd.f32 %v8987_v52, %v16040_v29  ;;  %v8106_v29 = vsel %vm7946_vm15, %v16035_v21, %v8676_v59  ;;  %9751 = vpow2.f32 %v8025_v37 }
 0xbe2   : > { %8148 = vadd.xlane.f32.xlu1 %v8147_v4  ;;  %8145 = vadd.xlane.f32.xlu0 %v8144_v5  ;;  %v8692_v12 = vadd.f32 -1.0, %v9740_v61  ;;  %v8121_v6 = vsel %vm7961_vm0, %v16078_v33, %v8691_v1  ;;  %v9742_v7 = vpop.eup %9741  ;;  %v8153_v40 = vsel %vm8131_vm1, %v8106_v29, 0.0  ;;  %v7986_v59 = vmin.f32 %v16184_v60, 0.0 }
 0xbe3   : > { %v8055_v34 = vmul.f32 1.442695, %v7997_v28  ;;  %v7998_v3 = vmin.f32 %v16157_v46, 0.0  ;;  %v8988_v42 = vpop.f32.mrb[84].mxu0  ;;  %v9744_v58 = vpop.eup %9743  ;;  %v8198_v25 = vsel %vm8131_vm1, %v8121_v6, 0.0  ;;  %v8677_v20 = vadd.f32 -1.0, %v9742_v7 }
 0xbe4   : > { %v8989_v39 = vpop.f32.mrb[85].mxu0  ;;  %v8122_v33 = vsel %vm7962_vm3, %v16085_v18, %v8692_v12  ;;  %v16178_v18 = vadd.f32 %v15983_v44, %v7548_v14  ;;  %v8678_v44 = vadd.f32 -1.0, %v9744_v58  ;;  %v8033_v29 = vmul.f32 1.442695, %v7986_v59 }
 0xbe5   : > { %9753 = vpow2.f32 %v8055_v34  ;;  %v8057_v21 = vmul.f32 1.442695, %v7998_v3  ;;  %v8990_v51 = vadd.f32 %v8989_v39, %v8988_v42  ;;  %v8991_v49 = vpop.f32.mrb[86].mxu0  ;;  %v8201_v62 = vsel %vm8131_vm1, %v8122_v33, 0.0 }
 0xbe6   : > { %v8992_v9 = vpop.f32.mrb[87].mxu0  ;;  %8202 = vadd.xlane.f32.xlu1 %v8201_v62  ;;  %8199 = vadd.xlane.f32.xlu0 %v8198_v25  ;;  %v8107_v17 = vsel %vm7947_vm2, %v16061_v47, %v8677_v20  ;;  %v7985_v53 = vmin.f32 %v16178_v18, 0.0  ;;  %v8108_v63 = vsel %vm7948_vm4, %v16074_v56, %v8678_v44  ;;  %vm7965_vm7 = vcmp.gt.f32.partialorder %v16149_v35, 0.0 }
 0xbe7   : > { %v9746_v31 = vpop.eup %9745  ;;  %9755 = vpow2.f32 %v8057_v21  ;;  %v16181_v15 = vadd.f32 %v8990_v51, %v16089_v13  ;;  %v8993_v38 = vadd.f32 %v8992_v9, %v8991_v49  ;;  %v8156_v7 = vsel %vm8131_vm1, %v8107_v17, 0.0 }
 0xbe8   : > { %v8693_v45 = vadd.f32 -1.0, %v9746_v31  ;;  %9757 = vpow2.f32 %v8027_v36  ;;  %v8031_v12 = vmul.f32 1.442695, %v7985_v53  ;;  %v8159_v50 = vsel %vm8131_vm1, %v8108_v63, 0.0  ;;  %v8280_v63 = vld [vmem:[%s16364_s6 + $0x80] sm:$0xff] }
 0xbe9   : > { %v9748_v57 = vpop.eup %9747  ;;  %v7999_v24 = vmin.f32 %v16181_v15, 0.0  ;;  %v16189_v8 = vadd.f32 %v8993_v38, %v16095_v55  ;;  %9759 = vpow2.f32 %v8029_v30  ;;  %vm7966_vm8 = vcmp.gt.f32.partialorder %v16157_v46, 0.0 }
 0xbea   : > { %8154 = vadd.xlane.f32.xlu1 %v8153_v40  ;;  %8151 = vadd.xlane.f32.xlu0 %v8150_v19  ;;  %v8694_v13 = vadd.f32 -1.0, %v9748_v57  ;;  %v8123_v32 = vsel %vm7963_vm5, %v16112_v2, %v8693_v45  ;;  %v9750_v52 = vpop.eup %9749  ;;  %vm7949_vm10 = vcmp.gt.f32.partialorder %v16109_v54, 0.0  ;;  %vm7967_vm11 = vcmp.gt.f32.partialorder %v16181_v15, 0.0 }
 0xbeb   : > { %v8059_v27 = vmul.f32 1.442695, %v7999_v24  ;;  %v8000_v5 = vmin.f32 %v16189_v8, 0.0  ;;  %v8994_v55 = vpop.f32.mrb[88].mxu0  ;;  %v8204_v2 = vsel %vm8131_vm1, %v8123_v32, 0.0  ;;  %v9752_v61 = vpop.eup %9751  ;;  %v8679_v39 = vadd.f32 -1.0, %v9750_v52 }
 0xbec   : > { %v8995_v11 = vpop.f32.mrb[89].mxu0  ;;  %v8124_v23 = vsel %vm7964_vm6, %v16125_v10, %v8694_v13  ;;  %v8680_v14 = vadd.f32 -1.0, %v9752_v61  ;;  %vm7968_vm12 = vcmp.gt.f32.partialorder %v16189_v8, 0.0  ;;  %vm7952_vm13 = vcmp.gt.f32.partialorder %v16152_v48, 0.0 }
 0xbed   : > { %9761 = vpow2.f32 %v8059_v27  ;;  %v8061_v37 = vmul.f32 1.442695, %v8000_v5  ;;  %v8996_v47 = vadd.f32 %v8995_v11, %v8994_v55  ;;  %v8997_v4 = vpop.f32.mrb[90].mxu0  ;;  %v8207_v1 = vsel %vm8131_vm1, %v8124_v23, 0.0 }
 0xbee   : > { %v8998_v28 = vpop.f32.mrb[91].mxu0  ;;  %8208 = vadd.xlane.f32.xlu1 %v8207_v1  ;;  %8205 = vadd.xlane.f32.xlu0 %v8204_v2  ;;  %v8110_v62 = vsel %vm7950_vm9, %v16116_v41, %v8680_v14  ;;  %v8109_v36 = vsel %vm7949_vm10, %v16109_v54, %v8679_v39  ;;  %vm7951_vm14 = vcmp.gt.f32.partialorder %v16140_v16, 0.0  ;;  %vm7954_vm2 = vcmp.gt.f32.partialorder %v16184_v60, 0.0  ;;  %v8263_v1 = vld [vmem:[#allocation3 + $0x18] sm:$0xff]  ;;  %v8282_v39 = vld [vmem:[%s16364_s6 + $0x90] sm:$0xff] }
 0xbef   : > { %v9754_v43 = vpop.eup %9753  ;;  %9763 = vpow2.f32 %v8061_v37  ;;  %v16207_v10 = vadd.f32 %v8996_v47, %v16142_v26  ;;  %v8999_v6 = vadd.f32 %v8998_v28, %v8997_v4  ;;  %v8165_v20 = vsel %vm8131_vm1, %v8110_v62, 0.0  ;;  %v8261_v4 = vld [vmem:[#allocation3 + $0x8] sm:$0xff]  ;;  %8404 = vmatprep.mubr.f32.mxu1 %v8263_v1  ;;  %v8266_v62 = vld [vmem:[%s16364_s6 + $0x10] sm:$0xff] }
 0xbf0   : > { %v8695_v34 = vadd.f32 -1.0, %v9754_v43  ;;  %9765 = vpow2.f32 %v8031_v12  ;;  %v8162_v31 = vsel %vm8131_vm1, %v8109_v36, 0.0  ;;  %vm7953_vm3 = vcmp.gt.f32.partialorder %v16178_v18, 0.0  ;;  %8399 = vmatprep.mubr.f32.mxu0 %v8261_v4  ;;  %v8271_v4 = vld [vmem:[%s16364_s6 + $0x38] sm:$0xff] }
 0xbf1   : > { %v9756_v3 = vpop.eup %9755  ;;  %v8001_v42 = vmin.f32 %v16207_v10, 0.0  ;;  %v16212_v58 = vadd.f32 %v8999_v6, %v16146_v22  ;;  %9767 = vpow2.f32 %v8033_v29  ;;  %vm7969_vm15 = vcmp.gt.f32.partialorder %v16207_v10, 0.0 }
 0xbf2   : > { %8160 = vadd.xlane.f32.xlu1 %v8159_v50  ;;  %8157 = vadd.xlane.f32.xlu0 %v8156_v7  ;;  %v8696_v56 = vadd.f32 -1.0, %v9756_v3  ;;  %v8125_v26 = vsel %vm7965_vm7, %v16149_v35, %v8695_v34  ;;  %v9758_v0 = vpop.eup %9757  ;;  %v8265_v7 = vld [vmem:[%s16364_s6 + $0x8] sm:$0xff]  ;;  %v8264_v34 = vld [vmem:[%s16364_s6] sm:$0xff] }
 0xbf3   : > { %v8063_v33 = vmul.f32 1.442695, %v8001_v42  ;;  %v8002_v25 = vmin.f32 %v16212_v58, 0.0  ;;  %v8210_v51 = vsel %vm8131_vm1, %v8125_v26, 0.0  ;;  %v9760_v49 = vpop.eup %9759  ;;  %v8681_v45 = vadd.f32 -1.0, %v9758_v0  ;;  %v8283_v26 = vld [vmem:[%s16364_s6 + $0x98] sm:$0xff] }
 0xbf4   : > { %v8126_v22 = vsel %vm7966_vm8, %v16157_v46, %v8696_v56  ;;  %v8682_v40 = vadd.f32 -1.0, %v9760_v49  ;;  %vm7970_vm0 = vcmp.gt.f32.partialorder %v16212_v58, 0.0 }
 0xbf5   : > { %9769 = vpow2.f32 %v8063_v33  ;;  %v8065_v21 = vmul.f32 1.442695, %v8002_v25  ;;  %v8213_v35 = vsel %vm8131_vm1, %v8126_v22, 0.0  ;;  %v8111_v13 = vsel %vm7951_vm14, %v16140_v16, %v8681_v45 }
 0xbf6   : > { %8214 = vadd.xlane.f32.xlu1 %v8213_v35  ;;  %8211 = vadd.xlane.f32.xlu0 %v8210_v51  ;;  %v8168_v27 = vsel %vm8131_vm1, %v8111_v13, 0.0  ;;  %v8267_v51 = vld [vmem:[%s16364_s6 + $0x18] sm:$0xff] }
 0xbf7   : > { %v9762_v9 = vpop.eup %9761  ;;  %9771 = vpow2.f32 %v8065_v21 }
 0xbf8   : > { %v8697_v46 = vadd.f32 -1.0, %v9762_v9 }
 0xbf9   : > { %v9764_v19 = vpop.eup %9763 }
 0xbfa   : > { %8166 = vadd.xlane.f32.xlu1 %v8165_v20  ;;  %8163 = vadd.xlane.f32.xlu0 %v8162_v31  ;;  %v8698_v38 = vadd.f32 -1.0, %v9764_v19  ;;  %v8127_v30 = vsel %vm7967_vm11, %v16181_v15, %v8697_v46  ;;  %v9766_v41 = vpop.eup %9765  ;;  %v8112_v15 = vsel %vm7952_vm13, %v16152_v48, %v8682_v40  ;;  %v8284_v40 = vld [vmem:[%s16364_s6 + $0xa0] sm:$0xff] }
 0xbfb   : > { %v8216_v24 = vsel %vm8131_vm1, %v8127_v30, 0.0  ;;  %v9768_v44 = vpop.eup %9767  ;;  %v8683_v11 = vadd.f32 -1.0, %v9766_v41 }
 0xbfc   : > { %v8128_v54 = vsel %vm7968_vm12, %v16189_v8, %v8698_v38  ;;  %v8171_v8 = vsel %vm8131_vm1, %v8112_v15, 0.0  ;;  %v8684_v59 = vadd.f32 -1.0, %v9768_v44  ;;  %v8285_v38 = vld [vmem:[%s16364_s6 + $0xa8] sm:$0xff] }
 0xbfd   : > { %v8219_v57 = vsel %vm8131_vm1, %v8128_v54, 0.0  ;;  %v8113_v52 = vsel %vm7953_vm3, %v16178_v18, %v8683_v11  ;;  %v8281_v18 = vld [vmem:[%s16364_s6 + $0x88] sm:$0xff] }
 0xbfe   : > { %8220 = vadd.xlane.f32.xlu1 %v8219_v57  ;;  %8217 = vadd.xlane.f32.xlu0 %v8216_v24  ;;  %v8114_v2 = vsel %vm7954_vm2, %v16184_v60, %v8684_v59  ;;  %v8174_v47 = vsel %vm8131_vm1, %v8113_v52, 0.0  ;;  %v8269_v15 = vld [vmem:[%s16364_s6 + $0x28] sm:$0xff]  ;;  %v8287_v59 = vld [vmem:[%s16364_s6 + $0xb8] sm:$0xff] }
 0xbff   : > { %v9770_v32 = vpop.eup %9769  ;;  %v8177_v37 = vsel %vm8131_vm1, %v8114_v2, 0.0 }
 0xc00   : > { %v8699_v17 = vadd.f32 -1.0, %v9770_v32  ;;  %v8268_v32 = vld [vmem:[%s16364_s6 + $0x20] sm:$0xff] }
 0xc01   : > { %v9772_v53 = vpop.eup %9771 }
 0xc02   : > { %8172 = vadd.xlane.f32.xlu1 %v8171_v8  ;;  %8169 = vadd.xlane.f32.xlu0 %v8168_v27  ;;  %v8700_v5 = vadd.f32 -1.0, %v9772_v53  ;;  %v8129_v55 = vsel %vm7969_vm15, %v16207_v10, %v8699_v17 }
 0xc03   : > { %v8222_v23 = vsel %vm8131_vm1, %v8129_v55, 0.0 }
 0xc04   : > { %v8130_v16 = vsel %vm7970_vm0, %v16212_v58, %v8700_v5 }
 0xc05   : > { %v8225_v48 = vsel %vm8131_vm1, %v8130_v16, 0.0  ;;  %v8286_v16 = vld [vmem:[%s16364_s6 + $0xb0] sm:$0xff] }
 0xc06   : > { %8226 = vadd.xlane.f32.xlu1 %v8225_v48  ;;  %8223 = vadd.xlane.f32.xlu0 %v8222_v23 }
 0xc0a   : > { %8178 = vadd.xlane.f32.xlu1 %v8177_v37  ;;  %8175 = vadd.xlane.f32.xlu0 %v8174_v47 }
 0xc59   : > { %v8182_v61 = vpop.xlane.xlu1 %8181 }
 0xc5a   : > { %v8244_v28 = vmul.f32 0.125, %v8182_v61  ;;  %v8270_v61 = vld [vmem:[%s16364_s6 + $0x30] sm:$0xff] }
 0xc5b   : > { %v8185_v60 = vpop.xlane.xlu0 %8184 }
 0xc5c   : > { %v8245_v43 = vmul.f32 0.125, %v8185_v60  ;;  %v8312_v10 = vmul.f32 %v8280_v63, %v8244_v28 }
 0xc5d   : > { %v8137_v12 = vpop.xlane.xlu1 %8136 }
 0xc5e   : > { %v8313_v6 = vmul.f32 %v8281_v18, %v8245_v43  ;;  %v8229_v29 = vmul.f32 0.125, %v8137_v12 }
 0xc5f   : > { %v8134_v3 = vpop.xlane.xlu0 %8133 }
 0xc60   : > { %v8228_v42 = vmul.f32 0.125, %v8134_v3  ;;  %v9406_v58 = vpack.c.bf16 %v8313_v6, %v8312_v10  ;;  %v8297_v50 = vmul.f32 %v8265_v7, %v8229_v29  ;;  %v8289_v10 = vld [vmem:[%s16364_s6 + $0xc8] sm:$0xff]  ;;  %v8288_v29 = vld [vmem:[%s16364_s6 + $0xc0] sm:$0xff] }
 0xc62   : > { %v8296_v56 = vmul.f32 %v8264_v34, %v8228_v42  ;;  %9407 = vmatprep.subr.bf16.mxu0 %v9406_v58  ;;  %9438 = vmatprep.subr.bf16.mxu1 %v9406_v58 }
 0xc63   : > { %v8191_v14 = vpop.xlane.xlu1 %8190  ;;  %v8188_v33 = vpop.xlane.xlu0 %8187 }
 0xc64   : > { %v9408_v25 = vpack.c.bf16 %v8297_v50, %v8296_v56  ;;  %v8247_v0 = vmul.f32 0.125, %v8191_v14  ;;  %v8246_v22 = vmul.f32 0.125, %v8188_v33  ;;  %v8273_v56 = vld [vmem:[%s16364_s6 + $0x48] sm:$0xff]  ;;  %v8272_v14 = vld [vmem:[%s16364_s6 + $0x40] sm:$0xff] }
 0xc66   : > { %v8315_v21 = vmul.f32 %v8283_v26, %v8247_v0  ;;  %v8314_v35 = vmul.f32 %v8282_v39, %v8246_v22  ;;  %9409 = vmatpush3.bf16.msra.mxu0 %v9408_v25  ;;  %9446 = vmatpush3.bf16.msra.mxu1 %v9408_v25 }
 0xc67   : > { %v8143_v49 = vpop.xlane.xlu1 %8142  ;;  %v8140_v36 = vpop.xlane.xlu0 %8139 }
 0xc68   : > { %v8231_v9 = vmul.f32 0.125, %v8143_v49  ;;  %v8230_v46 = vmul.f32 0.125, %v8140_v36  ;;  %v9410_v19 = vpack.c.bf16 %v8315_v21, %v8314_v35  ;;  %v8291_v35 = vld [vmem:[%s16364_s6 + $0xd8] sm:$0xff]  ;;  %v8290_v49 = vld [vmem:[%s16364_s6 + $0xd0] sm:$0xff] }
 0xc6a   : > { %v8299_v20 = vmul.f32 %v8267_v51, %v8231_v9  ;;  %v8298_v31 = vmul.f32 %v8266_v62, %v8230_v46  ;;  %9411 = vmatprep.subr.bf16.mxu0 %v9410_v19  ;;  %9439 = vmatprep.subr.bf16.mxu1 %v9410_v19 }
 0xc6b   : > { %v8197_v30 = vpop.xlane.xlu1 %8196  ;;  %v8194_v45 = vpop.xlane.xlu0 %8193 }
 0xc6c   : > { %v9412_v54 = vpack.c.bf16 %v8299_v20, %v8298_v31  ;;  %v8249_v41 = vmul.f32 0.125, %v8197_v30  ;;  %v8248_v57 = vmul.f32 0.125, %v8194_v45  ;;  %v8275_v31 = vld [vmem:[%s16364_s6 + $0x58] sm:$0xff]  ;;  %v8274_v30 = vld [vmem:[%s16364_s6 + $0x50] sm:$0xff] }
 0xc6e   : > { %v8317_v24 = vmul.f32 %v8285_v38, %v8249_v41  ;;  %v8316_v44 = vmul.f32 %v8284_v40, %v8248_v57  ;;  %9413 = vmatpush3.bf16.msra.mxu0 %v9412_v54  ;;  %9447 = vmatpush3.bf16.msra.mxu1 %v9412_v54 }
 0xc6f   : > { %v8149_v13 = vpop.xlane.xlu1 %8148  ;;  %v8146_v17 = vpop.xlane.xlu0 %8145 }
 0xc70   : > { %v8233_v53 = vmul.f32 0.125, %v8149_v13  ;;  %v8232_v8 = vmul.f32 0.125, %v8146_v17  ;;  %v9414_v27 = vpack.c.bf16 %v8317_v24, %v8316_v44  ;;  %v8293_v44 = vld [vmem:[%s16364_s6 + $0xe8] sm:$0xff]  ;;  %v8292_v13 = vld [vmem:[%s16364_s6 + $0xe0] sm:$0xff] }
 0xc72   : > { %v8301_v5 = vmul.f32 %v8269_v15, %v8233_v53  ;;  %v8300_v55 = vmul.f32 %v8268_v32, %v8232_v8  ;;  %9415 = vmatprep.subr.bf16.mxu0 %v9414_v27  ;;  %9440 = vmatprep.subr.bf16.mxu1 %v9414_v27 }
 0xc73   : > { %v8203_v11 = vpop.xlane.xlu1 %8202  ;;  %v8200_v48 = vpop.xlane.xlu0 %8199 }
 0xc74   : > { %v9416_v23 = vpack.c.bf16 %v8301_v5, %v8300_v55  ;;  %v8251_v2 = vmul.f32 0.125, %v8203_v11  ;;  %v8250_v52 = vmul.f32 0.125, %v8200_v48  ;;  %v8277_v55 = vld [vmem:[%s16364_s6 + $0x68] sm:$0xff]  ;;  %v8276_v11 = vld [vmem:[%s16364_s6 + $0x60] sm:$0xff] }
 0xc76   : > { %v8319_v37 = vmul.f32 %v8287_v59, %v8251_v2  ;;  %v8318_v47 = vmul.f32 %v8286_v16, %v8250_v52  ;;  %9417 = vmatpush3.bf16.msra.mxu0 %v9416_v23  ;;  %9448 = vmatpush3.bf16.msra.mxu1 %v9416_v23 }
 0xc77   : > { %v8155_v1 = vpop.xlane.xlu1 %8154  ;;  %v8152_v28 = vpop.xlane.xlu0 %8151 }
 0xc78   : > { %v8235_v63 = vmul.f32 0.125, %v8155_v1  ;;  %v8234_v18 = vmul.f32 0.125, %v8152_v28  ;;  %v9418_v60 = vpack.c.bf16 %v8319_v37, %v8318_v47  ;;  %v8295_v47 = vld [vmem:[%s16364_s6 + $0xf8] sm:$0xff]  ;;  %v8294_v1 = vld [vmem:[%s16364_s6 + $0xf0] sm:$0xff] }
 0xc7a   : > { %v8303_v43 = vmul.f32 %v8271_v4, %v8235_v63  ;;  %v8302_v12 = vmul.f32 %v8270_v61, %v8234_v18  ;;  %9419 = vmatprep.subr.bf16.mxu0 %v9418_v60  ;;  %9441 = vmatprep.subr.bf16.mxu1 %v9418_v60 }
 0xc7b   : > { %v8209_v6 = vpop.xlane.xlu1 %8208  ;;  %v8206_v7 = vpop.xlane.xlu0 %8205 }
 0xc7c   : > { %v9420_v34 = vpack.c.bf16 %v8303_v43, %v8302_v12  ;;  %v8253_v3 = vmul.f32 0.125, %v8209_v6  ;;  %v8252_v42 = vmul.f32 0.125, %v8206_v7  ;;  %v8279_v12 = vld [vmem:[%s16364_s6 + $0x78] sm:$0xff]  ;;  %v8278_v6 = vld [vmem:[%s16364_s6 + $0x70] sm:$0xff] }
 0xc7e   : > { %v8321_v58 = vmul.f32 %v8289_v10, %v8253_v3  ;;  %v8320_v50 = vmul.f32 %v8288_v29, %v8252_v42  ;;  %9421 = vmatpush3.bf16.msra.mxu0 %v9420_v34  ;;  %9449 = vmatpush3.bf16.msra.mxu1 %v9420_v34 }
 0xc7f   : > { %v8161_v26 = vpop.xlane.xlu1 %8160  ;;  %v8158_v39 = vpop.xlane.xlu0 %8157 }
 0xc80   : > { %v8237_v33 = vmul.f32 0.125, %v8161_v26  ;;  %v8236_v25 = vmul.f32 0.125, %v8158_v39  ;;  %v9422_v0 = vpack.c.bf16 %v8321_v58, %v8320_v50  ;;  %v8262_v26 = vld [vmem:[#allocation3 + $0x10] sm:$0xff] }
 0xc82   : > { %v8305_v22 = vmul.f32 %v8273_v56, %v8237_v33  ;;  %v8304_v21 = vmul.f32 %v8272_v14, %v8236_v25  ;;  %9423 = vmatprep.subr.bf16.mxu0 %v9422_v0  ;;  %9442 = vmatprep.subr.bf16.mxu1 %v9422_v0  ;;  %v8260_v56 = vld [vmem:[#allocation3] sm:$0xff] }
 0xc83   : > { %v8215_v51 = vpop.xlane.xlu1 %8214  ;;  %v8212_v62 = vpop.xlane.xlu0 %8211  ;;  %v8701_v33 = vld [vmem:[%s16366_s8] ss:$0 sm:$0xff] }
 0xc84   : > { %v9424_v36 = vpack.c.bf16 %v8305_v22, %v8304_v21  ;;  %v8255_v9 = vmul.f32 0.125, %v8215_v51  ;;  %v8254_v46 = vmul.f32 0.125, %v8212_v62 }
 0xc86   : > { %v8323_v19 = vmul.f32 %v8291_v35, %v8255_v9  ;;  %v8322_v20 = vmul.f32 %v8290_v49, %v8254_v46  ;;  %9425 = vmatpush3.bf16.msra.mxu0 %v9424_v36  ;;  %9450 = vmatpush3.bf16.msra.mxu1 %v9424_v36 }
 0xc87   : > { %v8167_v38 = vpop.xlane.xlu1 %8166  ;;  %v8164_v40 = vpop.xlane.xlu0 %8163 }
 0xc88   : > { %v8239_v45 = vmul.f32 0.125, %v8167_v38  ;;  %v8238_v54 = vmul.f32 0.125, %v8164_v40  ;;  %v9426_v41 = vpack.c.bf16 %v8323_v19, %v8322_v20 }
 0xc8a   : > { %v8307_v57 = vmul.f32 %v8275_v31, %v8239_v45  ;;  %v8306_v24 = vmul.f32 %v8274_v30, %v8238_v54  ;;  %9427 = vmatprep.subr.bf16.mxu0 %v9426_v41  ;;  %9443 = vmatprep.subr.bf16.mxu1 %v9426_v41 }
 0xc8b   : > { %v8221_v15 = vpop.xlane.xlu1 %8220  ;;  %v8218_v32 = vpop.xlane.xlu0 %8217 }
 0xc8c   : > { %v9428_v17 = vpack.c.bf16 %v8307_v57, %v8306_v24  ;;  %v8257_v53 = vmul.f32 0.125, %v8221_v15  ;;  %v8256_v8 = vmul.f32 0.125, %v8218_v32 }
 0xc8e   : > { %v8325_v27 = vmul.f32 %v8293_v44, %v8257_v53  ;;  %v8324_v5 = vmul.f32 %v8292_v13, %v8256_v8  ;;  %9429 = vmatpush3.bf16.msra.mxu0 %v9428_v17  ;;  %9451 = vmatpush3.bf16.msra.mxu1 %v9428_v17 }
 0xc8f   : > { %v8173_v59 = vpop.xlane.xlu1 %8172  ;;  %v8170_v16 = vpop.xlane.xlu0 %8169 }
 0xc90   : > { %v8241_v48 = vmul.f32 0.125, %v8173_v59  ;;  %v8240_v23 = vmul.f32 0.125, %v8170_v16  ;;  %v9430_v2 = vpack.c.bf16 %v8325_v27, %v8324_v5 }
 0xc92   : > { %v8309_v52 = vmul.f32 %v8277_v55, %v8241_v48  ;;  %v8308_v37 = vmul.f32 %v8276_v11, %v8240_v23  ;;  %9431 = vmatprep.subr.bf16.mxu0 %v9430_v2  ;;  %9444 = vmatprep.subr.bf16.mxu1 %v9430_v2 }
 0xc93   : > { %v8227_v4 = vpop.xlane.xlu1 %8226  ;;  %v8224_v61 = vpop.xlane.xlu0 %8223 }
 0xc94   : > { %v9432_v28 = vpack.c.bf16 %v8309_v52, %v8308_v37  ;;  %v8259_v63 = vmul.f32 0.125, %v8227_v4  ;;  %v8258_v18 = vmul.f32 0.125, %v8224_v61 }
 0xc96   : > { %v8327_v60 = vmul.f32 %v8295_v47, %v8259_v63  ;;  %v8326_v43 = vmul.f32 %v8294_v1, %v8258_v18  ;;  %9433 = vmatpush3.bf16.msra.mxu0 %v9432_v28  ;;  %9452 = vmatpush3.bf16.msra.mxu1 %v9432_v28 }
 0xc97   : > { %v8179_v10 = vpop.xlane.xlu1 %8178  ;;  %v8176_v29 = vpop.xlane.xlu0 %8175 }
 0xc98   : > { %v8243_v7 = vmul.f32 0.125, %v8179_v10  ;;  %v8242_v34 = vmul.f32 0.125, %v8176_v29  ;;  %v9434_v3 = vpack.c.bf16 %v8327_v60, %v8326_v43 }
 0xc9a   : > { %v8311_v42 = vmul.f32 %v8279_v12, %v8243_v7  ;;  %v8310_v58 = vmul.f32 %v8278_v6, %v8242_v34  ;;  %9435 = vmatprep.subr.bf16.mxu0 %v9434_v3  ;;  %9445 = vmatprep.subr.bf16.mxu1 %v9434_v3 }
 0xc9c   : > { %v9436_v50 = vpack.c.bf16 %v8311_v42, %v8310_v58 }
 0xc9e   : > { %9437 = vmatpush3.bf16.msra.mxu0 %v9436_v50  ;;  %9453 = vmatpush3.bf16.msra.mxu1 %v9436_v50 }
 0xca1   : > { %8400 = vmatmul.mubr.f32.vlgmr.msra.gmra.mrb[92].mxu0 %v8260_v56  ;;  %8405 = vmatmul.mubr.f32.vlgmr.msra.gmra.mrb[68].mxu1 %v8262_v26 }
 0xd74   : > { %v9032_v14 = vpop.f32.mrb[92].mxu0  ;;  %v9035_v39 = vpop.f32.mrb[68].mxu1 }
 0xd75   : > { %v9033_v25 = vpop.f32.mrb[93].mxu0  ;;  %v9036_v0 = vpop.f32.mrb[69].mxu1 }
 0xd76   : > { %v9034_v22 = vadd.f32 %v9033_v25, %v9032_v14  ;;  %v9037_v21 = vadd.f32 %v9036_v0, %v9035_v39 }
 0xd78   : > { %v8402_v35 = vadd.f32 %v9034_v22, %v8701_v33  ;;  %v8407_v51 = vadd.f32 %v9037_v21, %v8701_v33 }
 0xd7a   : > { %8412 = vmax.xlane.f32.xlu1 %v8407_v51  ;;  %8410 = vmax.xlane.f32.xlu0 %v8402_v35 }
 0xe07   : > { %v8413_v49 = vpop.xlane.xlu1 %8412  ;;  %v8411_v62 = vpop.xlane.xlu0 %8410 }
 0xe08   : > { %v8415_v36 = vsub.f32 %v8407_v51, %v8413_v49  ;;  %v8414_v9 = vsub.f32 %v8402_v35, %v8411_v62 }
 0xe0a   : > { %v8418_v46 = vmul.f32 1.442695, %v8415_v36  ;;  %v8416_v19 = vmul.f32 1.442695, %v8414_v9 }
 0xe0c   : > { %9773 = vpow2.f32 %v8418_v46 }
 0xe0d   : > { %9775 = vpow2.f32 %v8416_v19 }
 0xe16   : > { %v9774_v20 = vpop.eup %9773 }
 0xe17   : > { %v9776_v31 = vpop.eup %9775  ;;  %8422 = vadd.xlane.f32.xlu1 %v9774_v20 }
 0xe18   : > { %8420 = vadd.xlane.f32.xlu0 %v9776_v31 }
 0xea4   : > { %v8423_v38 = vpop.xlane.xlu1 %8422 }
 0xea5   : > { %9777 = vrcp.f32 %v8423_v38  ;;  %v8421_v30 = vpop.xlane.xlu0 %8420 }
 0xea6   : > { %9779 = vrcp.f32 %v8421_v30 }
 0xeaf   : > { %v9778_v40 = vpop.eup %9777 }
 0xeb0   : > { %v9780_v45 = vpop.eup %9779  ;;  %v8427_v54 = vmul.f32 %v9778_v40, %v9774_v20 }
 0xeb1   : > { %v8425_v41 = vmul.f32 %v9780_v45, %v9776_v31 }
 0xeb2   : > { %8429 = vst [vmem:[%s349_s24 + $0x8] sm:$0xff] %v8427_v54 }
 0xeb3   : > { %8428 = vst [vmem:[%s349_s24] sm:$0xff] %v8425_v41 }
 0xeb4 PF: > { %s20_s30 = sadd.s32 1, %s10051_s30  }
 0xeb5   : > { %p17_p5 = scmp.ge.s32.totalorder %s20_s30, 6  }
 0xeb7   :  { %19 = sbr.rel (!%p17_p5) target bundleno = 1 (0x1), region = 91 }
 0xebe   :  { %8452 = vsyncpa [#allocation4], 1 }
 0xebf   :  { %8454 = vsyncpa [#allocation4 + $0x1], 1 }

</bundles_post_ra>
